<compile_context>
chip_gen: v7x
topology: tpu7x:2x2x1
jax: 0.10.0
libtpu: 0.0.40
codegen_flags: <defaults>
</compile_context>

<pallas_src>
import functools

import jax
import jax.numpy as jnp
import numpy as np
from jax.experimental import pallas as pl
from jax.experimental.pallas import tpu as pltpu  # noqa: F401  (TPU backend)


# --------------------------------------------------------------------------
# shared math helper (used inside the kernel and in the pure-JAX reference)
# --------------------------------------------------------------------------
def _layernorm(x, g, b, eps=1e-5):
    mu = jnp.mean(x, axis=-1, keepdims=True)
    var = jnp.mean((x - mu) ** 2, axis=-1, keepdims=True)
    return (x - mu) * jax.lax.rsqrt(var + eps) * g + b


# --------------------------------------------------------------------------
# The single fused kernel: embeds -> depth x MixedBlock -> head
# --------------------------------------------------------------------------
def fused_kernel(xs_ref, xf_ref, lw_ref, sw_ref, addi_ref, adds_ref,
                 ln1g_ref, ln1b_ref, qkvw_ref, qkvb_ref, pw_ref, pb_ref,
                 ln2g_ref, ln2b_ref, m1w1_ref, m1b1_ref, m1w2_ref, m1b2_ref,
                 ln3g_ref, ln3b_ref, m2w1_ref, m2b1_ref, m2w2_ref, m2b2_ref,
                 simg_ref, wmb_ref, sseq_ref, wm2b_ref,
                 hlng_ref, hlnb_ref, hw_ref, hb_ref,
                 o_ref, *, B, ni, nk, H):
    f32, bf16 = jnp.float32, jnp.bfloat16
    D = lw_ref.shape[1]
    depth = qkvw_ref.shape[0]
    hd = D // H
    n_img = B * ni
    n_tot = B * (ni + nk)
    scale = float(hd) ** -0.5

    # ---- embeddings: (rows, 2048) bf16 x (2048, D) bf16 -> f32, + (bias+pos) -
    fi = jnp.dot(xs_ref[...], lw_ref[...], preferred_element_type=f32) + addi_ref[...]
    fs = jnp.dot(xf_ref[...], sw_ref[...], preferred_element_type=f32) + adds_ref[...]
    x = jnp.concatenate([fi, fs], axis=0)                  # (B*N, D) f32

    # ---- masks built in-kernel (no DMA): block-diagonal-by-batch attention
    #      bias and the image-row selector for the split MLP ------------------
    row_r = jax.lax.broadcasted_iota(jnp.int32, (n_tot, n_tot), 0)
    row_c = jax.lax.broadcasted_iota(jnp.int32, (n_tot, n_tot), 1)
    same = None
    for bb in range(B):
        rb = (((row_r >= bb * ni) & (row_r < (bb + 1) * ni)) |
              ((row_r >= n_img + bb * nk) & (row_r < n_img + (bb + 1) * nk)))
        cb = (((row_c >= bb * ni) & (row_c < (bb + 1) * ni)) |
              ((row_c >= n_img + bb * nk) & (row_c < n_img + (bb + 1) * nk)))
        term = rb & cb
        same = term if same is None else (same | term)
    attn_bias = jnp.where(same, 0.0, -1e30).astype(f32)     # (B*N, B*N)
    rowid = jax.lax.broadcasted_iota(jnp.int32, (n_tot, 1), 0)
    row_is_img = rowid < n_img                               # (B*N, 1) bool

    # ---- MixedBlocks (depth unrolled; weights stacked on leading depth axis) -
    for d in range(depth):
        # -- attention: one lane-dense QKV matmul, per-head only for scores ---
        h = _layernorm(x, ln1g_ref[d], ln1b_ref[d])
        qkv = jnp.dot(h.astype(bf16), qkvw_ref[d],
                      preferred_element_type=f32) + qkvb_ref[d]      # (n, 3D)
        qf = qkv[:, 0 * D:1 * D]
        kf = qkv[:, 1 * D:2 * D]
        vf = qkv[:, 2 * D:3 * D]
        q = jnp.stack([qf[:, hh * hd:(hh + 1) * hd] for hh in range(H)],
                      axis=0).astype(bf16)                           # (H, n, hd)
        k = jnp.stack([kf[:, hh * hd:(hh + 1) * hd] for hh in range(H)],
                      axis=0).astype(bf16)
        v = jnp.stack([vf[:, hh * hd:(hh + 1) * hd] for hh in range(H)],
                      axis=0).astype(bf16)
        logits = jnp.einsum('hnk,hmk->hnm', q, k,
                            preferred_element_type=f32) * scale + attn_bias
        m = jnp.max(logits, axis=-1, keepdims=True)
        e = jnp.exp(logits - m)
        p = e * pl.reciprocal(jnp.sum(e, axis=-1, keepdims=True), approx=False)
        o = jnp.einsum('hnm,hmk->hnk', p.astype(bf16), v,
                       preferred_element_type=f32)                   # (H, n, hd)
        oc = jnp.concatenate([o[hh] for hh in range(H)], axis=-1)    # (n, D)
        x = x + jnp.dot(oc.astype(bf16), pw_ref[d],
                        preferred_element_type=f32) + pb_ref[d]

        # -- split MLPs: run both branches on all rows, per-row select --------
        h1 = _layernorm(x, ln2g_ref[d], ln2b_ref[d])
        g1 = jax.nn.gelu(jnp.dot(h1.astype(bf16), m1w1_ref[d],
                                 preferred_element_type=f32) + m1b1_ref[d],
                         approximate=True)
        y1 = jnp.dot(g1.astype(bf16), m1w2_ref[d],
                     preferred_element_type=f32) + m1b2_ref[d]
        h2 = _layernorm(x, ln3g_ref[d], ln3b_ref[d])
        g2 = jax.nn.gelu(jnp.dot(h2.astype(bf16), m2w1_ref[d],
                                 preferred_element_type=f32) + m2b1_ref[d],
                         approximate=True)
        y2 = jnp.dot(g2.astype(bf16), m2w2_ref[d],
                     preferred_element_type=f32) + m2b2_ref[d]
        x = x + jnp.where(row_is_img, y1, y2)

    # ---- head: Conv1d(k=1) weighted means as (B, B*N) x (B*N, D) matmuls ----
    xb = x.astype(bf16)
    a = jnp.dot(simg_ref[...], xb, preferred_element_type=f32) + wmb_ref[...]
    b = jnp.dot(sseq_ref[...], xb, preferred_element_type=f32) + wm2b_ref[...]
    xh = jnp.concatenate([a, b], axis=-1)                   # (B, 2D)
    xh = _layernorm(xh, hlng_ref[...], hlnb_ref[...])
    o_ref[...] = (jnp.dot(xh.astype(bf16), hw_ref[...],
                          preferred_element_type=f32) + hb_ref[...]).astype(o_ref.dtype)


# --------------------------------------------------------------------------
# One-time host-side weight packing (hoisted out of the per-call forward):
# stack over depth, bf16 casts, bias+pos tiling, kron selection matrices.
# --------------------------------------------------------------------------
def pack_params(params, batch_size):
    f32, bf16 = jnp.float32, jnp.bfloat16
    B = batch_size
    ni = params['local_pos'].shape[1]
    nk = params['seq_pos'].shape[1]
    blocks = params['blocks']

    def stk(key, dtype):
        return jnp.stack([blk[key] for blk in blocks]).astype(dtype)

    packed = dict(
        lw=params['local_w'].astype(bf16),
        sw=params['seq_w'].astype(bf16),
        add_img=jnp.tile(params['local_b'] + params['local_pos'][0], (B, 1)).astype(f32),
        add_seq=jnp.tile(params['seq_b'] + params['seq_pos'][0], (B, 1)).astype(f32),
        ln1g=stk('ln1_g', f32), ln1b=stk('ln1_b', f32),
        qkvw=stk('qkv_w', bf16), qkvb=stk('qkv_b', f32),
        pw=stk('proj_w', bf16), pb=stk('proj_b', f32),
        ln2g=stk('ln2_g', f32), ln2b=stk('ln2_b', f32),
        m1w1=stk('m1_w1', bf16), m1b1=stk('m1_b1', f32),
        m1w2=stk('m1_w2', bf16), m1b2=stk('m1_b2', f32),
        ln3g=stk('ln3_g', f32), ln3b=stk('ln3_b', f32),
        m2w1=stk('m2_w1', bf16), m2b1=stk('m2_b1', f32),
        m2w2=stk('m2_w2', bf16), m2b2=stk('m2_b2', f32),
        # Conv1d(k=1) weighted means as row-selection matrices over the slab.
        s_img=jnp.concatenate(
            [jnp.kron(jnp.eye(B, dtype=f32), params['wm_w']),
             jnp.zeros((B, B * nk), f32)], axis=1).astype(bf16),
        s_seq=jnp.concatenate(
            [jnp.zeros((B, B * ni), f32),
             jnp.kron(jnp.eye(B, dtype=f32), params['wm2_w'])], axis=1).astype(bf16),
        wm_b=params['wm_b'].astype(f32),
        wm2_b=params['wm2_b'].astype(f32),
        hlng=params['head_ln_g'].astype(f32), hlnb=params['head_ln_b'].astype(f32),
        hw=params['head_w'].astype(bf16), hb=params['head_b'].astype(f32),
    )
    return jax.tree_util.tree_map(lambda a: a.block_until_ready(), packed)


# --------------------------------------------------------------------------
# Jitted forward: flatten/cast per-call inputs and issue the single pallas_call.
# --------------------------------------------------------------------------
@functools.partial(jax.jit, static_argnames=("num_imgs", "num_heads"))
def image_feature_correction(full_f_img, short_f_img, packed,
                             num_imgs=3, num_heads=8):
    bf16 = jnp.bfloat16
    B, ni, K = short_f_img.shape
    _, nk, _ = full_f_img.shape
    D = packed['lw'].shape[1]
    assert ni == num_imgs  # split point coincides with the image frames

    xs = short_f_img.reshape(B * ni, K).astype(bf16)
    xf = full_f_img.reshape(B * nk, K).astype(bf16)

    kernel = functools.partial(fused_kernel, B=B, ni=ni, nk=nk, H=num_heads)
    args = (xs, xf, packed['lw'], packed['sw'], packed['add_img'], packed['add_seq'],
            packed['ln1g'], packed['ln1b'], packed['qkvw'], packed['qkvb'],
            packed['pw'], packed['pb'],
            packed['ln2g'], packed['ln2b'], packed['m1w1'], packed['m1b1'],
            packed['m1w2'], packed['m1b2'],
            packed['ln3g'], packed['ln3b'], packed['m2w1'], packed['m2b1'],
            packed['m2w2'], packed['m2b2'],
            packed['s_img'], packed['wm_b'], packed['s_seq'], packed['wm2_b'],
            packed['hlng'], packed['hlnb'], packed['hw'], packed['hb'])

    # No grid: the whole problem (~2.5 MB of bf16 weights + tiny activations)
    # is mapped whole into VMEM; a single invocation does the entire forward.
    y = pl.pallas_call(
        kernel,
        out_shape=jax.ShapeDtypeStruct((B, D), jnp.float32),
    )(*args)
    return y.reshape(B, 1, D)


# --------------------------------------------------------------------------
# Deterministic parameter construction (shapes per the module's __init__)
# --------------------------------------------------------------------------
def init_params(key, embed_dim=128, depth=3, mlp_ratio=2.0,
                num_frames=3, num_frames_keep=9, in_dim=2048):
    hid = int(embed_dim * mlp_ratio)
    keys = iter(jax.random.split(key, 256))

    def nrm(shape, scale=0.02):
        return (scale * jax.random.normal(next(keys), shape)).astype(jnp.float32)

    params = {
        'local_w': nrm((in_dim, embed_dim)), 'local_b': nrm((1, embed_dim)),
        'seq_w': nrm((in_dim, embed_dim)), 'seq_b': nrm((1, embed_dim)),
        'local_pos': nrm((1, num_frames, embed_dim)),
        'seq_pos': nrm((1, num_frames_keep, embed_dim)),
        'blocks': [],
        'wm_w': nrm((1, num_frames)), 'wm_b': nrm((1, 1)),
        'wm2_w': nrm((1, num_frames_keep)), 'wm2_b': nrm((1, 1)),
        'head_ln_g': jnp.ones((1, 2 * embed_dim), jnp.float32),
        'head_ln_b': jnp.zeros((1, 2 * embed_dim), jnp.float32),
        'head_w': nrm((2 * embed_dim, embed_dim)), 'head_b': nrm((1, embed_dim)),
    }
    for _ in range(depth):
        params['blocks'].append({
            'ln1_g': jnp.ones((1, embed_dim), jnp.float32),
            'ln1_b': jnp.zeros((1, embed_dim), jnp.float32),
            'qkv_w': nrm((embed_dim, 3 * embed_dim)), 'qkv_b': nrm((1, 3 * embed_dim)),
            'proj_w': nrm((embed_dim, embed_dim)), 'proj_b': nrm((1, embed_dim)),
            'ln2_g': jnp.ones((1, embed_dim), jnp.float32),
            'ln2_b': jnp.zeros((1, embed_dim), jnp.float32),
            'm1_w1': nrm((embed_dim, hid)), 'm1_b1': nrm((1, hid)),
            'm1_w2': nrm((hid, embed_dim)), 'm1_b2': nrm((1, embed_dim)),
            'ln3_g': jnp.ones((1, embed_dim), jnp.float32),
            'ln3_b': jnp.zeros((1, embed_dim), jnp.float32),
            'm2_w1': nrm((embed_dim, hid)), 'm2_b1': nrm((1, hid)),
            'm2_w2': nrm((hid, embed_dim)), 'm2_b2': nrm((1, embed_dim)),
        })
    return params


# --------------------------------------------------------------------------
# Pure-JAX reference (mirrors the PyTorch forward at inference).
# Matmul operands are rounded through bf16 exactly where the kernel stores /
# casts to bf16 (weights and matmul LHS activations); everything else is f32.
# --------------------------------------------------------------------------
def reference_forward(full_f_img, short_f_img, params, num_imgs=3, num_heads=8):
    r = lambda t: t.astype(jnp.bfloat16).astype(jnp.float32)
    B = short_f_img.shape[0]

    f_img = r(short_f_img) @ r(params['local_w']) + params['local_b'] + params['local_pos']
    f_seq = r(full_f_img) @ r(params['seq_w']) + params['seq_b'] + params['seq_pos']
    f = jnp.concatenate([f_img, f_seq], axis=1)
    D = f.shape[-1]
    hd = D // num_heads
    scale = hd ** -0.5

    def mlp(x, w1, b1, w2, b2):
        h = r(x) @ r(w1) + b1
        return r(jax.nn.gelu(h, approximate=True)) @ r(w2) + b2

    for p in params['blocks']:
        N = f.shape[1]
        h = _layernorm(f, p['ln1_g'], p['ln1_b'])
        qkv = (r(h) @ r(p['qkv_w']) + p['qkv_b']).reshape(B, N, 3, num_heads, hd)
        qkv = qkv.transpose(2, 0, 3, 1, 4)
        q, k, v = r(qkv[0]), r(qkv[1]), r(qkv[2])
        attn = jax.nn.softmax(jnp.einsum('bhnd,bhmd->bhnm', q, k) * scale, axis=-1)
        o = jnp.einsum('bhnm,bhmd->bhnd', r(attn), v).transpose(0, 2, 1, 3).reshape(B, N, D)
        f = f + (r(o) @ r(p['proj_w']) + p['proj_b'])
        x1, x2 = f[:, :num_imgs], f[:, num_imgs:]
        x1 = x1 + mlp(_layernorm(x1, p['ln2_g'], p['ln2_b']),
                      p['m1_w1'], p['m1_b1'], p['m1_w2'], p['m1_b2'])
        x2 = x2 + mlp(_layernorm(x2, p['ln3_g'], p['ln3_b']),
                      p['m2_w1'], p['m2_b1'], p['m2_w2'], p['m2_b2'])
        f = jnp.concatenate([x1, x2], axis=1)

    fi, fs = f[:, :num_imgs], f[:, num_imgs:]
    a = jnp.einsum('oc,bcd->bod', r(params['wm_w']), r(fi)) + params['wm_b']
    b = jnp.einsum('oc,bcd->bod', r(params['wm2_w']), r(fs)) + params['wm2_b']
    x = jnp.concatenate([a, b], axis=-1)
    x = _layernorm(x, params['head_ln_g'], params['head_ln_b'])
    x = r(x) @ r(params['head_w']) + params['head_b']
    return x.reshape(B, 1, -1)


# --------------------------------------------------------------------------
if __name__ == "__main__":
    B = 2
    EMBED_DIM = 128
    NUM_HEADS = 8
    NUM_FRAMES = 3
    NUM_FRAMES_KEEP = 9
    IN_DIM = 2048

    key = jax.random.PRNGKey(0)
    k_short, k_full, k_params = jax.random.split(key, 3)
    short_f_img = jax.random.normal(k_short, (B, NUM_FRAMES, IN_DIM), jnp.float32)
    full_f_img = jax.random.normal(k_full, (B, NUM_FRAMES_KEEP, IN_DIM), jnp.float32)
    params = init_params(k_params, embed_dim=EMBED_DIM, depth=3, mlp_ratio=2.0,
                         num_frames=NUM_FRAMES, num_frames_keep=NUM_FRAMES_KEEP,
                         in_dim=IN_DIM)

    # One-time packing, hoisted out of the per-call forward.
    packed = pack_params(params, B)

    out = image_feature_correction(full_f_img, short_f_img, packed,
                                   num_imgs=NUM_FRAMES, num_heads=NUM_HEADS)
    out = jax.block_until_ready(out)
    assert out.shape == (B, 1, EMBED_DIM)

    ref = reference_forward(full_f_img, short_f_img, params,
                            num_imgs=NUM_FRAMES, num_heads=NUM_HEADS)
    np.testing.assert_allclose(np.asarray(out), np.asarray(ref),
                               rtol=5e-3, atol=5e-3)
    print("KERNEL_OK")
</pallas_src>

<mosaic_0001>
module attributes {stable_mosaic.version = 11 : i64} {
  func.func @fused_kernel(%arg0: memref<6x2048xbf16, #tpu.memory_space<vmem>>, %arg1: memref<18x2048xbf16, #tpu.memory_space<vmem>>, %arg2: memref<2048x128xbf16, #tpu.memory_space<vmem>>, %arg3: memref<2048x128xbf16, #tpu.memory_space<vmem>>, %arg4: memref<6x128xf32, #tpu.memory_space<vmem>>, %arg5: memref<18x128xf32, #tpu.memory_space<vmem>>, %arg6: memref<3x1x128xf32, #tpu.memory_space<vmem>>, %arg7: memref<3x1x128xf32, #tpu.memory_space<vmem>>, %arg8: memref<3x128x384xbf16, #tpu.memory_space<vmem>>, %arg9: memref<3x1x384xf32, #tpu.memory_space<vmem>>, %arg10: memref<3x128x128xbf16, #tpu.memory_space<vmem>>, %arg11: memref<3x1x128xf32, #tpu.memory_space<vmem>>, %arg12: memref<3x1x128xf32, #tpu.memory_space<vmem>>, %arg13: memref<3x1x128xf32, #tpu.memory_space<vmem>>, %arg14: memref<3x128x256xbf16, #tpu.memory_space<vmem>>, %arg15: memref<3x1x256xf32, #tpu.memory_space<vmem>>, %arg16: memref<3x256x128xbf16, #tpu.memory_space<vmem>>, %arg17: memref<3x1x128xf32, #tpu.memory_space<vmem>>, %arg18: memref<3x1x128xf32, #tpu.memory_space<vmem>>, %arg19: memref<3x1x128xf32, #tpu.memory_space<vmem>>, %arg20: memref<3x128x256xbf16, #tpu.memory_space<vmem>>, %arg21: memref<3x1x256xf32, #tpu.memory_space<vmem>>, %arg22: memref<3x256x128xbf16, #tpu.memory_space<vmem>>, %arg23: memref<3x1x128xf32, #tpu.memory_space<vmem>>, %arg24: memref<2x24xbf16, #tpu.memory_space<vmem>>, %arg25: memref<1x1xf32, #tpu.memory_space<vmem>>, %arg26: memref<2x24xbf16, #tpu.memory_space<vmem>>, %arg27: memref<1x1xf32, #tpu.memory_space<vmem>>, %arg28: memref<1x256xf32, #tpu.memory_space<vmem>>, %arg29: memref<1x256xf32, #tpu.memory_space<vmem>>, %arg30: memref<256x128xbf16, #tpu.memory_space<vmem>>, %arg31: memref<1x128xf32, #tpu.memory_space<vmem>>, %arg32: memref<2x128xf32, #tpu.memory_space<vmem>>) attributes {dimension_semantics = [], scalar_prefetch = 0 : i64, scratch_operands = 0 : i64, tpu.core_type = #tpu.core_type<tc>} {
    %c0 = arith.constant 0 : index
    %c0_0 = arith.constant 0 : index
    %0 = vector.load %arg0[%c0, %c0_0] : memref<6x2048xbf16, #tpu.memory_space<vmem>>, vector<6x2048xbf16>
    %c0_1 = arith.constant 0 : index
    %c0_2 = arith.constant 0 : index
    %1 = vector.load %arg2[%c0_1, %c0_2] : memref<2048x128xbf16, #tpu.memory_space<vmem>>, vector<2048x128xbf16>
    %cst = arith.constant dense<0.000000e+00> : vector<6x128xf32>
    %2 = tpu.matmul %0, %1, %cst {dimension_numbers = #tpu.dot_dimension_numbers<[1], [0], [0], [1], [0, 0, 1, 1], [], []>} : vector<6x2048xbf16>, vector<2048x128xbf16>, vector<6x128xf32> -> vector<6x128xf32>
    %c0_3 = arith.constant 0 : index
    %c0_4 = arith.constant 0 : index
    %3 = vector.load %arg4[%c0_3, %c0_4] : memref<6x128xf32, #tpu.memory_space<vmem>>, vector<6x128xf32>
    %4 = arith.addf %2, %3 : vector<6x128xf32>
    %c0_5 = arith.constant 0 : index
    %c0_6 = arith.constant 0 : index
    %5 = vector.load %arg1[%c0_5, %c0_6] : memref<18x2048xbf16, #tpu.memory_space<vmem>>, vector<18x2048xbf16>
    %c0_7 = arith.constant 0 : index
    %c0_8 = arith.constant 0 : index
    %6 = vector.load %arg3[%c0_7, %c0_8] : memref<2048x128xbf16, #tpu.memory_space<vmem>>, vector<2048x128xbf16>
    %cst_9 = arith.constant dense<0.000000e+00> : vector<18x128xf32>
    %7 = tpu.matmul %5, %6, %cst_9 {dimension_numbers = #tpu.dot_dimension_numbers<[1], [0], [0], [1], [0, 0, 1, 1], [], []>} : vector<18x2048xbf16>, vector<2048x128xbf16>, vector<18x128xf32> -> vector<18x128xf32>
    %c0_10 = arith.constant 0 : index
    %c0_11 = arith.constant 0 : index
    %8 = vector.load %arg5[%c0_10, %c0_11] : memref<18x128xf32, #tpu.memory_space<vmem>>, vector<18x128xf32>
    %9 = arith.addf %7, %8 : vector<18x128xf32>
    %10 = tpu.concatenate %4, %9 in 0 : vector<6x128xf32>, vector<18x128xf32> -> vector<24x128xf32>
    %11 = tpu.iota {dimensions = array<i32: 0>} : vector<24x24xi32>
    %12 = tpu.iota {dimensions = array<i32: 1>} : vector<24x24xi32>
    %c0_i32 = arith.constant 0 : i32
    %13 = vector.broadcast %c0_i32 : i32 to vector<24x24xi32>
    %14 = arith.cmpi sge, %11, %13 : vector<24x24xi32>
    %c3_i32 = arith.constant 3 : i32
    %15 = vector.broadcast %c3_i32 : i32 to vector<24x24xi32>
    %16 = arith.cmpi slt, %11, %15 : vector<24x24xi32>
    %17 = arith.andi %14, %16 : vector<24x24xi1>
    %c6_i32 = arith.constant 6 : i32
    %18 = vector.broadcast %c6_i32 : i32 to vector<24x24xi32>
    %19 = arith.cmpi sge, %11, %18 : vector<24x24xi32>
    %c15_i32 = arith.constant 15 : i32
    %20 = vector.broadcast %c15_i32 : i32 to vector<24x24xi32>
    %21 = arith.cmpi slt, %11, %20 : vector<24x24xi32>
    %22 = arith.andi %19, %21 : vector<24x24xi1>
    %23 = arith.ori %17, %22 : vector<24x24xi1>
    %c0_i32_12 = arith.constant 0 : i32
    %24 = vector.broadcast %c0_i32_12 : i32 to vector<24x24xi32>
    %25 = arith.cmpi sge, %12, %24 : vector<24x24xi32>
    %c3_i32_13 = arith.constant 3 : i32
    %26 = vector.broadcast %c3_i32_13 : i32 to vector<24x24xi32>
    %27 = arith.cmpi slt, %12, %26 : vector<24x24xi32>
    %28 = arith.andi %25, %27 : vector<24x24xi1>
    %c6_i32_14 = arith.constant 6 : i32
    %29 = vector.broadcast %c6_i32_14 : i32 to vector<24x24xi32>
    %30 = arith.cmpi sge, %12, %29 : vector<24x24xi32>
    %c15_i32_15 = arith.constant 15 : i32
    %31 = vector.broadcast %c15_i32_15 : i32 to vector<24x24xi32>
    %32 = arith.cmpi slt, %12, %31 : vector<24x24xi32>
    %33 = arith.andi %30, %32 : vector<24x24xi1>
    %34 = arith.ori %28, %33 : vector<24x24xi1>
    %35 = arith.andi %23, %34 : vector<24x24xi1>
    %c3_i32_16 = arith.constant 3 : i32
    %36 = vector.broadcast %c3_i32_16 : i32 to vector<24x24xi32>
    %37 = arith.cmpi sge, %11, %36 : vector<24x24xi32>
    %c6_i32_17 = arith.constant 6 : i32
    %38 = vector.broadcast %c6_i32_17 : i32 to vector<24x24xi32>
    %39 = arith.cmpi slt, %11, %38 : vector<24x24xi32>
    %40 = arith.andi %37, %39 : vector<24x24xi1>
    %c15_i32_18 = arith.constant 15 : i32
    %41 = vector.broadcast %c15_i32_18 : i32 to vector<24x24xi32>
    %42 = arith.cmpi sge, %11, %41 : vector<24x24xi32>
    %c24_i32 = arith.constant 24 : i32
    %43 = vector.broadcast %c24_i32 : i32 to vector<24x24xi32>
    %44 = arith.cmpi slt, %11, %43 : vector<24x24xi32>
    %45 = arith.andi %42, %44 : vector<24x24xi1>
    %46 = arith.ori %40, %45 : vector<24x24xi1>
    %c3_i32_19 = arith.constant 3 : i32
    %47 = vector.broadcast %c3_i32_19 : i32 to vector<24x24xi32>
    %48 = arith.cmpi sge, %12, %47 : vector<24x24xi32>
    %c6_i32_20 = arith.constant 6 : i32
    %49 = vector.broadcast %c6_i32_20 : i32 to vector<24x24xi32>
    %50 = arith.cmpi slt, %12, %49 : vector<24x24xi32>
    %51 = arith.andi %48, %50 : vector<24x24xi1>
    %c15_i32_21 = arith.constant 15 : i32
    %52 = vector.broadcast %c15_i32_21 : i32 to vector<24x24xi32>
    %53 = arith.cmpi sge, %12, %52 : vector<24x24xi32>
    %c24_i32_22 = arith.constant 24 : i32
    %54 = vector.broadcast %c24_i32_22 : i32 to vector<24x24xi32>
    %55 = arith.cmpi slt, %12, %54 : vector<24x24xi32>
    %56 = arith.andi %53, %55 : vector<24x24xi1>
    %57 = arith.ori %51, %56 : vector<24x24xi1>
    %58 = arith.andi %46, %57 : vector<24x24xi1>
    %59 = arith.ori %35, %58 : vector<24x24xi1>
    %cst_23 = arith.constant 0.000000e+00 : f32
    %cst_24 = arith.constant -1.000000e+30 : f32
    %60 = vector.broadcast %cst_23 : f32 to vector<24x24xf32>
    %61 = vector.broadcast %cst_24 : f32 to vector<24x24xf32>
    %62 = arith.select %59, %60, %61 : vector<24x24xi1>, vector<24x24xf32>
    %63 = tpu.iota {dimensions = array<i32: 0>} : vector<24x1xi32>
    %c6_i32_25 = arith.constant 6 : i32
    %64 = vector.broadcast %c6_i32_25 : i32 to vector<24x1xi32>
    %65 = arith.cmpi slt, %63, %64 : vector<24x1xi32>
    %c0_26 = arith.constant 0 : index
    %c0_27 = arith.constant 0 : index
    %c0_28 = arith.constant 0 : index
    %66 = vector.load %arg6[%c0_26, %c0_27, %c0_28] : memref<3x1x128xf32, #tpu.memory_space<vmem>>, vector<1x1x128xf32>
    %67 = vector.shape_cast %66 : vector<1x1x128xf32> to vector<1x128xf32>
    %c0_29 = arith.constant 0 : index
    %c0_30 = arith.constant 0 : index
    %c0_31 = arith.constant 0 : index
    %68 = vector.load %arg7[%c0_29, %c0_30, %c0_31] : memref<3x1x128xf32, #tpu.memory_space<vmem>>, vector<1x1x128xf32>
    %69 = vector.shape_cast %68 : vector<1x1x128xf32> to vector<1x128xf32>
    %cst_32 = arith.constant dense<0.000000e+00> : vector<24xf32>
    %70 = vector.multi_reduction <add>, %10, %cst_32 [1] : vector<24x128xf32> to vector<24xf32>
    %71 = vector.shape_cast %70 : vector<24xf32> to vector<24x1xf32>
    %cst_33 = arith.constant 1.280000e+02 : f32
    %72 = vector.broadcast %cst_33 : f32 to vector<24x1xf32>
    %73 = arith.divf %71, %72 : vector<24x1xf32>
    %74 = vector.broadcast %73 : vector<24x1xf32> to vector<24x128xf32>
    %75 = arith.subf %10, %74 : vector<24x128xf32>
    %76 = arith.mulf %75, %75 : vector<24x128xf32>
    %cst_34 = arith.constant dense<0.000000e+00> : vector<24xf32>
    %77 = vector.multi_reduction <add>, %76, %cst_34 [1] : vector<24x128xf32> to vector<24xf32>
    %78 = vector.shape_cast %77 : vector<24xf32> to vector<24x1xf32>
    %cst_35 = arith.constant 1.280000e+02 : f32
    %79 = vector.broadcast %cst_35 : f32 to vector<24x1xf32>
    %80 = arith.divf %78, %79 : vector<24x1xf32>
    %81 = vector.broadcast %73 : vector<24x1xf32> to vector<24x128xf32>
    %82 = arith.subf %10, %81 : vector<24x128xf32>
    %cst_36 = arith.constant 9.99999974E-6 : f32
    %83 = vector.broadcast %cst_36 : f32 to vector<24x1xf32>
    %84 = arith.addf %80, %83 : vector<24x1xf32>
    %85 = math.rsqrt %84 : vector<24x1xf32>
    %86 = vector.broadcast %85 : vector<24x1xf32> to vector<24x128xf32>
    %87 = arith.mulf %82, %86 : vector<24x128xf32>
    %88 = vector.broadcast %67 : vector<1x128xf32> to vector<24x128xf32>
    %89 = arith.mulf %87, %88 : vector<24x128xf32>
    %90 = vector.broadcast %69 : vector<1x128xf32> to vector<24x128xf32>
    %91 = arith.addf %89, %90 : vector<24x128xf32>
    %92 = arith.truncf %91 : vector<24x128xf32> to vector<24x128xbf16>
    %c0_37 = arith.constant 0 : index
    %c0_38 = arith.constant 0 : index
    %c0_39 = arith.constant 0 : index
    %93 = vector.load %arg8[%c0_37, %c0_38, %c0_39] : memref<3x128x384xbf16, #tpu.memory_space<vmem>>, vector<1x128x384xbf16>
    %94 = vector.shape_cast %93 : vector<1x128x384xbf16> to vector<128x384xbf16>
    %cst_40 = arith.constant dense<0.000000e+00> : vector<24x384xf32>
    %95 = tpu.matmul %92, %94, %cst_40 {dimension_numbers = #tpu.dot_dimension_numbers<[1], [0], [0], [1], [0, 0, 1, 1], [], []>} : vector<24x128xbf16>, vector<128x384xbf16>, vector<24x384xf32> -> vector<24x384xf32>
    %c0_41 = arith.constant 0 : index
    %c0_42 = arith.constant 0 : index
    %c0_43 = arith.constant 0 : index
    %96 = vector.load %arg9[%c0_41, %c0_42, %c0_43] : memref<3x1x384xf32, #tpu.memory_space<vmem>>, vector<1x1x384xf32>
    %97 = vector.shape_cast %96 : vector<1x1x384xf32> to vector<1x384xf32>
    %98 = vector.broadcast %97 : vector<1x384xf32> to vector<24x384xf32>
    %99 = arith.addf %95, %98 : vector<24x384xf32>
    %100 = vector.extract_strided_slice %99 {offsets = [0, 0], sizes = [24, 128], strides = [1, 1]} : vector<24x384xf32> to vector<24x128xf32>
    %101 = vector.extract_strided_slice %99 {offsets = [0, 128], sizes = [24, 128], strides = [1, 1]} : vector<24x384xf32> to vector<24x128xf32>
    %102 = vector.extract_strided_slice %99 {offsets = [0, 256], sizes = [24, 128], strides = [1, 1]} : vector<24x384xf32> to vector<24x128xf32>
    %103 = vector.extract_strided_slice %100 {offsets = [0, 0], sizes = [24, 16], strides = [1, 1]} : vector<24x128xf32> to vector<24x16xf32>
    %104 = vector.extract_strided_slice %100 {offsets = [0, 16], sizes = [24, 16], strides = [1, 1]} : vector<24x128xf32> to vector<24x16xf32>
    %105 = vector.extract_strided_slice %100 {offsets = [0, 32], sizes = [24, 16], strides = [1, 1]} : vector<24x128xf32> to vector<24x16xf32>
    %106 = vector.extract_strided_slice %100 {offsets = [0, 48], sizes = [24, 16], strides = [1, 1]} : vector<24x128xf32> to vector<24x16xf32>
    %107 = vector.extract_strided_slice %100 {offsets = [0, 64], sizes = [24, 16], strides = [1, 1]} : vector<24x128xf32> to vector<24x16xf32>
    %108 = vector.extract_strided_slice %100 {offsets = [0, 80], sizes = [24, 16], strides = [1, 1]} : vector<24x128xf32> to vector<24x16xf32>
    %109 = vector.extract_strided_slice %100 {offsets = [0, 96], sizes = [24, 16], strides = [1, 1]} : vector<24x128xf32> to vector<24x16xf32>
    %110 = vector.extract_strided_slice %100 {offsets = [0, 112], sizes = [24, 16], strides = [1, 1]} : vector<24x128xf32> to vector<24x16xf32>
    %111 = vector.shape_cast %103 : vector<24x16xf32> to vector<1x24x16xf32>
    %112 = vector.shape_cast %104 : vector<24x16xf32> to vector<1x24x16xf32>
    %113 = vector.shape_cast %105 : vector<24x16xf32> to vector<1x24x16xf32>
    %114 = vector.shape_cast %106 : vector<24x16xf32> to vector<1x24x16xf32>
    %115 = vector.shape_cast %107 : vector<24x16xf32> to vector<1x24x16xf32>
    %116 = vector.shape_cast %108 : vector<24x16xf32> to vector<1x24x16xf32>
    %117 = vector.shape_cast %109 : vector<24x16xf32> to vector<1x24x16xf32>
    %118 = vector.shape_cast %110 : vector<24x16xf32> to vector<1x24x16xf32>
    %119 = tpu.concatenate %111, %112, %113, %114, %115, %116, %117, %118 in 0 : vector<1x24x16xf32>, vector<1x24x16xf32>, vector<1x24x16xf32>, vector<1x24x16xf32>, vector<1x24x16xf32>, vector<1x24x16xf32>, vector<1x24x16xf32>, vector<1x24x16xf32> -> vector<8x24x16xf32>
    %120 = arith.truncf %119 : vector<8x24x16xf32> to vector<8x24x16xbf16>
    %121 = vector.extract_strided_slice %101 {offsets = [0, 0], sizes = [24, 16], strides = [1, 1]} : vector<24x128xf32> to vector<24x16xf32>
    %122 = vector.extract_strided_slice %101 {offsets = [0, 16], sizes = [24, 16], strides = [1, 1]} : vector<24x128xf32> to vector<24x16xf32>
    %123 = vector.extract_strided_slice %101 {offsets = [0, 32], sizes = [24, 16], strides = [1, 1]} : vector<24x128xf32> to vector<24x16xf32>
    %124 = vector.extract_strided_slice %101 {offsets = [0, 48], sizes = [24, 16], strides = [1, 1]} : vector<24x128xf32> to vector<24x16xf32>
    %125 = vector.extract_strided_slice %101 {offsets = [0, 64], sizes = [24, 16], strides = [1, 1]} : vector<24x128xf32> to vector<24x16xf32>
    %126 = vector.extract_strided_slice %101 {offsets = [0, 80], sizes = [24, 16], strides = [1, 1]} : vector<24x128xf32> to vector<24x16xf32>
    %127 = vector.extract_strided_slice %101 {offsets = [0, 96], sizes = [24, 16], strides = [1, 1]} : vector<24x128xf32> to vector<24x16xf32>
    %128 = vector.extract_strided_slice %101 {offsets = [0, 112], sizes = [24, 16], strides = [1, 1]} : vector<24x128xf32> to vector<24x16xf32>
    %129 = vector.shape_cast %121 : vector<24x16xf32> to vector<1x24x16xf32>
    %130 = vector.shape_cast %122 : vector<24x16xf32> to vector<1x24x16xf32>
    %131 = vector.shape_cast %123 : vector<24x16xf32> to vector<1x24x16xf32>
    %132 = vector.shape_cast %124 : vector<24x16xf32> to vector<1x24x16xf32>
    %133 = vector.shape_cast %125 : vector<24x16xf32> to vector<1x24x16xf32>
    %134 = vector.shape_cast %126 : vector<24x16xf32> to vector<1x24x16xf32>
    %135 = vector.shape_cast %127 : vector<24x16xf32> to vector<1x24x16xf32>
    %136 = vector.shape_cast %128 : vector<24x16xf32> to vector<1x24x16xf32>
    %137 = tpu.concatenate %129, %130, %131, %132, %133, %134, %135, %136 in 0 : vector<1x24x16xf32>, vector<1x24x16xf32>, vector<1x24x16xf32>, vector<1x24x16xf32>, vector<1x24x16xf32>, vector<1x24x16xf32>, vector<1x24x16xf32>, vector<1x24x16xf32> -> vector<8x24x16xf32>
    %138 = arith.truncf %137 : vector<8x24x16xf32> to vector<8x24x16xbf16>
    %139 = vector.extract_strided_slice %102 {offsets = [0, 0], sizes = [24, 16], strides = [1, 1]} : vector<24x128xf32> to vector<24x16xf32>
    %140 = vector.extract_strided_slice %102 {offsets = [0, 16], sizes = [24, 16], strides = [1, 1]} : vector<24x128xf32> to vector<24x16xf32>
    %141 = vector.extract_strided_slice %102 {offsets = [0, 32], sizes = [24, 16], strides = [1, 1]} : vector<24x128xf32> to vector<24x16xf32>
    %142 = vector.extract_strided_slice %102 {offsets = [0, 48], sizes = [24, 16], strides = [1, 1]} : vector<24x128xf32> to vector<24x16xf32>
    %143 = vector.extract_strided_slice %102 {offsets = [0, 64], sizes = [24, 16], strides = [1, 1]} : vector<24x128xf32> to vector<24x16xf32>
    %144 = vector.extract_strided_slice %102 {offsets = [0, 80], sizes = [24, 16], strides = [1, 1]} : vector<24x128xf32> to vector<24x16xf32>
    %145 = vector.extract_strided_slice %102 {offsets = [0, 96], sizes = [24, 16], strides = [1, 1]} : vector<24x128xf32> to vector<24x16xf32>
    %146 = vector.extract_strided_slice %102 {offsets = [0, 112], sizes = [24, 16], strides = [1, 1]} : vector<24x128xf32> to vector<24x16xf32>
    %147 = vector.shape_cast %139 : vector<24x16xf32> to vector<1x24x16xf32>
    %148 = vector.shape_cast %140 : vector<24x16xf32> to vector<1x24x16xf32>
    %149 = vector.shape_cast %141 : vector<24x16xf32> to vector<1x24x16xf32>
    %150 = vector.shape_cast %142 : vector<24x16xf32> to vector<1x24x16xf32>
    %151 = vector.shape_cast %143 : vector<24x16xf32> to vector<1x24x16xf32>
    %152 = vector.shape_cast %144 : vector<24x16xf32> to vector<1x24x16xf32>
    %153 = vector.shape_cast %145 : vector<24x16xf32> to vector<1x24x16xf32>
    %154 = vector.shape_cast %146 : vector<24x16xf32> to vector<1x24x16xf32>
    %155 = tpu.concatenate %147, %148, %149, %150, %151, %152, %153, %154 in 0 : vector<1x24x16xf32>, vector<1x24x16xf32>, vector<1x24x16xf32>, vector<1x24x16xf32>, vector<1x24x16xf32>, vector<1x24x16xf32>, vector<1x24x16xf32>, vector<1x24x16xf32> -> vector<8x24x16xf32>
    %156 = arith.truncf %155 : vector<8x24x16xf32> to vector<8x24x16xbf16>
    "tpu.trace_start"() <{level = 10 : i32, message = "hnk,hmk->hnm"}> : () -> ()
    %cst_44 = arith.constant dense<0.000000e+00> : vector<8x24x24xf32>
    %157 = tpu.matmul %120, %138, %cst_44 {dimension_numbers = #tpu.dot_dimension_numbers<[2], [2], [1], [1], [0, 0, 0, 1, 1, 1], [0], [0]>} : vector<8x24x16xbf16>, vector<8x24x16xbf16>, vector<8x24x24xf32> -> vector<8x24x24xf32>
    "tpu.trace_stop"() : () -> ()
    %cst_45 = arith.constant 2.500000e-01 : f32
    %158 = vector.broadcast %cst_45 : f32 to vector<8x24x24xf32>
    %159 = arith.mulf %157, %158 : vector<8x24x24xf32>
    %160 = vector.shape_cast %62 : vector<24x24xf32> to vector<1x24x24xf32>
    %161 = vector.broadcast %160 : vector<1x24x24xf32> to vector<8x24x24xf32>
    %162 = arith.addf %159, %161 : vector<8x24x24xf32>
    %cst_46 = arith.constant dense<0xFF800000> : vector<8x24xf32>
    %163 = vector.multi_reduction <maximumf>, %162, %cst_46 [2] : vector<8x24x24xf32> to vector<8x24xf32>
    %164 = vector.shape_cast %163 : vector<8x24xf32> to vector<8x24x1xf32>
    %165 = vector.broadcast %164 : vector<8x24x1xf32> to vector<8x24x24xf32>
    %166 = arith.subf %162, %165 : vector<8x24x24xf32>
    %167 = math.exp %166 : vector<8x24x24xf32>
    %cst_47 = arith.constant dense<0.000000e+00> : vector<8x24xf32>
    %168 = vector.multi_reduction <add>, %167, %cst_47 [2] : vector<8x24x24xf32> to vector<8x24xf32>
    %169 = vector.shape_cast %168 : vector<8x24xf32> to vector<8x24x1xf32>
    %170 = tpu.reciprocal %169 : vector<8x24x1xf32> -> vector<8x24x1xf32>
    %171 = vector.broadcast %170 : vector<8x24x1xf32> to vector<8x24x24xf32>
    %172 = arith.mulf %167, %171 : vector<8x24x24xf32>
    %173 = arith.truncf %172 : vector<8x24x24xf32> to vector<8x24x24xbf16>
    "tpu.trace_start"() <{level = 10 : i32, message = "hnm,hmk->hnk"}> : () -> ()
    %cst_48 = arith.constant dense<0.000000e+00> : vector<8x24x16xf32>
    %174 = tpu.matmul %173, %156, %cst_48 {dimension_numbers = #tpu.dot_dimension_numbers<[2], [1], [1], [2], [0, 0, 0, 1, 1, 2], [0], [0]>} : vector<8x24x24xbf16>, vector<8x24x16xbf16>, vector<8x24x16xf32> -> vector<8x24x16xf32>
    "tpu.trace_stop"() : () -> ()
    %175 = vector.extract_strided_slice %174 {offsets = [0, 0, 0], sizes = [1, 24, 16], strides = [1, 1, 1]} : vector<8x24x16xf32> to vector<1x24x16xf32>
    %176 = vector.shape_cast %175 : vector<1x24x16xf32> to vector<24x16xf32>
    %177 = vector.extract_strided_slice %174 {offsets = [1, 0, 0], sizes = [1, 24, 16], strides = [1, 1, 1]} : vector<8x24x16xf32> to vector<1x24x16xf32>
    %178 = vector.shape_cast %177 : vector<1x24x16xf32> to vector<24x16xf32>
    %179 = vector.extract_strided_slice %174 {offsets = [2, 0, 0], sizes = [1, 24, 16], strides = [1, 1, 1]} : vector<8x24x16xf32> to vector<1x24x16xf32>
    %180 = vector.shape_cast %179 : vector<1x24x16xf32> to vector<24x16xf32>
    %181 = vector.extract_strided_slice %174 {offsets = [3, 0, 0], sizes = [1, 24, 16], strides = [1, 1, 1]} : vector<8x24x16xf32> to vector<1x24x16xf32>
    %182 = vector.shape_cast %181 : vector<1x24x16xf32> to vector<24x16xf32>
    %183 = vector.extract_strided_slice %174 {offsets = [4, 0, 0], sizes = [1, 24, 16], strides = [1, 1, 1]} : vector<8x24x16xf32> to vector<1x24x16xf32>
    %184 = vector.shape_cast %183 : vector<1x24x16xf32> to vector<24x16xf32>
    %185 = vector.extract_strided_slice %174 {offsets = [5, 0, 0], sizes = [1, 24, 16], strides = [1, 1, 1]} : vector<8x24x16xf32> to vector<1x24x16xf32>
    %186 = vector.shape_cast %185 : vector<1x24x16xf32> to vector<24x16xf32>
    %187 = vector.extract_strided_slice %174 {offsets = [6, 0, 0], sizes = [1, 24, 16], strides = [1, 1, 1]} : vector<8x24x16xf32> to vector<1x24x16xf32>
    %188 = vector.shape_cast %187 : vector<1x24x16xf32> to vector<24x16xf32>
    %189 = vector.extract_strided_slice %174 {offsets = [7, 0, 0], sizes = [1, 24, 16], strides = [1, 1, 1]} : vector<8x24x16xf32> to vector<1x24x16xf32>
    %190 = vector.shape_cast %189 : vector<1x24x16xf32> to vector<24x16xf32>
    %191 = tpu.concatenate %176, %178, %180, %182, %184, %186, %188, %190 in 1 : vector<24x16xf32>, vector<24x16xf32>, vector<24x16xf32>, vector<24x16xf32>, vector<24x16xf32>, vector<24x16xf32>, vector<24x16xf32>, vector<24x16xf32> -> vector<24x128xf32>
    %192 = arith.truncf %191 : vector<24x128xf32> to vector<24x128xbf16>
    %c0_49 = arith.constant 0 : index
    %c0_50 = arith.constant 0 : index
    %c0_51 = arith.constant 0 : index
    %193 = vector.load %arg10[%c0_49, %c0_50, %c0_51] : memref<3x128x128xbf16, #tpu.memory_space<vmem>>, vector<1x128x128xbf16>
    %194 = vector.shape_cast %193 : vector<1x128x128xbf16> to vector<128x128xbf16>
    %cst_52 = arith.constant dense<0.000000e+00> : vector<24x128xf32>
    %195 = tpu.matmul %192, %194, %cst_52 {dimension_numbers = #tpu.dot_dimension_numbers<[1], [0], [0], [1], [0, 0, 1, 1], [], []>} : vector<24x128xbf16>, vector<128x128xbf16>, vector<24x128xf32> -> vector<24x128xf32>
    %196 = arith.addf %10, %195 : vector<24x128xf32>
    %c0_53 = arith.constant 0 : index
    %c0_54 = arith.constant 0 : index
    %c0_55 = arith.constant 0 : index
    %197 = vector.load %arg11[%c0_53, %c0_54, %c0_55] : memref<3x1x128xf32, #tpu.memory_space<vmem>>, vector<1x1x128xf32>
    %198 = vector.shape_cast %197 : vector<1x1x128xf32> to vector<1x128xf32>
    %199 = vector.broadcast %198 : vector<1x128xf32> to vector<24x128xf32>
    %200 = arith.addf %196, %199 : vector<24x128xf32>
    %c0_56 = arith.constant 0 : index
    %c0_57 = arith.constant 0 : index
    %c0_58 = arith.constant 0 : index
    %201 = vector.load %arg12[%c0_56, %c0_57, %c0_58] : memref<3x1x128xf32, #tpu.memory_space<vmem>>, vector<1x1x128xf32>
    %202 = vector.shape_cast %201 : vector<1x1x128xf32> to vector<1x128xf32>
    %c0_59 = arith.constant 0 : index
    %c0_60 = arith.constant 0 : index
    %c0_61 = arith.constant 0 : index
    %203 = vector.load %arg13[%c0_59, %c0_60, %c0_61] : memref<3x1x128xf32, #tpu.memory_space<vmem>>, vector<1x1x128xf32>
    %204 = vector.shape_cast %203 : vector<1x1x128xf32> to vector<1x128xf32>
    %cst_62 = arith.constant dense<0.000000e+00> : vector<24xf32>
    %205 = vector.multi_reduction <add>, %200, %cst_62 [1] : vector<24x128xf32> to vector<24xf32>
    %206 = vector.shape_cast %205 : vector<24xf32> to vector<24x1xf32>
    %cst_63 = arith.constant 1.280000e+02 : f32
    %207 = vector.broadcast %cst_63 : f32 to vector<24x1xf32>
    %208 = arith.divf %206, %207 : vector<24x1xf32>
    %209 = vector.broadcast %208 : vector<24x1xf32> to vector<24x128xf32>
    %210 = arith.subf %200, %209 : vector<24x128xf32>
    %211 = arith.mulf %210, %210 : vector<24x128xf32>
    %cst_64 = arith.constant dense<0.000000e+00> : vector<24xf32>
    %212 = vector.multi_reduction <add>, %211, %cst_64 [1] : vector<24x128xf32> to vector<24xf32>
    %213 = vector.shape_cast %212 : vector<24xf32> to vector<24x1xf32>
    %cst_65 = arith.constant 1.280000e+02 : f32
    %214 = vector.broadcast %cst_65 : f32 to vector<24x1xf32>
    %215 = arith.divf %213, %214 : vector<24x1xf32>
    %216 = vector.broadcast %208 : vector<24x1xf32> to vector<24x128xf32>
    %217 = arith.subf %200, %216 : vector<24x128xf32>
    %cst_66 = arith.constant 9.99999974E-6 : f32
    %218 = vector.broadcast %cst_66 : f32 to vector<24x1xf32>
    %219 = arith.addf %215, %218 : vector<24x1xf32>
    %220 = math.rsqrt %219 : vector<24x1xf32>
    %221 = vector.broadcast %220 : vector<24x1xf32> to vector<24x128xf32>
    %222 = arith.mulf %217, %221 : vector<24x128xf32>
    %223 = vector.broadcast %202 : vector<1x128xf32> to vector<24x128xf32>
    %224 = arith.mulf %222, %223 : vector<24x128xf32>
    %225 = vector.broadcast %204 : vector<1x128xf32> to vector<24x128xf32>
    %226 = arith.addf %224, %225 : vector<24x128xf32>
    %227 = arith.truncf %226 : vector<24x128xf32> to vector<24x128xbf16>
    %c0_67 = arith.constant 0 : index
    %c0_68 = arith.constant 0 : index
    %c0_69 = arith.constant 0 : index
    %228 = vector.load %arg14[%c0_67, %c0_68, %c0_69] : memref<3x128x256xbf16, #tpu.memory_space<vmem>>, vector<1x128x256xbf16>
    %229 = vector.shape_cast %228 : vector<1x128x256xbf16> to vector<128x256xbf16>
    %cst_70 = arith.constant dense<0.000000e+00> : vector<24x256xf32>
    %230 = tpu.matmul %227, %229, %cst_70 {dimension_numbers = #tpu.dot_dimension_numbers<[1], [0], [0], [1], [0, 0, 1, 1], [], []>} : vector<24x128xbf16>, vector<128x256xbf16>, vector<24x256xf32> -> vector<24x256xf32>
    %c0_71 = arith.constant 0 : index
    %c0_72 = arith.constant 0 : index
    %c0_73 = arith.constant 0 : index
    %231 = vector.load %arg15[%c0_71, %c0_72, %c0_73] : memref<3x1x256xf32, #tpu.memory_space<vmem>>, vector<1x1x256xf32>
    %232 = vector.shape_cast %231 : vector<1x1x256xf32> to vector<1x256xf32>
    %233 = vector.broadcast %232 : vector<1x256xf32> to vector<24x256xf32>
    %234 = arith.addf %230, %233 : vector<24x256xf32>
    %235 = arith.mulf %234, %234 : vector<24x256xf32>
    %236 = arith.mulf %234, %235 : vector<24x256xf32>
    %cst_74 = arith.constant 4.471500e-02 : f32
    %237 = vector.broadcast %cst_74 : f32 to vector<24x256xf32>
    %238 = arith.mulf %237, %236 : vector<24x256xf32>
    %239 = arith.addf %234, %238 : vector<24x256xf32>
    %cst_75 = arith.constant 0.797884583 : f32
    %240 = vector.broadcast %cst_75 : f32 to vector<24x256xf32>
    %241 = arith.mulf %240, %239 : vector<24x256xf32>
    %242 = math.tanh %241 : vector<24x256xf32>
    %cst_76 = arith.constant 1.000000e+00 : f32
    %243 = vector.broadcast %cst_76 : f32 to vector<24x256xf32>
    %244 = arith.addf %243, %242 : vector<24x256xf32>
    %cst_77 = arith.constant 5.000000e-01 : f32
    %245 = vector.broadcast %cst_77 : f32 to vector<24x256xf32>
    %246 = arith.mulf %245, %244 : vector<24x256xf32>
    %247 = arith.mulf %234, %246 : vector<24x256xf32>
    %248 = arith.truncf %247 : vector<24x256xf32> to vector<24x256xbf16>
    %c0_78 = arith.constant 0 : index
    %c0_79 = arith.constant 0 : index
    %c0_80 = arith.constant 0 : index
    %249 = vector.load %arg16[%c0_78, %c0_79, %c0_80] : memref<3x256x128xbf16, #tpu.memory_space<vmem>>, vector<1x256x128xbf16>
    %250 = vector.shape_cast %249 : vector<1x256x128xbf16> to vector<256x128xbf16>
    %cst_81 = arith.constant dense<0.000000e+00> : vector<24x128xf32>
    %251 = tpu.matmul %248, %250, %cst_81 {dimension_numbers = #tpu.dot_dimension_numbers<[1], [0], [0], [1], [0, 0, 1, 1], [], []>} : vector<24x256xbf16>, vector<256x128xbf16>, vector<24x128xf32> -> vector<24x128xf32>
    %c0_82 = arith.constant 0 : index
    %c0_83 = arith.constant 0 : index
    %c0_84 = arith.constant 0 : index
    %252 = vector.load %arg17[%c0_82, %c0_83, %c0_84] : memref<3x1x128xf32, #tpu.memory_space<vmem>>, vector<1x1x128xf32>
    %253 = vector.shape_cast %252 : vector<1x1x128xf32> to vector<1x128xf32>
    %254 = vector.broadcast %253 : vector<1x128xf32> to vector<24x128xf32>
    %255 = arith.addf %251, %254 : vector<24x128xf32>
    %c0_85 = arith.constant 0 : index
    %c0_86 = arith.constant 0 : index
    %c0_87 = arith.constant 0 : index
    %256 = vector.load %arg18[%c0_85, %c0_86, %c0_87] : memref<3x1x128xf32, #tpu.memory_space<vmem>>, vector<1x1x128xf32>
    %257 = vector.shape_cast %256 : vector<1x1x128xf32> to vector<1x128xf32>
    %c0_88 = arith.constant 0 : index
    %c0_89 = arith.constant 0 : index
    %c0_90 = arith.constant 0 : index
    %258 = vector.load %arg19[%c0_88, %c0_89, %c0_90] : memref<3x1x128xf32, #tpu.memory_space<vmem>>, vector<1x1x128xf32>
    %259 = vector.shape_cast %258 : vector<1x1x128xf32> to vector<1x128xf32>
    %cst_91 = arith.constant dense<0.000000e+00> : vector<24xf32>
    %260 = vector.multi_reduction <add>, %200, %cst_91 [1] : vector<24x128xf32> to vector<24xf32>
    %261 = vector.shape_cast %260 : vector<24xf32> to vector<24x1xf32>
    %cst_92 = arith.constant 1.280000e+02 : f32
    %262 = vector.broadcast %cst_92 : f32 to vector<24x1xf32>
    %263 = arith.divf %261, %262 : vector<24x1xf32>
    %264 = vector.broadcast %263 : vector<24x1xf32> to vector<24x128xf32>
    %265 = arith.subf %200, %264 : vector<24x128xf32>
    %266 = arith.mulf %265, %265 : vector<24x128xf32>
    %cst_93 = arith.constant dense<0.000000e+00> : vector<24xf32>
    %267 = vector.multi_reduction <add>, %266, %cst_93 [1] : vector<24x128xf32> to vector<24xf32>
    %268 = vector.shape_cast %267 : vector<24xf32> to vector<24x1xf32>
    %cst_94 = arith.constant 1.280000e+02 : f32
    %269 = vector.broadcast %cst_94 : f32 to vector<24x1xf32>
    %270 = arith.divf %268, %269 : vector<24x1xf32>
    %271 = vector.broadcast %263 : vector<24x1xf32> to vector<24x128xf32>
    %272 = arith.subf %200, %271 : vector<24x128xf32>
    %cst_95 = arith.constant 9.99999974E-6 : f32
    %273 = vector.broadcast %cst_95 : f32 to vector<24x1xf32>
    %274 = arith.addf %270, %273 : vector<24x1xf32>
    %275 = math.rsqrt %274 : vector<24x1xf32>
    %276 = vector.broadcast %275 : vector<24x1xf32> to vector<24x128xf32>
    %277 = arith.mulf %272, %276 : vector<24x128xf32>
    %278 = vector.broadcast %257 : vector<1x128xf32> to vector<24x128xf32>
    %279 = arith.mulf %277, %278 : vector<24x128xf32>
    %280 = vector.broadcast %259 : vector<1x128xf32> to vector<24x128xf32>
    %281 = arith.addf %279, %280 : vector<24x128xf32>
    %282 = arith.truncf %281 : vector<24x128xf32> to vector<24x128xbf16>
    %c0_96 = arith.constant 0 : index
    %c0_97 = arith.constant 0 : index
    %c0_98 = arith.constant 0 : index
    %283 = vector.load %arg20[%c0_96, %c0_97, %c0_98] : memref<3x128x256xbf16, #tpu.memory_space<vmem>>, vector<1x128x256xbf16>
    %284 = vector.shape_cast %283 : vector<1x128x256xbf16> to vector<128x256xbf16>
    %cst_99 = arith.constant dense<0.000000e+00> : vector<24x256xf32>
    %285 = tpu.matmul %282, %284, %cst_99 {dimension_numbers = #tpu.dot_dimension_numbers<[1], [0], [0], [1], [0, 0, 1, 1], [], []>} : vector<24x128xbf16>, vector<128x256xbf16>, vector<24x256xf32> -> vector<24x256xf32>
    %c0_100 = arith.constant 0 : index
    %c0_101 = arith.constant 0 : index
    %c0_102 = arith.constant 0 : index
    %286 = vector.load %arg21[%c0_100, %c0_101, %c0_102] : memref<3x1x256xf32, #tpu.memory_space<vmem>>, vector<1x1x256xf32>
    %287 = vector.shape_cast %286 : vector<1x1x256xf32> to vector<1x256xf32>
    %288 = vector.broadcast %287 : vector<1x256xf32> to vector<24x256xf32>
    %289 = arith.addf %285, %288 : vector<24x256xf32>
    %290 = arith.mulf %289, %289 : vector<24x256xf32>
    %291 = arith.mulf %289, %290 : vector<24x256xf32>
    %cst_103 = arith.constant 4.471500e-02 : f32
    %292 = vector.broadcast %cst_103 : f32 to vector<24x256xf32>
    %293 = arith.mulf %292, %291 : vector<24x256xf32>
    %294 = arith.addf %289, %293 : vector<24x256xf32>
    %cst_104 = arith.constant 0.797884583 : f32
    %295 = vector.broadcast %cst_104 : f32 to vector<24x256xf32>
    %296 = arith.mulf %295, %294 : vector<24x256xf32>
    %297 = math.tanh %296 : vector<24x256xf32>
    %cst_105 = arith.constant 1.000000e+00 : f32
    %298 = vector.broadcast %cst_105 : f32 to vector<24x256xf32>
    %299 = arith.addf %298, %297 : vector<24x256xf32>
    %cst_106 = arith.constant 5.000000e-01 : f32
    %300 = vector.broadcast %cst_106 : f32 to vector<24x256xf32>
    %301 = arith.mulf %300, %299 : vector<24x256xf32>
    %302 = arith.mulf %289, %301 : vector<24x256xf32>
    %303 = arith.truncf %302 : vector<24x256xf32> to vector<24x256xbf16>
    %c0_107 = arith.constant 0 : index
    %c0_108 = arith.constant 0 : index
    %c0_109 = arith.constant 0 : index
    %304 = vector.load %arg22[%c0_107, %c0_108, %c0_109] : memref<3x256x128xbf16, #tpu.memory_space<vmem>>, vector<1x256x128xbf16>
    %305 = vector.shape_cast %304 : vector<1x256x128xbf16> to vector<256x128xbf16>
    %cst_110 = arith.constant dense<0.000000e+00> : vector<24x128xf32>
    %306 = tpu.matmul %303, %305, %cst_110 {dimension_numbers = #tpu.dot_dimension_numbers<[1], [0], [0], [1], [0, 0, 1, 1], [], []>} : vector<24x256xbf16>, vector<256x128xbf16>, vector<24x128xf32> -> vector<24x128xf32>
    %c0_111 = arith.constant 0 : index
    %c0_112 = arith.constant 0 : index
    %c0_113 = arith.constant 0 : index
    %307 = vector.load %arg23[%c0_111, %c0_112, %c0_113] : memref<3x1x128xf32, #tpu.memory_space<vmem>>, vector<1x1x128xf32>
    %308 = vector.shape_cast %307 : vector<1x1x128xf32> to vector<1x128xf32>
    %309 = vector.broadcast %308 : vector<1x128xf32> to vector<24x128xf32>
    %310 = arith.addf %306, %309 : vector<24x128xf32>
    %311 = vector.shape_cast %65 : vector<24x1xi1> to vector<24x1xi1>
    %312 = vector.broadcast %311 : vector<24x1xi1> to vector<24x128xi1>
    %313 = arith.select %312, %255, %310 : vector<24x128xi1>, vector<24x128xf32>
    %314 = arith.addf %200, %313 : vector<24x128xf32>
    %c1 = arith.constant 1 : index
    %c0_114 = arith.constant 0 : index
    %c0_115 = arith.constant 0 : index
    %315 = vector.load %arg6[%c1, %c0_114, %c0_115] : memref<3x1x128xf32, #tpu.memory_space<vmem>>, vector<1x1x128xf32>
    %316 = vector.shape_cast %315 : vector<1x1x128xf32> to vector<1x128xf32>
    %c1_116 = arith.constant 1 : index
    %c0_117 = arith.constant 0 : index
    %c0_118 = arith.constant 0 : index
    %317 = vector.load %arg7[%c1_116, %c0_117, %c0_118] : memref<3x1x128xf32, #tpu.memory_space<vmem>>, vector<1x1x128xf32>
    %318 = vector.shape_cast %317 : vector<1x1x128xf32> to vector<1x128xf32>
    %cst_119 = arith.constant dense<0.000000e+00> : vector<24xf32>
    %319 = vector.multi_reduction <add>, %314, %cst_119 [1] : vector<24x128xf32> to vector<24xf32>
    %320 = vector.shape_cast %319 : vector<24xf32> to vector<24x1xf32>
    %cst_120 = arith.constant 1.280000e+02 : f32
    %321 = vector.broadcast %cst_120 : f32 to vector<24x1xf32>
    %322 = arith.divf %320, %321 : vector<24x1xf32>
    %323 = vector.broadcast %322 : vector<24x1xf32> to vector<24x128xf32>
    %324 = arith.subf %314, %323 : vector<24x128xf32>
    %325 = arith.mulf %324, %324 : vector<24x128xf32>
    %cst_121 = arith.constant dense<0.000000e+00> : vector<24xf32>
    %326 = vector.multi_reduction <add>, %325, %cst_121 [1] : vector<24x128xf32> to vector<24xf32>
    %327 = vector.shape_cast %326 : vector<24xf32> to vector<24x1xf32>
    %cst_122 = arith.constant 1.280000e+02 : f32
    %328 = vector.broadcast %cst_122 : f32 to vector<24x1xf32>
    %329 = arith.divf %327, %328 : vector<24x1xf32>
    %330 = vector.broadcast %322 : vector<24x1xf32> to vector<24x128xf32>
    %331 = arith.subf %314, %330 : vector<24x128xf32>
    %cst_123 = arith.constant 9.99999974E-6 : f32
    %332 = vector.broadcast %cst_123 : f32 to vector<24x1xf32>
    %333 = arith.addf %329, %332 : vector<24x1xf32>
    %334 = math.rsqrt %333 : vector<24x1xf32>
    %335 = vector.broadcast %334 : vector<24x1xf32> to vector<24x128xf32>
    %336 = arith.mulf %331, %335 : vector<24x128xf32>
    %337 = vector.broadcast %316 : vector<1x128xf32> to vector<24x128xf32>
    %338 = arith.mulf %336, %337 : vector<24x128xf32>
    %339 = vector.broadcast %318 : vector<1x128xf32> to vector<24x128xf32>
    %340 = arith.addf %338, %339 : vector<24x128xf32>
    %341 = arith.truncf %340 : vector<24x128xf32> to vector<24x128xbf16>
    %c1_124 = arith.constant 1 : index
    %c0_125 = arith.constant 0 : index
    %c0_126 = arith.constant 0 : index
    %342 = vector.load %arg8[%c1_124, %c0_125, %c0_126] : memref<3x128x384xbf16, #tpu.memory_space<vmem>>, vector<1x128x384xbf16>
    %343 = vector.shape_cast %342 : vector<1x128x384xbf16> to vector<128x384xbf16>
    %cst_127 = arith.constant dense<0.000000e+00> : vector<24x384xf32>
    %344 = tpu.matmul %341, %343, %cst_127 {dimension_numbers = #tpu.dot_dimension_numbers<[1], [0], [0], [1], [0, 0, 1, 1], [], []>} : vector<24x128xbf16>, vector<128x384xbf16>, vector<24x384xf32> -> vector<24x384xf32>
    %c1_128 = arith.constant 1 : index
    %c0_129 = arith.constant 0 : index
    %c0_130 = arith.constant 0 : index
    %345 = vector.load %arg9[%c1_128, %c0_129, %c0_130] : memref<3x1x384xf32, #tpu.memory_space<vmem>>, vector<1x1x384xf32>
    %346 = vector.shape_cast %345 : vector<1x1x384xf32> to vector<1x384xf32>
    %347 = vector.broadcast %346 : vector<1x384xf32> to vector<24x384xf32>
    %348 = arith.addf %344, %347 : vector<24x384xf32>
    %349 = vector.extract_strided_slice %348 {offsets = [0, 0], sizes = [24, 128], strides = [1, 1]} : vector<24x384xf32> to vector<24x128xf32>
    %350 = vector.extract_strided_slice %348 {offsets = [0, 128], sizes = [24, 128], strides = [1, 1]} : vector<24x384xf32> to vector<24x128xf32>
    %351 = vector.extract_strided_slice %348 {offsets = [0, 256], sizes = [24, 128], strides = [1, 1]} : vector<24x384xf32> to vector<24x128xf32>
    %352 = vector.extract_strided_slice %349 {offsets = [0, 0], sizes = [24, 16], strides = [1, 1]} : vector<24x128xf32> to vector<24x16xf32>
    %353 = vector.extract_strided_slice %349 {offsets = [0, 16], sizes = [24, 16], strides = [1, 1]} : vector<24x128xf32> to vector<24x16xf32>
    %354 = vector.extract_strided_slice %349 {offsets = [0, 32], sizes = [24, 16], strides = [1, 1]} : vector<24x128xf32> to vector<24x16xf32>
    %355 = vector.extract_strided_slice %349 {offsets = [0, 48], sizes = [24, 16], strides = [1, 1]} : vector<24x128xf32> to vector<24x16xf32>
    %356 = vector.extract_strided_slice %349 {offsets = [0, 64], sizes = [24, 16], strides = [1, 1]} : vector<24x128xf32> to vector<24x16xf32>
    %357 = vector.extract_strided_slice %349 {offsets = [0, 80], sizes = [24, 16], strides = [1, 1]} : vector<24x128xf32> to vector<24x16xf32>
    %358 = vector.extract_strided_slice %349 {offsets = [0, 96], sizes = [24, 16], strides = [1, 1]} : vector<24x128xf32> to vector<24x16xf32>
    %359 = vector.extract_strided_slice %349 {offsets = [0, 112], sizes = [24, 16], strides = [1, 1]} : vector<24x128xf32> to vector<24x16xf32>
    %360 = vector.shape_cast %352 : vector<24x16xf32> to vector<1x24x16xf32>
    %361 = vector.shape_cast %353 : vector<24x16xf32> to vector<1x24x16xf32>
    %362 = vector.shape_cast %354 : vector<24x16xf32> to vector<1x24x16xf32>
    %363 = vector.shape_cast %355 : vector<24x16xf32> to vector<1x24x16xf32>
    %364 = vector.shape_cast %356 : vector<24x16xf32> to vector<1x24x16xf32>
    %365 = vector.shape_cast %357 : vector<24x16xf32> to vector<1x24x16xf32>
    %366 = vector.shape_cast %358 : vector<24x16xf32> to vector<1x24x16xf32>
    %367 = vector.shape_cast %359 : vector<24x16xf32> to vector<1x24x16xf32>
    %368 = tpu.concatenate %360, %361, %362, %363, %364, %365, %366, %367 in 0 : vector<1x24x16xf32>, vector<1x24x16xf32>, vector<1x24x16xf32>, vector<1x24x16xf32>, vector<1x24x16xf32>, vector<1x24x16xf32>, vector<1x24x16xf32>, vector<1x24x16xf32> -> vector<8x24x16xf32>
    %369 = arith.truncf %368 : vector<8x24x16xf32> to vector<8x24x16xbf16>
    %370 = vector.extract_strided_slice %350 {offsets = [0, 0], sizes = [24, 16], strides = [1, 1]} : vector<24x128xf32> to vector<24x16xf32>
    %371 = vector.extract_strided_slice %350 {offsets = [0, 16], sizes = [24, 16], strides = [1, 1]} : vector<24x128xf32> to vector<24x16xf32>
    %372 = vector.extract_strided_slice %350 {offsets = [0, 32], sizes = [24, 16], strides = [1, 1]} : vector<24x128xf32> to vector<24x16xf32>
    %373 = vector.extract_strided_slice %350 {offsets = [0, 48], sizes = [24, 16], strides = [1, 1]} : vector<24x128xf32> to vector<24x16xf32>
    %374 = vector.extract_strided_slice %350 {offsets = [0, 64], sizes = [24, 16], strides = [1, 1]} : vector<24x128xf32> to vector<24x16xf32>
    %375 = vector.extract_strided_slice %350 {offsets = [0, 80], sizes = [24, 16], strides = [1, 1]} : vector<24x128xf32> to vector<24x16xf32>
    %376 = vector.extract_strided_slice %350 {offsets = [0, 96], sizes = [24, 16], strides = [1, 1]} : vector<24x128xf32> to vector<24x16xf32>
    %377 = vector.extract_strided_slice %350 {offsets = [0, 112], sizes = [24, 16], strides = [1, 1]} : vector<24x128xf32> to vector<24x16xf32>
    %378 = vector.shape_cast %370 : vector<24x16xf32> to vector<1x24x16xf32>
    %379 = vector.shape_cast %371 : vector<24x16xf32> to vector<1x24x16xf32>
    %380 = vector.shape_cast %372 : vector<24x16xf32> to vector<1x24x16xf32>
    %381 = vector.shape_cast %373 : vector<24x16xf32> to vector<1x24x16xf32>
    %382 = vector.shape_cast %374 : vector<24x16xf32> to vector<1x24x16xf32>
    %383 = vector.shape_cast %375 : vector<24x16xf32> to vector<1x24x16xf32>
    %384 = vector.shape_cast %376 : vector<24x16xf32> to vector<1x24x16xf32>
    %385 = vector.shape_cast %377 : vector<24x16xf32> to vector<1x24x16xf32>
    %386 = tpu.concatenate %378, %379, %380, %381, %382, %383, %384, %385 in 0 : vector<1x24x16xf32>, vector<1x24x16xf32>, vector<1x24x16xf32>, vector<1x24x16xf32>, vector<1x24x16xf32>, vector<1x24x16xf32>, vector<1x24x16xf32>, vector<1x24x16xf32> -> vector<8x24x16xf32>
    %387 = arith.truncf %386 : vector<8x24x16xf32> to vector<8x24x16xbf16>
    %388 = vector.extract_strided_slice %351 {offsets = [0, 0], sizes = [24, 16], strides = [1, 1]} : vector<24x128xf32> to vector<24x16xf32>
    %389 = vector.extract_strided_slice %351 {offsets = [0, 16], sizes = [24, 16], strides = [1, 1]} : vector<24x128xf32> to vector<24x16xf32>
    %390 = vector.extract_strided_slice %351 {offsets = [0, 32], sizes = [24, 16], strides = [1, 1]} : vector<24x128xf32> to vector<24x16xf32>
    %391 = vector.extract_strided_slice %351 {offsets = [0, 48], sizes = [24, 16], strides = [1, 1]} : vector<24x128xf32> to vector<24x16xf32>
    %392 = vector.extract_strided_slice %351 {offsets = [0, 64], sizes = [24, 16], strides = [1, 1]} : vector<24x128xf32> to vector<24x16xf32>
    %393 = vector.extract_strided_slice %351 {offsets = [0, 80], sizes = [24, 16], strides = [1, 1]} : vector<24x128xf32> to vector<24x16xf32>
    %394 = vector.extract_strided_slice %351 {offsets = [0, 96], sizes = [24, 16], strides = [1, 1]} : vector<24x128xf32> to vector<24x16xf32>
    %395 = vector.extract_strided_slice %351 {offsets = [0, 112], sizes = [24, 16], strides = [1, 1]} : vector<24x128xf32> to vector<24x16xf32>
    %396 = vector.shape_cast %388 : vector<24x16xf32> to vector<1x24x16xf32>
    %397 = vector.shape_cast %389 : vector<24x16xf32> to vector<1x24x16xf32>
    %398 = vector.shape_cast %390 : vector<24x16xf32> to vector<1x24x16xf32>
    %399 = vector.shape_cast %391 : vector<24x16xf32> to vector<1x24x16xf32>
    %400 = vector.shape_cast %392 : vector<24x16xf32> to vector<1x24x16xf32>
    %401 = vector.shape_cast %393 : vector<24x16xf32> to vector<1x24x16xf32>
    %402 = vector.shape_cast %394 : vector<24x16xf32> to vector<1x24x16xf32>
    %403 = vector.shape_cast %395 : vector<24x16xf32> to vector<1x24x16xf32>
    %404 = tpu.concatenate %396, %397, %398, %399, %400, %401, %402, %403 in 0 : vector<1x24x16xf32>, vector<1x24x16xf32>, vector<1x24x16xf32>, vector<1x24x16xf32>, vector<1x24x16xf32>, vector<1x24x16xf32>, vector<1x24x16xf32>, vector<1x24x16xf32> -> vector<8x24x16xf32>
    %405 = arith.truncf %404 : vector<8x24x16xf32> to vector<8x24x16xbf16>
    "tpu.trace_start"() <{level = 10 : i32, message = "hnk,hmk->hnm"}> : () -> ()
    %cst_131 = arith.constant dense<0.000000e+00> : vector<8x24x24xf32>
    %406 = tpu.matmul %369, %387, %cst_131 {dimension_numbers = #tpu.dot_dimension_numbers<[2], [2], [1], [1], [0, 0, 0, 1, 1, 1], [0], [0]>} : vector<8x24x16xbf16>, vector<8x24x16xbf16>, vector<8x24x24xf32> -> vector<8x24x24xf32>
    "tpu.trace_stop"() : () -> ()
    %cst_132 = arith.constant 2.500000e-01 : f32
    %407 = vector.broadcast %cst_132 : f32 to vector<8x24x24xf32>
    %408 = arith.mulf %406, %407 : vector<8x24x24xf32>
    %409 = vector.shape_cast %62 : vector<24x24xf32> to vector<1x24x24xf32>
    %410 = vector.broadcast %409 : vector<1x24x24xf32> to vector<8x24x24xf32>
    %411 = arith.addf %408, %410 : vector<8x24x24xf32>
    %cst_133 = arith.constant dense<0xFF800000> : vector<8x24xf32>
    %412 = vector.multi_reduction <maximumf>, %411, %cst_133 [2] : vector<8x24x24xf32> to vector<8x24xf32>
    %413 = vector.shape_cast %412 : vector<8x24xf32> to vector<8x24x1xf32>
    %414 = vector.broadcast %413 : vector<8x24x1xf32> to vector<8x24x24xf32>
    %415 = arith.subf %411, %414 : vector<8x24x24xf32>
    %416 = math.exp %415 : vector<8x24x24xf32>
    %cst_134 = arith.constant dense<0.000000e+00> : vector<8x24xf32>
    %417 = vector.multi_reduction <add>, %416, %cst_134 [2] : vector<8x24x24xf32> to vector<8x24xf32>
    %418 = vector.shape_cast %417 : vector<8x24xf32> to vector<8x24x1xf32>
    %419 = tpu.reciprocal %418 : vector<8x24x1xf32> -> vector<8x24x1xf32>
    %420 = vector.broadcast %419 : vector<8x24x1xf32> to vector<8x24x24xf32>
    %421 = arith.mulf %416, %420 : vector<8x24x24xf32>
    %422 = arith.truncf %421 : vector<8x24x24xf32> to vector<8x24x24xbf16>
    "tpu.trace_start"() <{level = 10 : i32, message = "hnm,hmk->hnk"}> : () -> ()
    %cst_135 = arith.constant dense<0.000000e+00> : vector<8x24x16xf32>
    %423 = tpu.matmul %422, %405, %cst_135 {dimension_numbers = #tpu.dot_dimension_numbers<[2], [1], [1], [2], [0, 0, 0, 1, 1, 2], [0], [0]>} : vector<8x24x24xbf16>, vector<8x24x16xbf16>, vector<8x24x16xf32> -> vector<8x24x16xf32>
    "tpu.trace_stop"() : () -> ()
    %424 = vector.extract_strided_slice %423 {offsets = [0, 0, 0], sizes = [1, 24, 16], strides = [1, 1, 1]} : vector<8x24x16xf32> to vector<1x24x16xf32>
    %425 = vector.shape_cast %424 : vector<1x24x16xf32> to vector<24x16xf32>
    %426 = vector.extract_strided_slice %423 {offsets = [1, 0, 0], sizes = [1, 24, 16], strides = [1, 1, 1]} : vector<8x24x16xf32> to vector<1x24x16xf32>
    %427 = vector.shape_cast %426 : vector<1x24x16xf32> to vector<24x16xf32>
    %428 = vector.extract_strided_slice %423 {offsets = [2, 0, 0], sizes = [1, 24, 16], strides = [1, 1, 1]} : vector<8x24x16xf32> to vector<1x24x16xf32>
    %429 = vector.shape_cast %428 : vector<1x24x16xf32> to vector<24x16xf32>
    %430 = vector.extract_strided_slice %423 {offsets = [3, 0, 0], sizes = [1, 24, 16], strides = [1, 1, 1]} : vector<8x24x16xf32> to vector<1x24x16xf32>
    %431 = vector.shape_cast %430 : vector<1x24x16xf32> to vector<24x16xf32>
    %432 = vector.extract_strided_slice %423 {offsets = [4, 0, 0], sizes = [1, 24, 16], strides = [1, 1, 1]} : vector<8x24x16xf32> to vector<1x24x16xf32>
    %433 = vector.shape_cast %432 : vector<1x24x16xf32> to vector<24x16xf32>
    %434 = vector.extract_strided_slice %423 {offsets = [5, 0, 0], sizes = [1, 24, 16], strides = [1, 1, 1]} : vector<8x24x16xf32> to vector<1x24x16xf32>
    %435 = vector.shape_cast %434 : vector<1x24x16xf32> to vector<24x16xf32>
    %436 = vector.extract_strided_slice %423 {offsets = [6, 0, 0], sizes = [1, 24, 16], strides = [1, 1, 1]} : vector<8x24x16xf32> to vector<1x24x16xf32>
    %437 = vector.shape_cast %436 : vector<1x24x16xf32> to vector<24x16xf32>
    %438 = vector.extract_strided_slice %423 {offsets = [7, 0, 0], sizes = [1, 24, 16], strides = [1, 1, 1]} : vector<8x24x16xf32> to vector<1x24x16xf32>
    %439 = vector.shape_cast %438 : vector<1x24x16xf32> to vector<24x16xf32>
    %440 = tpu.concatenate %425, %427, %429, %431, %433, %435, %437, %439 in 1 : vector<24x16xf32>, vector<24x16xf32>, vector<24x16xf32>, vector<24x16xf32>, vector<24x16xf32>, vector<24x16xf32>, vector<24x16xf32>, vector<24x16xf32> -> vector<24x128xf32>
    %441 = arith.truncf %440 : vector<24x128xf32> to vector<24x128xbf16>
    %c1_136 = arith.constant 1 : index
    %c0_137 = arith.constant 0 : index
    %c0_138 = arith.constant 0 : index
    %442 = vector.load %arg10[%c1_136, %c0_137, %c0_138] : memref<3x128x128xbf16, #tpu.memory_space<vmem>>, vector<1x128x128xbf16>
    %443 = vector.shape_cast %442 : vector<1x128x128xbf16> to vector<128x128xbf16>
    %cst_139 = arith.constant dense<0.000000e+00> : vector<24x128xf32>
    %444 = tpu.matmul %441, %443, %cst_139 {dimension_numbers = #tpu.dot_dimension_numbers<[1], [0], [0], [1], [0, 0, 1, 1], [], []>} : vector<24x128xbf16>, vector<128x128xbf16>, vector<24x128xf32> -> vector<24x128xf32>
    %445 = arith.addf %314, %444 : vector<24x128xf32>
    %c1_140 = arith.constant 1 : index
    %c0_141 = arith.constant 0 : index
    %c0_142 = arith.constant 0 : index
    %446 = vector.load %arg11[%c1_140, %c0_141, %c0_142] : memref<3x1x128xf32, #tpu.memory_space<vmem>>, vector<1x1x128xf32>
    %447 = vector.shape_cast %446 : vector<1x1x128xf32> to vector<1x128xf32>
    %448 = vector.broadcast %447 : vector<1x128xf32> to vector<24x128xf32>
    %449 = arith.addf %445, %448 : vector<24x128xf32>
    %c1_143 = arith.constant 1 : index
    %c0_144 = arith.constant 0 : index
    %c0_145 = arith.constant 0 : index
    %450 = vector.load %arg12[%c1_143, %c0_144, %c0_145] : memref<3x1x128xf32, #tpu.memory_space<vmem>>, vector<1x1x128xf32>
    %451 = vector.shape_cast %450 : vector<1x1x128xf32> to vector<1x128xf32>
    %c1_146 = arith.constant 1 : index
    %c0_147 = arith.constant 0 : index
    %c0_148 = arith.constant 0 : index
    %452 = vector.load %arg13[%c1_146, %c0_147, %c0_148] : memref<3x1x128xf32, #tpu.memory_space<vmem>>, vector<1x1x128xf32>
    %453 = vector.shape_cast %452 : vector<1x1x128xf32> to vector<1x128xf32>
    %cst_149 = arith.constant dense<0.000000e+00> : vector<24xf32>
    %454 = vector.multi_reduction <add>, %449, %cst_149 [1] : vector<24x128xf32> to vector<24xf32>
    %455 = vector.shape_cast %454 : vector<24xf32> to vector<24x1xf32>
    %cst_150 = arith.constant 1.280000e+02 : f32
    %456 = vector.broadcast %cst_150 : f32 to vector<24x1xf32>
    %457 = arith.divf %455, %456 : vector<24x1xf32>
    %458 = vector.broadcast %457 : vector<24x1xf32> to vector<24x128xf32>
    %459 = arith.subf %449, %458 : vector<24x128xf32>
    %460 = arith.mulf %459, %459 : vector<24x128xf32>
    %cst_151 = arith.constant dense<0.000000e+00> : vector<24xf32>
    %461 = vector.multi_reduction <add>, %460, %cst_151 [1] : vector<24x128xf32> to vector<24xf32>
    %462 = vector.shape_cast %461 : vector<24xf32> to vector<24x1xf32>
    %cst_152 = arith.constant 1.280000e+02 : f32
    %463 = vector.broadcast %cst_152 : f32 to vector<24x1xf32>
    %464 = arith.divf %462, %463 : vector<24x1xf32>
    %465 = vector.broadcast %457 : vector<24x1xf32> to vector<24x128xf32>
    %466 = arith.subf %449, %465 : vector<24x128xf32>
    %cst_153 = arith.constant 9.99999974E-6 : f32
    %467 = vector.broadcast %cst_153 : f32 to vector<24x1xf32>
    %468 = arith.addf %464, %467 : vector<24x1xf32>
    %469 = math.rsqrt %468 : vector<24x1xf32>
    %470 = vector.broadcast %469 : vector<24x1xf32> to vector<24x128xf32>
    %471 = arith.mulf %466, %470 : vector<24x128xf32>
    %472 = vector.broadcast %451 : vector<1x128xf32> to vector<24x128xf32>
    %473 = arith.mulf %471, %472 : vector<24x128xf32>
    %474 = vector.broadcast %453 : vector<1x128xf32> to vector<24x128xf32>
    %475 = arith.addf %473, %474 : vector<24x128xf32>
    %476 = arith.truncf %475 : vector<24x128xf32> to vector<24x128xbf16>
    %c1_154 = arith.constant 1 : index
    %c0_155 = arith.constant 0 : index
    %c0_156 = arith.constant 0 : index
    %477 = vector.load %arg14[%c1_154, %c0_155, %c0_156] : memref<3x128x256xbf16, #tpu.memory_space<vmem>>, vector<1x128x256xbf16>
    %478 = vector.shape_cast %477 : vector<1x128x256xbf16> to vector<128x256xbf16>
    %cst_157 = arith.constant dense<0.000000e+00> : vector<24x256xf32>
    %479 = tpu.matmul %476, %478, %cst_157 {dimension_numbers = #tpu.dot_dimension_numbers<[1], [0], [0], [1], [0, 0, 1, 1], [], []>} : vector<24x128xbf16>, vector<128x256xbf16>, vector<24x256xf32> -> vector<24x256xf32>
    %c1_158 = arith.constant 1 : index
    %c0_159 = arith.constant 0 : index
    %c0_160 = arith.constant 0 : index
    %480 = vector.load %arg15[%c1_158, %c0_159, %c0_160] : memref<3x1x256xf32, #tpu.memory_space<vmem>>, vector<1x1x256xf32>
    %481 = vector.shape_cast %480 : vector<1x1x256xf32> to vector<1x256xf32>
    %482 = vector.broadcast %481 : vector<1x256xf32> to vector<24x256xf32>
    %483 = arith.addf %479, %482 : vector<24x256xf32>
    %484 = arith.mulf %483, %483 : vector<24x256xf32>
    %485 = arith.mulf %483, %484 : vector<24x256xf32>
    %cst_161 = arith.constant 4.471500e-02 : f32
    %486 = vector.broadcast %cst_161 : f32 to vector<24x256xf32>
    %487 = arith.mulf %486, %485 : vector<24x256xf32>
    %488 = arith.addf %483, %487 : vector<24x256xf32>
    %cst_162 = arith.constant 0.797884583 : f32
    %489 = vector.broadcast %cst_162 : f32 to vector<24x256xf32>
    %490 = arith.mulf %489, %488 : vector<24x256xf32>
    %491 = math.tanh %490 : vector<24x256xf32>
    %cst_163 = arith.constant 1.000000e+00 : f32
    %492 = vector.broadcast %cst_163 : f32 to vector<24x256xf32>
    %493 = arith.addf %492, %491 : vector<24x256xf32>
    %cst_164 = arith.constant 5.000000e-01 : f32
    %494 = vector.broadcast %cst_164 : f32 to vector<24x256xf32>
    %495 = arith.mulf %494, %493 : vector<24x256xf32>
    %496 = arith.mulf %483, %495 : vector<24x256xf32>
    %497 = arith.truncf %496 : vector<24x256xf32> to vector<24x256xbf16>
    %c1_165 = arith.constant 1 : index
    %c0_166 = arith.constant 0 : index
    %c0_167 = arith.constant 0 : index
    %498 = vector.load %arg16[%c1_165, %c0_166, %c0_167] : memref<3x256x128xbf16, #tpu.memory_space<vmem>>, vector<1x256x128xbf16>
    %499 = vector.shape_cast %498 : vector<1x256x128xbf16> to vector<256x128xbf16>
    %cst_168 = arith.constant dense<0.000000e+00> : vector<24x128xf32>
    %500 = tpu.matmul %497, %499, %cst_168 {dimension_numbers = #tpu.dot_dimension_numbers<[1], [0], [0], [1], [0, 0, 1, 1], [], []>} : vector<24x256xbf16>, vector<256x128xbf16>, vector<24x128xf32> -> vector<24x128xf32>
    %c1_169 = arith.constant 1 : index
    %c0_170 = arith.constant 0 : index
    %c0_171 = arith.constant 0 : index
    %501 = vector.load %arg17[%c1_169, %c0_170, %c0_171] : memref<3x1x128xf32, #tpu.memory_space<vmem>>, vector<1x1x128xf32>
    %502 = vector.shape_cast %501 : vector<1x1x128xf32> to vector<1x128xf32>
    %503 = vector.broadcast %502 : vector<1x128xf32> to vector<24x128xf32>
    %504 = arith.addf %500, %503 : vector<24x128xf32>
    %c1_172 = arith.constant 1 : index
    %c0_173 = arith.constant 0 : index
    %c0_174 = arith.constant 0 : index
    %505 = vector.load %arg18[%c1_172, %c0_173, %c0_174] : memref<3x1x128xf32, #tpu.memory_space<vmem>>, vector<1x1x128xf32>
    %506 = vector.shape_cast %505 : vector<1x1x128xf32> to vector<1x128xf32>
    %c1_175 = arith.constant 1 : index
    %c0_176 = arith.constant 0 : index
    %c0_177 = arith.constant 0 : index
    %507 = vector.load %arg19[%c1_175, %c0_176, %c0_177] : memref<3x1x128xf32, #tpu.memory_space<vmem>>, vector<1x1x128xf32>
    %508 = vector.shape_cast %507 : vector<1x1x128xf32> to vector<1x128xf32>
    %cst_178 = arith.constant dense<0.000000e+00> : vector<24xf32>
    %509 = vector.multi_reduction <add>, %449, %cst_178 [1] : vector<24x128xf32> to vector<24xf32>
    %510 = vector.shape_cast %509 : vector<24xf32> to vector<24x1xf32>
    %cst_179 = arith.constant 1.280000e+02 : f32
    %511 = vector.broadcast %cst_179 : f32 to vector<24x1xf32>
    %512 = arith.divf %510, %511 : vector<24x1xf32>
    %513 = vector.broadcast %512 : vector<24x1xf32> to vector<24x128xf32>
    %514 = arith.subf %449, %513 : vector<24x128xf32>
    %515 = arith.mulf %514, %514 : vector<24x128xf32>
    %cst_180 = arith.constant dense<0.000000e+00> : vector<24xf32>
    %516 = vector.multi_reduction <add>, %515, %cst_180 [1] : vector<24x128xf32> to vector<24xf32>
    %517 = vector.shape_cast %516 : vector<24xf32> to vector<24x1xf32>
    %cst_181 = arith.constant 1.280000e+02 : f32
    %518 = vector.broadcast %cst_181 : f32 to vector<24x1xf32>
    %519 = arith.divf %517, %518 : vector<24x1xf32>
    %520 = vector.broadcast %512 : vector<24x1xf32> to vector<24x128xf32>
    %521 = arith.subf %449, %520 : vector<24x128xf32>
    %cst_182 = arith.constant 9.99999974E-6 : f32
    %522 = vector.broadcast %cst_182 : f32 to vector<24x1xf32>
    %523 = arith.addf %519, %522 : vector<24x1xf32>
    %524 = math.rsqrt %523 : vector<24x1xf32>
    %525 = vector.broadcast %524 : vector<24x1xf32> to vector<24x128xf32>
    %526 = arith.mulf %521, %525 : vector<24x128xf32>
    %527 = vector.broadcast %506 : vector<1x128xf32> to vector<24x128xf32>
    %528 = arith.mulf %526, %527 : vector<24x128xf32>
    %529 = vector.broadcast %508 : vector<1x128xf32> to vector<24x128xf32>
    %530 = arith.addf %528, %529 : vector<24x128xf32>
    %531 = arith.truncf %530 : vector<24x128xf32> to vector<24x128xbf16>
    %c1_183 = arith.constant 1 : index
    %c0_184 = arith.constant 0 : index
    %c0_185 = arith.constant 0 : index
    %532 = vector.load %arg20[%c1_183, %c0_184, %c0_185] : memref<3x128x256xbf16, #tpu.memory_space<vmem>>, vector<1x128x256xbf16>
    %533 = vector.shape_cast %532 : vector<1x128x256xbf16> to vector<128x256xbf16>
    %cst_186 = arith.constant dense<0.000000e+00> : vector<24x256xf32>
    %534 = tpu.matmul %531, %533, %cst_186 {dimension_numbers = #tpu.dot_dimension_numbers<[1], [0], [0], [1], [0, 0, 1, 1], [], []>} : vector<24x128xbf16>, vector<128x256xbf16>, vector<24x256xf32> -> vector<24x256xf32>
    %c1_187 = arith.constant 1 : index
    %c0_188 = arith.constant 0 : index
    %c0_189 = arith.constant 0 : index
    %535 = vector.load %arg21[%c1_187, %c0_188, %c0_189] : memref<3x1x256xf32, #tpu.memory_space<vmem>>, vector<1x1x256xf32>
    %536 = vector.shape_cast %535 : vector<1x1x256xf32> to vector<1x256xf32>
    %537 = vector.broadcast %536 : vector<1x256xf32> to vector<24x256xf32>
    %538 = arith.addf %534, %537 : vector<24x256xf32>
    %539 = arith.mulf %538, %538 : vector<24x256xf32>
    %540 = arith.mulf %538, %539 : vector<24x256xf32>
    %cst_190 = arith.constant 4.471500e-02 : f32
    %541 = vector.broadcast %cst_190 : f32 to vector<24x256xf32>
    %542 = arith.mulf %541, %540 : vector<24x256xf32>
    %543 = arith.addf %538, %542 : vector<24x256xf32>
    %cst_191 = arith.constant 0.797884583 : f32
    %544 = vector.broadcast %cst_191 : f32 to vector<24x256xf32>
    %545 = arith.mulf %544, %543 : vector<24x256xf32>
    %546 = math.tanh %545 : vector<24x256xf32>
    %cst_192 = arith.constant 1.000000e+00 : f32
    %547 = vector.broadcast %cst_192 : f32 to vector<24x256xf32>
    %548 = arith.addf %547, %546 : vector<24x256xf32>
    %cst_193 = arith.constant 5.000000e-01 : f32
    %549 = vector.broadcast %cst_193 : f32 to vector<24x256xf32>
    %550 = arith.mulf %549, %548 : vector<24x256xf32>
    %551 = arith.mulf %538, %550 : vector<24x256xf32>
    %552 = arith.truncf %551 : vector<24x256xf32> to vector<24x256xbf16>
    %c1_194 = arith.constant 1 : index
    %c0_195 = arith.constant 0 : index
    %c0_196 = arith.constant 0 : index
    %553 = vector.load %arg22[%c1_194, %c0_195, %c0_196] : memref<3x256x128xbf16, #tpu.memory_space<vmem>>, vector<1x256x128xbf16>
    %554 = vector.shape_cast %553 : vector<1x256x128xbf16> to vector<256x128xbf16>
    %cst_197 = arith.constant dense<0.000000e+00> : vector<24x128xf32>
    %555 = tpu.matmul %552, %554, %cst_197 {dimension_numbers = #tpu.dot_dimension_numbers<[1], [0], [0], [1], [0, 0, 1, 1], [], []>} : vector<24x256xbf16>, vector<256x128xbf16>, vector<24x128xf32> -> vector<24x128xf32>
    %c1_198 = arith.constant 1 : index
    %c0_199 = arith.constant 0 : index
    %c0_200 = arith.constant 0 : index
    %556 = vector.load %arg23[%c1_198, %c0_199, %c0_200] : memref<3x1x128xf32, #tpu.memory_space<vmem>>, vector<1x1x128xf32>
    %557 = vector.shape_cast %556 : vector<1x1x128xf32> to vector<1x128xf32>
    %558 = vector.broadcast %557 : vector<1x128xf32> to vector<24x128xf32>
    %559 = arith.addf %555, %558 : vector<24x128xf32>
    %560 = vector.shape_cast %65 : vector<24x1xi1> to vector<24x1xi1>
    %561 = vector.broadcast %560 : vector<24x1xi1> to vector<24x128xi1>
    %562 = arith.select %561, %504, %559 : vector<24x128xi1>, vector<24x128xf32>
    %563 = arith.addf %449, %562 : vector<24x128xf32>
    %c2 = arith.constant 2 : index
    %c0_201 = arith.constant 0 : index
    %c0_202 = arith.constant 0 : index
    %564 = vector.load %arg6[%c2, %c0_201, %c0_202] : memref<3x1x128xf32, #tpu.memory_space<vmem>>, vector<1x1x128xf32>
    %565 = vector.shape_cast %564 : vector<1x1x128xf32> to vector<1x128xf32>
    %c2_203 = arith.constant 2 : index
    %c0_204 = arith.constant 0 : index
    %c0_205 = arith.constant 0 : index
    %566 = vector.load %arg7[%c2_203, %c0_204, %c0_205] : memref<3x1x128xf32, #tpu.memory_space<vmem>>, vector<1x1x128xf32>
    %567 = vector.shape_cast %566 : vector<1x1x128xf32> to vector<1x128xf32>
    %cst_206 = arith.constant dense<0.000000e+00> : vector<24xf32>
    %568 = vector.multi_reduction <add>, %563, %cst_206 [1] : vector<24x128xf32> to vector<24xf32>
    %569 = vector.shape_cast %568 : vector<24xf32> to vector<24x1xf32>
    %cst_207 = arith.constant 1.280000e+02 : f32
    %570 = vector.broadcast %cst_207 : f32 to vector<24x1xf32>
    %571 = arith.divf %569, %570 : vector<24x1xf32>
    %572 = vector.broadcast %571 : vector<24x1xf32> to vector<24x128xf32>
    %573 = arith.subf %563, %572 : vector<24x128xf32>
    %574 = arith.mulf %573, %573 : vector<24x128xf32>
    %cst_208 = arith.constant dense<0.000000e+00> : vector<24xf32>
    %575 = vector.multi_reduction <add>, %574, %cst_208 [1] : vector<24x128xf32> to vector<24xf32>
    %576 = vector.shape_cast %575 : vector<24xf32> to vector<24x1xf32>
    %cst_209 = arith.constant 1.280000e+02 : f32
    %577 = vector.broadcast %cst_209 : f32 to vector<24x1xf32>
    %578 = arith.divf %576, %577 : vector<24x1xf32>
    %579 = vector.broadcast %571 : vector<24x1xf32> to vector<24x128xf32>
    %580 = arith.subf %563, %579 : vector<24x128xf32>
    %cst_210 = arith.constant 9.99999974E-6 : f32
    %581 = vector.broadcast %cst_210 : f32 to vector<24x1xf32>
    %582 = arith.addf %578, %581 : vector<24x1xf32>
    %583 = math.rsqrt %582 : vector<24x1xf32>
    %584 = vector.broadcast %583 : vector<24x1xf32> to vector<24x128xf32>
    %585 = arith.mulf %580, %584 : vector<24x128xf32>
    %586 = vector.broadcast %565 : vector<1x128xf32> to vector<24x128xf32>
    %587 = arith.mulf %585, %586 : vector<24x128xf32>
    %588 = vector.broadcast %567 : vector<1x128xf32> to vector<24x128xf32>
    %589 = arith.addf %587, %588 : vector<24x128xf32>
    %590 = arith.truncf %589 : vector<24x128xf32> to vector<24x128xbf16>
    %c2_211 = arith.constant 2 : index
    %c0_212 = arith.constant 0 : index
    %c0_213 = arith.constant 0 : index
    %591 = vector.load %arg8[%c2_211, %c0_212, %c0_213] : memref<3x128x384xbf16, #tpu.memory_space<vmem>>, vector<1x128x384xbf16>
    %592 = vector.shape_cast %591 : vector<1x128x384xbf16> to vector<128x384xbf16>
    %cst_214 = arith.constant dense<0.000000e+00> : vector<24x384xf32>
    %593 = tpu.matmul %590, %592, %cst_214 {dimension_numbers = #tpu.dot_dimension_numbers<[1], [0], [0], [1], [0, 0, 1, 1], [], []>} : vector<24x128xbf16>, vector<128x384xbf16>, vector<24x384xf32> -> vector<24x384xf32>
    %c2_215 = arith.constant 2 : index
    %c0_216 = arith.constant 0 : index
    %c0_217 = arith.constant 0 : index
    %594 = vector.load %arg9[%c2_215, %c0_216, %c0_217] : memref<3x1x384xf32, #tpu.memory_space<vmem>>, vector<1x1x384xf32>
    %595 = vector.shape_cast %594 : vector<1x1x384xf32> to vector<1x384xf32>
    %596 = vector.broadcast %595 : vector<1x384xf32> to vector<24x384xf32>
    %597 = arith.addf %593, %596 : vector<24x384xf32>
    %598 = vector.extract_strided_slice %597 {offsets = [0, 0], sizes = [24, 128], strides = [1, 1]} : vector<24x384xf32> to vector<24x128xf32>
    %599 = vector.extract_strided_slice %597 {offsets = [0, 128], sizes = [24, 128], strides = [1, 1]} : vector<24x384xf32> to vector<24x128xf32>
    %600 = vector.extract_strided_slice %597 {offsets = [0, 256], sizes = [24, 128], strides = [1, 1]} : vector<24x384xf32> to vector<24x128xf32>
    %601 = vector.extract_strided_slice %598 {offsets = [0, 0], sizes = [24, 16], strides = [1, 1]} : vector<24x128xf32> to vector<24x16xf32>
    %602 = vector.extract_strided_slice %598 {offsets = [0, 16], sizes = [24, 16], strides = [1, 1]} : vector<24x128xf32> to vector<24x16xf32>
    %603 = vector.extract_strided_slice %598 {offsets = [0, 32], sizes = [24, 16], strides = [1, 1]} : vector<24x128xf32> to vector<24x16xf32>
    %604 = vector.extract_strided_slice %598 {offsets = [0, 48], sizes = [24, 16], strides = [1, 1]} : vector<24x128xf32> to vector<24x16xf32>
    %605 = vector.extract_strided_slice %598 {offsets = [0, 64], sizes = [24, 16], strides = [1, 1]} : vector<24x128xf32> to vector<24x16xf32>
    %606 = vector.extract_strided_slice %598 {offsets = [0, 80], sizes = [24, 16], strides = [1, 1]} : vector<24x128xf32> to vector<24x16xf32>
    %607 = vector.extract_strided_slice %598 {offsets = [0, 96], sizes = [24, 16], strides = [1, 1]} : vector<24x128xf32> to vector<24x16xf32>
    %608 = vector.extract_strided_slice %598 {offsets = [0, 112], sizes = [24, 16], strides = [1, 1]} : vector<24x128xf32> to vector<24x16xf32>
    %609 = vector.shape_cast %601 : vector<24x16xf32> to vector<1x24x16xf32>
    %610 = vector.shape_cast %602 : vector<24x16xf32> to vector<1x24x16xf32>
    %611 = vector.shape_cast %603 : vector<24x16xf32> to vector<1x24x16xf32>
    %612 = vector.shape_cast %604 : vector<24x16xf32> to vector<1x24x16xf32>
    %613 = vector.shape_cast %605 : vector<24x16xf32> to vector<1x24x16xf32>
    %614 = vector.shape_cast %606 : vector<24x16xf32> to vector<1x24x16xf32>
    %615 = vector.shape_cast %607 : vector<24x16xf32> to vector<1x24x16xf32>
    %616 = vector.shape_cast %608 : vector<24x16xf32> to vector<1x24x16xf32>
    %617 = tpu.concatenate %609, %610, %611, %612, %613, %614, %615, %616 in 0 : vector<1x24x16xf32>, vector<1x24x16xf32>, vector<1x24x16xf32>, vector<1x24x16xf32>, vector<1x24x16xf32>, vector<1x24x16xf32>, vector<1x24x16xf32>, vector<1x24x16xf32> -> vector<8x24x16xf32>
    %618 = arith.truncf %617 : vector<8x24x16xf32> to vector<8x24x16xbf16>
    %619 = vector.extract_strided_slice %599 {offsets = [0, 0], sizes = [24, 16], strides = [1, 1]} : vector<24x128xf32> to vector<24x16xf32>
    %620 = vector.extract_strided_slice %599 {offsets = [0, 16], sizes = [24, 16], strides = [1, 1]} : vector<24x128xf32> to vector<24x16xf32>
    %621 = vector.extract_strided_slice %599 {offsets = [0, 32], sizes = [24, 16], strides = [1, 1]} : vector<24x128xf32> to vector<24x16xf32>
    %622 = vector.extract_strided_slice %599 {offsets = [0, 48], sizes = [24, 16], strides = [1, 1]} : vector<24x128xf32> to vector<24x16xf32>
    %623 = vector.extract_strided_slice %599 {offsets = [0, 64], sizes = [24, 16], strides = [1, 1]} : vector<24x128xf32> to vector<24x16xf32>
    %624 = vector.extract_strided_slice %599 {offsets = [0, 80], sizes = [24, 16], strides = [1, 1]} : vector<24x128xf32> to vector<24x16xf32>
    %625 = vector.extract_strided_slice %599 {offsets = [0, 96], sizes = [24, 16], strides = [1, 1]} : vector<24x128xf32> to vector<24x16xf32>
    %626 = vector.extract_strided_slice %599 {offsets = [0, 112], sizes = [24, 16], strides = [1, 1]} : vector<24x128xf32> to vector<24x16xf32>
    %627 = vector.shape_cast %619 : vector<24x16xf32> to vector<1x24x16xf32>
    %628 = vector.shape_cast %620 : vector<24x16xf32> to vector<1x24x16xf32>
    %629 = vector.shape_cast %621 : vector<24x16xf32> to vector<1x24x16xf32>
    %630 = vector.shape_cast %622 : vector<24x16xf32> to vector<1x24x16xf32>
    %631 = vector.shape_cast %623 : vector<24x16xf32> to vector<1x24x16xf32>
    %632 = vector.shape_cast %624 : vector<24x16xf32> to vector<1x24x16xf32>
    %633 = vector.shape_cast %625 : vector<24x16xf32> to vector<1x24x16xf32>
    %634 = vector.shape_cast %626 : vector<24x16xf32> to vector<1x24x16xf32>
    %635 = tpu.concatenate %627, %628, %629, %630, %631, %632, %633, %634 in 0 : vector<1x24x16xf32>, vector<1x24x16xf32>, vector<1x24x16xf32>, vector<1x24x16xf32>, vector<1x24x16xf32>, vector<1x24x16xf32>, vector<1x24x16xf32>, vector<1x24x16xf32> -> vector<8x24x16xf32>
    %636 = arith.truncf %635 : vector<8x24x16xf32> to vector<8x24x16xbf16>
    %637 = vector.extract_strided_slice %600 {offsets = [0, 0], sizes = [24, 16], strides = [1, 1]} : vector<24x128xf32> to vector<24x16xf32>
    %638 = vector.extract_strided_slice %600 {offsets = [0, 16], sizes = [24, 16], strides = [1, 1]} : vector<24x128xf32> to vector<24x16xf32>
    %639 = vector.extract_strided_slice %600 {offsets = [0, 32], sizes = [24, 16], strides = [1, 1]} : vector<24x128xf32> to vector<24x16xf32>
    %640 = vector.extract_strided_slice %600 {offsets = [0, 48], sizes = [24, 16], strides = [1, 1]} : vector<24x128xf32> to vector<24x16xf32>
    %641 = vector.extract_strided_slice %600 {offsets = [0, 64], sizes = [24, 16], strides = [1, 1]} : vector<24x128xf32> to vector<24x16xf32>
    %642 = vector.extract_strided_slice %600 {offsets = [0, 80], sizes = [24, 16], strides = [1, 1]} : vector<24x128xf32> to vector<24x16xf32>
    %643 = vector.extract_strided_slice %600 {offsets = [0, 96], sizes = [24, 16], strides = [1, 1]} : vector<24x128xf32> to vector<24x16xf32>
    %644 = vector.extract_strided_slice %600 {offsets = [0, 112], sizes = [24, 16], strides = [1, 1]} : vector<24x128xf32> to vector<24x16xf32>
    %645 = vector.shape_cast %637 : vector<24x16xf32> to vector<1x24x16xf32>
    %646 = vector.shape_cast %638 : vector<24x16xf32> to vector<1x24x16xf32>
    %647 = vector.shape_cast %639 : vector<24x16xf32> to vector<1x24x16xf32>
    %648 = vector.shape_cast %640 : vector<24x16xf32> to vector<1x24x16xf32>
    %649 = vector.shape_cast %641 : vector<24x16xf32> to vector<1x24x16xf32>
    %650 = vector.shape_cast %642 : vector<24x16xf32> to vector<1x24x16xf32>
    %651 = vector.shape_cast %643 : vector<24x16xf32> to vector<1x24x16xf32>
    %652 = vector.shape_cast %644 : vector<24x16xf32> to vector<1x24x16xf32>
    %653 = tpu.concatenate %645, %646, %647, %648, %649, %650, %651, %652 in 0 : vector<1x24x16xf32>, vector<1x24x16xf32>, vector<1x24x16xf32>, vector<1x24x16xf32>, vector<1x24x16xf32>, vector<1x24x16xf32>, vector<1x24x16xf32>, vector<1x24x16xf32> -> vector<8x24x16xf32>
    %654 = arith.truncf %653 : vector<8x24x16xf32> to vector<8x24x16xbf16>
    "tpu.trace_start"() <{level = 10 : i32, message = "hnk,hmk->hnm"}> : () -> ()
    %cst_218 = arith.constant dense<0.000000e+00> : vector<8x24x24xf32>
    %655 = tpu.matmul %618, %636, %cst_218 {dimension_numbers = #tpu.dot_dimension_numbers<[2], [2], [1], [1], [0, 0, 0, 1, 1, 1], [0], [0]>} : vector<8x24x16xbf16>, vector<8x24x16xbf16>, vector<8x24x24xf32> -> vector<8x24x24xf32>
    "tpu.trace_stop"() : () -> ()
    %cst_219 = arith.constant 2.500000e-01 : f32
    %656 = vector.broadcast %cst_219 : f32 to vector<8x24x24xf32>
    %657 = arith.mulf %655, %656 : vector<8x24x24xf32>
    %658 = vector.shape_cast %62 : vector<24x24xf32> to vector<1x24x24xf32>
    %659 = vector.broadcast %658 : vector<1x24x24xf32> to vector<8x24x24xf32>
    %660 = arith.addf %657, %659 : vector<8x24x24xf32>
    %cst_220 = arith.constant dense<0xFF800000> : vector<8x24xf32>
    %661 = vector.multi_reduction <maximumf>, %660, %cst_220 [2] : vector<8x24x24xf32> to vector<8x24xf32>
    %662 = vector.shape_cast %661 : vector<8x24xf32> to vector<8x24x1xf32>
    %663 = vector.broadcast %662 : vector<8x24x1xf32> to vector<8x24x24xf32>
    %664 = arith.subf %660, %663 : vector<8x24x24xf32>
    %665 = math.exp %664 : vector<8x24x24xf32>
    %cst_221 = arith.constant dense<0.000000e+00> : vector<8x24xf32>
    %666 = vector.multi_reduction <add>, %665, %cst_221 [2] : vector<8x24x24xf32> to vector<8x24xf32>
    %667 = vector.shape_cast %666 : vector<8x24xf32> to vector<8x24x1xf32>
    %668 = tpu.reciprocal %667 : vector<8x24x1xf32> -> vector<8x24x1xf32>
    %669 = vector.broadcast %668 : vector<8x24x1xf32> to vector<8x24x24xf32>
    %670 = arith.mulf %665, %669 : vector<8x24x24xf32>
    %671 = arith.truncf %670 : vector<8x24x24xf32> to vector<8x24x24xbf16>
    "tpu.trace_start"() <{level = 10 : i32, message = "hnm,hmk->hnk"}> : () -> ()
    %cst_222 = arith.constant dense<0.000000e+00> : vector<8x24x16xf32>
    %672 = tpu.matmul %671, %654, %cst_222 {dimension_numbers = #tpu.dot_dimension_numbers<[2], [1], [1], [2], [0, 0, 0, 1, 1, 2], [0], [0]>} : vector<8x24x24xbf16>, vector<8x24x16xbf16>, vector<8x24x16xf32> -> vector<8x24x16xf32>
    "tpu.trace_stop"() : () -> ()
    %673 = vector.extract_strided_slice %672 {offsets = [0, 0, 0], sizes = [1, 24, 16], strides = [1, 1, 1]} : vector<8x24x16xf32> to vector<1x24x16xf32>
    %674 = vector.shape_cast %673 : vector<1x24x16xf32> to vector<24x16xf32>
    %675 = vector.extract_strided_slice %672 {offsets = [1, 0, 0], sizes = [1, 24, 16], strides = [1, 1, 1]} : vector<8x24x16xf32> to vector<1x24x16xf32>
    %676 = vector.shape_cast %675 : vector<1x24x16xf32> to vector<24x16xf32>
    %677 = vector.extract_strided_slice %672 {offsets = [2, 0, 0], sizes = [1, 24, 16], strides = [1, 1, 1]} : vector<8x24x16xf32> to vector<1x24x16xf32>
    %678 = vector.shape_cast %677 : vector<1x24x16xf32> to vector<24x16xf32>
    %679 = vector.extract_strided_slice %672 {offsets = [3, 0, 0], sizes = [1, 24, 16], strides = [1, 1, 1]} : vector<8x24x16xf32> to vector<1x24x16xf32>
    %680 = vector.shape_cast %679 : vector<1x24x16xf32> to vector<24x16xf32>
    %681 = vector.extract_strided_slice %672 {offsets = [4, 0, 0], sizes = [1, 24, 16], strides = [1, 1, 1]} : vector<8x24x16xf32> to vector<1x24x16xf32>
    %682 = vector.shape_cast %681 : vector<1x24x16xf32> to vector<24x16xf32>
    %683 = vector.extract_strided_slice %672 {offsets = [5, 0, 0], sizes = [1, 24, 16], strides = [1, 1, 1]} : vector<8x24x16xf32> to vector<1x24x16xf32>
    %684 = vector.shape_cast %683 : vector<1x24x16xf32> to vector<24x16xf32>
    %685 = vector.extract_strided_slice %672 {offsets = [6, 0, 0], sizes = [1, 24, 16], strides = [1, 1, 1]} : vector<8x24x16xf32> to vector<1x24x16xf32>
    %686 = vector.shape_cast %685 : vector<1x24x16xf32> to vector<24x16xf32>
    %687 = vector.extract_strided_slice %672 {offsets = [7, 0, 0], sizes = [1, 24, 16], strides = [1, 1, 1]} : vector<8x24x16xf32> to vector<1x24x16xf32>
    %688 = vector.shape_cast %687 : vector<1x24x16xf32> to vector<24x16xf32>
    %689 = tpu.concatenate %674, %676, %678, %680, %682, %684, %686, %688 in 1 : vector<24x16xf32>, vector<24x16xf32>, vector<24x16xf32>, vector<24x16xf32>, vector<24x16xf32>, vector<24x16xf32>, vector<24x16xf32>, vector<24x16xf32> -> vector<24x128xf32>
    %690 = arith.truncf %689 : vector<24x128xf32> to vector<24x128xbf16>
    %c2_223 = arith.constant 2 : index
    %c0_224 = arith.constant 0 : index
    %c0_225 = arith.constant 0 : index
    %691 = vector.load %arg10[%c2_223, %c0_224, %c0_225] : memref<3x128x128xbf16, #tpu.memory_space<vmem>>, vector<1x128x128xbf16>
    %692 = vector.shape_cast %691 : vector<1x128x128xbf16> to vector<128x128xbf16>
    %cst_226 = arith.constant dense<0.000000e+00> : vector<24x128xf32>
    %693 = tpu.matmul %690, %692, %cst_226 {dimension_numbers = #tpu.dot_dimension_numbers<[1], [0], [0], [1], [0, 0, 1, 1], [], []>} : vector<24x128xbf16>, vector<128x128xbf16>, vector<24x128xf32> -> vector<24x128xf32>
    %694 = arith.addf %563, %693 : vector<24x128xf32>
    %c2_227 = arith.constant 2 : index
    %c0_228 = arith.constant 0 : index
    %c0_229 = arith.constant 0 : index
    %695 = vector.load %arg11[%c2_227, %c0_228, %c0_229] : memref<3x1x128xf32, #tpu.memory_space<vmem>>, vector<1x1x128xf32>
    %696 = vector.shape_cast %695 : vector<1x1x128xf32> to vector<1x128xf32>
    %697 = vector.broadcast %696 : vector<1x128xf32> to vector<24x128xf32>
    %698 = arith.addf %694, %697 : vector<24x128xf32>
    %c2_230 = arith.constant 2 : index
    %c0_231 = arith.constant 0 : index
    %c0_232 = arith.constant 0 : index
    %699 = vector.load %arg12[%c2_230, %c0_231, %c0_232] : memref<3x1x128xf32, #tpu.memory_space<vmem>>, vector<1x1x128xf32>
    %700 = vector.shape_cast %699 : vector<1x1x128xf32> to vector<1x128xf32>
    %c2_233 = arith.constant 2 : index
    %c0_234 = arith.constant 0 : index
    %c0_235 = arith.constant 0 : index
    %701 = vector.load %arg13[%c2_233, %c0_234, %c0_235] : memref<3x1x128xf32, #tpu.memory_space<vmem>>, vector<1x1x128xf32>
    %702 = vector.shape_cast %701 : vector<1x1x128xf32> to vector<1x128xf32>
    %cst_236 = arith.constant dense<0.000000e+00> : vector<24xf32>
    %703 = vector.multi_reduction <add>, %698, %cst_236 [1] : vector<24x128xf32> to vector<24xf32>
    %704 = vector.shape_cast %703 : vector<24xf32> to vector<24x1xf32>
    %cst_237 = arith.constant 1.280000e+02 : f32
    %705 = vector.broadcast %cst_237 : f32 to vector<24x1xf32>
    %706 = arith.divf %704, %705 : vector<24x1xf32>
    %707 = vector.broadcast %706 : vector<24x1xf32> to vector<24x128xf32>
    %708 = arith.subf %698, %707 : vector<24x128xf32>
    %709 = arith.mulf %708, %708 : vector<24x128xf32>
    %cst_238 = arith.constant dense<0.000000e+00> : vector<24xf32>
    %710 = vector.multi_reduction <add>, %709, %cst_238 [1] : vector<24x128xf32> to vector<24xf32>
    %711 = vector.shape_cast %710 : vector<24xf32> to vector<24x1xf32>
    %cst_239 = arith.constant 1.280000e+02 : f32
    %712 = vector.broadcast %cst_239 : f32 to vector<24x1xf32>
    %713 = arith.divf %711, %712 : vector<24x1xf32>
    %714 = vector.broadcast %706 : vector<24x1xf32> to vector<24x128xf32>
    %715 = arith.subf %698, %714 : vector<24x128xf32>
    %cst_240 = arith.constant 9.99999974E-6 : f32
    %716 = vector.broadcast %cst_240 : f32 to vector<24x1xf32>
    %717 = arith.addf %713, %716 : vector<24x1xf32>
    %718 = math.rsqrt %717 : vector<24x1xf32>
    %719 = vector.broadcast %718 : vector<24x1xf32> to vector<24x128xf32>
    %720 = arith.mulf %715, %719 : vector<24x128xf32>
    %721 = vector.broadcast %700 : vector<1x128xf32> to vector<24x128xf32>
    %722 = arith.mulf %720, %721 : vector<24x128xf32>
    %723 = vector.broadcast %702 : vector<1x128xf32> to vector<24x128xf32>
    %724 = arith.addf %722, %723 : vector<24x128xf32>
    %725 = arith.truncf %724 : vector<24x128xf32> to vector<24x128xbf16>
    %c2_241 = arith.constant 2 : index
    %c0_242 = arith.constant 0 : index
    %c0_243 = arith.constant 0 : index
    %726 = vector.load %arg14[%c2_241, %c0_242, %c0_243] : memref<3x128x256xbf16, #tpu.memory_space<vmem>>, vector<1x128x256xbf16>
    %727 = vector.shape_cast %726 : vector<1x128x256xbf16> to vector<128x256xbf16>
    %cst_244 = arith.constant dense<0.000000e+00> : vector<24x256xf32>
    %728 = tpu.matmul %725, %727, %cst_244 {dimension_numbers = #tpu.dot_dimension_numbers<[1], [0], [0], [1], [0, 0, 1, 1], [], []>} : vector<24x128xbf16>, vector<128x256xbf16>, vector<24x256xf32> -> vector<24x256xf32>
    %c2_245 = arith.constant 2 : index
    %c0_246 = arith.constant 0 : index
    %c0_247 = arith.constant 0 : index
    %729 = vector.load %arg15[%c2_245, %c0_246, %c0_247] : memref<3x1x256xf32, #tpu.memory_space<vmem>>, vector<1x1x256xf32>
    %730 = vector.shape_cast %729 : vector<1x1x256xf32> to vector<1x256xf32>
    %731 = vector.broadcast %730 : vector<1x256xf32> to vector<24x256xf32>
    %732 = arith.addf %728, %731 : vector<24x256xf32>
    %733 = arith.mulf %732, %732 : vector<24x256xf32>
    %734 = arith.mulf %732, %733 : vector<24x256xf32>
    %cst_248 = arith.constant 4.471500e-02 : f32
    %735 = vector.broadcast %cst_248 : f32 to vector<24x256xf32>
    %736 = arith.mulf %735, %734 : vector<24x256xf32>
    %737 = arith.addf %732, %736 : vector<24x256xf32>
    %cst_249 = arith.constant 0.797884583 : f32
    %738 = vector.broadcast %cst_249 : f32 to vector<24x256xf32>
    %739 = arith.mulf %738, %737 : vector<24x256xf32>
    %740 = math.tanh %739 : vector<24x256xf32>
    %cst_250 = arith.constant 1.000000e+00 : f32
    %741 = vector.broadcast %cst_250 : f32 to vector<24x256xf32>
    %742 = arith.addf %741, %740 : vector<24x256xf32>
    %cst_251 = arith.constant 5.000000e-01 : f32
    %743 = vector.broadcast %cst_251 : f32 to vector<24x256xf32>
    %744 = arith.mulf %743, %742 : vector<24x256xf32>
    %745 = arith.mulf %732, %744 : vector<24x256xf32>
    %746 = arith.truncf %745 : vector<24x256xf32> to vector<24x256xbf16>
    %c2_252 = arith.constant 2 : index
    %c0_253 = arith.constant 0 : index
    %c0_254 = arith.constant 0 : index
    %747 = vector.load %arg16[%c2_252, %c0_253, %c0_254] : memref<3x256x128xbf16, #tpu.memory_space<vmem>>, vector<1x256x128xbf16>
    %748 = vector.shape_cast %747 : vector<1x256x128xbf16> to vector<256x128xbf16>
    %cst_255 = arith.constant dense<0.000000e+00> : vector<24x128xf32>
    %749 = tpu.matmul %746, %748, %cst_255 {dimension_numbers = #tpu.dot_dimension_numbers<[1], [0], [0], [1], [0, 0, 1, 1], [], []>} : vector<24x256xbf16>, vector<256x128xbf16>, vector<24x128xf32> -> vector<24x128xf32>
    %c2_256 = arith.constant 2 : index
    %c0_257 = arith.constant 0 : index
    %c0_258 = arith.constant 0 : index
    %750 = vector.load %arg17[%c2_256, %c0_257, %c0_258] : memref<3x1x128xf32, #tpu.memory_space<vmem>>, vector<1x1x128xf32>
    %751 = vector.shape_cast %750 : vector<1x1x128xf32> to vector<1x128xf32>
    %752 = vector.broadcast %751 : vector<1x128xf32> to vector<24x128xf32>
    %753 = arith.addf %749, %752 : vector<24x128xf32>
    %c2_259 = arith.constant 2 : index
    %c0_260 = arith.constant 0 : index
    %c0_261 = arith.constant 0 : index
    %754 = vector.load %arg18[%c2_259, %c0_260, %c0_261] : memref<3x1x128xf32, #tpu.memory_space<vmem>>, vector<1x1x128xf32>
    %755 = vector.shape_cast %754 : vector<1x1x128xf32> to vector<1x128xf32>
    %c2_262 = arith.constant 2 : index
    %c0_263 = arith.constant 0 : index
    %c0_264 = arith.constant 0 : index
    %756 = vector.load %arg19[%c2_262, %c0_263, %c0_264] : memref<3x1x128xf32, #tpu.memory_space<vmem>>, vector<1x1x128xf32>
    %757 = vector.shape_cast %756 : vector<1x1x128xf32> to vector<1x128xf32>
    %cst_265 = arith.constant dense<0.000000e+00> : vector<24xf32>
    %758 = vector.multi_reduction <add>, %698, %cst_265 [1] : vector<24x128xf32> to vector<24xf32>
    %759 = vector.shape_cast %758 : vector<24xf32> to vector<24x1xf32>
    %cst_266 = arith.constant 1.280000e+02 : f32
    %760 = vector.broadcast %cst_266 : f32 to vector<24x1xf32>
    %761 = arith.divf %759, %760 : vector<24x1xf32>
    %762 = vector.broadcast %761 : vector<24x1xf32> to vector<24x128xf32>
    %763 = arith.subf %698, %762 : vector<24x128xf32>
    %764 = arith.mulf %763, %763 : vector<24x128xf32>
    %cst_267 = arith.constant dense<0.000000e+00> : vector<24xf32>
    %765 = vector.multi_reduction <add>, %764, %cst_267 [1] : vector<24x128xf32> to vector<24xf32>
    %766 = vector.shape_cast %765 : vector<24xf32> to vector<24x1xf32>
    %cst_268 = arith.constant 1.280000e+02 : f32
    %767 = vector.broadcast %cst_268 : f32 to vector<24x1xf32>
    %768 = arith.divf %766, %767 : vector<24x1xf32>
    %769 = vector.broadcast %761 : vector<24x1xf32> to vector<24x128xf32>
    %770 = arith.subf %698, %769 : vector<24x128xf32>
    %cst_269 = arith.constant 9.99999974E-6 : f32
    %771 = vector.broadcast %cst_269 : f32 to vector<24x1xf32>
    %772 = arith.addf %768, %771 : vector<24x1xf32>
    %773 = math.rsqrt %772 : vector<24x1xf32>
    %774 = vector.broadcast %773 : vector<24x1xf32> to vector<24x128xf32>
    %775 = arith.mulf %770, %774 : vector<24x128xf32>
    %776 = vector.broadcast %755 : vector<1x128xf32> to vector<24x128xf32>
    %777 = arith.mulf %775, %776 : vector<24x128xf32>
    %778 = vector.broadcast %757 : vector<1x128xf32> to vector<24x128xf32>
    %779 = arith.addf %777, %778 : vector<24x128xf32>
    %780 = arith.truncf %779 : vector<24x128xf32> to vector<24x128xbf16>
    %c2_270 = arith.constant 2 : index
    %c0_271 = arith.constant 0 : index
    %c0_272 = arith.constant 0 : index
    %781 = vector.load %arg20[%c2_270, %c0_271, %c0_272] : memref<3x128x256xbf16, #tpu.memory_space<vmem>>, vector<1x128x256xbf16>
    %782 = vector.shape_cast %781 : vector<1x128x256xbf16> to vector<128x256xbf16>
    %cst_273 = arith.constant dense<0.000000e+00> : vector<24x256xf32>
    %783 = tpu.matmul %780, %782, %cst_273 {dimension_numbers = #tpu.dot_dimension_numbers<[1], [0], [0], [1], [0, 0, 1, 1], [], []>} : vector<24x128xbf16>, vector<128x256xbf16>, vector<24x256xf32> -> vector<24x256xf32>
    %c2_274 = arith.constant 2 : index
    %c0_275 = arith.constant 0 : index
    %c0_276 = arith.constant 0 : index
    %784 = vector.load %arg21[%c2_274, %c0_275, %c0_276] : memref<3x1x256xf32, #tpu.memory_space<vmem>>, vector<1x1x256xf32>
    %785 = vector.shape_cast %784 : vector<1x1x256xf32> to vector<1x256xf32>
    %786 = vector.broadcast %785 : vector<1x256xf32> to vector<24x256xf32>
    %787 = arith.addf %783, %786 : vector<24x256xf32>
    %788 = arith.mulf %787, %787 : vector<24x256xf32>
    %789 = arith.mulf %787, %788 : vector<24x256xf32>
    %cst_277 = arith.constant 4.471500e-02 : f32
    %790 = vector.broadcast %cst_277 : f32 to vector<24x256xf32>
    %791 = arith.mulf %790, %789 : vector<24x256xf32>
    %792 = arith.addf %787, %791 : vector<24x256xf32>
    %cst_278 = arith.constant 0.797884583 : f32
    %793 = vector.broadcast %cst_278 : f32 to vector<24x256xf32>
    %794 = arith.mulf %793, %792 : vector<24x256xf32>
    %795 = math.tanh %794 : vector<24x256xf32>
    %cst_279 = arith.constant 1.000000e+00 : f32
    %796 = vector.broadcast %cst_279 : f32 to vector<24x256xf32>
    %797 = arith.addf %796, %795 : vector<24x256xf32>
    %cst_280 = arith.constant 5.000000e-01 : f32
    %798 = vector.broadcast %cst_280 : f32 to vector<24x256xf32>
    %799 = arith.mulf %798, %797 : vector<24x256xf32>
    %800 = arith.mulf %787, %799 : vector<24x256xf32>
    %801 = arith.truncf %800 : vector<24x256xf32> to vector<24x256xbf16>
    %c2_281 = arith.constant 2 : index
    %c0_282 = arith.constant 0 : index
    %c0_283 = arith.constant 0 : index
    %802 = vector.load %arg22[%c2_281, %c0_282, %c0_283] : memref<3x256x128xbf16, #tpu.memory_space<vmem>>, vector<1x256x128xbf16>
    %803 = vector.shape_cast %802 : vector<1x256x128xbf16> to vector<256x128xbf16>
    %cst_284 = arith.constant dense<0.000000e+00> : vector<24x128xf32>
    %804 = tpu.matmul %801, %803, %cst_284 {dimension_numbers = #tpu.dot_dimension_numbers<[1], [0], [0], [1], [0, 0, 1, 1], [], []>} : vector<24x256xbf16>, vector<256x128xbf16>, vector<24x128xf32> -> vector<24x128xf32>
    %c2_285 = arith.constant 2 : index
    %c0_286 = arith.constant 0 : index
    %c0_287 = arith.constant 0 : index
    %805 = vector.load %arg23[%c2_285, %c0_286, %c0_287] : memref<3x1x128xf32, #tpu.memory_space<vmem>>, vector<1x1x128xf32>
    %806 = vector.shape_cast %805 : vector<1x1x128xf32> to vector<1x128xf32>
    %807 = vector.broadcast %806 : vector<1x128xf32> to vector<24x128xf32>
    %808 = arith.addf %804, %807 : vector<24x128xf32>
    %809 = vector.shape_cast %65 : vector<24x1xi1> to vector<24x1xi1>
    %810 = vector.broadcast %809 : vector<24x1xi1> to vector<24x128xi1>
    %811 = arith.select %810, %753, %808 : vector<24x128xi1>, vector<24x128xf32>
    %812 = arith.addf %698, %811 : vector<24x128xf32>
    %813 = arith.truncf %812 : vector<24x128xf32> to vector<24x128xbf16>
    %c0_288 = arith.constant 0 : index
    %c0_289 = arith.constant 0 : index
    %814 = vector.load %arg24[%c0_288, %c0_289] : memref<2x24xbf16, #tpu.memory_space<vmem>>, vector<2x24xbf16>
    %cst_290 = arith.constant dense<0.000000e+00> : vector<2x128xf32>
    %815 = tpu.matmul %814, %813, %cst_290 {dimension_numbers = #tpu.dot_dimension_numbers<[1], [0], [0], [1], [0, 0, 1, 1], [], []>} : vector<2x24xbf16>, vector<24x128xbf16>, vector<2x128xf32> -> vector<2x128xf32>
    %c0_291 = arith.constant 0 : index
    %c0_292 = arith.constant 0 : index
    %816 = vector.load %arg25[%c0_291, %c0_292] : memref<1x1xf32, #tpu.memory_space<vmem>>, vector<1x1xf32>
    %817 = vector.broadcast %816 : vector<1x1xf32> to vector<2x128xf32>
    %818 = arith.addf %815, %817 : vector<2x128xf32>
    %c0_293 = arith.constant 0 : index
    %c0_294 = arith.constant 0 : index
    %819 = vector.load %arg26[%c0_293, %c0_294] : memref<2x24xbf16, #tpu.memory_space<vmem>>, vector<2x24xbf16>
    %cst_295 = arith.constant dense<0.000000e+00> : vector<2x128xf32>
    %820 = tpu.matmul %819, %813, %cst_295 {dimension_numbers = #tpu.dot_dimension_numbers<[1], [0], [0], [1], [0, 0, 1, 1], [], []>} : vector<2x24xbf16>, vector<24x128xbf16>, vector<2x128xf32> -> vector<2x128xf32>
    %c0_296 = arith.constant 0 : index
    %c0_297 = arith.constant 0 : index
    %821 = vector.load %arg27[%c0_296, %c0_297] : memref<1x1xf32, #tpu.memory_space<vmem>>, vector<1x1xf32>
    %822 = vector.broadcast %821 : vector<1x1xf32> to vector<2x128xf32>
    %823 = arith.addf %820, %822 : vector<2x128xf32>
    %824 = tpu.concatenate %818, %823 in 1 : vector<2x128xf32>, vector<2x128xf32> -> vector<2x256xf32>
    %c0_298 = arith.constant 0 : index
    %c0_299 = arith.constant 0 : index
    %825 = vector.load %arg28[%c0_298, %c0_299] : memref<1x256xf32, #tpu.memory_space<vmem>>, vector<1x256xf32>
    %c0_300 = arith.constant 0 : index
    %c0_301 = arith.constant 0 : index
    %826 = vector.load %arg29[%c0_300, %c0_301] : memref<1x256xf32, #tpu.memory_space<vmem>>, vector<1x256xf32>
    %cst_302 = arith.constant dense<0.000000e+00> : vector<2xf32>
    %827 = vector.multi_reduction <add>, %824, %cst_302 [1] : vector<2x256xf32> to vector<2xf32>
    %828 = vector.shape_cast %827 : vector<2xf32> to vector<2x1xf32>
    %cst_303 = arith.constant 2.560000e+02 : f32
    %829 = vector.broadcast %cst_303 : f32 to vector<2x1xf32>
    %830 = arith.divf %828, %829 : vector<2x1xf32>
    %831 = vector.broadcast %830 : vector<2x1xf32> to vector<2x256xf32>
    %832 = arith.subf %824, %831 : vector<2x256xf32>
    %833 = arith.mulf %832, %832 : vector<2x256xf32>
    %cst_304 = arith.constant dense<0.000000e+00> : vector<2xf32>
    %834 = vector.multi_reduction <add>, %833, %cst_304 [1] : vector<2x256xf32> to vector<2xf32>
    %835 = vector.shape_cast %834 : vector<2xf32> to vector<2x1xf32>
    %cst_305 = arith.constant 2.560000e+02 : f32
    %836 = vector.broadcast %cst_305 : f32 to vector<2x1xf32>
    %837 = arith.divf %835, %836 : vector<2x1xf32>
    %838 = vector.broadcast %830 : vector<2x1xf32> to vector<2x256xf32>
    %839 = arith.subf %824, %838 : vector<2x256xf32>
    %cst_306 = arith.constant 9.99999974E-6 : f32
    %840 = vector.broadcast %cst_306 : f32 to vector<2x1xf32>
    %841 = arith.addf %837, %840 : vector<2x1xf32>
    %842 = math.rsqrt %841 : vector<2x1xf32>
    %843 = vector.broadcast %842 : vector<2x1xf32> to vector<2x256xf32>
    %844 = arith.mulf %839, %843 : vector<2x256xf32>
    %845 = vector.broadcast %825 : vector<1x256xf32> to vector<2x256xf32>
    %846 = arith.mulf %844, %845 : vector<2x256xf32>
    %847 = vector.broadcast %826 : vector<1x256xf32> to vector<2x256xf32>
    %848 = arith.addf %846, %847 : vector<2x256xf32>
    %849 = arith.truncf %848 : vector<2x256xf32> to vector<2x256xbf16>
    %c0_307 = arith.constant 0 : index
    %c0_308 = arith.constant 0 : index
    %850 = vector.load %arg30[%c0_307, %c0_308] : memref<256x128xbf16, #tpu.memory_space<vmem>>, vector<256x128xbf16>
    %cst_309 = arith.constant dense<0.000000e+00> : vector<2x128xf32>
    %851 = tpu.matmul %849, %850, %cst_309 {dimension_numbers = #tpu.dot_dimension_numbers<[1], [0], [0], [1], [0, 0, 1, 1], [], []>} : vector<2x256xbf16>, vector<256x128xbf16>, vector<2x128xf32> -> vector<2x128xf32>
    %c0_310 = arith.constant 0 : index
    %c0_311 = arith.constant 0 : index
    %852 = vector.load %arg31[%c0_310, %c0_311] : memref<1x128xf32, #tpu.memory_space<vmem>>, vector<1x128xf32>
    %853 = vector.broadcast %852 : vector<1x128xf32> to vector<2x128xf32>
    %854 = arith.addf %851, %853 : vector<2x128xf32>
    %c0_312 = arith.constant 0 : index
    %c0_313 = arith.constant 0 : index
    %855 = vector.load %arg32[%c0_312, %c0_313] : memref<2x128xf32, #tpu.memory_space<vmem>>, vector<2x128xf32>
    tpu.vector_store %arg32[%c0_312, %c0_313], %854 {strides = array<i32>} : memref<2x128xf32, #tpu.memory_space<vmem>>, vector<2x128xf32>,
    return
  }
}

</mosaic_0001>

<bundles_post_ra>
// kernel: image_feature_correction.1
= control target key start
LH: loop header
LB: loop body
LE: loop exit
PB: predicated region body
PF: predicated region fallthrough
CT: control target
= control target key end

     0   :  { %s17196_s6 = smov 1   ;;  %s17197_s10 = smov 2   ;;  %s19775_s0 = inlined_call_operand.smem [shape: u32[33], index: -1, kind: input, shape index: {}] }
   0x1   :  { %s17275_s5 = sld [smem:[%s19775_s0]]   ;;  %s17198_s14 = smov 3  }
   0x2   :  { %s17280_s9 = sld [smem:[%s19775_s0 + %s17196_s6]]   ;;  %s17199_s18 = smov 4  }
   0x3   :  { %s17285_s13 = sld [smem:[%s19775_s0 + %s17197_s10]]   ;;  %s17200_s22 = smov 5  }
   0x4   :  { %s17290_s17 = sld [smem:[%s19775_s0 + %s17198_s14]]   ;;  %s17201_s26 = smov 6  }
   0x5   :  { %s17295_s21 = sld [smem:[%s19775_s0 + %s17199_s18]]   ;;  %s17202_s30 = smov 7  }
   0x6   :  { %s17300_s25 = sld [smem:[%s19775_s0 + %s17200_s22]]   ;;  %s17203_s4 = smov 8  }
   0x7   :  { %19791 = sst [smem:[#allocation50_spill]] %s17275_s5  ;;  %s17204_s10 = smov 9  }
   0x8   :  { %19792 = sst [smem:[#allocation51_spill]] %s17280_s9  ;;  %s17205_s15 = smov 10  }
   0x9   :  { %19793 = sst [smem:[#allocation52_spill]] %s17285_s13  ;;  %s17206_s20 = smov 11  }
   0xa   :  { %s17305_s29 = sld [smem:[%s19775_s0 + %s17201_s26]]   ;;  %s17207_s26 = smov 12  }
   0xb   :  { %19794 = sst [smem:[#allocation53_spill]] %s17295_s21  ;;  %s17208_s1 = smov 13  }
   0xc   :  { %19795 = sst [smem:[#allocation54_spill]] %s17300_s25  ;;  %s17209_s7 = smov 14  }
   0xd   :  { %s17310_s3 = sld [smem:[%s19775_s0 + %s17202_s30]]   ;;  %s17211_s22 = smov 16  }
   0xe   :  { %s17315_s8 = sld [smem:[%s19775_s0 + %s17203_s4]]   ;;  %s17212_s28 = smov 17  }
   0xf   :  { %s17320_s14 = sld [smem:[%s19775_s0 + %s17204_s10]]   ;;  %s17221_s10 = smov 26  }
  0x10   :  { %19796 = sst [smem:[#allocation55_spill]] %s17305_s29  ;;  %s17222_s16 = smov 28  }
  0x11   :  { %s17325_s19 = sld [smem:[%s19775_s0 + %s17205_s15]]   ;;  %s17210_s15 = smov 15  }
  0x12   :  { %s17330_s24 = sld [smem:[%s19775_s0 + %s17206_s20]]   ;;  %s17223_s23 = smov 29  }
  0x13   :  { %19797 = sst [smem:[#allocation56_spill]] %s17310_s3 }
  0x14   :  { %19798 = sst [smem:[#allocation57_spill]] %s17315_s8 }
  0x15   :  { %s17335_s30 = sld [smem:[%s19775_s0 + %s17207_s26]]  }
  0x16   :  { %s17340_s6 = sld [smem:[%s19775_s0 + %s17208_s1]]   ;;  %s17224_s1 = smov 30  }
  0x17   :  { %s17345_s12 = sld [smem:[%s19775_s0 + %s17209_s7]]   ;;  %s17213_s7 = smov 18  }
  0x18   :  { %s17350_s20 = sld [smem:[%s19775_s0 + %s17210_s15]]   ;;  %s17214_s15 = smov 19  }
  0x19   :  { %s17355_s27 = sld [smem:[%s19775_s0 + %s17211_s22]]   ;;  %s17215_s22 = smov 20  }
  0x1a   :  { %s17360_s4 = sld [smem:[%s19775_s0 + %s17212_s28]]   ;;  %s17216_s28 = smov 21  }
  0x1b   :  { %s17365_s3 = sld [smem:[%s19775_s0 + %s17213_s7]]   ;;  %s17217_s7 = smov 22  }
  0x1c   :  { %s17370_s29 = sld [smem:[%s19775_s0 + %s17214_s15]]   ;;  %s17218_s15 = smov 23  }
  0x1d   :  { %s17375_s8 = sld [smem:[%s19775_s0 + %s17215_s22]]   ;;  %s17219_s22 = smov 24  }
  0x1e   :  { %s17380_s25 = sld [smem:[%s19775_s0 + %s17216_s28]]   ;;  %s17220_s28 = smov 25  }
  0x1f   :  { %19799 = sst [smem:[#allocation58_spill]] %s17355_s27 }
  0x20   :  { %s17385_s21 = sld [smem:[%s19775_s0 + %s17217_s7]]  }
  0x21   :  { %19800 = sst [smem:[#allocation59_spill]] %s17365_s3 }
  0x22   :  { %s17390_s9 = sld [smem:[%s19775_s0 + %s17218_s15]]  }
  0x23   :  { %19801 = sst [smem:[#allocation60_spill]] %s17375_s8 }
  0x24   :  { %s17395_s5 = sld [smem:[%s19775_s0 + %s17219_s22]]  }
  0x25   :  { %s12791_s13 = sld [smem:[%s19775_s0 + %s17220_s28]]  }
  0x26   :  { %19802 = sst [smem:[#allocation61_spill]] %s17385_s21 }
  0x27   :  { %s17403_s21 = sld [smem:[%s19775_s0 + %s17221_s10]]   ;;  %s17225_s10 = smov 31  }
  0x28   :  { %s17408_s8 = sld [smem:[%s19775_s0 + %s17222_s16]]   ;;  %s17226_s16 = smov 32  }
  0x29   :  { %s17418_s3 = sld [smem:[%s19775_s0 + %s17224_s1]]  }
  0x2a   :  { %19803 = sst [smem:[#allocation62_spill]] %s17395_s5 }
  0x2b   :  { %s17413_s5 = sld [smem:[%s19775_s0 + %s17223_s23]]   ;;  %v70_v0 = vstv %s12791_s13  ;;  %s17227_s23 = smov 27  }
  0x2c   :  { %s17423_s27 = sld [smem:[%s19775_s0 + %s17225_s10]]   ;;  %71 = vst [vmem:[#allocation2] sm:$0x1] %v70_v0 }
  0x2d   :  { %s12793_s1 = sld [smem:[%s19775_s0 + %s17227_s23]]  }
  0x2e   :  { %19804 = sst [smem:[#allocation63_spill]] %s17408_s8 }
  0x2f   :  { %s17428_s8 = sld [smem:[%s19775_s0 + %s17226_s16]]  }
  0x33   :  { %v72_v1 = vstv %s12793_s1 }
  0x34   :  { %73 = vst [vmem:[#allocation3] sm:$0x1] %v72_v1 }
  0x35   :  { %74 = vsyncpa [#allocation5], 0 }
  0x36   :  { %75 = vsyncpa [#allocation8], 0 }
  0x37   :  { %76 = vsyncpa [#allocation11], 0 }
  0x38   :  { %77 = vsyncpa [#allocation14], 0 }
  0x39   :  { %78 = vsyncpa [#allocation17], 0 }
  0x3a   :  { %79 = vsyncpa [#allocation20], 0 }
  0x3b   :  { %80 = vsyncpa [#allocation23], 0 }
  0x3c   :  { %81 = vsyncpa [#allocation26], 0 }
  0x3d   :  { %82 = vsyncpa [#allocation29], 0 }
  0x3e   :  { %83 = vsyncpa [#allocation32], 0 }
  0x3f   :  { %84 = vsyncpa [#allocation35], 0 }
  0x40   :  { %85 = vsyncpa [#allocation6], 0  ;;  %s17228_s13 = smov [#allocation7]   ;;  %s16688_s0 = scalar_lea.hbm %s17320_s14, 144 }
  0x41   :  { %s119_s28 = sshll.u32 %s17228_s13, 4  ;;  %p16689_p0 = scmp.ne.s32.totalorder %s17320_s14, %s16688_s0  ;;  %s120_s28 = int_to_ptr.vmem [resolvable:$true] %s119_s28 }
  0x42   :  { %p16692_p1 = scmp.lt.u32.totalorder %s16688_s0, %s17320_s14 }
  0x44   :  { %p16694_p2 = pnand %p16692_p1, %p16689_p0 }
  0x46   :  { %16697 = shalt.err (!%p16694_p2)
}
  0x47   :  { %s16698_s2 = scalar_lea.vmem %s120_s28, 144  ;;  %s16702_s10 = scalar_lea.vmem %s120_s28, 160 }
  0x48   :  { %p16699_p3 = scmp.ne.s32.totalorder %s120_s28, %s16698_s2  ;;  %p16703_p4 = scmp.lt.s32.totalorder %s120_s28, %s120_s28 }
  0x49   :  { %p16704_p5 = scmp.lt.s32.totalorder %s16702_s10, %s16698_s2 }
  0x4b   :  { %p16705_p6 = por %p16704_p5, %p16703_p4 }
  0x4d   :  { %p16706_p7 = pnand %p16705_p6, %p16699_p3 }
  0x4f   :  { %16709 = shalt.err (!%p16706_p7)
}
  0x50   :  { %s17229_s7 = smov 48   ;;  %s17230_s11 = smov 3  }
  0x51   :  { %125 = dma.hbm_to_vmem [thread:$0]  %s17320_s14, 144, %s120_s28, [#allocation8], %s17229_s7, %s17229_s7, %s17230_s11  }
  0x52   :  { %s17231_s16 = smov [#allocation10]   ;;  %s16710_s18 = scalar_lea.hbm %s17330_s24, 48 }
  0x53   :  { %s143_s15 = sshll.u32 %s17231_s16, 4  ;;  %p16711_p8 = scmp.ne.s32.totalorder %s17330_s24, %s16710_s18  ;;  %s144_s15 = int_to_ptr.vmem [resolvable:$true] %s143_s15 }
  0x54   :  { %p16714_p9 = scmp.lt.u32.totalorder %s16710_s18, %s17330_s24 }
  0x56   :  { %p16716_p10 = pnand %p16714_p9, %p16711_p8 }
  0x58   :  { %16719 = shalt.err (!%p16716_p10)
}
  0x59   :  { %s16720_s23 = scalar_lea.vmem %s144_s15, 48  ;;  %s16724_s22 = scalar_lea.vmem %s144_s15, 64 }
  0x5a   :  { %p16721_p11 = scmp.ne.s32.totalorder %s144_s15, %s16720_s23  ;;  %p16725_p12 = scmp.lt.s32.totalorder %s144_s15, %s144_s15 }
  0x5b   :  { %p16726_p13 = scmp.lt.s32.totalorder %s16724_s22, %s16720_s23 }
  0x5d   :  { %p16727_p0 = por %p16726_p13, %p16725_p12 }
  0x5f   :  { %p16728_p1 = pnand %p16727_p0, %p16721_p11 }
  0x61   :  { %16731 = shalt.err (!%p16728_p1)
}
  0x62   :  { %s17232_s26 = smov 16   ;;  %s17233_s14 = smov 1  }
  0x63   :  { %149 = dma.hbm_to_vmem [thread:$0]  %s17330_s24, 48, %s144_s15, [#allocation11], %s17232_s26, %s17232_s26, %s17233_s14  }
  0x64   :  { %s17234_s1 = smov [#allocation13]   ;;  %s17235_s28 = smov [#allocation16]  }
  0x65   :  { %s167_s13 = sshll.u32 %s17234_s1, 4  ;;  %s191_s0 = sshll.u32 %s17235_s28, 4  ;;  %s168_s13 = int_to_ptr.vmem [resolvable:$true] %s167_s13  ;;  %s17446_s0 = int_to_ptr.vmem [resolvable:$true] %s191_s0 }
  0x66   :  { %s16732_s2 = scalar_lea.hbm %s17340_s6, 48 }
  0x67   :  { %p16733_p2 = scmp.ne.s32.totalorder %s17340_s6, %s16732_s2  ;;  %p16736_p3 = scmp.lt.u32.totalorder %s16732_s2, %s17340_s6 }
  0x69   :  { %p16738_p4 = pnand %p16736_p3, %p16733_p2 }
  0x6b   :  { %16741 = shalt.err (!%p16738_p4)
}
  0x6c   :  { %s16742_s10 = scalar_lea.vmem %s168_s13, 48  ;;  %s16746_s11 = scalar_lea.vmem %s168_s13, 64 }
  0x6d   :  { %p16743_p5 = scmp.ne.s32.totalorder %s168_s13, %s16742_s10  ;;  %p16747_p6 = scmp.lt.s32.totalorder %s168_s13, %s168_s13 }
  0x6e   :  { %p16748_p7 = scmp.lt.s32.totalorder %s16746_s11, %s16742_s10 }
  0x70   :  { %p16749_p8 = por %p16748_p7, %p16747_p6 }
  0x72   :  { %p16750_p9 = pnand %p16749_p8, %p16743_p5 }
  0x74   :  { %16753 = shalt.err (!%p16750_p9)
}
  0x75   :  { %173 = dma.hbm_to_vmem [thread:$0]  %s17340_s6, 48, %s168_s13, [#allocation14], %s17232_s26, %s17232_s26, %s17233_s14  }
  0x76   :  { %s16754_s24 = scalar_lea.hbm %s17350_s20, 96 }
  0x77   :  { %p16755_p10 = scmp.ne.s32.totalorder %s17350_s20, %s16754_s24  ;;  %p16758_p11 = scmp.lt.u32.totalorder %s16754_s24, %s17350_s20 }
  0x79   :  { %p16760_p12 = pnand %p16758_p11, %p16755_p10 }
  0x7b   :  { %16763 = shalt.err (!%p16760_p12)
}
  0x7c   :  { %s16764_s16 = scalar_lea.vmem %s17446_s0, 96  ;;  %p16769_p0 = scmp.lt.s32.totalorder %s17446_s0, %s17446_s0 }
  0x7d   :  { %p16765_p13 = scmp.ne.s32.totalorder %s17446_s0, %s16764_s16  ;;  %p16770_p1 = scmp.lt.s32.totalorder %s16764_s16, %s16764_s16 }
  0x7f   :  { %p16771_p2 = por %p16770_p1, %p16769_p0 }
  0x81   :  { %p16772_p3 = pnand %p16771_p2, %p16765_p13 }
  0x83   :  { %16775 = shalt.err (!%p16772_p3)
}
  0x84   :  { %s17236_s15 = smov 32   ;;  %s17237_s6 = smov 2  }
  0x85   :  { %197 = dma.hbm_to_vmem [thread:$0]  %s17350_s20, 96, %s17446_s0, [#allocation17], %s17236_s15, %s17236_s15, %s17237_s6  }
  0x86   :  { %s17238_s18 = smov [#allocation19]   ;;  %s17239_s22 = smov [#allocation22]  }
  0x87   :  { %s215_s23 = sshll.u32 %s17238_s18, 4  ;;  %s239_s1 = sshll.u32 %s17239_s22, 4  ;;  %s216_s23 = int_to_ptr.vmem [resolvable:$true] %s215_s23  ;;  %s17467_s1 = int_to_ptr.vmem [resolvable:$true] %s239_s1 }
  0x88   :  { %s16776_s13 = scalar_lea.hbm %s17360_s4, 48 }
  0x89   :  { %p16777_p4 = scmp.ne.s32.totalorder %s17360_s4, %s16776_s13  ;;  %p16780_p5 = scmp.lt.u32.totalorder %s16776_s13, %s17360_s4 }
  0x8b   :  { %p16782_p6 = pnand %p16780_p5, %p16777_p4 }
  0x8d   :  { %16785 = shalt.err (!%p16782_p6)
}
  0x8e   :  { %s16786_s28 = scalar_lea.vmem %s216_s23, 48  ;;  %s16790_s2 = scalar_lea.vmem %s216_s23, 64 }
  0x8f   :  { %p16787_p7 = scmp.ne.s32.totalorder %s216_s23, %s16786_s28  ;;  %p16791_p8 = scmp.lt.s32.totalorder %s216_s23, %s216_s23 }
  0x90   :  { %p16792_p9 = scmp.lt.s32.totalorder %s16790_s2, %s16786_s28 }
  0x92   :  { %p16793_p10 = por %p16792_p9, %p16791_p8 }
  0x94   :  { %p16794_p11 = pnand %p16793_p10, %p16787_p7 }
  0x96   :  { %16797 = shalt.err (!%p16794_p11)
}
  0x97   :  { %221 = dma.hbm_to_vmem [thread:$0]  %s17360_s4, 48, %s216_s23, [#allocation20], %s17232_s26, %s17232_s26, %s17233_s14  }
  0x98   :  { %s16798_s20 = scalar_lea.hbm %s17370_s29, 48 }
  0x99   :  { %p16799_p12 = scmp.ne.s32.totalorder %s17370_s29, %s16798_s20  ;;  %p16802_p13 = scmp.lt.u32.totalorder %s16798_s20, %s17370_s29 }
  0x9b   :  { %p16804_p0 = pnand %p16802_p13, %p16799_p12 }
  0x9d   :  { %16807 = shalt.err (!%p16804_p0)
}
  0x9e   :  { %s16808_s0 = scalar_lea.vmem %s17467_s1, 48  ;;  %s16812_s10 = scalar_lea.vmem %s17467_s1, 64 }
  0x9f   :  { %p16809_p1 = scmp.ne.s32.totalorder %s17467_s1, %s16808_s0  ;;  %p16813_p2 = scmp.lt.s32.totalorder %s17467_s1, %s17467_s1 }
  0xa0   :  { %p16814_p3 = scmp.lt.s32.totalorder %s16812_s10, %s16808_s0 }
  0xa2   :  { %p16815_p4 = por %p16814_p3, %p16813_p2 }
  0xa4   :  { %p16816_p5 = pnand %p16815_p4, %p16809_p1 }
  0xa6   :  { %16819 = shalt.err (!%p16816_p5)
}
  0xa7   :  { %245 = dma.hbm_to_vmem [thread:$0]  %s17370_s29, 48, %s17467_s1, [#allocation23], %s17232_s26, %s17232_s26, %s17233_s14  }
  0xa8   :  { %s17240_s4 = smov [#allocation25]   ;;  %s17241_s24 = smov [#allocation28]  }
  0xa9   :  { %s263_s11 = sshll.u32 %s17240_s4, 4  ;;  %s287_s16 = sshll.u32 %s17241_s24, 4  ;;  %s264_s11 = int_to_ptr.vmem [resolvable:$true] %s263_s11  ;;  %s17489_s16 = int_to_ptr.vmem [resolvable:$true] %s287_s16 }
  0xaa   :  { %s16820_s18 = scalar_lea.hbm %s17380_s25, 96 }
  0xab   :  { %p16821_p6 = scmp.ne.s32.totalorder %s17380_s25, %s16820_s18  ;;  %p16824_p7 = scmp.lt.u32.totalorder %s16820_s18, %s17380_s25 }
  0xad   :  { %p16826_p8 = pnand %p16824_p7, %p16821_p6 }
  0xaf   :  { %16829 = shalt.err (!%p16826_p8)
}
  0xb0   :  { %s16830_s23 = scalar_lea.vmem %s264_s11, 96  ;;  %p16835_p10 = scmp.lt.s32.totalorder %s264_s11, %s264_s11 }
  0xb1   :  { %p16831_p9 = scmp.ne.s32.totalorder %s264_s11, %s16830_s23  ;;  %p16836_p11 = scmp.lt.s32.totalorder %s16830_s23, %s16830_s23 }
  0xb3   :  { %p16837_p12 = por %p16836_p11, %p16835_p10 }
  0xb5   :  { %p16838_p13 = pnand %p16837_p12, %p16831_p9 }
  0xb7   :  { %16841 = shalt.err (!%p16838_p13)
}
  0xb8   :  { %269 = dma.hbm_to_vmem [thread:$0]  %s17380_s25, 96, %s264_s11, [#allocation26], %s17236_s15, %s17236_s15, %s17237_s6  }
  0xb9   :  { %s16842_s29 = scalar_lea.hbm %s17390_s9, 48 }
  0xba   :  { %p16843_p0 = scmp.ne.s32.totalorder %s17390_s9, %s16842_s29  ;;  %p16846_p1 = scmp.lt.u32.totalorder %s16842_s29, %s17390_s9 }
  0xbc   :  { %p16848_p2 = pnand %p16846_p1, %p16843_p0 }
  0xbe   :  { %16851 = shalt.err (!%p16848_p2)
}
  0xbf   :  { %s16852_s22 = scalar_lea.vmem %s17489_s16, 48  ;;  %s16856_s1 = scalar_lea.vmem %s17489_s16, 64 }
  0xc0   :  { %p16853_p3 = scmp.ne.s32.totalorder %s17489_s16, %s16852_s22  ;;  %p16857_p4 = scmp.lt.s32.totalorder %s17489_s16, %s17489_s16 }
  0xc1   :  { %p16858_p5 = scmp.lt.s32.totalorder %s16856_s1, %s16852_s22 }
  0xc3   :  { %p16859_p6 = por %p16858_p5, %p16857_p4 }
  0xc5   :  { %p16860_p7 = pnand %p16859_p6, %p16853_p3 }
  0xc7   :  { %16863 = shalt.err (!%p16860_p7)
}
  0xc8   :  { %293 = dma.hbm_to_vmem [thread:$0]  %s17390_s9, 48, %s17489_s16, [#allocation29], %s17232_s26, %s17232_s26, %s17233_s14  }
  0xc9   :  { %s17242_s25 = smov [#allocation31]   ;;  %s17243_s13 = smov [#allocation34]  }
  0xca   :  { %s312_s6 = sshll.u32 %s17242_s25, 4  ;;  %s334_s28 = sshll.u32 %s17243_s13, 4  ;;  %s313_s6 = int_to_ptr.vmem [resolvable:$true] %s312_s6  ;;  %s335_s28 = int_to_ptr.vmem [resolvable:$true] %s334_s28 }
  0xcb   :  { %s16864_s2 = scalar_lea.hbm %s17403_s21, 16 }
  0xcc   :  { %p16865_p8 = scmp.ne.s32.totalorder %s17403_s21, %s16864_s2  ;;  %p16868_p9 = scmp.lt.u32.totalorder %s16864_s2, %s17403_s21 }
  0xce   :  { %p16870_p10 = pnand %p16868_p9, %p16865_p8 }
  0xd0   :  { %16873 = shalt.err (!%p16870_p10)
}
  0xd1   :  { %s16874_s20 = scalar_lea.vmem %s313_s6, 16  ;;  %s16878_s0 = scalar_lea.vmem %s313_s6, 32 }
  0xd2   :  { %p16875_p11 = scmp.ne.s32.totalorder %s313_s6, %s16874_s20  ;;  %p16879_p12 = scmp.lt.s32.totalorder %s313_s6, %s313_s6 }
  0xd3   :  { %p16880_p13 = scmp.lt.s32.totalorder %s16878_s0, %s16874_s20 }
  0xd5   :  { %p16881_p0 = por %p16880_p13, %p16879_p12 }
  0xd7   :  { %p16882_p1 = pnand %p16881_p0, %p16875_p11 }
  0xd9   :  { %16885 = shalt.err (!%p16882_p1)
}
  0xda   :  { %315 = dma.hbm_to_vmem [thread:$0]  %s17403_s21, 16, %s313_s6, [#allocation32]  }
  0xdb   :  { %s16886_s9 = scalar_lea.hbm %s17413_s5, 32 }
  0xdc   :  { %p16887_p2 = scmp.ne.s32.totalorder %s17413_s5, %s16886_s9  ;;  %p16890_p3 = scmp.lt.u32.totalorder %s16886_s9, %s17413_s5 }
  0xde   :  { %p16892_p4 = pnand %p16890_p3, %p16887_p2 }
  0xe0   :  { %16895 = shalt.err (!%p16892_p4)
}
  0xe1   :  { %s16896_s10 = scalar_lea.vmem %s335_s28, 32  ;;  %p16901_p6 = scmp.lt.s32.totalorder %s335_s28, %s335_s28 }
  0xe2   :  { %p16897_p5 = scmp.ne.s32.totalorder %s335_s28, %s16896_s10  ;;  %p16902_p7 = scmp.lt.s32.totalorder %s16896_s10, %s16896_s10 }
  0xe4   :  { %p16903_p8 = por %p16902_p7, %p16901_p6 }
  0xe6   :  { %p16904_p9 = pnand %p16903_p8, %p16897_p5 }
  0xe8   :  { %16907 = shalt.err (!%p16904_p9)
}
  0xe9   :  { %337 = dma.hbm_to_vmem [thread:$0]  %s17413_s5, 32, %s335_s28, [#allocation35]  }
  0xea   :  { %s17244_s4 = smov [#allocation4]   ;;  %s16908_s21 = scalar_lea.hbm %s17290_s17, 16384 }
  0xeb   :  { %s97_s11 = sshll.u32 %s17244_s4, 4  ;;  %p16909_p10 = scmp.ne.s32.totalorder %s17290_s17, %s16908_s21  ;;  %s98_s11 = int_to_ptr.vmem [resolvable:$true] %s97_s11 }
  0xec   :  { %p16912_p11 = scmp.lt.u32.totalorder %s16908_s21, %s17290_s17 }
  0xee   :  { %p16914_p12 = pnand %p16912_p11, %p16909_p10 }
  0xf0   :  { %16917 = shalt.err (!%p16914_p12)
}
  0xf1   :  { %s16918_s24 = scalar_lea.vmem %s98_s11, 16384  ;;  %p16923_p0 = scmp.lt.s32.totalorder %s98_s11, %s98_s11 }
  0xf2   :  { %p16919_p13 = scmp.ne.s32.totalorder %s98_s11, %s16918_s24  ;;  %p16924_p1 = scmp.lt.s32.totalorder %s16918_s24, %s16918_s24 }
  0xf4   :  { %p16925_p2 = por %p16924_p1, %p16923_p0 }
  0xf6   :  { %p16926_p3 = pnand %p16925_p2, %p16919_p13 }
  0xf8   :  { %16929 = shalt.err (!%p16926_p3)
}
  0xf9   :  { %s17245_s16 = smov 64   ;;  %s17246_s5 = smov 4  }
  0xfa   :  { %103 = dma.hbm_to_vmem [thread:$0]  %s17290_s17, 16384, %s98_s11, [#allocation5], %s17245_s16, %s17245_s16, %s17246_s5  }
  0xfb   :  { %s17247_s18 = smov [#allocation9]   ;;  %s17248_s29 = smov [#allocation12]  }
  0xfc   :  { %s131_s23 = sshll.u32 %s17247_s18, 4  ;;  %s155_s22 = sshll.u32 %s17248_s29, 4  ;;  %s132_s23 = int_to_ptr.vmem [resolvable:$true] %s131_s23  ;;  %s156_s22 = int_to_ptr.vmem [resolvable:$true] %s155_s22 }
  0xfd   :  { %s16930_s1 = scalar_lea.hbm %s17325_s19, 3072 }
  0xfe   :  { %p16931_p4 = scmp.ne.s32.totalorder %s17325_s19, %s16930_s1  ;;  %p16934_p5 = scmp.lt.u32.totalorder %s16930_s1, %s17325_s19 }
 0x100   :  { %p16936_p6 = pnand %p16934_p5, %p16931_p4 }
 0x102   :  { %16939 = shalt.err (!%p16936_p6)
}
 0x103   :  { %s16940_s25 = scalar_lea.vmem %s132_s23, 3072  ;;  %p16945_p8 = scmp.lt.s32.totalorder %s132_s23, %s132_s23 }
 0x104   :  { %p16941_p7 = scmp.ne.s32.totalorder %s132_s23, %s16940_s25  ;;  %p16946_p9 = scmp.lt.s32.totalorder %s16940_s25, %s16940_s25 }
 0x106   :  { %p16947_p10 = por %p16946_p9, %p16945_p8 }
 0x108   :  { %p16948_p11 = pnand %p16947_p10, %p16941_p7 }
 0x10a   :  { %16951 = shalt.err (!%p16948_p11)
}
 0x10b   :  { %137 = dma.hbm_to_vmem [thread:$0]  %s17325_s19, 3072, %s132_s23, [#allocation8], %s17245_s16, %s17245_s16, %s17246_s5  }
 0x10c   :  { %s16952_s17 = scalar_lea.hbm %s17335_s30, 48 }
 0x10d   :  { %p16953_p12 = scmp.ne.s32.totalorder %s17335_s30, %s16952_s17  ;;  %p16956_p13 = scmp.lt.u32.totalorder %s16952_s17, %s17335_s30 }
 0x10f   :  { %p16958_p0 = pnand %p16956_p13, %p16953_p12 }
 0x111   :  { %16961 = shalt.err (!%p16958_p0)
}
 0x112   :  { %s16962_s6 = scalar_lea.vmem %s156_s22, 48  ;;  %s16966_s13 = scalar_lea.vmem %s156_s22, 64 }
 0x113   :  { %p16963_p1 = scmp.ne.s32.totalorder %s156_s22, %s16962_s6  ;;  %p16967_p2 = scmp.lt.s32.totalorder %s156_s22, %s156_s22 }
 0x114   :  { %p16968_p3 = scmp.lt.s32.totalorder %s16966_s13, %s16962_s6 }
 0x116   :  { %p16969_p4 = por %p16968_p3, %p16967_p2 }
 0x118   :  { %p16970_p5 = pnand %p16969_p4, %p16963_p1 }
 0x11a   :  { %16973 = shalt.err (!%p16970_p5)
}
 0x11b   :  { %161 = dma.hbm_to_vmem [thread:$0]  %s17335_s30, 48, %s156_s22, [#allocation11], %s17232_s26, %s17232_s26, %s17233_s14  }
 0x11c   :  { %s17249_s19 = smov [#allocation15]   ;;  %s16974_s2 = scalar_lea.hbm %s17345_s12, 6144 }
 0x11d   :  { %s179_s28 = sshll.u32 %s17249_s19, 4  ;;  %p16975_p6 = scmp.ne.s32.totalorder %s17345_s12, %s16974_s2  ;;  %s180_s28 = int_to_ptr.vmem [resolvable:$true] %s179_s28 }
 0x11e   :  { %p16978_p7 = scmp.lt.u32.totalorder %s16974_s2, %s17345_s12 }
 0x120   :  { %p16980_p8 = pnand %p16978_p7, %p16975_p6 }
 0x122   :  { %16983 = shalt.err (!%p16980_p8)
}
 0x123   :  { %s16984_s20 = scalar_lea.vmem %s180_s28, 6144  ;;  %p16989_p10 = scmp.lt.s32.totalorder %s180_s28, %s180_s28 }
 0x124   :  { %p16985_p9 = scmp.ne.s32.totalorder %s180_s28, %s16984_s20  ;;  %p16990_p11 = scmp.lt.s32.totalorder %s16984_s20, %s16984_s20 }
 0x126   :  { %p16991_p12 = por %p16990_p11, %p16989_p10 }
 0x128   :  { %p16992_p13 = pnand %p16991_p12, %p16985_p9 }
 0x12a   :  { %16995 = shalt.err (!%p16992_p13)
}
 0x12b   :  { %s17250_s0 = smov 128   ;;  %s19805_s9 = sld [smem:[#allocation58_spill]] }
 0x12c   :  { %s17251_s30 = smov 8   ;;  %s17252_s10 = smov [#allocation18]  }
 0x12d   :  { %185 = dma.hbm_to_vmem [thread:$0]  %s17345_s12, 6144, %s180_s28, [#allocation14], %s17250_s0, %s17250_s0, %s17251_s30  }
 0x12e   :  { %s203_s4 = sshll.u32 %s17252_s10, 4  ;;  %s17253_s11 = smov [#allocation21]   ;;  %s204_s4 = int_to_ptr.vmem [resolvable:$true] %s203_s4 }
 0x12f   :  { %s227_s21 = sshll.u32 %s17253_s11, 4  ;;  %s17547_s21 = int_to_ptr.vmem [resolvable:$true] %s227_s21 }
 0x131   :  { %s16996_s24 = scalar_lea.hbm %s19805_s9, 6144 }
 0x132   :  { %p16997_p0 = scmp.ne.s32.totalorder %s19805_s9, %s16996_s24  ;;  %p17000_p1 = scmp.lt.u32.totalorder %s16996_s24, %s19805_s9 }
 0x134   :  { %p17002_p2 = pnand %p17000_p1, %p16997_p0 }
 0x136   :  { %17005 = shalt.err (!%p17002_p2)
}
 0x137   :  { %s17006_s18 = scalar_lea.vmem %s204_s4, 6144  ;;  %p17011_p4 = scmp.lt.s32.totalorder %s204_s4, %s204_s4 }
 0x138   :  { %p17007_p3 = scmp.ne.s32.totalorder %s204_s4, %s17006_s18  ;;  %p17012_p5 = scmp.lt.s32.totalorder %s17006_s18, %s17006_s18 }
 0x13a   :  { %p17013_p6 = por %p17012_p5, %p17011_p4 }
 0x13c   :  { %p17014_p7 = pnand %p17013_p6, %p17007_p3 }
 0x13e   :  { %17017 = shalt.err (!%p17014_p7)
}
 0x13f   :  { %s19806_s12 = sld [smem:[#allocation59_spill]] }
 0x140   :  { %209 = dma.hbm_to_vmem [thread:$0]  %s19805_s9, 6144, %s204_s4, [#allocation17], %s17245_s16, %s17245_s16, %s17246_s5  }
 0x145   :  { %s17018_s23 = scalar_lea.hbm %s19806_s12, 48 }
 0x146   :  { %p17019_p8 = scmp.ne.s32.totalorder %s19806_s12, %s17018_s23  ;;  %p17022_p9 = scmp.lt.u32.totalorder %s17018_s23, %s19806_s12 }
 0x148   :  { %p17024_p10 = pnand %p17022_p9, %p17019_p8 }
 0x14a   :  { %17027 = shalt.err (!%p17024_p10)
}
 0x14b   :  { %s17028_s29 = scalar_lea.vmem %s17547_s21, 48  ;;  %s17032_s22 = scalar_lea.vmem %s17547_s21, 64 }
 0x14c   :  { %p17029_p11 = scmp.ne.s32.totalorder %s17547_s21, %s17028_s29  ;;  %p17033_p12 = scmp.lt.s32.totalorder %s17547_s21, %s17547_s21 }
 0x14d   :  { %p17034_p13 = scmp.lt.s32.totalorder %s17032_s22, %s17028_s29 }
 0x14f   :  { %p17035_p0 = por %p17034_p13, %p17033_p12 }
 0x151   :  { %p17036_p1 = pnand %p17035_p0, %p17029_p11 }
 0x153   :  { %17039 = shalt.err (!%p17036_p1)
}
 0x154   :  { %s19807_s1 = sld [smem:[#allocation60_spill]]  ;;  %s17254_s25 = smov [#allocation24]  }
 0x155   :  { %233 = dma.hbm_to_vmem [thread:$0]  %s19806_s12, 48, %s17547_s21, [#allocation20], %s17232_s26, %s17232_s26, %s17233_s14  }
 0x156   :  { %s251_s17 = sshll.u32 %s17254_s25, 4  ;;  %s17255_s6 = smov [#allocation27]   ;;  %s252_s17 = int_to_ptr.vmem [resolvable:$true] %s251_s17 }
 0x157   :  { %s275_s13 = sshll.u32 %s17255_s6, 4  ;;  %s17569_s13 = int_to_ptr.vmem [resolvable:$true] %s275_s13 }
 0x15a   :  { %s17040_s19 = scalar_lea.hbm %s19807_s1, 6144 }
 0x15b   :  { %p17041_p2 = scmp.ne.s32.totalorder %s19807_s1, %s17040_s19  ;;  %p17044_p3 = scmp.lt.u32.totalorder %s17040_s19, %s19807_s1 }
 0x15d   :  { %p17046_p4 = pnand %p17044_p3, %p17041_p2 }
 0x15f   :  { %17049 = shalt.err (!%p17046_p4)
}
 0x160   :  { %s17050_s28 = scalar_lea.vmem %s252_s17, 6144  ;;  %p17055_p6 = scmp.lt.s32.totalorder %s252_s17, %s252_s17 }
 0x161   :  { %p17051_p5 = scmp.ne.s32.totalorder %s252_s17, %s17050_s28  ;;  %p17056_p7 = scmp.lt.s32.totalorder %s17050_s28, %s17050_s28 }
 0x163   :  { %p17057_p8 = por %p17056_p7, %p17055_p6 }
 0x165   :  { %p17058_p9 = pnand %p17057_p8, %p17051_p5 }
 0x167   :  { %17061 = shalt.err (!%p17058_p9)
}
 0x168   :  { %s19808_s14 = sld [smem:[#allocation61_spill]] }
 0x169   :  { %257 = dma.hbm_to_vmem [thread:$0]  %s19807_s1, 6144, %s252_s17, [#allocation23], %s17250_s0, %s17250_s0, %s17251_s30  }
 0x16e   :  { %s17062_s2 = scalar_lea.hbm %s19808_s14, 6144 }
 0x16f   :  { %p17063_p10 = scmp.ne.s32.totalorder %s19808_s14, %s17062_s2  ;;  %p17066_p11 = scmp.lt.u32.totalorder %s17062_s2, %s19808_s14 }
 0x171   :  { %p17068_p12 = pnand %p17066_p11, %p17063_p10 }
 0x173   :  { %17071 = shalt.err (!%p17068_p12)
}
 0x174   :  { %s17072_s20 = scalar_lea.vmem %s17569_s13, 6144  ;;  %p17077_p0 = scmp.lt.s32.totalorder %s17569_s13, %s17569_s13 }
 0x175   :  { %p17073_p13 = scmp.ne.s32.totalorder %s17569_s13, %s17072_s20  ;;  %p17078_p1 = scmp.lt.s32.totalorder %s17072_s20, %s17072_s20 }
 0x177   :  { %p17079_p2 = por %p17078_p1, %p17077_p0 }
 0x179   :  { %p17080_p3 = pnand %p17079_p2, %p17073_p13 }
 0x17b   :  { %17083 = shalt.err (!%p17080_p3)
}
 0x17c   :  { %s19809_s0 = sld [smem:[#allocation62_spill]]  ;;  %s17256_s9 = smov [#allocation30]  }
 0x17d   :  { %281 = dma.hbm_to_vmem [thread:$0]  %s19808_s14, 6144, %s17569_s13, [#allocation26], %s17245_s16, %s17245_s16, %s17246_s5  }
 0x17e   :  { %s300_s30 = sshll.u32 %s17256_s9, 4  ;;  %s17257_s10 = smov [#allocation33]   ;;  %s301_s30 = int_to_ptr.vmem [resolvable:$true] %s300_s30 }
 0x17f   :  { %s324_s4 = sshll.u32 %s17257_s10, 4  ;;  %s325_s4 = int_to_ptr.vmem [resolvable:$true] %s324_s4 }
 0x182   :  { %s17084_s11 = scalar_lea.hbm %s19809_s0, 16 }
 0x183   :  { %p17085_p4 = scmp.ne.s32.totalorder %s19809_s0, %s17084_s11  ;;  %p17088_p5 = scmp.lt.u32.totalorder %s17084_s11, %s19809_s0 }
 0x185   :  { %p17090_p6 = pnand %p17088_p5, %p17085_p4 }
 0x187   :  { %17093 = shalt.err (!%p17090_p6)
}
 0x188   :  { %s17094_s21 = scalar_lea.vmem %s301_s30, 16  ;;  %s17098_s24 = scalar_lea.vmem %s301_s30, 32 }
 0x189   :  { %p17095_p7 = scmp.ne.s32.totalorder %s301_s30, %s17094_s21  ;;  %p17099_p8 = scmp.lt.s32.totalorder %s301_s30, %s301_s30 }
 0x18a   :  { %p17100_p9 = scmp.lt.s32.totalorder %s17098_s24, %s17094_s21 }
 0x18c   :  { %p17101_p10 = por %p17100_p9, %p17099_p8 }
 0x18e   :  { %p17102_p11 = pnand %p17101_p10, %p17095_p7 }
 0x190   :  { %17105 = shalt.err (!%p17102_p11)
}
 0x191   :  { %s19810_s5 = sld [smem:[#allocation63_spill]] }
 0x192   :  { %303 = dma.hbm_to_vmem [thread:$0]  %s19809_s0, 16, %s301_s30, [#allocation29]  }
 0x197   :  { %s17106_s18 = scalar_lea.hbm %s19810_s5, 32 }
 0x198   :  { %p17107_p12 = scmp.ne.s32.totalorder %s19810_s5, %s17106_s18  ;;  %p17110_p13 = scmp.lt.u32.totalorder %s17106_s18, %s19810_s5 }
 0x19a   :  { %p17112_p0 = pnand %p17110_p13, %p17107_p12 }
 0x19c   :  { %17115 = shalt.err (!%p17112_p0)
}
 0x19d   :  { %s17116_s12 = scalar_lea.vmem %s325_s4, 32  ;;  %p17121_p2 = scmp.lt.s32.totalorder %s325_s4, %s325_s4 }
 0x19e   :  { %p17117_p1 = scmp.ne.s32.totalorder %s325_s4, %s17116_s12  ;;  %p17122_p3 = scmp.lt.s32.totalorder %s17116_s12, %s17116_s12 }
 0x1a0   :  { %p17123_p4 = por %p17122_p3, %p17121_p2 }
 0x1a2   :  { %p17124_p5 = pnand %p17123_p4, %p17117_p1 }
 0x1a4   :  { %17127 = shalt.err (!%p17124_p5)
}
 0x1a5   :  { %327 = dma.hbm_to_vmem [thread:$0]  %s19810_s5, 32, %s325_s4, [#allocation32]  }
 0x1a6   :  { %s17258_s23 = smov [#allocation36]   ;;  %s17128_s22 = scalar_lea.hbm %s17423_s27, 16 }
 0x1a7   :  { %s346_s29 = sshll.u32 %s17258_s23, 4  ;;  %p17129_p6 = scmp.ne.s32.totalorder %s17423_s27, %s17128_s22  ;;  %s347_s29 = int_to_ptr.vmem [resolvable:$true] %s346_s29 }
 0x1a8   :  { %p17132_p7 = scmp.lt.u32.totalorder %s17128_s22, %s17423_s27 }
 0x1aa   :  { %p17134_p8 = pnand %p17132_p7, %p17129_p6 }
 0x1ac   :  { %17137 = shalt.err (!%p17134_p8)
}
 0x1ad   :  { %s17138_s1 = scalar_lea.vmem %s347_s29, 16  ;;  %s17142_s25 = scalar_lea.vmem %s347_s29, 32 }
 0x1ae   :  { %p17139_p9 = scmp.ne.s32.totalorder %s347_s29, %s17138_s1  ;;  %p17143_p10 = scmp.lt.s32.totalorder %s347_s29, %s347_s29 }
 0x1af   :  { %p17144_p11 = scmp.lt.s32.totalorder %s17142_s25, %s17138_s1 }
 0x1b1   :  { %p17145_p12 = por %p17144_p11, %p17143_p10 }
 0x1b3   :  { %p17146_p13 = pnand %p17145_p12, %p17139_p9 }
 0x1b5   :  { %17149 = shalt.err (!%p17146_p13)
}
 0x1b6   :  { %349 = dma.hbm_to_vmem [thread:$0]  %s17423_s27, 16, %s347_s29, [#allocation35]  }
 0x1b7   :  { %17172 = dma.done.wait [#allocation5], 16384  }
 0x1b8   :  { %17173 = vsyncadd [#allocation5], 4294950912 }
 0x1b9   :  { %17174 = dma.done.wait [#allocation8], 3216  }
 0x1ba   :  { %17175 = vsyncadd [#allocation8], 4294964080 }
 0x1bb   :  { %17176 = dma.done.wait [#allocation11], 96  }
 0x1bc   :  { %17177 = vsyncadd [#allocation11], 4294967200 }
 0x1bd   :  { %17178 = dma.done.wait [#allocation14], 6192  }
 0x1be   :  { %17179 = vsyncadd [#allocation14], 4294961104 }
 0x1bf   :  { %17180 = dma.done.wait [#allocation17], 6240  }
 0x1c0   :  { %17181 = vsyncadd [#allocation17], 4294961056 }
 0x1c1   :  { %17182 = dma.done.wait [#allocation20], 96  }
 0x1c2   :  { %17183 = vsyncadd [#allocation20], 4294967200 }
 0x1c3   :  { %17184 = dma.done.wait [#allocation23], 6192  }
 0x1c4   :  { %17185 = vsyncadd [#allocation23], 4294961104 }
 0x1c5   :  { %17186 = dma.done.wait [#allocation26], 6240  }
 0x1c6   :  { %17187 = vsyncadd [#allocation26], 4294961056 }
 0x1c7   :  { %17188 = dma.done.wait [#allocation29], 64  }
 0x1c8   :  { %17189 = vsyncadd [#allocation29], 4294967232 }
 0x1c9   :  { %17190 = dma.done.wait [#allocation32], 48  }
 0x1ca   :  { %17191 = vsyncadd [#allocation32], 4294967248 }
 0x1cb   :  { %17192 = dma.done.wait [#allocation35], 48  }
 0x1cc   :  { %17193 = vsyncadd [#allocation35], 4294967248  ;;  %s19811_s27 = sld [smem:[#allocation52_spill]]  ;;  %s19812_s17 = sld [smem:[#allocation50_spill]]  ;;  %vm3397_vm0 = vcmask 1045504   ;;  %vm19789_vm1 = vcmask 130048  }
 0x1cd   :  { %s19813_s6 = sld [smem:[#allocation51_spill]]  ;;  %s19814_s13 = sld [smem:[#allocation53_spill]]  ;;  %vm19790_vm2 = vcmask 1043456  }
 0x1ce   :  { %s19815_s19 = sld [smem:[#allocation54_spill]]  ;;  %s19816_s28 = sld [smem:[#allocation57_spill]] }
 0x1cf   :  { %s19817_s14 = sld [smem:[#allocation55_spill]]  ;;  %s19818_s2 = sld [smem:[#allocation56_spill]] }
 0x1d0   :  { %s17260_s20 = smov 112   ;;  %s17261_s0 = smov 80  }
 0x1d1   :  { %s17262_s9 = smov 96  }
 0x1d2   :  { %v15626_v2 = vld [vmem:[%s19811_s27 + $0x40] sm:$0xff]   ;;  %v15630_v6 = vld [vmem:[%s19811_s27 + $0x48] sm:$0xff]   ;;  %v15634_v10 = vld [vmem:[%s19811_s27 + $0x50] sm:$0xff]  }
 0x1d3   :  { %v15627_v3 = vld [vmem:[%s19811_s27 + $0xc0] sm:$0xff]   ;;  %13603 = vmatprep.subr.bf16.mxu0 %v15626_v2  ;;  %v15631_v7 = vld [vmem:[%s19811_s27 + $0xc8] sm:$0xff]   ;;  %v15635_v11 = vld [vmem:[%s19811_s27 + $0xd0] sm:$0xff]  }
 0x1d4   :  { %v15628_v4 = vld [vmem:[%s19811_s27] sm:$0xff]   ;;  %13625 = vmatprep.subr.bf16.mxu1 %v15627_v3  ;;  %v15632_v8 = vld [vmem:[%s19811_s27 + $0x8] sm:$0xff]   ;;  %v15636_v12 = vld [vmem:[%s19811_s27 + $0x10] sm:$0xff]  }
 0x1d5   :  { %v15629_v5 = vld [vmem:[%s19811_s27 + $0x80] sm:$0xff]   ;;  %13604 = vmatpush3.bf16.msra.mxu0 %v15628_v4  ;;  %v15633_v9 = vld [vmem:[%s19811_s27 + $0x88] sm:$0xff]   ;;  %v15637_v13 = vld [vmem:[%s19811_s27 + $0x90] sm:$0xff]  }
 0x1d6   :  { %13626 = vmatpush3.bf16.msra.mxu1 %v15629_v5  ;;  %13605 = vmatprep.subr.bf16.mxu0 %v15630_v6  ;;  %v15638_v14 = vld [vmem:[%s19811_s27 + $0x58] sm:$0xff]   ;;  %v15642_v18 = vld [vmem:[%s19811_s27 + $0x60] sm:$0xff]   ;;  %v15646_v22 = vld [vmem:[%s19811_s27 + $0x68] sm:$0xff]  }
 0x1d7   :  { %13627 = vmatprep.subr.bf16.mxu1 %v15631_v7  ;;  %v15639_v15 = vld [vmem:[%s19811_s27 + $0xd8] sm:$0xff]   ;;  %v15643_v19 = vld [vmem:[%s19811_s27 + $0xe0] sm:$0xff]   ;;  %v15647_v23 = vld [vmem:[%s19811_s27 + $0xe8] sm:$0xff]  }
 0x1d8   :  { %v15640_v16 = vld [vmem:[%s19811_s27 + $0x18] sm:$0xff]   ;;  %v15644_v20 = vld [vmem:[%s19811_s27 + $0x20] sm:$0xff]   ;;  %v15648_v24 = vld [vmem:[%s19811_s27 + $0x28] sm:$0xff]  }
 0x1d9   :  { %13606 = vmatpush3.bf16.msra.mxu0 %v15632_v8  ;;  %v15641_v17 = vld [vmem:[%s19811_s27 + $0x98] sm:$0xff]   ;;  %v15645_v21 = vld [vmem:[%s19811_s27 + $0xa0] sm:$0xff]   ;;  %v15649_v25 = vld [vmem:[%s19811_s27 + $0xa8] sm:$0xff]  }
 0x1da   :  { %13628 = vmatpush3.bf16.msra.mxu1 %v15633_v9  ;;  %13607 = vmatprep.subr.bf16.mxu0 %v15634_v10  ;;  %v15650_v26 = vld [vmem:[%s19811_s27 + $0x70] sm:$0xff]   ;;  %v15654_v30 = vld [vmem:[%s19811_s27 + $0x78] sm:$0xff]   ;;  %v414_v34 = vld [vmem:[%s19812_s17] sm:$0x77] }
 0x1db   :  { %13629 = vmatprep.subr.bf16.mxu1 %v15635_v11  ;;  %v15651_v27 = vld [vmem:[%s19811_s27 + $0xf0] sm:$0xff]   ;;  %v15655_v31 = vld [vmem:[%s19811_s27 + $0xf8] sm:$0xff]   ;;  %v415_v35 = vld [vmem:[%s19812_s17 + $0x8] sm:$0x77]  ;;  %v12799_v36 = vcombine.low %v414_v34, %v414_v34  ;;  %v12800_v37 = vcombine.high %v414_v34, %v414_v34 }
 0x1dc   :  { %v15652_v28 = vld [vmem:[%s19811_s27 + $0x30] sm:$0xff]   ;;  %v15656_v32 = vld [vmem:[%s19811_s27 + $0x38] sm:$0xff]   ;;  %v12801_v38 = vcombine.low %v415_v35, %v415_v35  ;;  %v12802_v39 = vcombine.high %v415_v35, %v415_v35  ;;  %v15662_v40 = vld [vmem:[%s19811_s27 + $0x140] sm:$0xff]  }
 0x1dd   :  { %13608 = vmatpush3.bf16.msra.mxu0 %v15636_v12  ;;  %v15653_v29 = vld [vmem:[%s19811_s27 + $0xb0] sm:$0xff]   ;;  %v15657_v33 = vld [vmem:[%s19811_s27 + $0xb8] sm:$0xff]   ;;  %v15663_v41 = vld [vmem:[%s19811_s27 + $0x1c0] sm:$0xff]   ;;  %1535 = vmatprep.mubr.bf16.mxu0 %v12800_v37 }
 0x1de   :  { %13630 = vmatpush3.bf16.msra.mxu1 %v15637_v13  ;;  %13609 = vmatprep.subr.bf16.mxu0 %v15638_v14  ;;  %v15664_v42 = vld [vmem:[%s19811_s27 + $0x100] sm:$0xff]   ;;  %v15666_v44 = vld [vmem:[%s19811_s27 + $0x148] sm:$0xff]   ;;  %v15670_v48 = vld [vmem:[%s19811_s27 + $0x150] sm:$0xff]  }
 0x1df   :  { %13631 = vmatprep.subr.bf16.mxu1 %v15639_v15  ;;  %1575 = vmatprep.mubr.bf16.mxu1 %v12802_v39  ;;  %v15665_v43 = vld [vmem:[%s19811_s27 + $0x180] sm:$0xff]   ;;  %v15667_v45 = vld [vmem:[%s19811_s27 + $0x1c8] sm:$0xff]   ;;  %v15671_v49 = vld [vmem:[%s19811_s27 + $0x1d0] sm:$0xff]  }
 0x1e0   :  { %v15668_v46 = vld [vmem:[%s19811_s27 + $0x108] sm:$0xff]   ;;  %v15672_v50 = vld [vmem:[%s19811_s27 + $0x110] sm:$0xff]   ;;  %v15674_v52 = vld [vmem:[%s19811_s27 + $0x158] sm:$0xff]  }
 0x1e1   :  { %13610 = vmatpush3.bf16.msra.mxu0 %v15640_v16  ;;  %v15669_v47 = vld [vmem:[%s19811_s27 + $0x188] sm:$0xff]   ;;  %v15673_v51 = vld [vmem:[%s19811_s27 + $0x190] sm:$0xff]   ;;  %v15675_v53 = vld [vmem:[%s19811_s27 + $0x1d8] sm:$0xff]  }
 0x1e2   :  { %13632 = vmatpush3.bf16.msra.mxu1 %v15641_v17  ;;  %13611 = vmatprep.subr.bf16.mxu0 %v15642_v18  ;;  %v15676_v54 = vld [vmem:[%s19811_s27 + $0x118] sm:$0xff]   ;;  %v15678_v56 = vld [vmem:[%s19811_s27 + $0x160] sm:$0xff]   ;;  %v15682_v60 = vld [vmem:[%s19811_s27 + $0x168] sm:$0xff]  }
 0x1e3   :  { %13633 = vmatprep.subr.bf16.mxu1 %v15643_v19  ;;  %v15677_v55 = vld [vmem:[%s19811_s27 + $0x198] sm:$0xff]   ;;  %v15679_v57 = vld [vmem:[%s19811_s27 + $0x1e0] sm:$0xff]   ;;  %v15683_v61 = vld [vmem:[%s19811_s27 + $0x1e8] sm:$0xff]  }
 0x1e4   :  { %v15680_v58 = vld [vmem:[%s19811_s27 + $0x120] sm:$0xff]   ;;  %v15684_v62 = vld [vmem:[%s19811_s27 + $0x128] sm:$0xff]   ;;  %v15686_v0 = vld [vmem:[%s19811_s27 + $0x170] sm:$0xff]  }
 0x1e5   :  { %13612 = vmatpush3.bf16.msra.mxu0 %v15644_v20  ;;  %v15681_v59 = vld [vmem:[%s19811_s27 + $0x1a0] sm:$0xff]   ;;  %v15685_v63 = vld [vmem:[%s19811_s27 + $0x1a8] sm:$0xff]   ;;  %v15687_v1 = vld [vmem:[%s19811_s27 + $0x1f0] sm:$0xff]  }
 0x1e6   :  { %13634 = vmatpush3.bf16.msra.mxu1 %v15645_v21  ;;  %13613 = vmatprep.subr.bf16.mxu0 %v15646_v22  ;;  %v15688_v2 = vld [vmem:[%s19811_s27 + $0x130] sm:$0xff]   ;;  %v15690_v4 = vld [vmem:[%s19811_s27 + $0x178] sm:$0xff]   ;;  %v15698_v14 = vld [vmem:[%s19811_s27 + $0x240] sm:$0xff]  }
 0x1e7   :  { %13635 = vmatprep.subr.bf16.mxu1 %v15647_v23  ;;  %v15689_v3 = vld [vmem:[%s19811_s27 + $0x1b0] sm:$0xff]   ;;  %v15691_v5 = vld [vmem:[%s19811_s27 + $0x1f8] sm:$0xff]   ;;  %v15699_v15 = vld [vmem:[%s19811_s27 + $0x2c0] sm:$0xff]  }
 0x1e8   :  { %v15692_v6 = vld [vmem:[%s19811_s27 + $0x138] sm:$0xff]   ;;  %v416_v8 = vld [vmem:[%s19812_s17 + $0x10] sm:$0x77]  ;;  %v15700_v16 = vld [vmem:[%s19811_s27 + $0x200] sm:$0xff]  }
 0x1e9   :  { %13614 = vmatpush3.bf16.msra.mxu0 %v15648_v24  ;;  %v15693_v7 = vld [vmem:[%s19811_s27 + $0x1b8] sm:$0xff]   ;;  %v12803_v9 = vcombine.low %v416_v8, %v416_v8  ;;  %v12804_v10 = vcombine.high %v416_v8, %v416_v8  ;;  %v15701_v17 = vld [vmem:[%s19811_s27 + $0x280] sm:$0xff]   ;;  %v15702_v18 = vld [vmem:[%s19811_s27 + $0x248] sm:$0xff]  }
 0x1ea   :  { %13636 = vmatpush3.bf16.msra.mxu1 %v15649_v25  ;;  %13615 = vmatprep.subr.bf16.mxu0 %v15650_v26  ;;  %v417_v11 = vld [vmem:[%s19812_s17 + $0x18] sm:$0x77]  ;;  %v15703_v19 = vld [vmem:[%s19811_s27 + $0x2c8] sm:$0xff]   ;;  %v15706_v22 = vld [vmem:[%s19811_s27 + $0x250] sm:$0xff]  }
 0x1eb   :  { %13637 = vmatprep.subr.bf16.mxu1 %v15651_v27  ;;  %v12805_v12 = vcombine.low %v417_v11, %v417_v11  ;;  %v12806_v13 = vcombine.high %v417_v11, %v417_v11  ;;  %v15704_v20 = vld [vmem:[%s19811_s27 + $0x208] sm:$0xff]   ;;  %v15707_v23 = vld [vmem:[%s19811_s27 + $0x2d0] sm:$0xff]   ;;  %v15710_v26 = vld [vmem:[%s19811_s27 + $0x258] sm:$0xff]  }
 0x1ec   :  { %v15705_v21 = vld [vmem:[%s19811_s27 + $0x288] sm:$0xff]   ;;  %v15708_v24 = vld [vmem:[%s19811_s27 + $0x210] sm:$0xff]   ;;  %v15711_v27 = vld [vmem:[%s19811_s27 + $0x2d8] sm:$0xff]  }
 0x1ed   :  { %13616 = vmatpush3.bf16.msra.mxu0 %v15652_v28  ;;  %v15709_v25 = vld [vmem:[%s19811_s27 + $0x290] sm:$0xff]   ;;  %v15712_v28 = vld [vmem:[%s19811_s27 + $0x218] sm:$0xff]   ;;  %v15718_v34 = vld [vmem:[%s19811_s27 + $0x268] sm:$0xff]  }
 0x1ee   :  { %13638 = vmatpush3.bf16.msra.mxu1 %v15653_v29  ;;  %13617 = vmatprep.subr.bf16.mxu0 %v15654_v30  ;;  %v15713_v29 = vld [vmem:[%s19811_s27 + $0x298] sm:$0xff]   ;;  %v15714_v30 = vld [vmem:[%s19811_s27 + $0x260] sm:$0xff]   ;;  %v15719_v35 = vld [vmem:[%s19811_s27 + $0x2e8] sm:$0xff]  }
 0x1ef   :  { %13639 = vmatprep.subr.bf16.mxu1 %v15655_v31  ;;  %v15715_v31 = vld [vmem:[%s19811_s27 + $0x2e0] sm:$0xff]   ;;  %v15721_v37 = vld [vmem:[%s19811_s27 + $0x2a8] sm:$0xff]   ;;  %v15723_v39 = vld [vmem:[%s19811_s27 + $0x2f0] sm:$0xff]  }
 0x1f0   :  { %v15754_v8 = vld [vmem:[%s19811_s27 + $0x368] sm:$0xff]  }
 0x1f1   :  { %13618 = vmatpush3.bf16.msra.mxu0 %v15656_v32  ;;  %v15716_v32 = vld [vmem:[%s19811_s27 + $0x220] sm:$0xff]   ;;  %v15757_v11 = vld [vmem:[%s19811_s27 + $0x3a8] sm:$0xff]  }
 0x1f2   :  { %13640 = vmatpush3.bf16.msra.mxu1 %v15657_v33  ;;  %13647 = vmatprep.subr.bf16.mxu0 %v15662_v40  ;;  %v15717_v33 = vld [vmem:[%s19811_s27 + $0x2a0] sm:$0xff]   ;;  %v15724_v40 = vld [vmem:[%s19811_s27 + $0x230] sm:$0xff]  }
 0x1f3   :  { %13669 = vmatprep.subr.bf16.mxu1 %v15663_v41  ;;  %v15725_v41 = vld [vmem:[%s19811_s27 + $0x2b0] sm:$0xff]  }
 0x1f4   :  { %1536 = vmatmul.mubr.bf16.vlgmr.msra.gmra.mrb[0].mxu0 %v12799_v36  ;;  %v15720_v36 = vld [vmem:[%s19811_s27 + $0x228] sm:$0xff]  }
 0x1f5   :  { %1576 = vmatmul.mubr.bf16.vlgmr.msra.gmra.mrb[0].mxu1 %v12801_v38  ;;  %13648 = vmatpush3.bf16.msra.mxu0 %v15664_v42  ;;  %v15722_v38 = vld [vmem:[%s19811_s27 + $0x270] sm:$0xff]   ;;  %v15726_v42 = vld [vmem:[%s19811_s27 + $0x278] sm:$0xff]  }
 0x1f6   :  { %13670 = vmatpush3.bf16.msra.mxu1 %v15665_v43  ;;  %13649 = vmatprep.subr.bf16.mxu0 %v15666_v44  ;;  %v15727_v43 = vld [vmem:[%s19811_s27 + $0x2f8] sm:$0xff]  }
 0x1f7   :  { %13671 = vmatprep.subr.bf16.mxu1 %v15667_v45  ;;  %1615 = vmatprep.mubr.bf16.mxu0 %v12804_v10  ;;  %v15728_v44 = vld [vmem:[%s19811_s27 + $0x238] sm:$0xff]   ;;  %v15756_v10 = vld [vmem:[%s19811_s27 + $0x328] sm:$0xff]  }
 0x1f8   :  { %1655 = vmatprep.mubr.bf16.mxu1 %v12806_v13  ;;  %v15729_v45 = vld [vmem:[%s19811_s27 + $0x2b8] sm:$0xff]   ;;  %v15759_v13 = vld [vmem:[%s19811_s27 + $0x3f0] sm:$0xff]  }
 0x1f9   :  { %13650 = vmatpush3.bf16.msra.mxu0 %v15668_v46  ;;  %v418_v46 = vld [vmem:[%s19812_s17 + $0x20] sm:$0x77] }
 0x1fa   :  { %13672 = vmatpush3.bf16.msra.mxu1 %v15669_v47  ;;  %13651 = vmatprep.subr.bf16.mxu0 %v15670_v48  ;;  %v419_v47 = vld [vmem:[%s19812_s17 + $0x28] sm:$0x77]  ;;  %v12807_v48 = vcombine.low %v418_v46, %v418_v46 }
 0x1fb   :  { %13673 = vmatprep.subr.bf16.mxu1 %v15671_v49  ;;  %v12808_v49 = vcombine.high %v418_v46, %v418_v46  ;;  %v15790_v46 = vld [vmem:[#allocation4 + $0x68] sm:$0xff]  }
 0x1fd   :  { %13652 = vmatpush3.bf16.msra.mxu0 %v15672_v50  ;;  %v12809_v50 = vcombine.low %v419_v47, %v419_v47 }
 0x1fe   :  { %13674 = vmatpush3.bf16.msra.mxu1 %v15673_v51  ;;  %13653 = vmatprep.subr.bf16.mxu0 %v15674_v52  ;;  %v12810_v51 = vcombine.high %v419_v47, %v419_v47  ;;  %v15734_v52 = vld [vmem:[%s19811_s27 + $0x340] sm:$0xff]   ;;  %v15791_v47 = vld [vmem:[#allocation4 + $0xe8] sm:$0xff]  }
 0x1ff   :  { %13675 = vmatprep.subr.bf16.mxu1 %v15675_v53  ;;  %v15735_v53 = vld [vmem:[%s19811_s27 + $0x3c0] sm:$0xff]  }
 0x201   :  { %13654 = vmatpush3.bf16.msra.mxu0 %v15676_v54  ;;  %v15736_v54 = vld [vmem:[%s19811_s27 + $0x300] sm:$0xff]  }
 0x202   :  { %13676 = vmatpush3.bf16.msra.mxu1 %v15677_v55  ;;  %13655 = vmatprep.subr.bf16.mxu0 %v15678_v56  ;;  %v15737_v55 = vld [vmem:[%s19811_s27 + $0x380] sm:$0xff]   ;;  %v15738_v56 = vld [vmem:[%s19811_s27 + $0x348] sm:$0xff]  }
 0x203   :  { %13677 = vmatprep.subr.bf16.mxu1 %v15679_v57  ;;  %v15739_v57 = vld [vmem:[%s19811_s27 + $0x3c8] sm:$0xff]  }
 0x205   :  { %13656 = vmatpush3.bf16.msra.mxu0 %v15680_v58  ;;  %v15740_v58 = vld [vmem:[%s19811_s27 + $0x308] sm:$0xff]  }
 0x206   :  { %13678 = vmatpush3.bf16.msra.mxu1 %v15681_v59  ;;  %13657 = vmatprep.subr.bf16.mxu0 %v15682_v60  ;;  %v15741_v59 = vld [vmem:[%s19811_s27 + $0x388] sm:$0xff]   ;;  %v15742_v60 = vld [vmem:[%s19811_s27 + $0x350] sm:$0xff]  }
 0x207   :  { %13679 = vmatprep.subr.bf16.mxu1 %v15683_v61  ;;  %v15743_v61 = vld [vmem:[%s19811_s27 + $0x3d0] sm:$0xff]  }
 0x209   :  { %13658 = vmatpush3.bf16.msra.mxu0 %v15684_v62  ;;  %v15744_v62 = vld [vmem:[%s19811_s27 + $0x310] sm:$0xff]  }
 0x20a   :  { %13680 = vmatpush3.bf16.msra.mxu1 %v15685_v63  ;;  %13659 = vmatprep.subr.bf16.mxu0 %v15686_v0  ;;  %v15745_v63 = vld [vmem:[%s19811_s27 + $0x390] sm:$0xff]   ;;  %v15746_v0 = vld [vmem:[%s19811_s27 + $0x358] sm:$0xff]  }
 0x20b   :  { %13681 = vmatprep.subr.bf16.mxu1 %v15687_v1  ;;  %v15747_v1 = vld [vmem:[%s19811_s27 + $0x3d8] sm:$0xff]  }
 0x20d   :  { %13660 = vmatpush3.bf16.msra.mxu0 %v15688_v2  ;;  %v15748_v2 = vld [vmem:[%s19811_s27 + $0x318] sm:$0xff]  }
 0x20e   :  { %13682 = vmatpush3.bf16.msra.mxu1 %v15689_v3  ;;  %13661 = vmatprep.subr.bf16.mxu0 %v15690_v4  ;;  %v15749_v3 = vld [vmem:[%s19811_s27 + $0x398] sm:$0xff]   ;;  %v15750_v4 = vld [vmem:[%s19811_s27 + $0x360] sm:$0xff]  }
 0x20f   :  { %13683 = vmatprep.subr.bf16.mxu1 %v15691_v5  ;;  %v15751_v5 = vld [vmem:[%s19811_s27 + $0x3e0] sm:$0xff]  }
 0x211   :  { %13662 = vmatpush3.bf16.msra.mxu0 %v15692_v6  ;;  %v15752_v6 = vld [vmem:[%s19811_s27 + $0x320] sm:$0xff]  }
 0x212   :  { %13684 = vmatpush3.bf16.msra.mxu1 %v15693_v7  ;;  %13691 = vmatprep.subr.bf16.mxu0 %v15698_v14  ;;  %v15753_v7 = vld [vmem:[%s19811_s27 + $0x3a0] sm:$0xff]   ;;  %v15760_v14 = vld [vmem:[%s19811_s27 + $0x330] sm:$0xff]  }
 0x213   :  { %13713 = vmatprep.subr.bf16.mxu1 %v15699_v15  ;;  %v15761_v15 = vld [vmem:[%s19811_s27 + $0x3b0] sm:$0xff]  }
 0x214   :  { %1616 = vmatmul.mubr.bf16.vlgmr.msra.gmra.mrb[4].mxu0 %v12803_v9  ;;  %v15755_v9 = vld [vmem:[%s19811_s27 + $0x3e8] sm:$0xff]  }
 0x215   :  { %1656 = vmatmul.mubr.bf16.vlgmr.msra.gmra.mrb[4].mxu1 %v12805_v12  ;;  %13692 = vmatpush3.bf16.msra.mxu0 %v15700_v16  ;;  %v15758_v12 = vld [vmem:[%s19811_s27 + $0x370] sm:$0xff]   ;;  %v15762_v16 = vld [vmem:[%s19811_s27 + $0x378] sm:$0xff]  }
 0x216   :  { %13714 = vmatpush3.bf16.msra.mxu1 %v15701_v17  ;;  %13693 = vmatprep.subr.bf16.mxu0 %v15702_v18  ;;  %v15763_v17 = vld [vmem:[%s19811_s27 + $0x3f8] sm:$0xff]  }
 0x217   :  { %13715 = vmatprep.subr.bf16.mxu1 %v15703_v19  ;;  %1695 = vmatprep.mubr.bf16.mxu0 %v12808_v49  ;;  %v15764_v18 = vld [vmem:[%s19811_s27 + $0x338] sm:$0xff]   ;;  %v15793_v49 = vld [vmem:[#allocation4 + $0xa8] sm:$0xff]  }
 0x218   :  { %1735 = vmatprep.mubr.bf16.mxu1 %v12810_v51  ;;  %v15765_v19 = vld [vmem:[%s19811_s27 + $0x3b8] sm:$0xff]  }
 0x219   :  { %13694 = vmatpush3.bf16.msra.mxu0 %v15704_v20  ;;  %v420_v20 = vld [vmem:[%s19812_s17 + $0x30] sm:$0x77] }
 0x21a   :  { %13716 = vmatpush3.bf16.msra.mxu1 %v15705_v21  ;;  %13695 = vmatprep.subr.bf16.mxu0 %v15706_v22  ;;  %v421_v21 = vld [vmem:[%s19812_s17 + $0x38] sm:$0x77]  ;;  %v12811_v22 = vcombine.low %v420_v20, %v420_v20 }
 0x21b   :  { %13717 = vmatprep.subr.bf16.mxu1 %v15707_v23  ;;  %v12812_v23 = vcombine.high %v420_v20, %v420_v20  ;;  %v15795_v51 = vld [vmem:[#allocation4 + $0xf0] sm:$0xff]   ;;  %v15820_v20 = vld [vmem:[#allocation4 + $0x120] sm:$0xff]  }
 0x21d   :  { %13696 = vmatpush3.bf16.msra.mxu0 %v15708_v24  ;;  %v12813_v24 = vcombine.low %v421_v21, %v421_v21 }
 0x21e   :  { %13718 = vmatpush3.bf16.msra.mxu1 %v15709_v25  ;;  %13697 = vmatprep.subr.bf16.mxu0 %v15710_v26  ;;  %v15770_v25 = vld [vmem:[#allocation4 + $0x40] sm:$0xff]   ;;  %v12814_v26 = vcombine.high %v421_v21, %v421_v21 }
 0x21f   :  { %13719 = vmatprep.subr.bf16.mxu1 %v15711_v27  ;;  %v15771_v27 = vld [vmem:[#allocation4 + $0xc0] sm:$0xff]  }
 0x220   :  { %v15821_v21 = vld [vmem:[#allocation4 + $0x1a0] sm:$0xff]  }
 0x221   :  { %13698 = vmatpush3.bf16.msra.mxu0 %v15712_v28  ;;  %v15772_v28 = vld [vmem:[#allocation4] sm:$0xff]  }
 0x222   :  { %13720 = vmatpush3.bf16.msra.mxu1 %v15713_v29  ;;  %13699 = vmatprep.subr.bf16.mxu0 %v15714_v30  ;;  %v15773_v29 = vld [vmem:[#allocation4 + $0x80] sm:$0xff]   ;;  %v15774_v30 = vld [vmem:[#allocation4 + $0x48] sm:$0xff]  }
 0x223   :  { %13721 = vmatprep.subr.bf16.mxu1 %v15715_v31  ;;  %v15775_v31 = vld [vmem:[#allocation4 + $0xc8] sm:$0xff]  }
 0x225   :  { %13700 = vmatpush3.bf16.msra.mxu0 %v15716_v32  ;;  %v15776_v32 = vld [vmem:[#allocation4 + $0x8] sm:$0xff]  }
 0x226   :  { %13722 = vmatpush3.bf16.msra.mxu1 %v15717_v33  ;;  %13701 = vmatprep.subr.bf16.mxu0 %v15718_v34  ;;  %v15777_v33 = vld [vmem:[#allocation4 + $0x88] sm:$0xff]   ;;  %v15778_v34 = vld [vmem:[#allocation4 + $0x50] sm:$0xff]  }
 0x227   :  { %13723 = vmatprep.subr.bf16.mxu1 %v15719_v35  ;;  %v15779_v35 = vld [vmem:[#allocation4 + $0xd0] sm:$0xff]  }
 0x229   :  { %13702 = vmatpush3.bf16.msra.mxu0 %v15720_v36  ;;  %v15780_v36 = vld [vmem:[#allocation4 + $0x10] sm:$0xff]  }
 0x22a   :  { %13724 = vmatpush3.bf16.msra.mxu1 %v15721_v37  ;;  %13703 = vmatprep.subr.bf16.mxu0 %v15722_v38  ;;  %v15781_v37 = vld [vmem:[#allocation4 + $0x90] sm:$0xff]   ;;  %v15782_v38 = vld [vmem:[#allocation4 + $0x58] sm:$0xff]  }
 0x22b   :  { %13725 = vmatprep.subr.bf16.mxu1 %v15723_v39  ;;  %v15783_v39 = vld [vmem:[#allocation4 + $0xd8] sm:$0xff]  }
 0x22d   :  { %13704 = vmatpush3.bf16.msra.mxu0 %v15724_v40  ;;  %v15784_v40 = vld [vmem:[#allocation4 + $0x18] sm:$0xff]  }
 0x22e   :  { %13726 = vmatpush3.bf16.msra.mxu1 %v15725_v41  ;;  %13705 = vmatprep.subr.bf16.mxu0 %v15726_v42  ;;  %v15785_v41 = vld [vmem:[#allocation4 + $0x98] sm:$0xff]   ;;  %v15786_v42 = vld [vmem:[#allocation4 + $0x60] sm:$0xff]  }
 0x22f   :  { %13727 = vmatprep.subr.bf16.mxu1 %v15727_v43  ;;  %v15787_v43 = vld [vmem:[#allocation4 + $0xe0] sm:$0xff]  }
 0x231   :  { %13706 = vmatpush3.bf16.msra.mxu0 %v15728_v44  ;;  %v15788_v44 = vld [vmem:[#allocation4 + $0x20] sm:$0xff]  }
 0x232   :  { %13728 = vmatpush3.bf16.msra.mxu1 %v15729_v45  ;;  %13735 = vmatprep.subr.bf16.mxu0 %v15734_v52  ;;  %v15789_v45 = vld [vmem:[#allocation4 + $0xa0] sm:$0xff]   ;;  %v15796_v52 = vld [vmem:[#allocation4 + $0x30] sm:$0xff]  }
 0x233   :  { %13757 = vmatprep.subr.bf16.mxu1 %v15735_v53  ;;  %v15797_v53 = vld [vmem:[#allocation4 + $0xb0] sm:$0xff]  }
 0x234   :  { %1696 = vmatmul.mubr.bf16.vlgmr.msra.gmra.mrb[8].mxu0 %v12807_v48  ;;  %v15792_v48 = vld [vmem:[#allocation4 + $0x28] sm:$0xff]  }
 0x235   :  { %1736 = vmatmul.mubr.bf16.vlgmr.msra.gmra.mrb[8].mxu1 %v12809_v50  ;;  %13736 = vmatpush3.bf16.msra.mxu0 %v15736_v54  ;;  %v15794_v50 = vld [vmem:[#allocation4 + $0x70] sm:$0xff]   ;;  %v15798_v54 = vld [vmem:[#allocation4 + $0x78] sm:$0xff]  }
 0x236   :  { %13758 = vmatpush3.bf16.msra.mxu1 %v15737_v55  ;;  %13737 = vmatprep.subr.bf16.mxu0 %v15738_v56  ;;  %v15799_v55 = vld [vmem:[#allocation4 + $0xf8] sm:$0xff]  }
 0x237   :  { %13759 = vmatprep.subr.bf16.mxu1 %v15739_v57  ;;  %1775 = vmatprep.mubr.bf16.mxu0 %v12812_v23  ;;  %v15800_v56 = vld [vmem:[#allocation4 + $0x38] sm:$0xff]   ;;  %v15823_v23 = vld [vmem:[#allocation4 + $0x1e8] sm:$0xff]  }
 0x238   :  { %1815 = vmatprep.mubr.bf16.mxu1 %v12814_v26  ;;  %v15801_v57 = vld [vmem:[#allocation4 + $0xb8] sm:$0xff]   ;;  %v15825_v26 = vld [vmem:[#allocation4 + $0x128] sm:$0xff]  }
 0x239   :  { %13738 = vmatpush3.bf16.msra.mxu0 %v15740_v58  ;;  %v1823_v58 = vld [vmem:[%s19813_s6] sm:$0xff] }
 0x23a   :  { %13760 = vmatpush3.bf16.msra.mxu1 %v15741_v59  ;;  %13739 = vmatprep.subr.bf16.mxu0 %v15742_v60  ;;  %v1831_v59 = vld [vmem:[%s19813_s6 + $0x40] sm:$0xff]  ;;  %v1824_v60 = vld [vmem:[%s19813_s6 + $0x8] sm:$0xff] }
 0x23b   :  { %13761 = vmatprep.subr.bf16.mxu1 %v15743_v61  ;;  %v1832_v61 = vld [vmem:[%s19813_s6 + $0x48] sm:$0xff] }
 0x23d   :  { %13740 = vmatpush3.bf16.msra.mxu0 %v15744_v62  ;;  %v12943_v62 = vcombine.low %v1823_v58, %v1831_v59 }
 0x23e   :  { %13762 = vmatpush3.bf16.msra.mxu1 %v15745_v63  ;;  %13741 = vmatprep.subr.bf16.mxu0 %v15746_v0  ;;  %v12944_v63 = vcombine.high %v1823_v58, %v1831_v59  ;;  %v12945_v0 = vcombine.low %v1824_v60, %v1832_v61  ;;  %v15848_v59 = vld [vmem:[#allocation4 + $0x250] sm:$0xff]  }
 0x23f   :  { %13763 = vmatprep.subr.bf16.mxu1 %v15747_v1  ;;  %v15802_v1 = vld [vmem:[#allocation4 + $0x140] sm:$0xff]  }
 0x241   :  { %13742 = vmatpush3.bf16.msra.mxu0 %v15748_v2  ;;  %v12946_v2 = vcombine.high %v1824_v60, %v1832_v61  ;;  %v15849_v60 = vld [vmem:[#allocation4 + $0x2d0] sm:$0xff]  }
 0x242   :  { %13764 = vmatpush3.bf16.msra.mxu1 %v15749_v3  ;;  %13743 = vmatprep.subr.bf16.mxu0 %v15750_v4  ;;  %v15803_v3 = vld [vmem:[#allocation4 + $0x1c0] sm:$0xff]   ;;  %v1842_v61 = vld [vmem:[%s19813_s6 + $0x98] sm:$0x11] }
 0x243   :  { %13765 = vmatprep.subr.bf16.mxu1 %v15751_v5  ;;  %v15804_v4 = vld [vmem:[#allocation4 + $0x100] sm:$0xff]  }
 0x244   :  { %v15805_v5 = vld [vmem:[#allocation4 + $0x180] sm:$0xff]  }
 0x245   :  { %13744 = vmatpush3.bf16.msra.mxu0 %v15752_v6  ;;  %v15806_v6 = vld [vmem:[#allocation4 + $0x148] sm:$0xff]  }
 0x246   :  { %13766 = vmatpush3.bf16.msra.mxu1 %v15753_v7  ;;  %13745 = vmatprep.subr.bf16.mxu0 %v15754_v8  ;;  %v15807_v7 = vld [vmem:[#allocation4 + $0x1c8] sm:$0xff]  }
 0x247   :  { %13767 = vmatprep.subr.bf16.mxu1 %v15755_v9  ;;  %v15808_v8 = vld [vmem:[#allocation4 + $0x108] sm:$0xff]  }
 0x248   :  { %v15809_v9 = vld [vmem:[#allocation4 + $0x188] sm:$0xff]  }
 0x249   :  { %13746 = vmatpush3.bf16.msra.mxu0 %v15756_v10  ;;  %v15810_v10 = vld [vmem:[#allocation4 + $0x150] sm:$0xff]  }
 0x24a   :  { %13768 = vmatpush3.bf16.msra.mxu1 %v15757_v11  ;;  %13747 = vmatprep.subr.bf16.mxu0 %v15758_v12  ;;  %v15811_v11 = vld [vmem:[#allocation4 + $0x1d0] sm:$0xff]  }
 0x24b   :  { %13769 = vmatprep.subr.bf16.mxu1 %v15759_v13  ;;  %v15812_v12 = vld [vmem:[#allocation4 + $0x110] sm:$0xff]  }
 0x24c   :  { %v15813_v13 = vld [vmem:[#allocation4 + $0x190] sm:$0xff]  }
 0x24d   :  { %13748 = vmatpush3.bf16.msra.mxu0 %v15760_v14  ;;  %v15814_v14 = vld [vmem:[#allocation4 + $0x158] sm:$0xff]  }
 0x24e   :  { %13770 = vmatpush3.bf16.msra.mxu1 %v15761_v15  ;;  %13749 = vmatprep.subr.bf16.mxu0 %v15762_v16  ;;  %v15815_v15 = vld [vmem:[#allocation4 + $0x1d8] sm:$0xff]  }
 0x24f   :  { %13771 = vmatprep.subr.bf16.mxu1 %v15763_v17  ;;  %v15816_v16 = vld [vmem:[#allocation4 + $0x118] sm:$0xff]  }
 0x250   :  { %v15817_v17 = vld [vmem:[#allocation4 + $0x198] sm:$0xff]  }
 0x251   :  { %13750 = vmatpush3.bf16.msra.mxu0 %v15764_v18  ;;  %v15818_v18 = vld [vmem:[#allocation4 + $0x160] sm:$0xff]  }
 0x252   :  { %13772 = vmatpush3.bf16.msra.mxu1 %v15765_v19  ;;  %13779 = vmatprep.subr.bf16.mxu0 %v15770_v25  ;;  %v15819_v19 = vld [vmem:[#allocation4 + $0x1e0] sm:$0xff]  }
 0x253   :  { %13807 = vmatprep.subr.bf16.mxu1 %v15771_v27 }
 0x254   :  { %1776 = vmatmul.mubr.bf16.vlgmr.msra.gmra.mrb[12].mxu0 %v12811_v22  ;;  %v15822_v22 = vld [vmem:[#allocation4 + $0x168] sm:$0xff]  }
 0x255   :  { %1816 = vmatmul.mubr.bf16.vlgmr.msra.gmra.mrb[12].mxu1 %v12813_v24  ;;  %13780 = vmatpush3.bf16.msra.mxu0 %v15772_v28  ;;  %v1839_v24 = vld [vmem:[%s19813_s6 + $0x80] sm:$0x11]  ;;  %v15826_v28 = vld [vmem:[#allocation4 + $0x1a8] sm:$0xff]  }
 0x256   :  { %13808 = vmatpush3.bf16.msra.mxu1 %v15773_v29  ;;  %13781 = vmatprep.subr.bf16.mxu0 %v15774_v30  ;;  %v12960_v25 = vcombine.high %v1839_v24, %v1839_v24  ;;  %v12959_v27 = vcombine.low %v1839_v24, %v1839_v24  ;;  %v1840_v29 = vld [vmem:[%s19813_s6 + $0x88] sm:$0x11] }
 0x257   :  { %13809 = vmatprep.subr.bf16.mxu1 %v15775_v31  ;;  %3042 = vmatprep.mubr.bf16.mxu0 %v12944_v63  ;;  %v12962_v30 = vcombine.high %v1840_v29, %v1840_v29  ;;  %v12961_v31 = vcombine.low %v1840_v29, %v1840_v29  ;;  %v15851_v63 = vld [vmem:[#allocation4 + $0x210] sm:$0xff]   ;;  %v1828_v24 = vld [vmem:[%s19813_s6 + $0x28] sm:$0xff] }
 0x258   :  { %3090 = vmatprep.mubr.bf16.mxu1 %v12946_v2  ;;  %v15854_v2 = vld [vmem:[#allocation4 + $0x258] sm:$0xff]  }
 0x259   :  { %13782 = vmatpush3.bf16.msra.mxu0 %v15776_v32  ;;  %v15830_v32 = vld [vmem:[#allocation4 + $0x170] sm:$0xff]  }
 0x25a   :  { %13810 = vmatpush3.bf16.msra.mxu1 %v15777_v33  ;;  %13783 = vmatprep.subr.bf16.mxu0 %v15778_v34  ;;  %v15831_v33 = vld [vmem:[#allocation4 + $0x1f0] sm:$0xff]  }
 0x25b   :  { %13811 = vmatprep.subr.bf16.mxu1 %v15779_v35  ;;  %v15832_v34 = vld [vmem:[#allocation4 + $0x130] sm:$0xff]  }
 0x25c   :  { %v15833_v35 = vld [vmem:[#allocation4 + $0x1b0] sm:$0xff]  }
 0x25d   :  { %13784 = vmatpush3.bf16.msra.mxu0 %v15780_v36  ;;  %v15834_v36 = vld [vmem:[#allocation4 + $0x178] sm:$0xff]  }
 0x25e   :  { %13812 = vmatpush3.bf16.msra.mxu1 %v15781_v37  ;;  %13785 = vmatprep.subr.bf16.mxu0 %v15782_v38  ;;  %v15835_v37 = vld [vmem:[#allocation4 + $0x1f8] sm:$0xff]  }
 0x25f   :  { %13813 = vmatprep.subr.bf16.mxu1 %v15783_v39  ;;  %v15836_v38 = vld [vmem:[#allocation4 + $0x138] sm:$0xff]  }
 0x260   :  { %v15837_v39 = vld [vmem:[#allocation4 + $0x1b8] sm:$0xff]  }
 0x261   :  { %13786 = vmatpush3.bf16.msra.mxu0 %v15784_v40  ;;  %v1825_v40 = vld [vmem:[%s19813_s6 + $0x10] sm:$0xff] }
 0x262   :  { %13814 = vmatpush3.bf16.msra.mxu1 %v15785_v41  ;;  %13787 = vmatprep.subr.bf16.mxu0 %v15786_v42  ;;  %v1833_v41 = vld [vmem:[%s19813_s6 + $0x50] sm:$0xff]  ;;  %v1826_v42 = vld [vmem:[%s19813_s6 + $0x18] sm:$0xff] }
 0x263   :  { %13815 = vmatprep.subr.bf16.mxu1 %v15787_v43  ;;  %v1834_v43 = vld [vmem:[%s19813_s6 + $0x58] sm:$0xff] }
 0x265   :  { %13788 = vmatpush3.bf16.msra.mxu0 %v15788_v44  ;;  %v12947_v44 = vcombine.low %v1825_v40, %v1833_v41 }
 0x266   :  { %13816 = vmatpush3.bf16.msra.mxu1 %v15789_v45  ;;  %13789 = vmatprep.subr.bf16.mxu0 %v15790_v46  ;;  %v12948_v45 = vcombine.high %v1825_v40, %v1833_v41  ;;  %v12949_v46 = vcombine.low %v1826_v42, %v1834_v43  ;;  %v15884_v41 = vld [vmem:[#allocation4 + $0x350] sm:$0xff]  }
 0x267   :  { %13817 = vmatprep.subr.bf16.mxu1 %v15791_v47  ;;  %v12950_v47 = vcombine.high %v1826_v42, %v1834_v43  ;;  %v15885_v42 = vld [vmem:[#allocation4 + $0x3d0] sm:$0xff]   ;;  %v1844_v43 = vld [vmem:[%s19813_s6 + $0xa8] sm:$0x11] }
 0x269   :  { %13790 = vmatpush3.bf16.msra.mxu0 %v15792_v48  ;;  %v15838_v48 = vld [vmem:[#allocation4 + $0x240] sm:$0xff]  }
 0x26a   :  { %13818 = vmatpush3.bf16.msra.mxu1 %v15793_v49  ;;  %13791 = vmatprep.subr.bf16.mxu0 %v15794_v50  ;;  %v15839_v49 = vld [vmem:[#allocation4 + $0x2c0] sm:$0xff]  }
 0x26b   :  { %13819 = vmatprep.subr.bf16.mxu1 %v15795_v51  ;;  %v15840_v50 = vld [vmem:[#allocation4 + $0x200] sm:$0xff]  }
 0x26c   :  { %v15841_v51 = vld [vmem:[#allocation4 + $0x280] sm:$0xff]  }
 0x26d   :  { %13792 = vmatpush3.bf16.msra.mxu0 %v15796_v52  ;;  %v15842_v52 = vld [vmem:[#allocation4 + $0x248] sm:$0xff]  }
 0x26e   :  { %13820 = vmatpush3.bf16.msra.mxu1 %v15797_v53  ;;  %13793 = vmatprep.subr.bf16.mxu0 %v15798_v54  ;;  %v15843_v53 = vld [vmem:[#allocation4 + $0x2c8] sm:$0xff]  }
 0x26f   :  { %13821 = vmatprep.subr.bf16.mxu1 %v15799_v55  ;;  %v15844_v54 = vld [vmem:[#allocation4 + $0x208] sm:$0xff]  }
 0x270   :  { %v15845_v55 = vld [vmem:[#allocation4 + $0x288] sm:$0xff]  }
 0x271   :  { %13794 = vmatpush3.bf16.msra.mxu0 %v15800_v56  ;;  %v1841_v56 = vld [vmem:[%s19813_s6 + $0x90] sm:$0x11] }
 0x272   :  { %13822 = vmatpush3.bf16.msra.mxu1 %v15801_v57  ;;  %13835 = vmatprep.subr.bf16.mxu0 %v15802_v1  ;;  %v12964_v57 = vcombine.high %v1841_v56, %v1841_v56  ;;  %v12963_v58 = vcombine.low %v1841_v56, %v1841_v56  ;;  %v15852_v1 = vld [vmem:[#allocation4 + $0x290] sm:$0xff]   ;;  %v15895_v56 = vld [vmem:[#allocation4 + $0x3e0] sm:$0xff]  }
 0x273   :  { %13863 = vmatprep.subr.bf16.mxu1 %v15803_v3  ;;  %v15855_v3 = vld [vmem:[#allocation4 + $0x2d8] sm:$0xff]  }
 0x274   :  { %3043 = vmatmul.mubr.bf16.vlgmr.msra.gmra.mrb[16].mxu0 %v12943_v62  ;;  %v12966_v62 = vcombine.high %v1842_v61, %v1842_v61 }
 0x275   :  { %3091 = vmatmul.mubr.bf16.vlgmr.msra.gmra.mrb[16].mxu1 %v12945_v0  ;;  %13836 = vmatpush3.bf16.msra.mxu0 %v15804_v4  ;;  %v12965_v0 = vcombine.low %v1842_v61, %v1842_v61  ;;  %v15856_v4 = vld [vmem:[#allocation4 + $0x218] sm:$0xff]  }
 0x276   :  { %13864 = vmatpush3.bf16.msra.mxu1 %v15805_v5  ;;  %13837 = vmatprep.subr.bf16.mxu0 %v15806_v6  ;;  %v15857_v5 = vld [vmem:[#allocation4 + $0x298] sm:$0xff]   ;;  %v15858_v6 = vld [vmem:[#allocation4 + $0x260] sm:$0xff]  }
 0x277   :  { %13865 = vmatprep.subr.bf16.mxu1 %v15807_v7  ;;  %3050 = vmatprep.mubr.bf16.mxu0 %v12960_v25  ;;  %v15859_v7 = vld [vmem:[#allocation4 + $0x2e0] sm:$0xff]  }
 0x278   :  { %3098 = vmatprep.mubr.bf16.mxu1 %v12962_v30  ;;  %v1836_v25 = vld [vmem:[%s19813_s6 + $0x68] sm:$0xff] }
 0x279   :  { %13838 = vmatpush3.bf16.msra.mxu0 %v15808_v8  ;;  %v15860_v8 = vld [vmem:[#allocation4 + $0x220] sm:$0xff]   ;;  %v12954_v29 = vcombine.high %v1828_v24, %v1836_v25 }
 0x27a   :  { %13866 = vmatpush3.bf16.msra.mxu1 %v15809_v9  ;;  %13839 = vmatprep.subr.bf16.mxu0 %v15810_v10  ;;  %v15861_v9 = vld [vmem:[#allocation4 + $0x2a0] sm:$0xff]   ;;  %v15862_v10 = vld [vmem:[#allocation4 + $0x268] sm:$0xff]  }
 0x27b   :  { %13867 = vmatprep.subr.bf16.mxu1 %v15811_v11  ;;  %v15863_v11 = vld [vmem:[#allocation4 + $0x2e8] sm:$0xff]   ;;  %v15874_v30 = vld [vmem:[#allocation4 + $0x340] sm:$0xff]  }
 0x27c   :  { %3051 = vmatmul.mubr.bf16.gmra.mrb[20].mxu0 %v12959_v27 }
 0x27d   :  { %13840 = vmatpush3.bf16.msra.mxu0 %v15812_v12  ;;  %3099 = vmatmul.mubr.bf16.gmra.mrb[20].mxu1 %v12961_v31  ;;  %v15864_v12 = vld [vmem:[#allocation4 + $0x228] sm:$0xff]   ;;  %v15875_v31 = vld [vmem:[#allocation4 + $0x3c0] sm:$0xff]  }
 0x27e   :  { %13868 = vmatpush3.bf16.msra.mxu1 %v15813_v13  ;;  %13841 = vmatprep.subr.bf16.mxu0 %v15814_v14  ;;  %v15865_v13 = vld [vmem:[#allocation4 + $0x2a8] sm:$0xff]   ;;  %v15866_v14 = vld [vmem:[#allocation4 + $0x270] sm:$0xff]  }
 0x27f   :  { %13869 = vmatprep.subr.bf16.mxu1 %v15815_v15  ;;  %3138 = vmatprep.mubr.bf16.mxu0 %v12948_v45  ;;  %v15867_v15 = vld [vmem:[#allocation4 + $0x2f0] sm:$0xff]  }
 0x280   :  { %3186 = vmatprep.mubr.bf16.mxu1 %v12950_v47  ;;  %v15887_v45 = vld [vmem:[#allocation4 + $0x310] sm:$0xff]  }
 0x281   :  { %13842 = vmatpush3.bf16.msra.mxu0 %v15816_v16  ;;  %v15868_v16 = vld [vmem:[#allocation4 + $0x230] sm:$0xff]  }
 0x282   :  { %13870 = vmatpush3.bf16.msra.mxu1 %v15817_v17  ;;  %13843 = vmatprep.subr.bf16.mxu0 %v15818_v18  ;;  %v15869_v17 = vld [vmem:[#allocation4 + $0x2b0] sm:$0xff]   ;;  %v15870_v18 = vld [vmem:[#allocation4 + $0x278] sm:$0xff]  }
 0x283   :  { %13871 = vmatprep.subr.bf16.mxu1 %v15819_v19  ;;  %v15871_v19 = vld [vmem:[#allocation4 + $0x2f8] sm:$0xff]   ;;  %v15888_v47 = vld [vmem:[#allocation4 + $0x390] sm:$0xff]  }
 0x285   :  { %13844 = vmatpush3.bf16.msra.mxu0 %v15820_v20  ;;  %v15872_v20 = vld [vmem:[#allocation4 + $0x238] sm:$0xff]  }
 0x286   :  { %13872 = vmatpush3.bf16.msra.mxu1 %v15821_v21  ;;  %13845 = vmatprep.subr.bf16.mxu0 %v15822_v22  ;;  %v15873_v21 = vld [vmem:[#allocation4 + $0x2b8] sm:$0xff]  }
 0x287   :  { %13873 = vmatprep.subr.bf16.mxu1 %v15823_v23  ;;  %v1827_v22 = vld [vmem:[%s19813_s6 + $0x20] sm:$0xff] }
 0x288   :  { %v1835_v23 = vld [vmem:[%s19813_s6 + $0x60] sm:$0xff] }
 0x289   :  { %13846 = vmatpush3.bf16.msra.mxu0 %v15825_v26  ;;  %v12951_v26 = vcombine.low %v1827_v22, %v1835_v23  ;;  %v12952_v27 = vcombine.high %v1827_v22, %v1835_v23  ;;  %v1838_v22 = vld [vmem:[%s19813_s6 + $0x78] sm:$0xff]  ;;  %v1845_v23 = vld [vmem:[%s19813_s6 + $0xb0] sm:$0x11] }
 0x28a   :  { %13874 = vmatpush3.bf16.msra.mxu1 %v15826_v28  ;;  %13847 = vmatprep.subr.bf16.mxu0 %v15830_v32  ;;  %v12953_v28 = vcombine.low %v1828_v24, %v1836_v25  ;;  %v15876_v32 = vld [vmem:[#allocation4 + $0x300] sm:$0xff]   ;;  %v1846_v24 = vld [vmem:[%s19813_s6 + $0xb8] sm:$0x11] }
 0x28b   :  { %13875 = vmatprep.subr.bf16.mxu1 %v15831_v33  ;;  %v15877_v33 = vld [vmem:[#allocation4 + $0x380] sm:$0xff]  }
 0x28d   :  { %13848 = vmatpush3.bf16.msra.mxu0 %v15832_v34  ;;  %v15878_v34 = vld [vmem:[#allocation4 + $0x348] sm:$0xff]  }
 0x28e   :  { %13876 = vmatpush3.bf16.msra.mxu1 %v15833_v35  ;;  %13849 = vmatprep.subr.bf16.mxu0 %v15834_v36  ;;  %v15879_v35 = vld [vmem:[#allocation4 + $0x3c8] sm:$0xff]  }
 0x28f   :  { %13877 = vmatprep.subr.bf16.mxu1 %v15835_v37  ;;  %v15880_v36 = vld [vmem:[#allocation4 + $0x308] sm:$0xff]  }
 0x290   :  { %v15881_v37 = vld [vmem:[#allocation4 + $0x388] sm:$0xff]  }
 0x291   :  { %13850 = vmatpush3.bf16.msra.mxu0 %v15836_v38  ;;  %v1843_v38 = vld [vmem:[%s19813_s6 + $0xa0] sm:$0x11] }
 0x292   :  { %13878 = vmatpush3.bf16.msra.mxu1 %v15837_v39  ;;  %13891 = vmatprep.subr.bf16.mxu0 %v15838_v48  ;;  %v12968_v39 = vcombine.high %v1843_v38, %v1843_v38  ;;  %v12967_v40 = vcombine.low %v1843_v38, %v1843_v38  ;;  %v15890_v48 = vld [vmem:[#allocation4 + $0x358] sm:$0xff]  }
 0x293   :  { %13919 = vmatprep.subr.bf16.mxu1 %v15839_v49  ;;  %v15891_v49 = vld [vmem:[#allocation4 + $0x3d8] sm:$0xff]  }
 0x294   :  { %3139 = vmatmul.mubr.bf16.vlgmr.msra.gmra.mrb[24].mxu0 %v12947_v44  ;;  %v12970_v44 = vcombine.high %v1844_v43, %v1844_v43 }
 0x295   :  { %3187 = vmatmul.mubr.bf16.vlgmr.msra.gmra.mrb[24].mxu1 %v12949_v46  ;;  %13892 = vmatpush3.bf16.msra.mxu0 %v15840_v50  ;;  %v12969_v46 = vcombine.low %v1844_v43, %v1844_v43  ;;  %v15892_v50 = vld [vmem:[#allocation4 + $0x318] sm:$0xff]  }
 0x296   :  { %13920 = vmatpush3.bf16.msra.mxu1 %v15841_v51  ;;  %13893 = vmatprep.subr.bf16.mxu0 %v15842_v52  ;;  %v15893_v52 = vld [vmem:[#allocation4 + $0x398] sm:$0xff]  }
 0x297   :  { %13921 = vmatprep.subr.bf16.mxu1 %v15843_v53  ;;  %3146 = vmatprep.mubr.bf16.mxu0 %v12964_v57 }
 0x298   :  { %3194 = vmatprep.mubr.bf16.mxu1 %v12966_v62  ;;  %v15897_v62 = vld [vmem:[#allocation4 + $0x3a0] sm:$0xff]  }
 0x299   :  { %13894 = vmatpush3.bf16.msra.mxu0 %v15844_v54  ;;  %v15894_v54 = vld [vmem:[#allocation4 + $0x360] sm:$0xff]  }
 0x29a   :  { %13922 = vmatpush3.bf16.msra.mxu1 %v15845_v55  ;;  %13895 = vmatprep.subr.bf16.mxu0 %v15848_v59  ;;  %v15896_v59 = vld [vmem:[#allocation4 + $0x320] sm:$0xff]  }
 0x29b   :  { %13923 = vmatprep.subr.bf16.mxu1 %v15849_v60 }
 0x29c   :  { %3147 = vmatmul.mubr.bf16.gmra.mrb[28].mxu0 %v12963_v58 }
 0x29d   :  { %13896 = vmatpush3.bf16.msra.mxu0 %v15851_v63  ;;  %3195 = vmatmul.mubr.bf16.gmra.mrb[28].mxu1 %v12965_v0  ;;  %v678_v63 = vld [vmem:[%s19814_s13] sm:$0x3f] }
 0x29e   :  { %13924 = vmatpush3.bf16.msra.mxu1 %v15852_v1  ;;  %13897 = vmatprep.subr.bf16.mxu0 %v15854_v2  ;;  %v15898_v2 = vld [vmem:[#allocation4 + $0x368] sm:$0xff]  }
 0x29f   :  { %13925 = vmatprep.subr.bf16.mxu1 %v15855_v3  ;;  %3234 = vmatprep.mubr.bf16.mxu0 %v12952_v27  ;;  %v12972_v27 = vcombine.high %v1845_v23, %v1845_v23 }
 0x2a0   :  { %3282 = vmatprep.mubr.bf16.mxu1 %v12954_v29  ;;  %v12971_v29 = vcombine.low %v1845_v23, %v1845_v23 }
 0x2a1   :  { %13898 = vmatpush3.bf16.msra.mxu0 %v15856_v4  ;;  %v15899_v4 = vld [vmem:[#allocation4 + $0x3e8] sm:$0xff]  }
 0x2a2   :  { %13926 = vmatpush3.bf16.msra.mxu1 %v15857_v5  ;;  %13899 = vmatprep.subr.bf16.mxu0 %v15858_v6 }
 0x2a3   :  { %13927 = vmatprep.subr.bf16.mxu1 %v15859_v7  ;;  %v15900_v7 = vld [vmem:[#allocation4 + $0x328] sm:$0xff]  }
 0x2a5   :  { %13900 = vmatpush3.bf16.msra.mxu0 %v15860_v8  ;;  %v15901_v8 = vld [vmem:[#allocation4 + $0x3a8] sm:$0xff]  }
 0x2a6   :  { %13928 = vmatpush3.bf16.msra.mxu1 %v15861_v9  ;;  %13901 = vmatprep.subr.bf16.mxu0 %v15862_v10  ;;  %v15902_v9 = vld [vmem:[#allocation4 + $0x370] sm:$0xff]  }
 0x2a7   :  { %13929 = vmatprep.subr.bf16.mxu1 %v15863_v11  ;;  %v15903_v10 = vld [vmem:[#allocation4 + $0x3f0] sm:$0xff]  }
 0x2a8   :  { %v15904_v11 = vld [vmem:[#allocation4 + $0x330] sm:$0xff]  }
 0x2a9   :  { %13902 = vmatpush3.bf16.msra.mxu0 %v15864_v12  ;;  %v15905_v12 = vld [vmem:[#allocation4 + $0x3b0] sm:$0xff]  }
 0x2aa   :  { %13930 = vmatpush3.bf16.msra.mxu1 %v15865_v13  ;;  %13903 = vmatprep.subr.bf16.mxu0 %v15866_v14  ;;  %v15906_v13 = vld [vmem:[#allocation4 + $0x378] sm:$0xff]  }
 0x2ab   :  { %13931 = vmatprep.subr.bf16.mxu1 %v15867_v15  ;;  %v15907_v14 = vld [vmem:[#allocation4 + $0x3f8] sm:$0xff]  }
 0x2ac   :  { %v15908_v15 = vld [vmem:[#allocation4 + $0x338] sm:$0xff]  }
 0x2ad   :  { %13904 = vmatpush3.bf16.msra.mxu0 %v15868_v16  ;;  %v15909_v16 = vld [vmem:[#allocation4 + $0x3b8] sm:$0xff]  }
 0x2ae   :  { %13932 = vmatpush3.bf16.msra.mxu1 %v15869_v17  ;;  %13905 = vmatprep.subr.bf16.mxu0 %v15870_v18  ;;  %v1829_v17 = vld [vmem:[%s19813_s6 + $0x30] sm:$0xff] }
 0x2af   :  { %13933 = vmatprep.subr.bf16.mxu1 %v15871_v19  ;;  %v1837_v18 = vld [vmem:[%s19813_s6 + $0x70] sm:$0xff]  ;;  %v1830_v19 = vld [vmem:[%s19813_s6 + $0x38] sm:$0xff] }
 0x2b0   :  { %v12957_v25 = vcombine.low %v1830_v19, %v1838_v22 }
 0x2b1   :  { %13906 = vmatpush3.bf16.msra.mxu0 %v15872_v20  ;;  %v12955_v20 = vcombine.low %v1829_v17, %v1837_v18 }
 0x2b2   :  { %13934 = vmatpush3.bf16.msra.mxu1 %v15873_v21  ;;  %13947 = vmatprep.subr.bf16.mxu0 %v15874_v30  ;;  %v12956_v21 = vcombine.high %v1829_v17, %v1837_v18  ;;  %v12973_v30 = vcombine.low %v1846_v24, %v1846_v24 }
 0x2b3   :  { %13975 = vmatprep.subr.bf16.mxu1 %v15875_v31 }
 0x2b4   :  { %3235 = vmatmul.mubr.bf16.vlgmr.msra.gmra.mrb[32].mxu0 %v12951_v26  ;;  %v12958_v26 = vcombine.high %v1830_v19, %v1838_v22 }
 0x2b5   :  { %3283 = vmatmul.mubr.bf16.vlgmr.msra.gmra.mrb[32].mxu1 %v12953_v28  ;;  %13948 = vmatpush3.bf16.msra.mxu0 %v15876_v32  ;;  %v12974_v28 = vcombine.high %v1846_v24, %v1846_v24 }
 0x2b6   :  { %13976 = vmatpush3.bf16.msra.mxu1 %v15877_v33  ;;  %13949 = vmatprep.subr.bf16.mxu0 %v15878_v34 }
 0x2b7   :  { %13977 = vmatprep.subr.bf16.mxu1 %v15879_v35  ;;  %3242 = vmatprep.mubr.bf16.mxu0 %v12968_v39 }
 0x2b8   :  { %3290 = vmatprep.mubr.bf16.mxu1 %v12970_v44 }
 0x2b9   :  { %13950 = vmatpush3.bf16.msra.mxu0 %v15880_v36 }
 0x2ba   :  { %13978 = vmatpush3.bf16.msra.mxu1 %v15881_v37  ;;  %13951 = vmatprep.subr.bf16.mxu0 %v15884_v41 }
 0x2bb   :  { %13979 = vmatprep.subr.bf16.mxu1 %v15885_v42 }
 0x2bc   :  { %3243 = vmatmul.mubr.bf16.gmra.mrb[36].mxu0 %v12967_v40 }
 0x2bd   :  { %13952 = vmatpush3.bf16.msra.mxu0 %v15887_v45  ;;  %3291 = vmatmul.mubr.bf16.gmra.mrb[36].mxu1 %v12969_v46 }
 0x2be   :  { %13980 = vmatpush3.bf16.msra.mxu1 %v15888_v47  ;;  %13953 = vmatprep.subr.bf16.mxu0 %v15890_v48 }
 0x2bf   :  { %13981 = vmatprep.subr.bf16.mxu1 %v15891_v49  ;;  %3330 = vmatprep.mubr.bf16.mxu0 %v12956_v21  ;;  %v2105_v21 = vld [vmem:[%s19815_s19 + $0x10] sm:$0x3] }
 0x2c0   :  { %3378 = vmatprep.mubr.bf16.mxu1 %v12958_v26 }
 0x2c1   :  { %13954 = vmatpush3.bf16.msra.mxu0 %v15892_v50 }
 0x2c2   :  { %13982 = vmatpush3.bf16.msra.mxu1 %v15893_v52  ;;  %13955 = vmatprep.subr.bf16.mxu0 %v15894_v54 }
 0x2c3   :  { %13983 = vmatprep.subr.bf16.mxu1 %v15895_v56 }
 0x2c5   :  { %13956 = vmatpush3.bf16.msra.mxu0 %v15896_v59 }
 0x2c6   :  { %13984 = vmatpush3.bf16.msra.mxu1 %v15897_v62  ;;  %13957 = vmatprep.subr.bf16.mxu0 %v15898_v2 }
 0x2c7   :  { %v13619_v51 = vpop.f32.mrb[0].mxu0  ;;  %13985 = vmatprep.subr.bf16.mxu1 %v15899_v4 }
 0x2c8   :  { %v13641_v53 = vpop.f32.mrb[0].mxu1  ;;  %v13620_v55 = vpop.f32.mrb[1].mxu0 }
 0x2c9   :  { %v13621_v57 = vadd.f32 %v13620_v55, %v13619_v51  ;;  %v13642_v58 = vpop.f32.mrb[1].mxu1  ;;  %v13622_v61 = vpop.f32.mrb[2].mxu0  ;;  %13958 = vmatpush3.bf16.msra.mxu0 %v15900_v7  ;;  %v2104_v7 = vld [vmem:[%s19815_s19 + $0x8] sm:$0xff] }
 0x2ca   :  { %v13643_v60 = vadd.f32 %v13642_v58, %v13641_v53  ;;  %v13644_v0 = vpop.f32.mrb[2].mxu1  ;;  %v13623_v3 = vpop.f32.mrb[3].mxu0  ;;  %13986 = vmatpush3.bf16.msra.mxu1 %v15901_v8  ;;  %13959 = vmatprep.subr.bf16.mxu0 %v15902_v9 }
 0x2cb   :  { %v1538_v1 = vadd.f32 %v13621_v57, %v678_v63  ;;  %v13645_v5 = vpop.f32.mrb[3].mxu1  ;;  %13987 = vmatprep.subr.bf16.mxu1 %v15903_v10  ;;  %v2103_v3 = vld [vmem:[%s19815_s19] sm:$0xff] }
 0x2cd   :  { %v1578_v6 = vadd.f32 %v13643_v60, %v1538_v1  ;;  %13960 = vmatpush3.bf16.msra.mxu0 %v15904_v11 }
 0x2ce   :  { %13988 = vmatpush3.bf16.msra.mxu1 %v15905_v12  ;;  %13961 = vmatprep.subr.bf16.mxu0 %v15906_v13 }
 0x2cf   :  { %13989 = vmatprep.subr.bf16.mxu1 %v15907_v14 }
 0x2d1   :  { %13962 = vmatpush3.bf16.msra.mxu0 %v15908_v15 }
 0x2d2   :  { %13990 = vmatpush3.bf16.msra.mxu1 %v15909_v16 }
 0x2d4   :  { %3331 = vmatmul.mubr.bf16.vlgmr.msra.gmra.mrb[40].mxu0 %v12955_v20 }
 0x2d5   :  { %3379 = vmatmul.mubr.bf16.vlgmr.msra.gmra.mrb[40].mxu1 %v12957_v25  ;;  %3338 = vmatprep.mubr.bf16.mxu0 %v12972_v27 }
 0x2d6   :  { %3386 = vmatprep.mubr.bf16.mxu1 %v12974_v28 }
 0x2dc   :  { %3339 = vmatmul.mubr.bf16.gmra.mrb[44].mxu0 %v12971_v29 }
 0x2dd   :  { %3387 = vmatmul.mubr.bf16.gmra.mrb[44].mxu1 %v12973_v30 }
 0x2e7   :  { %v13663_v31 = vpop.f32.mrb[4].mxu0 }
 0x2e8   :  { %v13685_v32 = vpop.f32.mrb[4].mxu1  ;;  %v13664_v33 = vpop.f32.mrb[5].mxu0 }
 0x2e9   :  { %v13686_v34 = vpop.f32.mrb[5].mxu1  ;;  %v13665_v35 = vadd.f32 %v13664_v33, %v13663_v31  ;;  %v13666_v37 = vpop.f32.mrb[6].mxu0 }
 0x2ea   :  { %v13687_v36 = vadd.f32 %v13686_v34, %v13685_v32  ;;  %v13688_v38 = vpop.f32.mrb[6].mxu1  ;;  %v13667_v39 = vpop.f32.mrb[7].mxu0 }
 0x2eb   :  { %v13689_v40 = vpop.f32.mrb[7].mxu1  ;;  %v1618_v41 = vadd.f32 %v13665_v35, %v1578_v6 }
 0x2ed   :  { %v1658_v42 = vadd.f32 %v13687_v36, %v1618_v41 }
 0x307   :  { %v13707_v43 = vpop.f32.mrb[8].mxu0 }
 0x308   :  { %v13729_v44 = vpop.f32.mrb[8].mxu1  ;;  %v13708_v45 = vpop.f32.mrb[9].mxu0 }
 0x309   :  { %v13709_v46 = vadd.f32 %v13708_v45, %v13707_v43  ;;  %v13730_v47 = vpop.f32.mrb[9].mxu1  ;;  %v13710_v48 = vpop.f32.mrb[10].mxu0 }
 0x30a   :  { %v13731_v49 = vadd.f32 %v13730_v47, %v13729_v44  ;;  %v13732_v50 = vpop.f32.mrb[10].mxu1  ;;  %v13711_v51 = vpop.f32.mrb[11].mxu0 }
 0x30b   :  { %v1698_v52 = vadd.f32 %v13709_v46, %v1658_v42  ;;  %v13733_v53 = vpop.f32.mrb[11].mxu1 }
 0x30d   :  { %v1738_v54 = vadd.f32 %v13731_v49, %v1698_v52 }
 0x327   :  { %v13751_v55 = vpop.f32.mrb[12].mxu0 }
 0x328   :  { %v13773_v56 = vpop.f32.mrb[12].mxu1  ;;  %v13752_v57 = vpop.f32.mrb[13].mxu0 }
 0x329   :  { %v13753_v58 = vadd.f32 %v13752_v57, %v13751_v55  ;;  %v13774_v59 = vpop.f32.mrb[13].mxu1  ;;  %v13754_v60 = vpop.f32.mrb[14].mxu0 }
 0x32a   :  { %v13775_v61 = vadd.f32 %v13774_v59, %v13773_v56  ;;  %v13776_v62 = vpop.f32.mrb[14].mxu1  ;;  %v13755_v63 = vpop.f32.mrb[15].mxu0 }
 0x32b   :  { %v1778_v0 = vadd.f32 %v13753_v58, %v1738_v54  ;;  %v13777_v1 = vpop.f32.mrb[15].mxu1 }
 0x32d   :  { %v17763_v2 = vadd.f32 %v13775_v61, %v1778_v0 }
 0x347   :  { %v13795_v4 = vpop.f32.mrb[16].mxu0 }
 0x348   :  { %v13823_v5 = vpop.f32.mrb[16].mxu1  ;;  %v13796_v6 = vpop.f32.mrb[17].mxu0 }
 0x349   :  { %v13797_v8 = vadd.f32 %v13796_v6, %v13795_v4  ;;  %v13824_v9 = vpop.f32.mrb[17].mxu1  ;;  %v13798_v10 = vpop.f32.mrb[18].mxu0 }
 0x34a   :  { %v13825_v11 = vadd.f32 %v13824_v9, %v13823_v5  ;;  %v13826_v12 = vpop.f32.mrb[18].mxu1  ;;  %v13799_v13 = vpop.f32.mrb[19].mxu0 }
 0x34b   :  { %v3045_v14 = vadd.f32 %v13797_v8, %v2103_v3  ;;  %v13800_v15 = vadd.f32 %v13799_v13, %v13798_v10  ;;  %v13827_v16 = vpop.f32.mrb[19].mxu1 }
 0x34c   :  { %v13828_v17 = vadd.f32 %v13827_v16, %v13826_v12 }
 0x34d   :  { %v3093_v18 = vadd.f32 %v13825_v11, %v3045_v14  ;;  %v3048_v19 = vadd.f32 %v13800_v15, %v2104_v7 }
 0x34f   :  { %v3096_v20 = vadd.f32 %v13828_v17, %v3048_v19  ;;  %v13801_v22 = vpop.f32.mrb[20].mxu0 }
 0x350   :  { %v13802_v23 = vpop.f32.mrb[21].mxu0  ;;  %v13829_v26 = vpop.f32.mrb[20].mxu1 }
 0x351   :  { %v13803_v24 = vadd.f32 %v13802_v23, %v13801_v22  ;;  %v13804_v25 = vpop.f32.mrb[22].mxu0  ;;  %v13830_v28 = vpop.f32.mrb[21].mxu1 }
 0x352   :  { %v13805_v27 = vpop.f32.mrb[23].mxu0  ;;  %v13831_v30 = vadd.f32 %v13830_v28, %v13829_v26  ;;  %v13832_v31 = vpop.f32.mrb[22].mxu1 }
 0x353   :  { %v3053_v29 = vadd.f32 %v13803_v24, %v2105_v21  ;;  %v13833_v32 = vpop.f32.mrb[23].mxu1 }
 0x355   :  { %v3101_v33 = vadd.f32 %v13831_v30, %v3053_v29 }
 0x367   :  { %v13851_v34 = vpop.f32.mrb[24].mxu0 }
 0x368   :  { %v13879_v35 = vpop.f32.mrb[24].mxu1  ;;  %v13852_v36 = vpop.f32.mrb[25].mxu0 }
 0x369   :  { %v13880_v37 = vpop.f32.mrb[25].mxu1  ;;  %v13853_v38 = vadd.f32 %v13852_v36, %v13851_v34  ;;  %v13854_v40 = vpop.f32.mrb[26].mxu0 }
 0x36a   :  { %v13881_v39 = vadd.f32 %v13880_v37, %v13879_v35  ;;  %v13882_v41 = vpop.f32.mrb[26].mxu1  ;;  %v13855_v42 = vpop.f32.mrb[27].mxu0 }
 0x36b   :  { %v13883_v43 = vpop.f32.mrb[27].mxu1  ;;  %v3141_v44 = vadd.f32 %v13853_v38, %v3093_v18  ;;  %v13856_v45 = vadd.f32 %v13855_v42, %v13854_v40 }
 0x36c   :  { %v13884_v46 = vadd.f32 %v13883_v43, %v13882_v41 }
 0x36d   :  { %v3189_v47 = vadd.f32 %v13881_v39, %v3141_v44  ;;  %v3144_v48 = vadd.f32 %v13856_v45, %v3096_v20 }
 0x36f   :  { %v3192_v49 = vadd.f32 %v13884_v46, %v3144_v48  ;;  %v13857_v50 = vpop.f32.mrb[28].mxu0 }
 0x370   :  { %v13858_v51 = vpop.f32.mrb[29].mxu0  ;;  %v13885_v54 = vpop.f32.mrb[28].mxu1 }
 0x371   :  { %v13859_v52 = vadd.f32 %v13858_v51, %v13857_v50  ;;  %v13860_v53 = vpop.f32.mrb[30].mxu0  ;;  %v13886_v57 = vpop.f32.mrb[29].mxu1 }
 0x372   :  { %v13861_v55 = vpop.f32.mrb[31].mxu0  ;;  %v13887_v58 = vadd.f32 %v13886_v57, %v13885_v54  ;;  %v13888_v59 = vpop.f32.mrb[30].mxu1 }
 0x373   :  { %v3149_v56 = vadd.f32 %v13859_v52, %v3101_v33  ;;  %v13889_v60 = vpop.f32.mrb[31].mxu1 }
 0x375   :  { %v3197_v61 = vadd.f32 %v13887_v58, %v3149_v56 }
 0x387   :  { %v13907_v62 = vpop.f32.mrb[32].mxu0 }
 0x388   :  { %v13935_v63 = vpop.f32.mrb[32].mxu1  ;;  %v13908_v0 = vpop.f32.mrb[33].mxu0 }
 0x389   :  { %v13936_v1 = vpop.f32.mrb[33].mxu1  ;;  %v13909_v3 = vadd.f32 %v13908_v0, %v13907_v62  ;;  %v13910_v5 = vpop.f32.mrb[34].mxu0  ;;  %v15919_v62 = vld [vmem:[%s19816_s28 + $0x1c] ss:$12 sps:$4 sm:$0xff]   ;;  %v15917_v0 = vld [vmem:[%s19816_s28 + $0x18] ss:$12 sps:$4 sm:$0xff]  }
 0x38a   :  { %v13937_v4 = vadd.f32 %v13936_v1, %v13935_v63  ;;  %v13938_v6 = vpop.f32.mrb[34].mxu1  ;;  %v13911_v7 = vpop.f32.mrb[35].mxu0  ;;  %v15920_v63 = vld [vmem:[%s19816_s28 + $0x8] ss:$12 sps:$4 sm:$0xff]  }
 0x38b   :  { %v13939_v8 = vpop.f32.mrb[35].mxu1  ;;  %v3237_v9 = vadd.f32 %v13909_v3, %v3189_v47  ;;  %v13912_v10 = vadd.f32 %v13911_v7, %v13910_v5  ;;  %14451 = vmatprep.subr.bf16.mxu1 %v15920_v63 }
 0x38c   :  { %v13940_v11 = vadd.f32 %v13939_v8, %v13938_v6  ;;  %14452 = vmatpush3.bf16.msra.mxu1 %v15920_v63 }
 0x38d   :  { %v3285_v12 = vadd.f32 %v13937_v4, %v3237_v9  ;;  %v3240_v13 = vadd.f32 %v13912_v10, %v3192_v49 }
 0x38f   :  { %v3288_v14 = vadd.f32 %v13940_v11, %v3240_v13  ;;  %v13913_v15 = vpop.f32.mrb[36].mxu0 }
 0x390   :  { %v13914_v16 = vpop.f32.mrb[37].mxu0  ;;  %v13941_v19 = vpop.f32.mrb[36].mxu1 }
 0x391   :  { %v13915_v17 = vadd.f32 %v13914_v16, %v13913_v15  ;;  %v13916_v18 = vpop.f32.mrb[38].mxu0  ;;  %v13942_v22 = vpop.f32.mrb[37].mxu1  ;;  %v15924_v15 = vld [vmem:[%s19816_s28 + $0x20] ss:$12 sps:$4 sm:$0xff]   ;;  %v15921_v16 = vld [vmem:[%s19816_s28 + $0x30] ss:$12 sps:$4 sm:$0xff]  }
 0x392   :  { %v13917_v20 = vpop.f32.mrb[39].mxu0  ;;  %v13943_v23 = vadd.f32 %v13942_v22, %v13941_v19  ;;  %v13944_v24 = vpop.f32.mrb[38].mxu1  ;;  %14453 = vmatprep.subr.bf16.mxu1 %v15924_v15  ;;  %v15928_v18 = vld [vmem:[%s19816_s28 + $0x38] ss:$12 sps:$4 sm:$0xff]   ;;  %v15925_v19 = vld [vmem:[%s19816_s28 + $0x48] ss:$12 sps:$4 sm:$0xff]  }
 0x393   :  { %v3245_v21 = vadd.f32 %v13915_v17, %v3197_v61  ;;  %v13945_v25 = vpop.f32.mrb[39].mxu1  ;;  %v15916_v61 = vld [vmem:[%s19816_s28 + $0x4] ss:$12 sps:$4 sm:$0xff]   ;;  %14454 = vmatpush3.bf16.msra.mxu1 %v15924_v15  ;;  %v15927_v17 = vld [vmem:[%s19816_s28 + $0x4c] ss:$12 sps:$4 sm:$0xff]  }
 0x394   :  { %3714 = vmatprep.subr.bf16.mxu0 %v15916_v61  ;;  %14455 = vmatprep.subr.bf16.mxu1 %v15928_v18  ;;  %v15931_v20 = vld [vmem:[%s19816_s28 + $0x64] ss:$12 sps:$4 sm:$0xff]   ;;  %v15929_v22 = vld [vmem:[%s19816_s28 + $0x60] ss:$12 sps:$4 sm:$0xff]   ;;  %v15936_v24 = vld [vmem:[%s19816_s28 + $0x68] ss:$12 sps:$4 sm:$0xff]   ;;  %v3407_v61 = vlaneseq }
 0x395   :  { %v3293_v26 = vadd.f32 %v13943_v23, %v3245_v21  ;;  %v15932_v21 = vld [vmem:[%s19816_s28 + $0x50] ss:$12 sps:$4 sm:$0xff]   ;;  %v15933_v25 = vld [vmem:[%s19816_s28 + $0x78] ss:$12 sps:$4 sm:$0xff]  }
 0x396   :  { %v15935_v23 = vld [vmem:[%s19816_s28 + $0x7c] ss:$12 sps:$4 sm:$0xff]  }
 0x397   :  { %14456 = vmatpush3.bf16.msra.mxu1 %v15928_v18 }
 0x398   :  { %14457 = vmatprep.subr.bf16.mxu1 %v15932_v21 }
 0x39b   :  { %14458 = vmatpush3.bf16.msra.mxu1 %v15932_v21 }
 0x39c   :  { %14459 = vmatprep.subr.bf16.mxu1 %v15936_v24 }
 0x39f   :  { %14460 = vmatpush3.bf16.msra.mxu1 %v15936_v24 }
 0x3a7   :  { %v13963_v27 = vpop.f32.mrb[40].mxu0 }
 0x3a8   :  { %v13991_v28 = vpop.f32.mrb[40].mxu1  ;;  %v13964_v29 = vpop.f32.mrb[41].mxu0 }
 0x3a9   :  { %v13965_v30 = vadd.f32 %v13964_v29, %v13963_v27  ;;  %v13992_v31 = vpop.f32.mrb[41].mxu1  ;;  %v13966_v32 = vpop.f32.mrb[42].mxu0  ;;  %v15940_v27 = vld [vmem:[%s19816_s28 + $0x80] ss:$12 sps:$4 sm:$0xff]  }
 0x3aa   :  { %v13993_v33 = vadd.f32 %v13992_v31, %v13991_v28  ;;  %v13994_v34 = vpop.f32.mrb[42].mxu1  ;;  %v13967_v35 = vpop.f32.mrb[43].mxu0  ;;  %v15937_v28 = vld [vmem:[%s19816_s28 + $0x90] ss:$12 sps:$4 sm:$0xff]   ;;  %14461 = vmatprep.subr.bf16.mxu1 %v15940_v27  ;;  %v15943_v29 = vld [vmem:[%s19816_s28 + $0xac] ss:$12 sps:$4 sm:$0xff]  }
 0x3ab   :  { %v3333_v36 = vadd.f32 %v13965_v30, %v3285_v12  ;;  %v13968_v37 = vadd.f32 %v13967_v35, %v13966_v32  ;;  %v13995_v38 = vpop.f32.mrb[43].mxu1  ;;  %14462 = vmatpush3.bf16.msra.mxu1 %v15940_v27  ;;  %v15944_v30 = vld [vmem:[%s19816_s28 + $0x98] ss:$12 sps:$4 sm:$0xff]   ;;  %v15941_v31 = vld [vmem:[%s19816_s28 + $0xa8] ss:$12 sps:$4 sm:$0xff]   ;;  %v17259_v32 = vmov 0  }
 0x3ac   :  { %v13996_v39 = vadd.f32 %v13995_v38, %v13994_v34  ;;  %14463 = vmatprep.subr.bf16.mxu1 %v15944_v30  ;;  %3746 = vmatprep.mubr.bf16.mxu0 %v17259_v32 }
 0x3ad   :  { %v3381_v40 = vadd.f32 %v13993_v33, %v3333_v36  ;;  %v3336_v41 = vadd.f32 %v13968_v37, %v3288_v14  ;;  %v15923_v14 = vld [vmem:[%s19816_s28 + $0x34] ss:$12 sps:$4 sm:$0xff]   ;;  %v15945_v33 = vld [vmem:[%s19816_s28 + $0xb0] ss:$12 sps:$4 sm:$0xff]   ;;  %15624 = vset.pattern.permute.xlu0 %v17259_v32  ;;  %15625 = vset.pattern.permute.xlu1 %v17259_v32 }
 0x3af   :  { %v3398_v42 = vrot.slane %v3381_v40, 2  ;;  %v3384_v43 = vadd.f32 %v13996_v39, %v3336_v41  ;;  %v13969_v44 = vpop.f32.mrb[44].mxu0  ;;  %14464 = vmatpush3.bf16.msra.mxu1 %v15944_v30 }
 0x3b0   :  { %v13970_v45 = vpop.f32.mrb[45].mxu0  ;;  %v13997_v46 = vpop.f32.mrb[44].mxu1  ;;  %14465 = vmatprep.subr.bf16.mxu1 %v15945_v33 }
 0x3b1   :  { %v3399_v47 = vrot.slane %v3384_v43, 2  ;;  %v13971_v48 = vadd.f32 %v13970_v45, %v13969_v44  ;;  %v13972_v49 = vpop.f32.mrb[46].mxu0  ;;  %v13998_v50 = vpop.f32.mrb[45].mxu1  ;;  %v17770_v51 = vsel %vm3397_vm0, %v17763_v2, %v3398_v42  ;;  %v15914_v2 = vld [vmem:[%s19816_s28] ss:$12 sps:$4 sm:$0xff]  }
 0x3b2   :  { %v13999_v52 = vadd.f32 %v13998_v50, %v13997_v46  ;;  %3483 = vadd.xlane.f32.xlu0 %v17770_v51  ;;  %v13973_v53 = vpop.f32.mrb[47].mxu0  ;;  %v14000_v54 = vpop.f32.mrb[46].mxu1  ;;  %3715 = vmatpush1.bf16.msra.mxu0 %v15914_v2  ;;  %v13103_v45 = vld [vmem:[%s19817_s14] ss:$0 sm:$0xff] }
 0x3b3   :  { %v3341_v55 = vadd.f32 %v13971_v48, %v3293_v26  ;;  %v14001_v56 = vpop.f32.mrb[47].mxu1  ;;  %v17774_v57 = vsel %vm3397_vm0, %v3398_v42, %v3399_v47  ;;  %3716 = vmatprep.subr.bf16.mxu0 %v15919_v62  ;;  %v15939_v26 = vld [vmem:[%s19816_s28 + $0x94] ss:$12 sps:$4 sm:$0xff]   ;;  %14466 = vmatpush3.bf16.msra.mxu1 %v15945_v33  ;;  %v17830_v62 = vshrl.u32 %v3407_v61, 7 }
 0x3b4   :  { %v13104_v49 = vld [vmem:[%s19818_s2] ss:$0 sm:$0xff] }
 0x3b5   :  { %v3389_v58 = vadd.f32 %v13999_v52, %v3341_v55  ;;  %v17833_v63 = vsub.s32 0, %v17830_v62  ;;  %vm3416_vm3 = vcmp.lt.s32.totalorder %v17830_v62, 3  ;;  %vm3422_vm4 = vcmp.ge.s32.totalorder %v17830_v62, 6 }
 0x3b6   :  { %3485 = vadd.xlane.f32.xlu0 %v17774_v57  ;;  %3717 = vmatpush1.bf16.msra.mxu0 %v15917_v0  ;;  %v3569_v0 = vld [vmem:[#allocation7] sm:$0x7]  ;;  %vm17969_vm9 = vmor %vm3416_vm3, %vm3422_vm4  ;;  %vm3444_vm14 = vcmp.ge.s32.totalorder %v17830_v62, 3  ;;  %vm3447_vm15 = vcmp.lt.s32.totalorder %v17830_v62, 6 }
 0x3b7   :  { %v3401_v59 = vrot.slane %v3389_v58, 2  ;;  %3718 = vmatprep.subr.bf16.mxu0 %v15923_v14  ;;  %vm3450_vm4 = vmand %vm3444_vm14, %vm3447_vm15 }
 0x3b9   :  { %v17778_v60 = vsel %vm3397_vm0, %v3399_v47, %v3401_v59 }
 0x3ba   :  { %3487 = vadd.xlane.f32.xlu1 %v17778_v60  ;;  %3719 = vmatpush1.bf16.msra.mxu0 %v15921_v16 }
 0x3bb   :  { %3720 = vmatprep.subr.bf16.mxu0 %v15927_v17 }
 0x3be   :  { %3721 = vmatpush1.bf16.msra.mxu0 %v15925_v19 }
 0x3bf   :  { %3722 = vmatprep.subr.bf16.mxu0 %v15931_v20 }
 0x3c2   :  { %3723 = vmatpush1.bf16.msra.mxu0 %v15929_v22 }
 0x3c3   :  { %3724 = vmatprep.subr.bf16.mxu0 %v15935_v23 }
 0x3c6   :  { %3725 = vmatpush1.bf16.msra.mxu0 %v15933_v25 }
 0x3c7   :  { %3726 = vmatprep.subr.bf16.mxu0 %v15939_v26 }
 0x3ca   :  { %3727 = vmatpush1.bf16.msra.mxu0 %v15937_v28 }
 0x3cb   :  { %3728 = vmatprep.subr.bf16.mxu0 %v15943_v29 }
 0x3ce   :  { %3729 = vmatpush1.bf16.msra.mxu0 %v15941_v31 }
 0x43f   :  { %v3484_v1 = vpop.xlane.xlu0 %3483 }
 0x440   :  { %v3490_v3 = vmul.f32 0.0078125, %v3484_v1  ;;  %v17836_v1 = vsub.s32 1, %v17830_v62 }
 0x442   :  { %v17787_v4 = vsub.f32 %v17770_v51, %v3490_v3  ;;  %v3574_v3 = vrot.slane %v3569_v0, %v17833_v63 }
 0x443   :  { %v3486_v5 = vpop.xlane.xlu0 %3485 }
 0x444   :  { %v3491_v6 = vmul.f32 0.0078125, %v3486_v5  ;;  %v3496_v7 = vmul.f32 %v17787_v4, %v17787_v4  ;;  %v3578_v5 = vrot.slane %v3569_v0, %v17836_v1 }
 0x446   :  { %3499 = vadd.xlane.f32.xlu1 %v3496_v7  ;;  %v17792_v8 = vsub.f32 %v17774_v57, %v3491_v6  ;;  %v17841_v6 = vsub.s32 2, %v17830_v62 }
 0x447   :  { %v3488_v9 = vpop.xlane.xlu1 %3487 }
 0x448   :  { %v3492_v10 = vmul.f32 0.0078125, %v3488_v9  ;;  %v3497_v11 = vmul.f32 %v17792_v8, %v17792_v8  ;;  %v3582_v14 = vrot.slane %v3569_v0, %v17841_v6 }
 0x44a   :  { %3501 = vadd.xlane.f32.xlu0 %v3497_v11  ;;  %v17797_v12 = vsub.f32 %v17778_v60, %v3492_v10 }
 0x44c   :  { %v3498_v13 = vmul.f32 %v17797_v12, %v17797_v12 }
 0x44e   :  { %3503 = vadd.xlane.f32.xlu1 %v3498_v13 }
 0x4d3   :  { %v3500_v34 = vpop.xlane.xlu1 %3499 }
 0x4d4   :  { %v3505_v35 = vmul.f32 0.0078125, %v3500_v34 }
 0x4d6   :  { %v3508_v36 = vadd.f32 1e-05, %v3505_v35 }
 0x4d7   :  { %v3502_v37 = vpop.xlane.xlu0 %3501 }
 0x4d8   :  { %16290 = vrsqrt.f32 %v3508_v36  ;;  %v3506_v38 = vmul.f32 0.0078125, %v3502_v37 }
 0x4da   :  { %v3509_v39 = vadd.f32 1e-05, %v3506_v38 }
 0x4db   :  { %v3504_v40 = vpop.xlane.xlu1 %3503 }
 0x4dc   :  { %16292 = vrsqrt.f32 %v3509_v39  ;;  %v3507_v41 = vmul.f32 0.0078125, %v3504_v40 }
 0x4de   :  { %v3510_v42 = vadd.f32 1e-05, %v3507_v41 }
 0x4e0   :  { %16294 = vrsqrt.f32 %v3510_v42 }
 0x4e2   :  { %v16291_v43 = vpop.eup %16290 }
 0x4e3   :  { %v3514_v44 = vmul.f32 %v16291_v43, %v17787_v4 }
 0x4e5   :  { %v3523_v47 = vmul.f32 %v13103_v45, %v3514_v44 }
 0x4e6   :  { %v16293_v46 = vpop.eup %16292 }
 0x4e7   :  { %v3515_v48 = vmul.f32 %v16293_v46, %v17792_v8  ;;  %v3532_v54 = vadd.f32 %v13104_v49, %v3523_v47 }
 0x4e9   :  { %v3524_v50 = vmul.f32 %v13103_v45, %v3515_v48 }
 0x4ea   :  { %v16295_v52 = vpop.eup %16294 }
 0x4eb   :  { %v3516_v53 = vmul.f32 %v16295_v52, %v17797_v12  ;;  %v3533_v55 = vadd.f32 %v13104_v49, %v3524_v50 }
 0x4ed   :  { %v3535_v56 = vpack.c.bf16 %v3533_v55, %v3532_v54  ;;  %v3525_v58 = vmul.f32 %v13103_v45, %v3516_v53 }
 0x4ef   :  { %3747 = vmatmul.mubr.bf16.vlgmr.msra.gmra.mrb[48].mxu0 %v3535_v56  ;;  %14467 = vmatprep.mubr.bf16.mxu1 %v3535_v56  ;;  %v3534_v59 = vadd.f32 %v13104_v49, %v3525_v58 }
 0x4f0   :  { %3756 = vmatprep.mubr.bf16.mxu0 %v17259_v32 }
 0x4f1   :  { %v3536_v2 = vpack.c.bf16 %v3534_v59, %v3534_v59 }
 0x4f3   :  { %14468 = vmatmul.mubr.bf16.vlgmr.msra.gmra.mrb[48].mxu1 %v3536_v2 }
 0x4f7   :  { %3757 = vmatmul.mubr.bf16.gmra.mrb[52].mxu0 %v3536_v2 }
 0x5c2   :  { %v3748_v4 = vpop.f32.mrb[48].mxu0 }
 0x5c3   :  { %v3750_v7 = vpop.f32.mrb[49].mxu0  ;;  %v3749_v9 = vadd.f32 %v3748_v4, %v3574_v3 }
 0x5c4   :  { %v3752_v8 = vpop.f32.mrb[50].mxu0  ;;  %v3751_v12 = vadd.f32 %v3750_v7, %v3578_v5 }
 0x5c5   :  { %v3753_v10 = vadd.f32 %v3752_v8, %v3574_v3  ;;  %v3754_v11 = vpop.f32.mrb[51].mxu0 }
 0x5c6   :  { %v3755_v13 = vadd.f32 %v3754_v11, %v3578_v5  ;;  %v14469_v15 = vpop.f32.mrb[48].mxu1 }
 0x5c7   :  { %v3799_v16 = vpop.f32.mrb[49].mxu1  ;;  %v3879_v17 = vpack.c.bf16 %v3753_v10, %v3749_v9  ;;  %v15209_v18 = vpack.i.bf16 %v3753_v10, %v3749_v9  ;;  %v17872_v40 = vadd.f32 %v14469_v15, %v3582_v14 }
 0x5c8   :  { %v14470_v19 = vpop.f32.mrb[50].mxu1  ;;  %v15114_v20 = vpack.i.bf16 %v3755_v13, %v3751_v12  ;;  %v3961_v21 = vpack.c.bf16 %v3755_v13, %v3751_v12  ;;  %v3800_v23 = vadd.f32 %v3799_v16, %v3582_v14 }
 0x5c9   :  { %v3802_v22 = vpop.f32.mrb[51].mxu1  ;;  %14475 = vmatprep.mubr.msk.bf16.mxu0 %vm19789_vm1, %v3879_v17 }
 0x5ca   :  { %v3803_v24 = vadd.f32 %v3802_v22, %v3582_v14  ;;  %v3758_v25 = vpop.f32.mrb[52].mxu0  ;;  %15115 = vrot.lane.b32.xlu0 %v15114_v20, %s17260_s20  ;;  %14971 = vmatprep.subr.msk.bf16.mxu0 %vm19789_vm1, %v3961_v21  ;;  %v4067_v26 = vsel %vm19789_vm1, %v3961_v21, 0 }
 0x5cb   :  { %v3759_v27 = vadd.f32 %v3758_v25, %v3574_v3  ;;  %v3760_v28 = vpop.f32.mrb[53].mxu0  ;;  %14472 = vmatpush3.bf16.xpose.msra.mxu0 %v4067_v26 }
 0x5cc   :  { %v3761_v29 = vadd.f32 %v3760_v28, %v3578_v5  ;;  %v3762_v30 = vpop.f32.mrb[54].mxu0  ;;  %v17848_v31 = vpack.i.bf16 %v3803_v24, %v3800_v23  ;;  %v17853_v37 = vpack.c.bf16 %v3803_v24, %v3800_v23 }
 0x5cd   :  { %v3763_v33 = vpop.f32.mrb[55].mxu0  ;;  %v15129_v34 = vpack.i.bf16 %v3759_v27, %v3753_v10  ;;  %v3880_v39 = vpack.c.bf16 %v3759_v27, %v3759_v27 }
 0x5ce   :  { %15135 = vrot.lane.b32.xlu0 %v15114_v20, %s17261_s0  ;;  %v3962_v35 = vpack.c.bf16 %v3761_v29, %v3761_v29  ;;  %v15119_v36 = vpack.i.bf16 %v3749_v9, %v3761_v29 }
 0x5d0   :  { %14972 = vmatprep.subr.msk.bf16.mxu0 %vm19789_vm1, %v3962_v35  ;;  %15120 = vrot.lane.b32.xlu1 %v15119_v36, %s17260_s20  ;;  %v4070_v38 = vsel %vm19789_vm1, %v3962_v35, 0 }
 0x5d2   :  { %15150 = vrot.lane.b32.xlu0 %v15119_v36, %s17261_s0 }
 0x5d3   :  { %14474 = vmatpush3.bf16.xpose.msra.mxu0 %v4070_v38 }
 0x5d4   :  { %15125 = vrot.lane.b32.xlu1 %v15114_v20, %s17262_s9 }
 0x5d6   :  { %15155 = vrot.lane.b32.xlu0 %v15114_v20, %s17245_s16 }
 0x5d8   :  { %15130 = vrot.lane.b32.xlu1 %v15129_v34, %s17260_s20 }
 0x5da   :  { %15165 = vrot.lane.b32.xlu0 %v15114_v20, %s17229_s7  ;;  %14476 = vmatmul.mubr.msk.bf16.vlgmr.msra.gmra.mrb[56].mxu0 %vm19789_vm1, %v3880_v39 }
 0x5dc   :  { %15140 = vrot.lane.b32.xlu1 %v15119_v36, %s17262_s9 }
 0x5de   :  { %15180 = vrot.lane.b32.xlu0 %v15119_v36, %s17229_s7 }
 0x5e0   :  { %15145 = vrot.lane.b32.xlu1 %v15129_v34, %s17262_s9 }
 0x5e2   :  { %15185 = vrot.lane.b32.xlu0 %v15114_v20, %s17236_s15 }
 0x5e4   :  { %15160 = vrot.lane.b32.xlu1 %v15129_v34, %s17261_s0 }
 0x5e6   :  { %15195 = vrot.lane.b32.xlu0 %v15114_v20, %s17232_s26 }
 0x5e8   :  { %15170 = vrot.lane.b32.xlu1 %v15119_v36, %s17245_s16 }
 0x5ea   :  { %3956 = vrot.lane.b32.xlu0 %v3761_v29, %s17232_s26 }
 0x5ec   :  { %15175 = vrot.lane.b32.xlu1 %v15129_v34, %s17245_s16 }
 0x5ee   :  { %15210 = vrot.lane.b32.xlu0 %v15209_v18, %s17232_s26 }
 0x5f0   :  { %15190 = vrot.lane.b32.xlu1 %v15129_v34, %s17229_s7 }
 0x5f2   :  { %4011 = vrot.lane.b32.xlu0 %v17872_v40, %s17245_s16 }
 0x5f4   :  { %15200 = vrot.lane.b32.xlu1 %v15119_v36, %s17236_s15 }
 0x5f6   :  { %15215 = vrot.lane.b32.xlu0 %v17848_v31, %s17260_s20 }
 0x5f8   :  { %15205 = vrot.lane.b32.xlu1 %v15129_v34, %s17236_s15 }
 0x5fa   :  { %15220 = vrot.lane.b32.xlu0 %v17848_v31, %s17262_s9 }
 0x5fc   :  { %3874 = vrot.lane.b32.xlu1 %v3759_v27, %s17232_s26 }
 0x5fe   :  { %15230 = vrot.lane.b32.xlu0 %v17848_v31, %s17245_s16 }
 0x600   :  { %3984 = vrot.lane.b32.xlu1 %v17872_v40, %s17260_s20 }
 0x604   :  { %3993 = vrot.lane.b32.xlu1 %v17872_v40, %s17262_s9 }
 0x608   :  { %4002 = vrot.lane.b32.xlu1 %v17872_v40, %s17261_s0 }
 0x60c   :  { %4020 = vrot.lane.b32.xlu1 %v17872_v40, %s17229_s7 }
 0x610   :  { %15225 = vrot.lane.b32.xlu1 %v17848_v31, %s17261_s0 }
 0x614   :  { %15235 = vrot.lane.b32.xlu1 %v17848_v31, %s17229_s7 }
 0x63c   :  { %v15116_v41 = vpop.permute.xlu0 %15115 }
 0x63d   :  { %v15118_v42 = vunpack.i.h.bf16 %v15116_v41  ;;  %v15117_v43 = vunpack.i.l.bf16 %v15116_v41 }
 0x63f   :  { %v3963_v44 = vpack.c.bf16 %v15118_v42, %v15117_v43 }
 0x640   :  { %v15136_v45 = vpop.permute.xlu0 %15135 }
 0x641   :  { %14973 = vmatprep.subr.msk.bf16.mxu1 %vm19789_vm1, %v3963_v44  ;;  %v4127_v46 = vsel %vm19789_vm1, %v3963_v44, 0  ;;  %v15138_v50 = vunpack.i.h.bf16 %v15136_v45  ;;  %v15137_v52 = vunpack.i.l.bf16 %v15136_v45 }
 0x642   :  { %14480 = vmatpush3.bf16.xpose.msra.mxu1 %v4127_v46  ;;  %v15121_v47 = vpop.permute.xlu1 %15120 }
 0x643   :  { %v15122_v48 = vunpack.i.l.bf16 %v15121_v47  ;;  %v3967_v59 = vpack.c.bf16 %v15138_v50, %v15137_v52  ;;  %v15123_v4 = vunpack.i.h.bf16 %v15121_v47 }
 0x644   :  { %v15151_v49 = vpop.permute.xlu0 %15150 }
 0x645   :  { %v3964_v53 = vpack.c.bf16 %v15122_v48, %v15122_v48  ;;  %v15152_v10 = vunpack.i.l.bf16 %v15151_v49  ;;  %v4247_v20 = vsel %vm19789_vm1, %v3967_v59, 0  ;;  %v15153_v33 = vunpack.i.h.bf16 %v15151_v49 }
 0x646   :  { %v15126_v54 = vpop.permute.xlu1 %15125 }
 0x647   :  { %v15128_v55 = vunpack.i.h.bf16 %v15126_v54  ;;  %v15127_v56 = vunpack.i.l.bf16 %v15126_v54  ;;  %14974 = vmatprep.subr.msk.bf16.mxu1 %vm19789_vm1, %v3964_v53  ;;  %v4130_v0 = vsel %vm19789_vm1, %v3964_v53, 0  ;;  %v3968_v17 = vpack.c.bf16 %v15152_v10, %v15152_v10 }
 0x648   :  { %v15156_v58 = vpop.permute.xlu0 %15155 }
 0x649   :  { %v3965_v2 = vpack.c.bf16 %v15128_v55, %v15127_v56  ;;  %v15158_v13 = vunpack.i.h.bf16 %v15156_v58  ;;  %v15157_v14 = vunpack.i.l.bf16 %v15156_v58  ;;  %v4250_v39 = vsel %vm19789_vm1, %v3968_v17, 0 }
 0x64a   :  { %v15131_v3 = vpop.permute.xlu1 %15130  ;;  %14482 = vmatpush3.bf16.xpose.msra.mxu1 %v4130_v0 }
 0x64b   :  { %v15133_v5 = vunpack.i.h.bf16 %v15131_v3  ;;  %v15132_v7 = vunpack.i.l.bf16 %v15131_v3  ;;  %14975 = vmatprep.subr.msk.bf16.mxu0 %vm19789_vm1, %v3965_v2  ;;  %14977 = vmatprep.subr.msk.bf16.mxu1 %vm19789_vm1, %v3967_v59  ;;  %v4187_v8 = vsel %vm19789_vm1, %v3965_v2, 0  ;;  %v3969_v22 = vpack.c.bf16 %v15158_v13, %v15157_v14 }
 0x64c   :  { %v15166_v9 = vpop.permute.xlu0 %15165  ;;  %14488 = vmatpush3.bf16.xpose.msra.mxu0 %v4187_v8 }
 0x64d   :  { %v3881_v11 = vpack.c.bf16 %v15132_v7, %v15123_v4  ;;  %v3882_v15 = vpack.c.bf16 %v15133_v5, %v15133_v5  ;;  %v15168_v28 = vunpack.i.h.bf16 %v15166_v9  ;;  %v15167_v29 = vunpack.i.l.bf16 %v15166_v9 }
 0x64e   :  { %v15141_v12 = vpop.permute.xlu1 %15140  ;;  %v4307_v45 = vsel %vm19789_vm1, %v3969_v22, 0 }
 0x64f   :  { %v15142_v16 = vunpack.i.l.bf16 %v15141_v12  ;;  %14483 = vmatprep.mubr.msk.bf16.mxu1 %vm19789_vm1, %v3881_v11  ;;  %v15143_v23 = vunpack.i.h.bf16 %v15141_v12  ;;  %v3971_v41 = vpack.c.bf16 %v15168_v28, %v15167_v29 }
 0x650   :  { %v17906_v19 = vpop.permute.xlu0 %15180 }
 0x651   :  { %v3966_v18 = vpack.c.bf16 %v15142_v16, %v15142_v16  ;;  %14484 = vmatmul.mubr.msk.bf16.vlgmr.msra.gmra.mrb[52].mxu1 %vm19789_vm1, %v3882_v15  ;;  %v15182_v46 = vunpack.i.l.bf16 %v17906_v19  ;;  %v4367_v59 = vsel %vm19789_vm1, %v3971_v41, 0  ;;  %v15183_v0 = vunpack.i.h.bf16 %v17906_v19 }
 0x652   :  { %v15146_v21 = vpop.permute.xlu1 %15145  ;;  %14496 = vmatpush3.bf16.xpose.msra.mxu1 %v4247_v20 }
 0x653   :  { %v15147_v24 = vunpack.i.l.bf16 %v15146_v21  ;;  %14976 = vmatprep.subr.msk.bf16.mxu0 %vm19789_vm1, %v3966_v18  ;;  %14978 = vmatprep.subr.msk.bf16.mxu1 %vm19789_vm1, %v3968_v17  ;;  %v4190_v25 = vsel %vm19789_vm1, %v3966_v18, 0  ;;  %v15148_v26 = vunpack.i.h.bf16 %v15146_v21  ;;  %v3972_v56 = vpack.c.bf16 %v15182_v46, %v15182_v46 }
 0x654   :  { %14490 = vmatpush3.bf16.xpose.msra.mxu0 %v4190_v25  ;;  %v15186_v34 = vpop.permute.xlu0 %15185 }
 0x655   :  { %v3883_v27 = vpack.c.bf16 %v15147_v24, %v15143_v23  ;;  %14979 = vmatprep.subr.msk.bf16.mxu0 %vm19789_vm1, %v3969_v22  ;;  %v3884_v36 = vpack.c.bf16 %v15148_v26, %v15148_v26  ;;  %v15188_v49 = vunpack.i.h.bf16 %v15186_v34  ;;  %v15187_v52 = vunpack.i.l.bf16 %v15186_v34 }
 0x656   :  { %v15161_v30 = vpop.permute.xlu1 %15160  ;;  %v4370_v17 = vsel %vm19789_vm1, %v3972_v56, 0 }
 0x657   :  { %v15162_v35 = vunpack.i.l.bf16 %v15161_v30  ;;  %14491 = vmatprep.mubr.msk.bf16.mxu0 %vm19789_vm1, %v3883_v27  ;;  %v15163_v43 = vunpack.i.h.bf16 %v15161_v30  ;;  %v3973_v3 = vpack.c.bf16 %v15188_v49, %v15187_v52 }
 0x658   :  { %v15196_v47 = vpop.permute.xlu0 %15195 }
 0x659   :  { %v3885_v38 = vpack.c.bf16 %v15162_v35, %v15153_v33  ;;  %v3886_v53 = vpack.c.bf16 %v15163_v43, %v15163_v43  ;;  %v15198_v8 = vunpack.i.h.bf16 %v15196_v47  ;;  %v15197_v9 = vunpack.i.l.bf16 %v15196_v47 }
 0x65a   :  { %v15171_v42 = vpop.permute.xlu1 %15170  ;;  %14498 = vmatpush3.bf16.xpose.msra.mxu1 %v4250_v39  ;;  %v4427_v19 = vsel %vm19789_vm1, %v3973_v3, 0  ;;  %v4044_v47 = vpack.c.bf16 %v17872_v40, %v17872_v40 }
 0x65b   :  { %v15172_v44 = vunpack.i.l.bf16 %v15171_v42  ;;  %14492 = vmatmul.mubr.msk.bf16.vlgmr.msra.gmra.mrb[60].mxu0 %vm19789_vm1, %v3884_v36  ;;  %14499 = vmatprep.mubr.msk.bf16.mxu1 %vm19789_vm1, %v3885_v38  ;;  %v15173_v54 = vunpack.i.h.bf16 %v15171_v42  ;;  %v3975_v14 = vpack.c.bf16 %v15198_v8, %v15197_v9 }
 0x65c   :  { %14981 = vmatprep.subr.msk.bf16.mxu1 %vm19789_vm1, %v3971_v41  ;;  %14504 = vmatpush3.bf16.xpose.msra.mxu0 %v4307_v45  ;;  %v3957_v4 = vpop.permute.xlu0 %3956 }
 0x65d   :  { %v3970_v48 = vpack.c.bf16 %v15172_v44, %v15172_v44  ;;  %v3976_v30 = vpack.c.bf16 %v3957_v4, %v3957_v4  ;;  %v4487_v33 = vsel %vm19789_vm1, %v3975_v14, 0  ;;  %v3412_v4 = vand.u32 127, %v3407_v61 }
 0x65e   :  { %v15176_v50 = vpop.permute.xlu1 %15175  ;;  %v17263_v61 = vmov -1e+30  }
 0x65f   :  { %v15177_v55 = vunpack.i.l.bf16 %v15176_v50  ;;  %14980 = vmatprep.subr.msk.bf16.mxu0 %vm19789_vm1, %v3970_v48  ;;  %v4310_v7 = vsel %vm19789_vm1, %v3970_v48, 0  ;;  %v15178_v10 = vunpack.i.h.bf16 %v15176_v50  ;;  %v4490_v43 = vsel %vm19789_vm1, %v3976_v30, 0 }
 0x660   :  { %v15211_v16 = vpop.permute.xlu0 %15210  ;;  %v4877_v50 = vsel %vm19790_vm2, %v4044_v47, 0  ;;  %vm3437_vm5 = vcmp.ge.s32.totalorder %v3412_v4, 6  ;;  %vm3438_vm6 = vcmp.lt.s32.totalorder %v3412_v4, 15  ;;  %vm3465_vm7 = vcmp.ge.s32.totalorder %v3412_v4, 3 }
 0x661   :  { %v3887_v58 = vpack.c.bf16 %v15177_v55, %v15173_v54  ;;  %14500 = vmatmul.mubr.msk.bf16.vlgmr.msra.gmra.mrb[56].mxu1 %vm19789_vm1, %v3886_v53  ;;  %v3888_v15 = vpack.c.bf16 %v15178_v10, %v15178_v10  ;;  %v15213_v24 = vunpack.i.h.bf16 %v15211_v16  ;;  %v15212_v25 = vunpack.i.l.bf16 %v15211_v16  ;;  %vm3439_vm13 = vmand %vm3437_vm5, %vm3438_vm6 }
 0x662   :  { %v15191_v2 = vpop.permute.xlu1 %15190  ;;  %14512 = vmatpush3.bf16.xpose.msra.mxu1 %v4367_v59  ;;  %vm3466_vm8 = vcmp.lt.s32.totalorder %v3412_v4, 6  ;;  %vm3468_vm10 = vcmp.ge.s32.totalorder %v3412_v4, 15  ;;  %vm3469_vm11 = vcmp.lt.s32.totalorder %v3412_v4, 24  ;;  %vm3435_vm12 = vcmp.lt.s32.totalorder %v3412_v4, 3 }
 0x663   :  { %v15192_v5 = vunpack.i.l.bf16 %v15191_v2  ;;  %14507 = vmatprep.mubr.msk.bf16.mxu0 %vm19789_vm1, %v3887_v58  ;;  %14982 = vmatprep.subr.msk.bf16.mxu1 %vm19789_vm1, %v3972_v56  ;;  %v15193_v20 = vunpack.i.h.bf16 %v15191_v2  ;;  %v3893_v29 = vpack.c.bf16 %v15213_v24, %v15212_v25  ;;  %vm3467_vm0 = vmand %vm3465_vm7, %vm3466_vm8 }
 0x664   :  { %14506 = vmatpush3.bf16.xpose.msra.mxu0 %v4310_v7  ;;  %v17938_v34 = vpop.permute.xlu0 %4011  ;;  %v3409_v7 = vadd.s32 8, %v17830_v62 }
 0x665   :  { %v3889_v11 = vpack.c.bf16 %v15192_v5, %v15183_v0  ;;  %14983 = vmatprep.subr.msk.bf16.mxu0 %vm19789_vm1, %v3973_v3  ;;  %v3890_v28 = vpack.c.bf16 %v15193_v20, %v15193_v20  ;;  %v19819_v5 = vmov 0 }
 0x666   :  { %v15201_v12 = vpop.permute.xlu1 %15200  ;;  %v19820_v5 = vsel %vm17969_vm9, 4294967295, %v19819_v5  ;;  %vm3426_vm3 = vcmp.lt.s32.totalorder %v3409_v7, 15  ;;  %vm3454_vm7 = vcmp.ge.s32.totalorder %v3409_v7, 15 }
 0x667   :  { %v15202_v13 = vunpack.i.l.bf16 %v15201_v12  ;;  %14515 = vmatprep.mubr.msk.bf16.mxu1 %vm19789_vm1, %v3889_v11  ;;  %v15203_v21 = vunpack.i.h.bf16 %v15201_v12  ;;  %vm19821_vm5 = vnez %v19820_v5 }
 0x668   :  { %v15216_v41 = vpop.permute.xlu0 %15215 }
 0x669   :  { %v3974_v22 = vpack.c.bf16 %v15202_v13, %v15202_v13  ;;  %v15218_v45 = vunpack.i.h.bf16 %v15216_v41  ;;  %v15217_v46 = vunpack.i.l.bf16 %v15216_v41 }
 0x66a   :  { %v15206_v18 = vpop.permute.xlu1 %15205  ;;  %14514 = vmatpush3.bf16.xpose.msra.mxu1 %v4370_v17 }
 0x66b   :  { %v15207_v23 = vunpack.i.l.bf16 %v15206_v18  ;;  %14508 = vmatmul.mubr.msk.bf16.vlgmr.msra.gmra.mrb[64].mxu0 %vm19789_vm1, %v3888_v15  ;;  %14985 = vmatprep.subr.msk.bf16.mxu1 %vm19789_vm1, %v3975_v14  ;;  %v4430_v36 = vsel %vm19789_vm1, %v3974_v22, 0  ;;  %v15208_v38 = vunpack.i.h.bf16 %v15206_v18  ;;  %v17957_v52 = vpack.c.bf16 %v15218_v45, %v15217_v46 }
 0x66c   :  { %14520 = vmatpush3.bf16.xpose.msra.mxu0 %v4427_v19 }
 0x66d   :  { %v3891_v26 = vpack.c.bf16 %v15207_v23, %v15203_v21  ;;  %14984 = vmatprep.subr.msk.bf16.mxu0 %vm19789_vm1, %v3974_v22  ;;  %v3892_v42 = vpack.c.bf16 %v15208_v38, %v15208_v38 }
 0x66e   :  { %v3875_v27 = vpop.permute.xlu1 %3874 }
 0x66f   :  { %14523 = vmatprep.mubr.msk.bf16.mxu0 %vm19789_vm1, %v3891_v26  ;;  %v3894_v49 = vpack.c.bf16 %v3875_v27, %v3875_v27 }
 0x671   :  { %14516 = vmatmul.mubr.msk.bf16.vlgmr.msra.gmra.mrb[60].mxu1 %vm19789_vm1, %v3890_v28 }
 0x672   :  { %v17940_v35 = vpop.permute.xlu1 %3984  ;;  %14528 = vmatpush3.bf16.xpose.msra.mxu1 %v4487_v33  ;;  %14531 = vmatprep.mubr.msk.bf16.mxu1 %vm19789_vm1, %v3893_v29 }
 0x673   :  { %14986 = vmatprep.subr.msk.bf16.mxu1 %vm19789_vm1, %v3976_v30 }
 0x674   :  { %14522 = vmatpush3.bf16.xpose.msra.mxu0 %v4430_v36 }
 0x675   :  { %14535 = vmatprep.subr.bf16.mxu0 %v17853_v37 }
 0x676   :  { %v17946_v39 = vpop.permute.xlu1 %3993 }
 0x67a   :  { %v4003_v44 = vpop.permute.xlu1 %4002  ;;  %14530 = vmatpush3.bf16.xpose.msra.mxu1 %v4490_v43 }
 0x67b   :  { %14524 = vmatmul.mubr.msk.bf16.vlgmr.msra.gmra.mrb[68].mxu0 %vm19789_vm1, %v3892_v42  ;;  %v4050_v58 = vpack.c.bf16 %v4003_v44, %v4003_v44 }
 0x67c   :  { %14536 = vmatpush3.bf16.msra.mxu0 %v17853_v37 }
 0x67d   :  { %14987 = vmatprep.subr.msk.bf16.mxu0 %vm19790_vm2, %v4044_v47  ;;  %v5048_v0 = vsel %vm19790_vm2, %v4050_v58, 0 }
 0x67e   :  { %v17954_v48 = vpop.permute.xlu1 %4020 }
 0x680   :  { %14538 = vmatpush3.bf16.msra.mxu0 %v4877_v50 }
 0x681   :  { %14532 = vmatmul.mubr.msk.bf16.vlgmr.msra.gmra.mrb[64].mxu1 %vm19789_vm1, %v3894_v49  ;;  %14543 = vmatprep.subr.bf16.mxu0 %v17957_v52  ;;  %vm3470_vm1 = vmand %vm3468_vm10, %vm3469_vm11 }
 0x682   :  { %v15226_v53 = vpop.permute.xlu1 %15225  ;;  %vm3471_vm9 = vmor %vm3467_vm0, %vm3470_vm1  ;;  %vm4588_vm1 = vcmask 195584  }
 0x683   :  { %v15228_v54 = vunpack.i.h.bf16 %v15226_v53  ;;  %v15227_v55 = vunpack.i.l.bf16 %v15226_v53  ;;  %vm3472_vm10 = vmand %vm3450_vm4, %vm3471_vm9  ;;  %v17980_v8 = vsel %vm3471_vm9, 0.0, %v17263_v61 }
 0x684   :  { %vm3473_vm11 = vmand %vm3454_vm7, %vm3471_vm9 }
 0x685   :  { %v4049_v56 = vpack.c.bf16 %v15228_v54, %v15227_v55 }
 0x686   :  { %v15236_v37 = vpop.permute.xlu1 %15235 }
 0x687   :  { %v15238_v59 = vunpack.i.h.bf16 %v15236_v37  ;;  %v15237_v2 = vunpack.i.l.bf16 %v15236_v37  ;;  %14559 = vmatprep.subr.bf16.mxu1 %v4049_v56 }
 0x688   :  { %14560 = vmatpush3.bf16.msra.mxu1 %v4049_v56 }
 0x689   :  { %14990 = vmatprep.subr.msk.bf16.mxu1 %vm19790_vm2, %v4050_v58  ;;  %v17963_v3 = vpack.c.bf16 %v15238_v59, %v15237_v2  ;;  %vm3440_vm2 = vmor %vm3435_vm12, %vm3439_vm13 }
 0x68a   :  { %vm3441_vm6 = vmand %vm19821_vm5, %vm3440_vm2 }
 0x68b   :  { %vm3442_vm8 = vmand %vm3426_vm3, %vm3440_vm2  ;;  %vm19822_vm2 = vcmask 1043456  }
 0x68c   :  { %14562 = vmatpush3.bf16.msra.mxu1 %v5048_v0  ;;  %vm3475_vm12 = vmor %vm3441_vm6, %vm3472_vm10 }
 0x68d   :  { %14575 = vmatprep.subr.bf16.mxu1 %v17963_v3  ;;  %vm3476_vm13 = vmor %vm3442_vm8, %vm3473_vm11  ;;  %v17982_v12 = vsel %vm3475_vm12, 0.0, %v17263_v61  ;;  %vm5413_vm12 = vcmask 261120  }
 0x68e   :  { %v17984_v15 = vsel %vm3476_vm13, 0.0, %v17263_v61  ;;  %vm19823_vm9 = vmmov %vm19822_vm2  ;;  %vm5417_vm13 = vcmask 392192  }
 0x68f   :  { %vm19824_vm14 = vmmov %vm19822_vm2 }
 0x690   :  { %vm19825_vm0 = vmmov %vm19822_vm2 }
 0x691   :  { %vm19826_vm3 = vmmov %vm19825_vm0 }
 0x692   :  { %vm19827_vm4 = vmmov %vm19825_vm0 }
 0x693   :  { %vm19828_vm5 = vmmov %vm19825_vm0 }
 0x694   :  { %vm19829_vm6 = vmmov %vm19825_vm0 }
 0x695   :  { %vm19830_vm7 = vmmov %vm19825_vm0 }
 0x696   :  { %vm19831_vm8 = vmmov %vm19825_vm0 }
 0x697   :  { %vm19832_vm10 = vmmov %vm19825_vm0 }
 0x698   :  { %vm19833_vm11 = vmmov %vm19825_vm0 }
 0x6ad   :  { %v14477_v9 = vpop.f32.mrb[56].mxu0 }
 0x6ae   :  { %v4542_v10 = vmul.f32 0.25, %v14477_v9  ;;  %v4106_v11 = vpop.f32.mrb[57].mxu0  ;;  %v18032_v9 = vpop.permute.xlu0 %15220 }
 0x6af   :  { %v4540_v13 = vmul.f32 0.25, %v4106_v11  ;;  %v14478_v14 = vpop.f32.mrb[58].mxu0 }
 0x6b0   :  { %v4109_v16 = vpop.f32.mrb[59].mxu0  ;;  %v17987_v17 = vadd.f32 %v4542_v10, %v17980_v8 }
 0x6b1   :  { %v4541_v18 = vmul.f32 0.25, %v4109_v16  ;;  %v17992_v20 = vadd.f32 %v4540_v13, %v17982_v12 }
 0x6b2   :  { %v4595_v19 = vsel %vm4588_vm1, %v17987_v17, -inf }
 0x6b3   :  { %4596 = vmax.xlane.f32.xlu0 %v4595_v19  ;;  %v17995_v21 = vadd.f32 %v4541_v18, %v17984_v15  ;;  %v4589_v23 = vsel %vm4588_vm1, %v17992_v20, -inf }
 0x6b5   :  { %v4592_v22 = vsel %vm4588_vm1, %v17995_v21, -inf }
 0x6b6   :  { %4593 = vmax.xlane.f32.xlu1 %v4592_v22 }
 0x6b7   :  { %4590 = vmax.xlane.f32.xlu0 %v4589_v23 }
 0x724   :  { %v14485_v24 = vpop.f32.mrb[52].mxu1 }
 0x725   :  { %v4545_v25 = vmul.f32 0.25, %v14485_v24  ;;  %v4166_v26 = vpop.f32.mrb[53].mxu1  ;;  %v18043_v24 = vpop.permute.xlu0 %15230 }
 0x726   :  { %v14486_v27 = vpop.f32.mrb[54].mxu1  ;;  %v4543_v36 = vmul.f32 0.25, %v4166_v26 }
 0x727   :  { %v4169_v28 = vpop.f32.mrb[55].mxu1  ;;  %v18002_v29 = vadd.f32 %v4545_v25, %v17980_v8 }
 0x728   :  { %v18012_v49 = vadd.f32 %v4543_v36, %v17982_v12  ;;  %v4544_v59 = vmul.f32 0.25, %v4169_v28 }
 0x729   :  { %v4604_v30 = vsel %vm4588_vm1, %v18002_v29, -inf }
 0x72a   :  { %4605 = vmax.xlane.f32.xlu1 %v4604_v30  ;;  %v4598_v0 = vsel %vm4588_vm1, %v18012_v49, -inf  ;;  %v18037_v11 = vadd.f32 %v4544_v59, %v17984_v15 }
 0x72c   :  { %v4601_v19 = vsel %vm4588_vm1, %v18037_v11, -inf }
 0x72e   :  { %v14493_v33 = vpop.f32.mrb[60].mxu0 }
 0x72f   :  { %v4548_v38 = vmul.f32 0.25, %v14493_v33  ;;  %v4226_v41 = vpop.f32.mrb[61].mxu0 }
 0x730   :  { %v14494_v42 = vpop.f32.mrb[62].mxu0  ;;  %v4546_v46 = vmul.f32 0.25, %v4226_v41 }
 0x731   :  { %v4229_v43 = vpop.f32.mrb[63].mxu0  ;;  %v18007_v44 = vadd.f32 %v4548_v38, %v17980_v8 }
 0x732   :  { %v4547_v45 = vmul.f32 0.25, %v4229_v43  ;;  %v18025_v5 = vadd.f32 %v4546_v46, %v17982_v12 }
 0x733   :  { %v4613_v47 = vsel %vm4588_vm1, %v18007_v44, -inf }
 0x734   :  { %v14501_v50 = vpop.f32.mrb[56].mxu1  ;;  %4614 = vmax.xlane.f32.xlu0 %v4613_v47  ;;  %v18015_v53 = vadd.f32 %v4547_v45, %v17984_v15  ;;  %v4607_v10 = vsel %vm4588_vm1, %v18025_v5, -inf }
 0x735   :  { %v4551_v54 = vmul.f32 0.25, %v14501_v50  ;;  %v4286_v55 = vpop.f32.mrb[57].mxu1 }
 0x736   :  { %v4549_v56 = vmul.f32 0.25, %v4286_v55  ;;  %v14502_v37 = vpop.f32.mrb[58].mxu1  ;;  %v4610_v58 = vsel %vm4588_vm1, %v18015_v53, -inf }
 0x737   :  { %v4289_v2 = vpop.f32.mrb[59].mxu1  ;;  %4611 = vmax.xlane.f32.xlu1 %v4610_v58  ;;  %v18022_v4 = vadd.f32 %v4551_v54, %v17980_v8 }
 0x738   :  { %4599 = vmax.xlane.f32.xlu0 %v4598_v0  ;;  %v18030_v61 = vadd.f32 %v4549_v56, %v17982_v12  ;;  %v4550_v28 = vmul.f32 0.25, %v4289_v2 }
 0x739   :  { %v4622_v7 = vsel %vm4588_vm1, %v18022_v4, -inf }
 0x73a   :  { %v4616_v14 = vsel %vm4588_vm1, %v18030_v61, -inf  ;;  %v18065_v58 = vadd.f32 %v4550_v28, %v17984_v15 }
 0x73b   :  { %4623 = vmax.xlane.f32.xlu1 %v4622_v7 }
 0x73c   :  { %4608 = vmax.xlane.f32.xlu0 %v4607_v10  ;;  %v4619_v10 = vsel %vm4588_vm1, %v18065_v58, -inf }
 0x73e   :  { %v14509_v13 = vpop.f32.mrb[64].mxu0 }
 0x73f   :  { %v4554_v16 = vmul.f32 0.25, %v14509_v13  ;;  %4617 = vmax.xlane.f32.xlu1 %v4616_v14  ;;  %v4346_v18 = vpop.f32.mrb[65].mxu0 }
 0x740   :  { %v4552_v22 = vmul.f32 0.25, %v4346_v18  ;;  %4602 = vmax.xlane.f32.xlu0 %v4601_v19  ;;  %v14510_v23 = vpop.f32.mrb[66].mxu0  ;;  %v4597_v42 = vpop.xlane.xlu0 %4596 }
 0x741   :  { %v4349_v25 = vpop.f32.mrb[67].mxu0  ;;  %v18046_v26 = vadd.f32 %v4554_v16, %v17980_v8  ;;  %v4663_v2 = vsub.f32 %v17987_v17, %v4597_v42 }
 0x742   :  { %v4553_v27 = vmul.f32 0.25, %v4349_v25  ;;  %v18051_v36 = vadd.f32 %v4552_v22, %v17982_v12 }
 0x743   :  { %v4594_v30 = vpop.xlane.xlu1 %4593  ;;  %v4631_v33 = vsel %vm4588_vm1, %v18046_v26, -inf  ;;  %v4689_v13 = vmul.f32 1.442695, %v4663_v2 }
 0x744   :  { %v14517_v38 = vpop.f32.mrb[60].mxu1  ;;  %4632 = vmax.xlane.f32.xlu0 %v4631_v33  ;;  %v18054_v41 = vadd.f32 %v4553_v27, %v17984_v15  ;;  %v4662_v43 = vsub.f32 %v17995_v21, %v4594_v30  ;;  %v4625_v56 = vsel %vm4588_vm1, %v18051_v36, -inf  ;;  %v4591_v7 = vpop.xlane.xlu0 %4590 }
 0x745   :  { %v4557_v45 = vmul.f32 0.25, %v14517_v38  ;;  %v4406_v46 = vpop.f32.mrb[61].mxu1  ;;  %v4661_v14 = vsub.f32 %v17992_v20, %v4591_v7 }
 0x746   :  { %v4555_v47 = vmul.f32 0.25, %v4406_v46  ;;  %v14518_v50 = vpop.f32.mrb[62].mxu1  ;;  %v4628_v54 = vsel %vm4588_vm1, %v18054_v41, -inf  ;;  %v4687_v21 = vmul.f32 1.442695, %v4662_v43 }
 0x747   :  { %v4409_v55 = vpop.f32.mrb[63].mxu1  ;;  %4629 = vmax.xlane.f32.xlu1 %v4628_v54  ;;  %v18062_v37 = vadd.f32 %v4557_v45, %v17980_v8  ;;  %v4685_v28 = vmul.f32 1.442695, %v4661_v14 }
 0x748   :  { %4626 = vmax.xlane.f32.xlu0 %v4625_v56  ;;  %v18071_v0 = vadd.f32 %v4555_v47, %v17982_v12  ;;  %16296 = vpow2.f32 %v4687_v21  ;;  %v4556_v33 = vmul.f32 0.25, %v4409_v55 }
 0x749   :  { %v4640_v59 = vsel %vm4588_vm1, %v18062_v37, -inf  ;;  %16298 = vpow2.f32 %v4689_v13 }
 0x74a   :  { %v4634_v18 = vsel %vm4588_vm1, %v18071_v0, -inf  ;;  %16300 = vpow2.f32 %v4685_v28  ;;  %v18096_v21 = vadd.f32 %v4556_v33, %v17984_v15 }
 0x74b   :  { %4641 = vmax.xlane.f32.xlu1 %v4640_v59 }
 0x74c   :  { %4620 = vmax.xlane.f32.xlu0 %v4619_v10  ;;  %v4637_v10 = vsel %vm4588_vm1, %v18096_v21, -inf }
 0x74e   :  { %v14525_v16 = vpop.f32.mrb[68].mxu0 }
 0x74f   :  { %v4560_v19 = vmul.f32 0.25, %v14525_v16  ;;  %4635 = vmax.xlane.f32.xlu1 %v4634_v18  ;;  %v4466_v17 = vpop.f32.mrb[69].mxu0 }
 0x750   :  { %v4558_v22 = vmul.f32 0.25, %v4466_v17  ;;  %v14526_v23 = vpop.f32.mrb[70].mxu0 }
 0x751   :  { %v4469_v25 = vpop.f32.mrb[71].mxu0  ;;  %v18079_v27 = vadd.f32 %v4560_v19, %v17980_v8 }
 0x752   :  { %v4559_v30 = vmul.f32 0.25, %v4469_v25  ;;  %v18084_v38 = vadd.f32 %v4558_v22, %v17982_v12  ;;  %v18091_v54 = vpop.eup %16296 }
 0x753   :  { %v4649_v20 = vsel %vm4588_vm1, %v18079_v27, -inf  ;;  %v4736_v2 = vsel %vm4588_vm1, %v18091_v54, 0.0  ;;  %v18105_v13 = vpop.eup %16298 }
 0x754   :  { %v14533_v42 = vpop.f32.mrb[64].mxu1  ;;  %4650 = vmax.xlane.f32.xlu0 %v4649_v20  ;;  %v18087_v43 = vadd.f32 %v4559_v30, %v17984_v15  ;;  %v4643_v56 = vsel %vm4588_vm1, %v18084_v38, -inf  ;;  %v4739_v19 = vsel %vm4588_vm1, %v18105_v13, 0.0  ;;  %v18114_v17 = vpop.eup %16300 }
 0x755   :  { %v4526_v45 = vpop.f32.mrb[65].mxu1  ;;  %v4563_v46 = vmul.f32 0.25, %v14533_v42  ;;  %v4733_v23 = vsel %vm4588_vm1, %v18114_v17, 0.0 }
 0x756   :  { %v14534_v47 = vpop.f32.mrb[66].mxu1  ;;  %v4646_v50 = vsel %vm4588_vm1, %v18087_v43, -inf  ;;  %v4561_v59 = vmul.f32 0.25, %v4526_v45 }
 0x757   :  { %v4529_v55 = vpop.f32.mrb[67].mxu1  ;;  %4647 = vmax.xlane.f32.xlu1 %v4646_v50  ;;  %v18101_v7 = vadd.f32 %v4563_v46, %v17980_v8 }
 0x758   :  { %4644 = vmax.xlane.f32.xlu0 %v4643_v56  ;;  %v18110_v16 = vadd.f32 %v4561_v59, %v17982_v12  ;;  %v4562_v18 = vmul.f32 0.25, %v4529_v55 }
 0x759   :  { %v4658_v14 = vsel %vm4588_vm1, %v18101_v7, -inf }
 0x75a   :  { %v4652_v22 = vsel %vm4588_vm1, %v18110_v16, -inf  ;;  %v18121_v25 = vadd.f32 %v4562_v18, %v17984_v15 }
 0x75b   :  { %4737 = vadd.xlane.f32.xlu1 %v4736_v2 }
 0x75c   :  { %4638 = vmax.xlane.f32.xlu0 %v4637_v10  ;;  %v4655_v28 = vsel %vm4588_vm1, %v18121_v25, -inf }
 0x75f   :  { %4659 = vmax.xlane.f32.xlu1 %v4658_v14 }
 0x760   :  { %4740 = vadd.xlane.f32.xlu0 %v4739_v19 }
 0x763   :  { %4653 = vmax.xlane.f32.xlu1 %v4652_v22 }
 0x764   :  { %4734 = vadd.xlane.f32.xlu0 %v4733_v23 }
 0x768   :  { %4656 = vmax.xlane.f32.xlu0 %v4655_v28 }
 0x774   :  { %15245 = vrot.lane.b32.xlu1 %v17848_v31, %s17232_s26 }
 0x77e   :  { %15240 = vrot.lane.b32.xlu0 %v17848_v31, %s17236_s15 }
 0x7b7   :  { %v4606_v30 = vpop.xlane.xlu1 %4605 }
 0x7b8   :  { %v4666_v33 = vsub.f32 %v18002_v29, %v4606_v30 }
 0x7ba   :  { %v4695_v20 = vmul.f32 1.442695, %v4666_v33 }
 0x7bc   :  { %16302 = vpow2.f32 %v4695_v20 }
 0x7c1   :  { %v4615_v42 = vpop.xlane.xlu0 %4614 }
 0x7c2   :  { %v4669_v45 = vsub.f32 %v18007_v44, %v4615_v42 }
 0x7c4   :  { %v4701_v46 = vmul.f32 1.442695, %v4669_v45  ;;  %v4612_v47 = vpop.xlane.xlu1 %4611 }
 0x7c5   :  { %v4668_v50 = vsub.f32 %v18015_v53, %v4612_v47  ;;  %v4600_v55 = vpop.xlane.xlu0 %4599 }
 0x7c6   :  { %v18132_v56 = vpop.eup %16302  ;;  %16304 = vpow2.f32 %v4701_v46  ;;  %v4664_v59 = vsub.f32 %v18012_v49, %v4600_v55 }
 0x7c7   :  { %v4748_v31 = vsel %vm4588_vm1, %v18132_v56, 0.0  ;;  %v4699_v2 = vmul.f32 1.442695, %v4668_v50 }
 0x7c8   :  { %v4691_v29 = vmul.f32 1.442695, %v4664_v59  ;;  %v4624_v10 = vpop.xlane.xlu1 %4623  ;;  %4749 = vadd.xlane.f32.xlu1 %v4748_v31 }
 0x7c9   :  { %v4672_v14 = vsub.f32 %v18022_v4, %v4624_v10  ;;  %v4609_v44 = vpop.xlane.xlu0 %4608 }
 0x7ca   :  { %16306 = vpow2.f32 %v4691_v29  ;;  %v4667_v18 = vsub.f32 %v18025_v5, %v4609_v44 }
 0x7cb   :  { %16308 = vpow2.f32 %v4699_v2  ;;  %v4707_v53 = vmul.f32 1.442695, %v4672_v14 }
 0x7cc   :  { %v4697_v19 = vmul.f32 1.442695, %v4667_v18  ;;  %v4618_v22 = vpop.xlane.xlu1 %4617 }
 0x7cd   :  { %v4670_v23 = vsub.f32 %v18030_v61, %v4618_v22  ;;  %v4603_v49 = vpop.xlane.xlu0 %4602 }
 0x7ce   :  { %16310 = vpow2.f32 %v4697_v19  ;;  %v4665_v28 = vsub.f32 %v18037_v11, %v4603_v49 }
 0x7cf   :  { %16312 = vpow2.f32 %v4707_v53  ;;  %v4703_v33 = vmul.f32 1.442695, %v4670_v23 }
 0x7d0   :  { %v18141_v30 = vpop.eup %16304  ;;  %v4693_v20 = vmul.f32 1.442695, %v4665_v28 }
 0x7d1   :  { %v4633_v4 = vpop.xlane.xlu0 %4632  ;;  %v4757_v42 = vsel %vm4588_vm1, %v18141_v30, 0.0 }
 0x7d2   :  { %16314 = vpow2.f32 %v4693_v20  ;;  %v4675_v5 = vsub.f32 %v18046_v26, %v4633_v4  ;;  %4758 = vadd.xlane.f32.xlu0 %v4757_v42 }
 0x7d3   :  { %16316 = vpow2.f32 %v4703_v33 }
 0x7d4   :  { %v18146_v45 = vpop.eup %16306  ;;  %v4713_v61 = vmul.f32 1.442695, %v4675_v5  ;;  %v4630_v46 = vpop.xlane.xlu1 %4629 }
 0x7d5   :  { %v4674_v11 = vsub.f32 %v18054_v41, %v4630_v46  ;;  %v4627_v47 = vpop.xlane.xlu0 %4626  ;;  %v4742_v50 = vsel %vm4588_vm1, %v18146_v45, 0.0  ;;  %v18151_v55 = vpop.eup %16308 }
 0x7d6   :  { %16318 = vpow2.f32 %v4713_v61  ;;  %v4673_v59 = vsub.f32 %v18051_v36, %v4627_v47  ;;  %4743 = vadd.xlane.f32.xlu1 %v4742_v50  ;;  %v4754_v44 = vsel %vm4588_vm1, %v18151_v55, 0.0 }
 0x7d7   :  { %v4711_v31 = vmul.f32 1.442695, %v4674_v11 }
 0x7d8   :  { %v18154_v26 = vpop.eup %16310  ;;  %v4709_v2 = vmul.f32 1.442695, %v4673_v59  ;;  %v4642_v29 = vpop.xlane.xlu1 %4641 }
 0x7d9   :  { %16320 = vpow2.f32 %v4711_v31  ;;  %v4678_v10 = vsub.f32 %v18062_v37, %v4642_v29  ;;  %v4621_v14 = vpop.xlane.xlu0 %4620  ;;  %v4751_v41 = vsel %vm4588_vm1, %v18154_v26, 0.0  ;;  %v18161_v18 = vpop.eup %16312 }
 0x7da   :  { %16322 = vpow2.f32 %v4709_v2  ;;  %v4671_v36 = vsub.f32 %v18065_v58, %v4621_v14  ;;  %4752 = vadd.xlane.f32.xlu0 %v4751_v41  ;;  %4755 = vadd.xlane.f32.xlu1 %v4754_v44  ;;  %v4766_v28 = vsel %vm4588_vm1, %v18161_v18, 0.0 }
 0x7db   :  { %v4719_v53 = vmul.f32 1.442695, %v4678_v10 }
 0x7dc   :  { %v18164_v19 = vpop.eup %16314  ;;  %v4705_v22 = vmul.f32 1.442695, %v4671_v36  ;;  %v4636_v23 = vpop.xlane.xlu1 %4635 }
 0x7dd   :  { %16324 = vpow2.f32 %v4719_v53  ;;  %v4676_v37 = vsub.f32 %v18071_v0, %v4636_v23  ;;  %v4745_v49 = vsel %vm4588_vm1, %v18164_v19, 0.0  ;;  %v18171_v33 = vpop.eup %16316 }
 0x7de   :  { %16326 = vpow2.f32 %v4705_v22  ;;  %4746 = vadd.xlane.f32.xlu0 %v4745_v49  ;;  %4767 = vadd.xlane.f32.xlu1 %v4766_v28  ;;  %v4760_v0 = vsel %vm4588_vm1, %v18171_v33, 0.0 }
 0x7df   :  { %v4715_v58 = vmul.f32 1.442695, %v4676_v37 }
 0x7e0   :  { %v18173_v20 = vpop.eup %16318 }
 0x7e1   :  { %16328 = vpow2.f32 %v4715_v58  ;;  %v4651_v4 = vpop.xlane.xlu0 %4650  ;;  %v4775_v42 = vsel %vm4588_vm1, %v18173_v20, 0.0 }
 0x7e2   :  { %v4681_v5 = vsub.f32 %v18079_v27, %v4651_v4  ;;  %4776 = vadd.xlane.f32.xlu0 %v4775_v42  ;;  %4761 = vadd.xlane.f32.xlu1 %v4760_v0 }
 0x7e3   :  { %v18180_v61 = vpop.eup %16320 }
 0x7e4   :  { %v18182_v46 = vpop.eup %16322  ;;  %v4725_v11 = vmul.f32 1.442695, %v4681_v5  ;;  %v4648_v47 = vpop.xlane.xlu1 %4647  ;;  %v4772_v50 = vsel %vm4588_vm1, %v18180_v61, 0.0 }
 0x7e5   :  { %v4680_v59 = vsub.f32 %v18087_v43, %v4648_v47  ;;  %v4645_v31 = vpop.xlane.xlu0 %4644  ;;  %v4769_v2 = vsel %vm4588_vm1, %v18182_v46, 0.0 }
 0x7e6   :  { %16330 = vpow2.f32 %v4725_v11  ;;  %v4679_v27 = vsub.f32 %v18084_v38, %v4645_v31  ;;  %4770 = vadd.xlane.f32.xlu0 %v4769_v2  ;;  %4773 = vadd.xlane.f32.xlu1 %v4772_v50 }
 0x7e7   :  { %v18190_v29 = vpop.eup %16324  ;;  %v4723_v36 = vmul.f32 1.442695, %v4680_v59 }
 0x7e8   :  { %v18192_v10 = vpop.eup %16326  ;;  %v4721_v14 = vmul.f32 1.442695, %v4679_v27  ;;  %v4738_v41 = vpop.xlane.xlu1 %4737  ;;  %v4784_v44 = vsel %vm4588_vm1, %v18190_v29, 0.0 }
 0x7e9   :  { %v4639_v43 = vpop.xlane.xlu0 %4638  ;;  %v4763_v53 = vsel %vm4588_vm1, %v18192_v10, 0.0 }
 0x7ea   :  { %16332 = vpow2.f32 %v4721_v14  ;;  %v4677_v22 = vsub.f32 %v18096_v21, %v4639_v43  ;;  %4764 = vadd.xlane.f32.xlu0 %v4763_v53  ;;  %4785 = vadd.xlane.f32.xlu1 %v4784_v44 }
 0x7eb   :  { %v18199_v38 = vpop.eup %16328  ;;  %16334 = vpow2.f32 %v4723_v36 }
 0x7ec   :  { %v4717_v23 = vmul.f32 1.442695, %v4677_v22  ;;  %v4660_v37 = vpop.xlane.xlu1 %4659  ;;  %v4778_v49 = vsel %vm4588_vm1, %v18199_v38, 0.0 }
 0x7ed   :  { %v4684_v28 = vsub.f32 %v18101_v7, %v4660_v37  ;;  %v4741_v58 = vpop.xlane.xlu0 %4740 }
 0x7ee   :  { %16336 = vpow2.f32 %v4717_v23  ;;  %4779 = vadd.xlane.f32.xlu1 %v4778_v49 }
 0x7ef   :  { %v4731_v4 = vmul.f32 1.442695, %v4684_v28  ;;  %16338 = vrcp.f32 %v4741_v58 }
 0x7f0   :  { %v18204_v42 = vpop.eup %16330  ;;  %16340 = vrcp.f32 %v4738_v41  ;;  %v4654_v21 = vpop.xlane.xlu1 %4653 }
 0x7f1   :  { %16342 = vpow2.f32 %v4731_v4  ;;  %v4682_v0 = vsub.f32 %v18110_v16, %v4654_v21  ;;  %v4735_v5 = vpop.xlane.xlu0 %4734  ;;  %v4793_v11 = vsel %vm4588_vm1, %v18204_v42, 0.0  ;;  %v15222_v21 = vunpack.i.l.bf16 %v18032_v9 }
 0x7f2   :  { %16344 = vrcp.f32 %v4735_v5  ;;  %4794 = vadd.xlane.f32.xlu0 %v4793_v11 }
 0x7f3   :  { %v4727_v47 = vmul.f32 1.442695, %v4682_v0 }
 0x7f4   :  { %v18209_v7 = vpop.eup %16332 }
 0x7f5   :  { %16346 = vpow2.f32 %v4727_v47  ;;  %v4657_v50 = vpop.xlane.xlu0 %4656  ;;  %v4787_v59 = vsel %vm4588_vm1, %v18209_v7, 0.0  ;;  %v18214_v2 = vpop.eup %16334 }
 0x7f6   :  { %v4683_v31 = vsub.f32 %v18121_v25, %v4657_v50  ;;  %4788 = vadd.xlane.f32.xlu1 %v4787_v59  ;;  %v4790_v22 = vsel %vm4588_vm1, %v18214_v2, 0.0 }
 0x7f8   :  { %v18216_v16 = vpop.eup %16336  ;;  %v4729_v27 = vmul.f32 1.442695, %v4683_v31 }
 0x7f9   :  { %v16339_v14 = vpop.eup %16338  ;;  %v4781_v41 = vsel %vm4588_vm1, %v18216_v16, 0.0 }
 0x7fa   :  { %v16341_v44 = vpop.eup %16340  ;;  %16348 = vpow2.f32 %v4729_v27  ;;  %4782 = vadd.xlane.f32.xlu0 %v4781_v41  ;;  %v4831_v25 = vmul.f32 %v16339_v14, %v18105_v13  ;;  %v15223_v13 = vunpack.i.h.bf16 %v18032_v9 }
 0x7fb   :  { %v18220_v36 = vpop.eup %16342  ;;  %v4830_v37 = vmul.f32 %v16341_v44, %v18091_v54 }
 0x7fc   :  { %v16345_v43 = vpop.eup %16344  ;;  %v4802_v53 = vsel %vm4588_vm1, %v18220_v36, 0.0  ;;  %v4854_v4 = vpack.c.bf16 %v4831_v25, %v4831_v25  ;;  %v4047_v11 = vpack.c.bf16 %v15223_v13, %v15222_v21 }
 0x7fd   :  { %4803 = vadd.xlane.f32.xlu1 %v4802_v53  ;;  %v4829_v23 = vmul.f32 %v16345_v43, %v18114_v17  ;;  %v4046_v17 = vpack.c.bf16 %v17940_v35, %v17940_v35  ;;  %v18250_v35 = vpop.permute.xlu1 %15245 }
 0x7fe   :  { %4791 = vadd.xlane.f32.xlu0 %v4790_v22 }
 0x7ff   :  { %v18229_v49 = vpop.eup %16346  ;;  %v4853_v28 = vpack.c.bf16 %v4830_v37, %v4829_v23  ;;  %v4934_v5 = vsel %vm19823_vm9, %v4046_v17, 0  ;;  %vm5425_vm9 = vcmask 654336  }
 0x800   :  { %v4796_v58 = vsel %vm4588_vm1, %v18229_v49, 0.0 }
 0x801   :  { %14539 = vmatprep.mubr.msk.bf16.mxu0 %vm4588_vm1, %v4853_v28  ;;  %4797 = vadd.xlane.f32.xlu1 %v4796_v58 }
 0x802   :  { %14540 = vmatmul.mubr.msk.bf16.vlgmr.msra.gmra.mrb[72].mxu0 %vm4588_vm1, %v4854_v4 }
 0x803   :  { %14544 = vmatpush3.bf16.msra.mxu0 %v17957_v52  ;;  %v18252_v52 = vpop.permute.xlu0 %15240 }
 0x804   :  { %v18240_v54 = vpop.eup %16348  ;;  %14988 = vmatprep.subr.msk.bf16.mxu0 %vm19822_vm2, %v4046_v17  ;;  %vm5421_vm2 = vcmask 523264  }
 0x805   :  { %v4799_v0 = vsel %vm4588_vm1, %v18240_v54, 0.0 }
 0x806   :  { %4800 = vadd.xlane.f32.xlu0 %v4799_v0 }
 0x807   :  { %14546 = vmatpush3.bf16.msra.mxu0 %v4934_v5 }
 0x808   :  { %14551 = vmatprep.subr.bf16.mxu0 %v4047_v11 }
 0x812   :  { %4038 = vrot.lane.b32.xlu1 %v17872_v40, %s17232_s26 }
 0x81c   :  { %4029 = vrot.lane.b32.xlu0 %v17872_v40, %s17236_s15 }
 0x855   :  { %v4750_v9 = vpop.xlane.xlu1 %4749 }
 0x856   :  { %16350 = vrcp.f32 %v4750_v9 }
 0x85f   :  { %v4759_v47 = vpop.xlane.xlu0 %4758 }
 0x860   :  { %v16351_v43 = vpop.eup %16350 }
 0x861   :  { %v4834_v28 = vmul.f32 %v16351_v43, %v18132_v56  ;;  %v15232_v56 = vunpack.i.l.bf16 %v18043_v24 }
 0x863   :  { %v4744_v50 = vpop.xlane.xlu1 %4743  ;;  %v4856_v5 = vpack.c.bf16 %v4834_v28, %v4834_v28 }
 0x864   :  { %16352 = vrcp.f32 %v4744_v50  ;;  %v15233_v50 = vunpack.i.h.bf16 %v18043_v24 }
 0x867   :  { %v4753_v59 = vpop.xlane.xlu0 %4752  ;;  %v4756_v31 = vpop.xlane.xlu1 %4755 }
 0x868   :  { %16354 = vrcp.f32 %v4753_v59 }
 0x869   :  { %16356 = vrcp.f32 %v4756_v31 }
 0x86b   :  { %v4747_v27 = vpop.xlane.xlu0 %4746  ;;  %v4768_v14 = vpop.xlane.xlu1 %4767 }
 0x86c   :  { %16358 = vrcp.f32 %v4747_v27 }
 0x86d   :  { %16360 = vrcp.f32 %v4759_v47 }
 0x86e   :  { %v16353_v40 = vpop.eup %16352  ;;  %16362 = vrcp.f32 %v4768_v14 }
 0x86f   :  { %v4777_v41 = vpop.xlane.xlu0 %4776  ;;  %v4762_v44 = vpop.xlane.xlu1 %4761  ;;  %v4832_v4 = vmul.f32 %v16353_v40, %v18146_v45  ;;  %v4048_v45 = vpack.c.bf16 %v17946_v39, %v17946_v39 }
 0x871   :  { %v4991_v24 = vsel %vm19825_vm0, %v4048_v45, 0  ;;  %vm19834_vm0 = vcmask 130048  }
 0x872   :  { %v16355_v53 = vpop.eup %16354 }
 0x873   :  { %v4771_v25 = vpop.xlane.xlu0 %4770  ;;  %v4774_v22 = vpop.xlane.xlu1 %4773  ;;  %v4835_v21 = vmul.f32 %v16355_v53, %v18154_v26 }
 0x874   :  { %v16357_v23 = vpop.eup %16356  ;;  %16364 = vrcp.f32 %v4771_v25 }
 0x875   :  { %16366 = vrcp.f32 %v4774_v22  ;;  %v4836_v17 = vmul.f32 %v16357_v23, %v18151_v55 }
 0x876   :  { %v16359_v37 = vpop.eup %16358  ;;  %16368 = vrcp.f32 %v4762_v44 }
 0x877   :  { %v4765_v58 = vpop.xlane.xlu0 %4764  ;;  %v4833_v13 = vmul.f32 %v16359_v37, %v18164_v19  ;;  %v16361_v9 = vpop.eup %16360  ;;  %v4857_v47 = vpack.c.bf16 %v4836_v17, %v4835_v21  ;;  %v15243_v37 = vunpack.i.h.bf16 %v18252_v52 }
 0x878   :  { %16370 = vrcp.f32 %v4765_v58  ;;  %v4786_v19 = vpop.xlane.xlu1 %4785  ;;  %v16363_v26 = vpop.eup %16362  ;;  %v4837_v59 = vmul.f32 %v16361_v9, %v18141_v30  ;;  %v4052_v30 = vpack.c.bf16 %v17938_v34, %v17938_v34 }
 0x879   :  { %16372 = vrcp.f32 %v4777_v41  ;;  %v4855_v0 = vpack.c.bf16 %v4833_v13, %v4832_v4  ;;  %v4051_v41 = vpack.c.bf16 %v15233_v50, %v15232_v56  ;;  %v4840_v40 = vmul.f32 %v16363_v26, %v18161_v18 }
 0x87a   :  { %16374 = vrcp.f32 %v4786_v19  ;;  %v15248_v4 = vunpack.i.h.bf16 %v18250_v35  ;;  %v15247_v13 = vunpack.i.l.bf16 %v18250_v35 }
 0x87b   :  { %14547 = vmatprep.mubr.msk.bf16.mxu0 %vm4588_vm1, %v4855_v0  ;;  %v4860_v34 = vpack.c.bf16 %v4840_v40, %v4840_v40 }
 0x87c   :  { %14548 = vmatmul.mubr.msk.bf16.vlgmr.msra.gmra.mrb[76].mxu0 %vm4588_vm1, %v4856_v5  ;;  %v4780_v43 = vpop.xlane.xlu1 %4779  ;;  %v4057_v0 = vpack.c.bf16 %v15248_v4, %v15247_v13  ;;  %v15947_v13 = vld [vmem:[#allocation9 + $0x8] sm:$0xff]  }
 0x87d   :  { %14552 = vmatpush3.bf16.msra.mxu0 %v4047_v11  ;;  %14555 = vmatprep.mubr.msk.bf16.mxu0 %vm4588_vm1, %v4857_v47  ;;  %v4858_v11 = vpack.c.bf16 %v4837_v59, %v4837_v59  ;;  %16376 = vrcp.f32 %v4780_v43 }
 0x87e   :  { %v16365_v55 = vpop.eup %16364  ;;  %14989 = vmatprep.subr.msk.bf16.mxu0 %vm19824_vm14, %v4048_v45  ;;  %vm5429_vm14 = vcmask 785408  }
 0x87f   :  { %v16367_v31 = vpop.eup %16366  ;;  %v4841_v27 = vmul.f32 %v16365_v55, %v18182_v46  ;;  %v4795_v25 = vpop.xlane.xlu0 %4794 }
 0x880   :  { %v16369_v14 = vpop.eup %16368  ;;  %v4842_v39 = vmul.f32 %v16367_v31, %v18180_v61  ;;  %v15242_v61 = vunpack.i.l.bf16 %v18252_v52  ;;  %v5105_v52 = vsel %vm19827_vm4, %v4052_v30, 0  ;;  %vm19836_vm4 = vmmov %vm19834_vm0 }
 0x881   :  { %14554 = vmatpush3.bf16.msra.mxu0 %v4991_v24  ;;  %v4838_v46 = vmul.f32 %v16369_v14, %v18171_v33 }
 0x882   :  { %v16371_v44 = vpop.eup %16370  ;;  %14567 = vmatprep.subr.bf16.mxu0 %v4051_v41  ;;  %v4861_v22 = vpack.c.bf16 %v4842_v39, %v4841_v27  ;;  %v4055_v21 = vpack.c.bf16 %v15243_v37, %v15242_v61 }
 0x883   :  { %v16373_v53 = vpop.eup %16372  ;;  %v4839_v23 = vmul.f32 %v16371_v44, %v18192_v10  ;;  %v4789_v28 = vpop.xlane.xlu1 %4788  ;;  %v4054_v10 = vpack.c.bf16 %v17954_v48, %v17954_v48 }
 0x884   :  { %14556 = vmatmul.mubr.msk.bf16.vlgmr.msra.gmra.mrb[80].mxu0 %vm4588_vm1, %v4858_v11  ;;  %v4843_v33 = vmul.f32 %v16373_v53, %v18173_v20  ;;  %v16375_v5 = vpop.eup %16374 }
 0x885   :  { %14568 = vmatpush3.bf16.msra.mxu0 %v4051_v41  ;;  %14571 = vmatprep.mubr.msk.bf16.mxu0 %vm4588_vm1, %v4861_v22  ;;  %v4859_v18 = vpack.c.bf16 %v4839_v23, %v4838_v46  ;;  %v5162_v35 = vsel %vm19829_vm6, %v4054_v10, 0  ;;  %v4846_v50 = vmul.f32 %v16375_v5, %v18190_v29  ;;  %vm19837_vm6 = vmmov %vm19834_vm0 }
 0x886   :  { %14991 = vmatprep.subr.msk.bf16.mxu0 %vm19826_vm3, %v4052_v30  ;;  %v4862_v20 = vpack.c.bf16 %v4843_v33, %v4843_v33  ;;  %v15946_v33 = vld [vmem:[#allocation9] sm:$0xff]   ;;  %vm19835_vm3 = vmmov %vm19834_vm0 }
 0x887   :  { %v4783_v58 = vpop.xlane.xlu0 %4782  ;;  %14563 = vmatprep.mubr.msk.bf16.mxu1 %vm4588_vm1, %v4859_v18  ;;  %v4864_v14 = vpack.c.bf16 %v4846_v50, %v4846_v50 }
 0x888   :  { %16378 = vrcp.f32 %v4783_v58  ;;  %14564 = vmatmul.mubr.msk.bf16.vlgmr.msra.gmra.mrb[68].mxu1 %vm4588_vm1, %v4860_v34 }
 0x889   :  { %14570 = vmatpush3.bf16.msra.mxu0 %v5105_v52  ;;  %14576 = vmatpush3.bf16.msra.mxu1 %v17963_v3  ;;  %16380 = vrcp.f32 %v4789_v28  ;;  %v16377_v3 = vpop.eup %16376 }
 0x88a   :  { %14992 = vmatprep.subr.msk.bf16.mxu1 %vm19828_vm5, %v4054_v10  ;;  %14583 = vmatprep.subr.bf16.mxu0 %v4055_v21  ;;  %v4804_v48 = vpop.xlane.xlu1 %4803  ;;  %16382 = vrcp.f32 %v4795_v25  ;;  %v4844_v45 = vmul.f32 %v16377_v3, %v18199_v38  ;;  %v15949_v3 = vld [vmem:[#allocation9 + $0x18] sm:$0xff]   ;;  %vm5433_vm5 = vcmask 916480  }
 0x88b   :  { %v4792_v17 = vpop.xlane.xlu0 %4791 }
 0x88c   :  { %16384 = vrcp.f32 %v4792_v17  ;;  %14572 = vmatmul.mubr.msk.bf16.vlgmr.msra.gmra.mrb[84].mxu0 %vm4588_vm1, %v4862_v20 }
 0x88d   :  { %14578 = vmatpush3.bf16.msra.mxu1 %v5162_v35  ;;  %14584 = vmatpush3.bf16.msra.mxu0 %v4055_v21  ;;  %16386 = vrcp.f32 %v4804_v48  ;;  %v15948_v21 = vld [vmem:[#allocation9 + $0x10] sm:$0xff]  }
 0x88e   :  { %14591 = vmatprep.subr.bf16.mxu1 %v4057_v0  ;;  %v4798_v9 = vpop.xlane.xlu1 %4797 }
 0x88f   :  { %16388 = vrcp.f32 %v4798_v9 }
 0x892   :  { %v16379_v47 = vpop.eup %16378  ;;  %v4039_v59 = vpop.permute.xlu1 %4038 }
 0x893   :  { %v4801_v56 = vpop.xlane.xlu0 %4800  ;;  %v4845_v19 = vmul.f32 %v16379_v47, %v18216_v16  ;;  %v16381_v26 = vpop.eup %16380  ;;  %v4058_v29 = vpack.c.bf16 %v4039_v59, %v4039_v59 }
 0x894   :  { %16390 = vrcp.f32 %v4801_v56  ;;  %v16383_v55 = vpop.eup %16382  ;;  %v4847_v41 = vmul.f32 %v16381_v26, %v18209_v7  ;;  %v15951_v26 = vld [vmem:[#allocation9 + $0x28] sm:$0xff]  }
 0x895   :  { %v4863_v31 = vpack.c.bf16 %v4845_v19, %v4844_v45  ;;  %v4849_v38 = vmul.f32 %v16383_v55, %v18204_v42  ;;  %v15950_v19 = vld [vmem:[#allocation9 + $0x20] sm:$0xff]  }
 0x896   :  { %v16385_v27 = vpop.eup %16384 }
 0x897   :  { %v4030_v24 = vpop.permute.xlu0 %4029  ;;  %14579 = vmatprep.mubr.msk.bf16.mxu1 %vm4588_vm1, %v4863_v31  ;;  %v4848_v39 = vmul.f32 %v16385_v27, %v18214_v2  ;;  %v16387_v11 = vpop.eup %16386  ;;  %v5276_v2 = vsel %vm19833_vm11, %v4058_v29, 0  ;;  %v4866_v40 = vpack.c.bf16 %v4849_v38, %v4849_v38  ;;  %v15952_v31 = vld [vmem:[#allocation9 + $0x30] sm:$0xff]   ;;  %vm19841_vm11 = vmmov %vm19834_vm0 }
 0x898   :  { %v4056_v44 = vpack.c.bf16 %v4030_v24, %v4030_v24  ;;  %14580 = vmatmul.mubr.msk.bf16.vlgmr.msra.gmra.mrb[72].mxu1 %vm4588_vm1, %v4864_v14  ;;  %v4852_v42 = vmul.f32 %v16387_v11, %v18220_v36 }
 0x899   :  { %14592 = vmatpush3.bf16.msra.mxu1 %v4057_v0  ;;  %v4865_v16 = vpack.c.bf16 %v4848_v39, %v4847_v41  ;;  %v16389_v7 = vpop.eup %16388  ;;  %v15953_v41 = vld [vmem:[#allocation9 + $0x38] sm:$0xff]  }
 0x89a   :  { %14994 = vmatprep.subr.msk.bf16.mxu1 %vm19830_vm7, %v4058_v29  ;;  %14993 = vmatprep.subr.msk.bf16.mxu0 %vm19831_vm8, %v4056_v44  ;;  %v5219_v43 = vsel %vm19832_vm10, %v4056_v44, 0  ;;  %v4850_v30 = vmul.f32 %v16389_v7, %v18229_v49  ;;  %v4868_v46 = vpack.c.bf16 %v4852_v42, %v4852_v42  ;;  %vm19838_vm7 = vmmov %vm19834_vm0 }
 0x89b   :  { %14586 = vmatpush3.bf16.msra.mxu0 %v5219_v43  ;;  %14587 = vmatprep.mubr.msk.bf16.mxu0 %vm4588_vm1, %v4865_v16  ;;  %vm19839_vm8 = vmmov %vm19834_vm0 }
 0x89c   :  { %14599 = vmatprep.subr.bf16.mxu0 %v15946_v33  ;;  %vm19840_vm10 = vmmov %vm19834_vm0 }
 0x89d   :  { %14594 = vmatpush3.bf16.msra.mxu1 %v5276_v2 }
 0x89e   :  { %v16391_v53 = vpop.eup %16390  ;;  %14588 = vmatmul.mubr.msk.bf16.vlgmr.msra.gmra.mrb[88].mxu0 %vm4588_vm1, %v4866_v40 }
 0x89f   :  { %v4851_v25 = vmul.f32 %v16391_v53, %v18240_v54  ;;  %14600 = vmatpush3.bf16.msra.mxu0 %v15946_v33 }
 0x8a0   :  { %14601 = vmatprep.subr.bf16.mxu0 %v15947_v13 }
 0x8a1   :  { %v4867_v22 = vpack.c.bf16 %v4851_v25, %v4850_v30 }
 0x8a3   :  { %14595 = vmatprep.mubr.msk.bf16.mxu1 %vm4588_vm1, %v4867_v22  ;;  %14602 = vmatpush3.bf16.msra.mxu0 %v15947_v13 }
 0x8a4   :  { %14596 = vmatmul.mubr.msk.bf16.vlgmr.msra.gmra.mrb[76].mxu1 %vm4588_vm1, %v4868_v46  ;;  %14603 = vmatprep.subr.bf16.mxu0 %v15948_v21 }
 0x8a5   :  { %5759 = vmatprep.mubr.bf16.mxu1 %v17259_v32 }
 0x8a7   :  { %14604 = vmatpush3.bf16.msra.mxu0 %v15948_v21 }
 0x8a8   :  { %14605 = vmatprep.subr.bf16.mxu0 %v15949_v3 }
 0x8ab   :  { %14606 = vmatpush3.bf16.msra.mxu0 %v15949_v3 }
 0x8ac   :  { %14607 = vmatprep.subr.bf16.mxu0 %v15950_v19 }
 0x8af   :  { %14608 = vmatpush3.bf16.msra.mxu0 %v15950_v19 }
 0x8b0   :  { %14609 = vmatprep.subr.bf16.mxu0 %v15951_v26 }
 0x8b3   :  { %14610 = vmatpush3.bf16.msra.mxu0 %v15951_v26 }
 0x8b4   :  { %14611 = vmatprep.subr.bf16.mxu0 %v15952_v31 }
 0x8b7   :  { %14612 = vmatpush3.bf16.msra.mxu0 %v15952_v31 }
 0x8b8   :  { %14613 = vmatprep.subr.bf16.mxu0 %v15953_v41 }
 0x8bb   :  { %14614 = vmatpush3.bf16.msra.mxu0 %v15953_v41 }
 0x8d5   :  { %v18313_v23 = vpop.f32.mrb[72].mxu0 }
 0x8d6   :  { %v18315_v37 = vpop.f32.mrb[73].mxu0 }
 0x8d7   :  { %v14542_v61 = vpop.f32.mrb[74].mxu0 }
 0x8d8   :  { %v18317_v18 = vpop.f32.mrb[75].mxu0 }
 0x94f   :  { %v14549_v36 = vpop.f32.mrb[76].mxu0 }
 0x950   :  { %5333 = vrot.lane.b32.xlu1 %v14549_v36, %s17232_s26  ;;  %v4970_v49 = vpop.f32.mrb[77].mxu0 }
 0x951   :  { %v14550_v54 = vpop.f32.mrb[78].mxu0 }
 0x952   :  { %v4973_v28 = vpop.f32.mrb[79].mxu0 }
 0x953   :  { %v15249_v34 = vpack.i.bf16 %v4973_v28, %v4970_v49 }
 0x955   :  { %15250 = vrot.lane.b32.xlu0 %v15249_v34, %s17232_s26 }
 0x957   :  { %v14557_v10 = vpop.f32.mrb[80].mxu0 }
 0x958   :  { %5345 = vrot.lane.b32.xlu1 %v14557_v10, %s17236_s15  ;;  %v5027_v58 = vpop.f32.mrb[81].mxu0 }
 0x959   :  { %v14558_v52 = vpop.f32.mrb[82].mxu0 }
 0x95a   :  { %v5030_v4 = vpop.f32.mrb[83].mxu0 }
 0x95b   :  { %v15254_v48 = vpack.i.bf16 %v5030_v4, %v5027_v58  ;;  %v14565_v20 = vpop.f32.mrb[68].mxu1 }
 0x95c   :  { %5357 = vrot.lane.b32.xlu1 %v14565_v20, %s17229_s7  ;;  %v5084_v17 = vpop.f32.mrb[69].mxu1 }
 0x95d   :  { %15255 = vrot.lane.b32.xlu0 %v15254_v48, %s17236_s15  ;;  %v14566_v35 = vpop.f32.mrb[70].mxu1 }
 0x95e   :  { %v5087_v0 = vpop.f32.mrb[71].mxu1 }
 0x95f   :  { %v15259_v5 = vpack.i.bf16 %v5087_v0, %v5084_v17  ;;  %v14573_v9 = vpop.f32.mrb[84].mxu0 }
 0x960   :  { %5369 = vrot.lane.b32.xlu1 %v14573_v9, %s17245_s16  ;;  %v5141_v47 = vpop.f32.mrb[85].mxu0 }
 0x961   :  { %15260 = vrot.lane.b32.xlu0 %v15259_v5, %s17229_s7  ;;  %v14574_v50 = vpop.f32.mrb[86].mxu0 }
 0x962   :  { %v5144_v56 = vpop.f32.mrb[87].mxu0 }
 0x963   :  { %v15264_v45 = vpack.i.bf16 %v5144_v56, %v5141_v47 }
 0x965   :  { %15265 = vrot.lane.b32.xlu0 %v15264_v45, %s17245_s16 }
 0x96b   :  { %v14581_v55 = vpop.f32.mrb[72].mxu1 }
 0x96c   :  { %5381 = vrot.lane.b32.xlu1 %v14581_v55, %s17261_s0  ;;  %v5198_v59 = vpop.f32.mrb[73].mxu1 }
 0x96d   :  { %v14582_v27 = vpop.f32.mrb[74].mxu1 }
 0x96e   :  { %v5201_v14 = vpop.f32.mrb[75].mxu1 }
 0x96f   :  { %v15269_v24 = vpack.i.bf16 %v5201_v14, %v5198_v59 }
 0x971   :  { %15270 = vrot.lane.b32.xlu0 %v15269_v24, %s17261_s0  ;;  %v14589_v39 = vpop.f32.mrb[88].mxu0 }
 0x972   :  { %5393 = vrot.lane.b32.xlu1 %v14589_v39, %s17262_s9  ;;  %v5255_v29 = vpop.f32.mrb[89].mxu0 }
 0x973   :  { %v14590_v44 = vpop.f32.mrb[90].mxu0 }
 0x974   :  { %v5258_v38 = vpop.f32.mrb[91].mxu0 }
 0x975   :  { %v15274_v16 = vpack.i.bf16 %v5258_v38, %v5255_v29 }
 0x977   :  { %15275 = vrot.lane.b32.xlu0 %v15274_v16, %s17262_s9  ;;  %v14597_v43 = vpop.f32.mrb[76].mxu1 }
 0x978   :  { %5405 = vrot.lane.b32.xlu1 %v14597_v43, %s17260_s20  ;;  %v5312_v11 = vpop.f32.mrb[77].mxu1 }
 0x979   :  { %v14598_v7 = vpop.f32.mrb[78].mxu1 }
 0x97a   :  { %v5315_v2 = vpop.f32.mrb[79].mxu1 }
 0x97b   :  { %v15279_v40 = vpack.i.bf16 %v5315_v2, %v5312_v11 }
 0x97d   :  { %15280 = vrot.lane.b32.xlu0 %v15279_v40, %s17260_s20  ;;  %v13169_v40 = vld [vmem:[#allocation10] ss:$0 sm:$0xff] }
 0x9c2   :  { %v5334_v53 = vpop.permute.xlu1 %5333 }
 0x9c3   :  { %v5412_v58 = vsel %vm19834_vm0, %v18313_v23, %v5334_v53 }
 0x9c7   :  { %v15251_v42 = vpop.permute.xlu0 %15250 }
 0x9c8   :  { %v15253_v49 = vunpack.i.h.bf16 %v15251_v42  ;;  %v15252_v34 = vunpack.i.l.bf16 %v15251_v42 }
 0x9ca   :  { %v5346_v30 = vpop.permute.xlu1 %5345  ;;  %v5411_v52 = vsel %vm19835_vm3, %v18317_v18, %v15253_v49  ;;  %v5410_v20 = vsel %vm19836_vm4, %v18315_v37, %v15252_v34  ;;  %vm19842_vm3 = vmmov %vm19834_vm0 }
 0x9cb   :  { %v5416_v17 = vsel %vm5413_vm12, %v5412_v58, %v5346_v30  ;;  %vm19843_vm4 = vmmov %vm19834_vm0 }
 0x9ce   :  { %v5358_v22 = vpop.permute.xlu1 %5357 }
 0x9cf   :  { %v15256_v25 = vpop.permute.xlu0 %15255  ;;  %v5420_v5 = vsel %vm5417_vm13, %v5416_v17, %v5358_v22 }
 0x9d0   :  { %v15258_v33 = vunpack.i.h.bf16 %v15256_v25  ;;  %v15257_v10 = vunpack.i.l.bf16 %v15256_v25 }
 0x9d2   :  { %v5370_v61 = vpop.permute.xlu1 %5369  ;;  %v5415_v9 = vsel %vm5413_vm12, %v5411_v52, %v15258_v33  ;;  %v5414_v47 = vsel %vm5413_vm12, %v5410_v20, %v15257_v10 }
 0x9d3   :  { %v15261_v46 = vpop.permute.xlu0 %15260  ;;  %v5424_v18 = vsel %vm5421_vm2, %v5420_v5, %v5370_v61  ;;  %v15963_v5 = vld [vmem:[#allocation15 + $0x30] ss:$8 sps:$4 sm:$0xff]  }
 0x9d4   :  { %v15263_v4 = vunpack.i.h.bf16 %v15261_v46  ;;  %v15262_v13 = vunpack.i.l.bf16 %v15261_v46 }
 0x9d6   :  { %v5419_v45 = vsel %vm5417_vm13, %v5415_v9, %v15263_v4  ;;  %v5418_v37 = vsel %vm5417_vm13, %v5414_v47, %v15262_v13  ;;  %v15965_v9 = vld [vmem:[#allocation15 + $0x34] ss:$8 sps:$4 sm:$0xff]  }
 0x9d7   :  { %v15266_v36 = vpop.permute.xlu0 %15265  ;;  %v15971_v47 = vld [vmem:[#allocation15 + $0x54] ss:$8 sps:$4 sm:$0xff]  }
 0x9d8   :  { %v15268_v35 = vunpack.i.h.bf16 %v15266_v36  ;;  %v15267_v0 = vunpack.i.l.bf16 %v15266_v36 }
 0x9da   :  { %v5423_v55 = vsel %vm5421_vm2, %v5419_v45, %v15268_v35  ;;  %v5422_v59 = vsel %vm5421_vm2, %v5418_v37, %v15267_v0  ;;  %v15960_v35 = vld [vmem:[#allocation15 + $0x20] ss:$8 sps:$4 sm:$0xff]   ;;  %v15962_v0 = vld [vmem:[#allocation15 + $0x24] ss:$8 sps:$4 sm:$0xff]   ;;  %v15977_v45 = vld [vmem:[#allocation15 + $0x74] ss:$8 sps:$4 sm:$0xff]  }
 0x9db   :  { %v15975_v37 = vld [vmem:[#allocation15 + $0x70] ss:$8 sps:$4 sm:$0xff]  }
 0x9de   :  { %v5382_v54 = vpop.permute.xlu1 %5381 }
 0x9df   :  { %v5428_v19 = vsel %vm5425_vm9, %v5424_v18, %v5382_v54  ;;  %v15954_v54 = vld [vmem:[#allocation15] ss:$8 sps:$4 sm:$0xff]   ;;  %v15969_v18 = vld [vmem:[#allocation15 + $0x50] ss:$8 sps:$4 sm:$0xff]  }
 0x9e3   :  { %v15271_v28 = vpop.permute.xlu0 %15270 }
 0x9e4   :  { %v5394_v21 = vpop.permute.xlu1 %5393  ;;  %v15273_v3 = vunpack.i.h.bf16 %v15271_v28  ;;  %v15272_v23 = vunpack.i.l.bf16 %v15271_v28  ;;  %v15959_v28 = vld [vmem:[#allocation15 + $0x14] ss:$8 sps:$4 sm:$0xff]  }
 0x9e5   :  { %v5432_v31 = vsel %vm5429_vm14, %v5428_v19, %v5394_v21  ;;  %v15980_v19 = vld [vmem:[#allocation24 + $0x4] ss:$8 sps:$4 sm:$0xff]  }
 0x9e6   :  { %v5427_v14 = vsel %vm5425_vm9, %v5423_v55, %v15273_v3  ;;  %v5426_v24 = vsel %vm5425_vm9, %v5422_v59, %v15272_v23  ;;  %v15968_v3 = vld [vmem:[#allocation15 + $0x44] ss:$8 sps:$4 sm:$0xff]   ;;  %v15966_v23 = vld [vmem:[#allocation15 + $0x40] ss:$8 sps:$4 sm:$0xff]  }
 0x9e9   :  { %v15276_v48 = vpop.permute.xlu0 %15275 }
 0x9ea   :  { %v15278_v50 = vunpack.i.h.bf16 %v15276_v48  ;;  %v15277_v56 = vunpack.i.l.bf16 %v15276_v48  ;;  %v5406_v26 = vpop.permute.xlu1 %5405 }
 0x9eb   :  { %v5436_v29 = vsel %vm5433_vm5, %v5432_v31, %v5406_v26 }
 0x9ec   :  { %v5430_v44 = vsel %vm5429_vm14, %v5426_v24, %v15277_v56  ;;  %v5431_v38 = vsel %vm5429_vm14, %v5427_v14, %v15278_v50  ;;  %v5438_v7 = vpack.c.bf16 %v5436_v29, %v5436_v29  ;;  %v15974_v50 = vld [vmem:[#allocation15 + $0x64] ss:$8 sps:$4 sm:$0xff]   ;;  %v15972_v56 = vld [vmem:[#allocation15 + $0x60] ss:$8 sps:$4 sm:$0xff]  }
 0x9ef   :  { %v15281_v27 = vpop.permute.xlu0 %15280 }
 0x9f0   :  { %v15283_v41 = vunpack.i.h.bf16 %v15281_v27  ;;  %v15282_v39 = vunpack.i.l.bf16 %v15281_v27 }
 0x9f2   :  { %v5434_v16 = vsel %vm5433_vm5, %v5430_v44, %v15282_v39  ;;  %v5435_v43 = vsel %vm5433_vm5, %v5431_v38, %v15283_v41  ;;  %v13170_v38 = vld [vmem:[#allocation12] ss:$0 sm:$0xff] }
 0x9f3   :  { %v5437_v11 = vpack.c.bf16 %v5435_v43, %v5434_v16 }
 0x9f5   :  { %14615 = vmatprep.mubr.bf16.mxu0 %v5437_v11 }
 0x9f6   :  { %14616 = vmatmul.mubr.bf16.vlgmr.msra.gmra.mrb[92].mxu0 %v5438_v7 }
 0xac9   :  { %v14617_v2 = vpop.f32.mrb[92].mxu0 }
 0xaca   :  { %v5537_v53 = vpop.f32.mrb[93].mxu0  ;;  %v5553_v22 = vadd.f32 %v14617_v2, %v17778_v60  ;;  %v15957_v60 = vld [vmem:[#allocation15 + $0x10] ss:$8 sps:$4 sm:$0xff]   ;;  %v13171_v2 = vld [vmem:[#allocation13] ss:$0 sm:$0xff] }
 0xacb   :  { %v5551_v42 = vadd.f32 %v5537_v53, %v17770_v51  ;;  %v14618_v30 = vpop.f32.mrb[94].mxu0  ;;  %v15956_v51 = vld [vmem:[#allocation15 + $0x4] ss:$8 sps:$4 sm:$0xff]  }
 0xacc   :  { %v5540_v25 = vpop.f32.mrb[95].mxu0  ;;  %v18365_v49 = vadd.f32 %v13169_v40, %v5553_v22  ;;  %5727 = vmatprep.subr.bf16.mxu1 %v15956_v51  ;;  %v15981_v51 = vld [vmem:[#allocation24 + $0x10] ss:$8 sps:$4 sm:$0xff]  }
 0xacd   :  { %v18359_v46 = vadd.f32 %v13169_v40, %v5551_v42  ;;  %v5552_v61 = vadd.f32 %v5540_v25, %v17774_v57  ;;  %5728 = vmatpush1.bf16.msra.mxu1 %v15954_v54  ;;  %v15978_v25 = vld [vmem:[#allocation24] ss:$8 sps:$4 sm:$0xff]  }
 0xace   :  { %5729 = vmatprep.subr.bf16.mxu1 %v15959_v28  ;;  %v15986_v28 = vld [vmem:[#allocation24 + $0x24] ss:$8 sps:$4 sm:$0xff]  }
 0xacf   :  { %v18362_v36 = vadd.f32 %v13169_v40, %v5552_v61  ;;  %5566 = vadd.xlane.f32.xlu0 %v18359_v46  ;;  %v15983_v61 = vld [vmem:[#allocation24 + $0x14] ss:$8 sps:$4 sm:$0xff]  }
 0xad1   :  { %5568 = vadd.xlane.f32.xlu1 %v18362_v36  ;;  %5730 = vmatpush1.bf16.msra.mxu1 %v15957_v60 }
 0xad2   :  { %5731 = vmatprep.subr.bf16.mxu1 %v15962_v0 }
 0xad3   :  { %5570 = vadd.xlane.f32.xlu0 %v18365_v49 }
 0xad5   :  { %5732 = vmatpush1.bf16.msra.mxu1 %v15960_v35  ;;  %v16001_v35 = vld [vmem:[#allocation24 + $0x74] ss:$8 sps:$4 sm:$0xff]  }
 0xad6   :  { %5733 = vmatprep.subr.bf16.mxu1 %v15965_v9  ;;  %v13206_v9 = vld [vmem:[#allocation22] ss:$0 sm:$0xff] }
 0xad9   :  { %5734 = vmatpush1.bf16.msra.mxu1 %v15963_v5  ;;  %v15999_v5 = vld [vmem:[#allocation24 + $0x70] ss:$8 sps:$4 sm:$0xff]  }
 0xada   :  { %5735 = vmatprep.subr.bf16.mxu1 %v15968_v3 }
 0xadd   :  { %5736 = vmatpush1.bf16.msra.mxu1 %v15966_v23 }
 0xade   :  { %5737 = vmatprep.subr.bf16.mxu1 %v15971_v47 }
 0xae1   :  { %5738 = vmatpush1.bf16.msra.mxu1 %v15969_v18 }
 0xae2   :  { %5739 = vmatprep.subr.bf16.mxu1 %v15974_v50 }
 0xae5   :  { %5740 = vmatpush1.bf16.msra.mxu1 %v15972_v56 }
 0xae6   :  { %5741 = vmatprep.subr.bf16.mxu1 %v15977_v45  ;;  %v16002_v45 = vld [vmem:[#allocation18 + $0x40] sm:$0xff]  }
 0xae7   :  { %14087 = vmatprep.subr.bf16.mxu0 %v16002_v45 }
 0xae9   :  { %5742 = vmatpush1.bf16.msra.mxu1 %v15975_v37  ;;  %v16003_v37 = vld [vmem:[#allocation18] sm:$0xff]  }
 0xaea   :  { %6149 = vmatprep.subr.bf16.mxu1 %v15980_v19  ;;  %14088 = vmatpush3.bf16.msra.mxu0 %v16003_v37  ;;  %v16004_v19 = vld [vmem:[#allocation18 + $0x48] sm:$0xff]  }
 0xaeb   :  { %14089 = vmatprep.subr.bf16.mxu0 %v16004_v19 }
 0xb5c   :  { %v5567_v34 = vpop.xlane.xlu0 %5566 }
 0xb5d   :  { %v5572_v57 = vmul.f32 0.0078125, %v5567_v34  ;;  %v15984_v34 = vld [vmem:[#allocation24 + $0x20] ss:$8 sps:$4 sm:$0xff]  }
 0xb5e   :  { %v5569_v33 = vpop.xlane.xlu1 %5568 }
 0xb5f   :  { %v5575_v10 = vsub.f32 %v18359_v46, %v5572_v57  ;;  %v5573_v58 = vmul.f32 0.0078125, %v5569_v33  ;;  %v15989_v33 = vld [vmem:[#allocation24 + $0x34] ss:$8 sps:$4 sm:$0xff]  }
 0xb60   :  { %v5571_v52 = vpop.xlane.xlu0 %5570 }
 0xb61   :  { %v5576_v4 = vsub.f32 %v18362_v36, %v5573_v58  ;;  %v5574_v13 = vmul.f32 0.0078125, %v5571_v52  ;;  %v5578_v21 = vmul.f32 %v5575_v10, %v5575_v10  ;;  %v15992_v58 = vld [vmem:[#allocation24 + $0x44] ss:$8 sps:$4 sm:$0xff]   ;;  %v15990_v52 = vld [vmem:[#allocation24 + $0x40] ss:$8 sps:$4 sm:$0xff]  }
 0xb63   :  { %v5577_v48 = vsub.f32 %v18365_v49, %v5574_v13  ;;  %5581 = vadd.xlane.f32.xlu0 %v5578_v21  ;;  %v5579_v17 = vmul.f32 %v5576_v4, %v5576_v4  ;;  %v15993_v13 = vld [vmem:[#allocation24 + $0x50] ss:$8 sps:$4 sm:$0xff]   ;;  %v15998_v21 = vld [vmem:[#allocation24 + $0x64] ss:$8 sps:$4 sm:$0xff]  }
 0xb65   :  { %v5580_v20 = vmul.f32 %v5577_v48, %v5577_v48 }
 0xb67   :  { %5585 = vadd.xlane.f32.xlu1 %v5580_v20  ;;  %5583 = vadd.xlane.f32.xlu0 %v5579_v17  ;;  %v15996_v20 = vld [vmem:[#allocation24 + $0x60] ss:$8 sps:$4 sm:$0xff]  }
 0xbf0   :  { %v5582_v26 = vpop.xlane.xlu0 %5581 }
 0xbf1   :  { %v5587_v55 = vmul.f32 0.0078125, %v5582_v26  ;;  %v16005_v26 = vld [vmem:[#allocation18 + $0x8] sm:$0xff]  }
 0xbf2   :  { %14090 = vmatpush3.bf16.msra.mxu0 %v16005_v26 }
 0xbf3   :  { %v5590_v59 = vadd.f32 1e-05, %v5587_v55  ;;  %v16006_v55 = vld [vmem:[#allocation18 + $0x50] sm:$0xff]  }
 0xbf4   :  { %v5584_v31 = vpop.xlane.xlu0 %5583  ;;  %v5586_v27 = vpop.xlane.xlu1 %5585  ;;  %14091 = vmatprep.subr.bf16.mxu0 %v16006_v55 }
 0xbf5   :  { %16392 = vrsqrt.f32 %v5590_v59  ;;  %v5588_v14 = vmul.f32 0.0078125, %v5584_v31  ;;  %v5589_v24 = vmul.f32 0.0078125, %v5586_v27  ;;  %v16007_v59 = vld [vmem:[#allocation18 + $0x10] sm:$0xff]   ;;  %v16008_v31 = vld [vmem:[#allocation18 + $0x58] sm:$0xff]  }
 0xbf6   :  { %14092 = vmatpush3.bf16.msra.mxu0 %v16007_v59  ;;  %v16009_v27 = vld [vmem:[#allocation18 + $0x18] sm:$0xff]  }
 0xbf7   :  { %v5591_v41 = vadd.f32 1e-05, %v5588_v14  ;;  %v5592_v39 = vadd.f32 1e-05, %v5589_v24  ;;  %14093 = vmatprep.subr.bf16.mxu0 %v16008_v31  ;;  %v16010_v14 = vld [vmem:[#allocation18 + $0x60] sm:$0xff]  }
 0xbf8   :  { %v16011_v24 = vld [vmem:[#allocation18 + $0x20] sm:$0xff]  }
 0xbf9   :  { %16394 = vrsqrt.f32 %v5591_v41  ;;  %v16012_v41 = vld [vmem:[#allocation18 + $0x68] sm:$0xff]  }
 0xbfa   :  { %16396 = vrsqrt.f32 %v5592_v39  ;;  %14094 = vmatpush3.bf16.msra.mxu0 %v16009_v27  ;;  %v16013_v39 = vld [vmem:[#allocation18 + $0x28] sm:$0xff]  }
 0xbfb   :  { %14095 = vmatprep.subr.bf16.mxu0 %v16010_v14 }
 0xbfe   :  { %14096 = vmatpush3.bf16.msra.mxu0 %v16011_v24 }
 0xbff   :  { %v16393_v29 = vpop.eup %16392  ;;  %14097 = vmatprep.subr.bf16.mxu0 %v16012_v41 }
 0xc00   :  { %v5596_v44 = vmul.f32 %v16393_v29, %v5575_v10  ;;  %v15987_v10 = vld [vmem:[#allocation24 + $0x30] ss:$8 sps:$4 sm:$0xff]   ;;  %v16014_v29 = vld [vmem:[#allocation18 + $0x70] sm:$0xff]  }
 0xc02   :  { %v5605_v7 = vmul.f32 %v13170_v38, %v5596_v44  ;;  %14098 = vmatpush3.bf16.msra.mxu0 %v16013_v39 }
 0xc03   :  { %v16395_v16 = vpop.eup %16394  ;;  %14099 = vmatprep.subr.bf16.mxu0 %v16014_v29 }
 0xc04   :  { %v16397_v43 = vpop.eup %16396  ;;  %v5597_v11 = vmul.f32 %v16395_v16, %v5576_v4  ;;  %v5614_v42 = vadd.f32 %v13171_v2, %v5605_v7  ;;  %v15995_v4 = vld [vmem:[#allocation24 + $0x54] ss:$8 sps:$4 sm:$0xff]   ;;  %v16017_v16 = vld [vmem:[#allocation18 + $0x38] sm:$0xff]  }
 0xc05   :  { %v5598_v53 = vmul.f32 %v16397_v43, %v5577_v48  ;;  %v13205_v48 = vld [vmem:[#allocation21] ss:$0 sm:$0xff]  ;;  %v16018_v43 = vld [vmem:[#allocation27 + $0x40] sm:$0xff]  }
 0xc06   :  { %v5606_v40 = vmul.f32 %v13170_v38, %v5597_v11  ;;  %v6028_v17 = vmul.f32 %v13205_v48, %v5597_v11  ;;  %v6027_v0 = vmul.f32 %v13205_v48, %v5596_v44  ;;  %v16015_v44 = vld [vmem:[#allocation18 + $0x30] sm:$0xff]   ;;  %v5635_v11 = vld [vmem:[#allocation16] sm:$0x3] }
 0xc07   :  { %v5607_v54 = vmul.f32 %v13170_v38, %v5598_v53  ;;  %v6029_v18 = vmul.f32 %v13205_v48, %v5598_v53  ;;  %v16016_v38 = vld [vmem:[#allocation18 + $0x78] sm:$0xff]   ;;  %14100 = vmatpush3.bf16.msra.mxu0 %v16015_v44  ;;  %v5640_v7 = vrot.slane %v5635_v11, %v17833_v63 }
 0xc08   :  { %v5615_v30 = vadd.f32 %v13171_v2, %v5606_v40  ;;  %v6037_v3 = vadd.f32 %v13206_v9, %v6028_v17  ;;  %v6036_v23 = vadd.f32 %v13206_v9, %v6027_v0  ;;  %14101 = vmatprep.subr.bf16.mxu0 %v16016_v38 }
 0xc09   :  { %v5616_v60 = vadd.f32 %v13171_v2, %v5607_v54  ;;  %v6038_v50 = vadd.f32 %v13206_v9, %v6029_v18  ;;  %v5644_v2 = vrot.slane %v5635_v11, %v17836_v1 }
 0xc0a   :  { %v5617_v22 = vpack.c.bf16 %v5615_v30, %v5614_v42  ;;  %v6039_v47 = vpack.c.bf16 %v6037_v3, %v6036_v23 }
 0xc0b   :  { %v5618_v57 = vpack.c.bf16 %v5616_v60, %v5616_v60  ;;  %v6040_v56 = vpack.c.bf16 %v6038_v50, %v6038_v50  ;;  %14102 = vmatpush3.bf16.msra.mxu0 %v16017_v16 }
 0xc0c   :  { %5760 = vmatmul.mubr.bf16.vlgmr.msra.gmra.mrb[80].mxu1 %v5617_v22  ;;  %14115 = vmatprep.subr.bf16.mxu0 %v16018_v43 }
 0xc0d   :  { %6150 = vmatpush1.bf16.msra.mxu1 %v15978_v25  ;;  %5769 = vmatprep.mubr.bf16.mxu1 %v17259_v32 }
 0xc0e   :  { %6151 = vmatprep.subr.bf16.mxu1 %v15983_v61 }
 0xc11   :  { %6152 = vmatpush1.bf16.msra.mxu1 %v15981_v51 }
 0xc12   :  { %6153 = vmatprep.subr.bf16.mxu1 %v15986_v28 }
 0xc14   :  { %5770 = vmatmul.mubr.bf16.gmra.mrb[84].mxu1 %v5618_v57 }
 0xc15   :  { %6154 = vmatpush1.bf16.msra.mxu1 %v15984_v34  ;;  %6181 = vmatprep.mubr.bf16.mxu1 %v17259_v32 }
 0xc16   :  { %6155 = vmatprep.subr.bf16.mxu1 %v15989_v33 }
 0xc19   :  { %6156 = vmatpush1.bf16.msra.mxu1 %v15987_v10 }
 0xc1a   :  { %6157 = vmatprep.subr.bf16.mxu1 %v15992_v58 }
 0xc1d   :  { %6158 = vmatpush1.bf16.msra.mxu1 %v15990_v52 }
 0xc1e   :  { %6159 = vmatprep.subr.bf16.mxu1 %v15995_v4 }
 0xc21   :  { %6160 = vmatpush1.bf16.msra.mxu1 %v15993_v13 }
 0xc22   :  { %6161 = vmatprep.subr.bf16.mxu1 %v15998_v21 }
 0xc25   :  { %6162 = vmatpush1.bf16.msra.mxu1 %v15996_v20 }
 0xc26   :  { %6163 = vmatprep.subr.bf16.mxu1 %v16001_v35 }
 0xc29   :  { %6164 = vmatpush1.bf16.msra.mxu1 %v15999_v5 }
 0xc2c   :  { %6182 = vmatmul.mubr.bf16.vlgmr.msra.gmra.mrb[88].mxu1 %v6039_v47 }
 0xc2d   :  { %6191 = vmatprep.mubr.bf16.mxu1 %v17259_v32 }
 0xc34   :  { %6192 = vmatmul.mubr.bf16.gmra.mrb[92].mxu1 %v6040_v56 }
 0xc35   :  { %6721 = vmatprep.mubr.bf16.mxu1 %v17259_v32 }
 0xcdf   :  { %v5761_v40 = vpop.f32.mrb[80].mxu1 }
 0xce0   :  { %v18378_v53 = vadd.f32 %v5761_v40, %v5640_v7  ;;  %v5763_v42 = vpop.f32.mrb[81].mxu1 }
 0xce1   :  { %v18380_v30 = vadd.f32 %v5763_v42, %v5644_v2  ;;  %v5765_v25 = vpop.f32.mrb[82].mxu1 }
 0xce2   :  { %v5778_v22 = vmul.f32 %v18378_v53, %v18378_v53  ;;  %v5766_v61 = vadd.f32 %v5765_v25, %v5640_v7  ;;  %v5767_v54 = vpop.f32.mrb[83].mxu1 }
 0xce3   :  { %v5779_v51 = vmul.f32 %v18380_v30, %v18380_v30  ;;  %v5768_v28 = vadd.f32 %v5767_v54, %v5644_v2 }
 0xce4   :  { %v5784_v60 = vmul.f32 %v5778_v22, %v18378_v53  ;;  %v5780_v34 = vmul.f32 %v5766_v61, %v5766_v61 }
 0xce5   :  { %v5785_v57 = vmul.f32 %v5779_v51, %v18380_v30  ;;  %v5781_v33 = vmul.f32 %v5768_v28, %v5768_v28 }
 0xce6   :  { %v5790_v10 = vmul.f32 0.044715, %v5784_v60  ;;  %v5786_v58 = vmul.f32 %v5780_v34, %v5766_v61 }
 0xce7   :  { %v5791_v52 = vmul.f32 0.044715, %v5785_v57  ;;  %v5787_v4 = vmul.f32 %v5781_v33, %v5768_v28  ;;  %v5771_v13 = vpop.f32.mrb[84].mxu1 }
 0xce8   :  { %v5796_v21 = vadd.f32 %v5790_v10, %v18378_v53  ;;  %v5792_v48 = vmul.f32 0.044715, %v5786_v58  ;;  %v18389_v20 = vadd.f32 %v5771_v13, %v5640_v7  ;;  %v5773_v17 = vpop.f32.mrb[85].mxu1 }
 0xce9   :  { %v5797_v35 = vadd.f32 %v5791_v52, %v18380_v30  ;;  %v5793_v0 = vmul.f32 0.044715, %v5787_v4  ;;  %v18392_v5 = vadd.f32 %v5773_v17, %v5644_v2  ;;  %v5775_v9 = vpop.f32.mrb[86].mxu1  ;;  %v6057_v2 = vld [vmem:[#allocation25] sm:$0x3] }
 0xcea   :  { %v5802_v3 = vmul.f32 0.7978846, %v5796_v21  ;;  %v5798_v23 = vadd.f32 %v5792_v48, %v5766_v61  ;;  %v5782_v47 = vmul.f32 %v18389_v20, %v18389_v20  ;;  %v5776_v18 = vpop.f32.mrb[87].mxu1  ;;  %v6062_v22 = vrot.slane %v6057_v2, %v17833_v63 }
 0xceb   :  { %v5803_v50 = vmul.f32 0.7978846, %v5797_v35  ;;  %v5799_v56 = vadd.f32 %v5793_v0, %v5768_v28  ;;  %v5783_v45 = vmul.f32 %v18392_v5, %v18392_v5  ;;  %v6066_v34 = vrot.slane %v6057_v2, %v17836_v1  ;;  %v16019_v35 = vld [vmem:[#allocation27] sm:$0xff]  }
 0xcec   :  { %16398 = vtanh.f32 %v5802_v3  ;;  %v5804_v37 = vmul.f32 0.7978846, %v5798_v23  ;;  %v5788_v19 = vmul.f32 %v5782_v47, %v18389_v20 }
 0xced   :  { %16400 = vtanh.f32 %v5803_v50  ;;  %v5805_v26 = vmul.f32 0.7978846, %v5799_v56  ;;  %v5789_v55 = vmul.f32 %v5783_v45, %v18392_v5 }
 0xcee   :  { %16402 = vtanh.f32 %v5804_v37  ;;  %v5794_v59 = vmul.f32 0.044715, %v5788_v19  ;;  %v16021_v37 = vld [vmem:[#allocation27 + $0x8] sm:$0xff]  }
 0xcef   :  { %16404 = vtanh.f32 %v5805_v26  ;;  %v5795_v31 = vmul.f32 0.044715, %v5789_v55 }
 0xcf0   :  { %v5800_v27 = vadd.f32 %v5794_v59, %v18389_v20  ;;  %v16022_v59 = vld [vmem:[#allocation27 + $0x50] sm:$0xff]  }
 0xcf1   :  { %v5801_v14 = vadd.f32 %v5795_v31, %v18392_v5 }
 0xcf2   :  { %v5806_v24 = vmul.f32 0.7978846, %v5800_v27 }
 0xcf3   :  { %v5807_v41 = vmul.f32 0.7978846, %v5801_v14 }
 0xcf4   :  { %16406 = vtanh.f32 %v5806_v24 }
 0xcf5   :  { %16408 = vtanh.f32 %v5807_v41 }
 0xcf6   :  { %v16399_v39 = vpop.eup %16398 }
 0xcf7   :  { %v16401_v29 = vpop.eup %16400  ;;  %v5814_v44 = vadd.f32 1.0, %v16399_v39 }
 0xcf8   :  { %v16403_v38 = vpop.eup %16402  ;;  %v5815_v16 = vadd.f32 1.0, %v16401_v29 }
 0xcf9   :  { %v16405_v43 = vpop.eup %16404  ;;  %v5820_v11 = vmul.f32 0.5, %v5814_v44  ;;  %v5816_v7 = vadd.f32 1.0, %v16403_v38 }
 0xcfa   :  { %v5817_v40 = vadd.f32 1.0, %v16405_v43  ;;  %v5821_v42 = vmul.f32 0.5, %v5815_v16  ;;  %v16023_v43 = vld [vmem:[#allocation27 + $0x10] sm:$0xff]  }
 0xcfb   :  { %v5822_v25 = vmul.f32 0.5, %v5816_v7  ;;  %v5826_v51 = vmul.f32 %v5820_v11, %v18378_v53 }
 0xcfc   :  { %v5823_v54 = vmul.f32 0.5, %v5817_v40  ;;  %v5827_v33 = vmul.f32 %v5821_v42, %v18380_v30  ;;  %v16024_v42 = vld [vmem:[#allocation27 + $0x58] sm:$0xff]  }
 0xcfd   :  { %v5828_v60 = vmul.f32 %v5822_v25, %v5766_v61  ;;  %v16020_v61 = vld [vmem:[#allocation27 + $0x48] sm:$0xff]  }
 0xcfe   :  { %v16407_v57 = vpop.eup %16406  ;;  %v5829_v10 = vmul.f32 %v5823_v54, %v5768_v28 }
 0xcff   :  { %v16409_v58 = vpop.eup %16408  ;;  %v6183_v52 = vpop.f32.mrb[88].mxu1  ;;  %v5832_v4 = vpack.c.bf16 %v5828_v60, %v5826_v51  ;;  %v5818_v13 = vadd.f32 1.0, %v16407_v57 }
 0xd00   :  { %v18406_v21 = vadd.f32 %v6183_v52, %v6062_v22  ;;  %v6185_v48 = vpop.f32.mrb[89].mxu1  ;;  %v5833_v17 = vpack.c.bf16 %v5829_v10, %v5827_v33  ;;  %v5819_v0 = vadd.f32 1.0, %v16409_v58  ;;  %v16025_v58 = vld [vmem:[#allocation27 + $0x18] sm:$0xff]  }
 0xd01   :  { %v18408_v9 = vadd.f32 %v6185_v48, %v6066_v34  ;;  %v6187_v53 = vpop.f32.mrb[90].mxu1  ;;  %v5824_v3 = vmul.f32 0.5, %v5818_v13  ;;  %v16026_v13 = vld [vmem:[#allocation27 + $0x60] sm:$0xff]  }
 0xd02   :  { %v6200_v23 = vmul.f32 %v18406_v21, %v18406_v21  ;;  %v18412_v30 = vadd.f32 %v6187_v53, %v6062_v22  ;;  %v6189_v28 = vpop.f32.mrb[91].mxu1  ;;  %6003 = vmatprep.mubr.bf16.mxu0 %v5833_v17  ;;  %v5825_v47 = vmul.f32 0.5, %v5819_v0  ;;  %v16027_v0 = vld [vmem:[#allocation27 + $0x20] sm:$0xff]  }
 0xd03   :  { %v6201_v18 = vmul.f32 %v18408_v9, %v18408_v9  ;;  %v18416_v50 = vadd.f32 %v6189_v28, %v6066_v34  ;;  %6004 = vmatmul.mubr.bf16.vlgmr.msra.gmra.mrb[96].mxu0 %v5832_v4  ;;  %v5830_v31 = vmul.f32 %v5824_v3, %v18389_v20  ;;  %v16029_v28 = vld [vmem:[#allocation27 + $0x28] sm:$0xff]  }
 0xd04   :  { %v6206_v56 = vmul.f32 %v6200_v23, %v18406_v21  ;;  %v6202_v45 = vmul.f32 %v18412_v30, %v18412_v30  ;;  %14116 = vmatpush3.bf16.msra.mxu0 %v16019_v35  ;;  %v5831_v19 = vmul.f32 %v5825_v47, %v18392_v5  ;;  %v16030_v47 = vld [vmem:[#allocation27 + $0x70] sm:$0xff]  }
 0xd05   :  { %v6207_v26 = vmul.f32 %v6201_v18, %v18408_v9  ;;  %v6203_v55 = vmul.f32 %v18416_v50, %v18416_v50  ;;  %14117 = vmatprep.subr.bf16.mxu0 %v16020_v61  ;;  %v5834_v40 = vpack.c.bf16 %v5830_v31, %v5830_v31  ;;  %v16028_v61 = vld [vmem:[#allocation27 + $0x68] sm:$0xff]  }
 0xd06   :  { %v6212_v27 = vmul.f32 0.044715, %v6206_v56  ;;  %v6208_v14 = vmul.f32 %v6202_v45, %v18412_v30  ;;  %v5835_v24 = vpack.c.bf16 %v5831_v19, %v5831_v19  ;;  %v16031_v19 = vld [vmem:[#allocation27 + $0x30] sm:$0xff]  }
 0xd07   :  { %v6213_v41 = vmul.f32 0.044715, %v6207_v26  ;;  %v6209_v39 = vmul.f32 %v6203_v55, %v18416_v50  ;;  %v6193_v29 = vpop.f32.mrb[92].mxu1 }
 0xd08   :  { %v6218_v44 = vadd.f32 %v6212_v27, %v18406_v21  ;;  %v6214_v5 = vmul.f32 0.044715, %v6208_v14  ;;  %v18429_v38 = vadd.f32 %v6193_v29, %v6062_v22  ;;  %v6195_v16 = vpop.f32.mrb[93].mxu1  ;;  %14118 = vmatpush3.bf16.msra.mxu0 %v16021_v37  ;;  %6011 = vmatprep.mubr.bf16.mxu0 %v5835_v24  ;;  %v16032_v27 = vld [vmem:[#allocation27 + $0x78] sm:$0xff]  }
 0xd09   :  { %v6219_v11 = vadd.f32 %v6213_v41, %v18408_v9  ;;  %v6215_v20 = vmul.f32 0.044715, %v6209_v39  ;;  %v18432_v7 = vadd.f32 %v6195_v16, %v6066_v34  ;;  %v6197_v2 = vpop.f32.mrb[94].mxu1  ;;  %14119 = vmatprep.subr.bf16.mxu0 %v16022_v59  ;;  %v16033_v39 = vld [vmem:[#allocation27 + $0x38] sm:$0xff]  }
 0xd0a   :  { %v6224_v25 = vmul.f32 0.7978846, %v6218_v44  ;;  %v6220_v54 = vadd.f32 %v6214_v5, %v18412_v30  ;;  %v6204_v22 = vmul.f32 %v18429_v38, %v18429_v38  ;;  %v6198_v51 = vpop.f32.mrb[95].mxu1 }
 0xd0b   :  { %v6225_v60 = vmul.f32 0.7978846, %v6219_v11  ;;  %v6221_v57 = vadd.f32 %v6215_v20, %v18416_v50  ;;  %v6205_v33 = vmul.f32 %v18432_v7, %v18432_v7  ;;  %6012 = vmatmul.mubr.bf16.gmra.mrb[100].mxu0 %v5834_v40 }
 0xd0c   :  { %16410 = vtanh.f32 %v6224_v25  ;;  %v6226_v34 = vmul.f32 0.7978846, %v6220_v54  ;;  %v6210_v10 = vmul.f32 %v6204_v22, %v18429_v38  ;;  %14120 = vmatpush3.bf16.msra.mxu0 %v16023_v43 }
 0xd0d   :  { %16412 = vtanh.f32 %v6225_v60  ;;  %v6227_v52 = vmul.f32 0.7978846, %v6221_v57  ;;  %v6211_v4 = vmul.f32 %v6205_v33, %v18432_v7  ;;  %14121 = vmatprep.subr.bf16.mxu0 %v16024_v42 }
 0xd0e   :  { %16414 = vtanh.f32 %v6226_v34  ;;  %v6216_v48 = vmul.f32 0.044715, %v6210_v10 }
 0xd0f   :  { %16416 = vtanh.f32 %v6227_v52  ;;  %v6217_v17 = vmul.f32 0.044715, %v6211_v4 }
 0xd10   :  { %v6222_v35 = vadd.f32 %v6216_v48, %v18429_v38  ;;  %14122 = vmatpush3.bf16.msra.mxu0 %v16025_v58  ;;  %v13188_v48 = vld [vmem:[#allocation19] ss:$0 sm:$0xff] }
 0xd11   :  { %v6223_v53 = vadd.f32 %v6217_v17, %v18432_v7  ;;  %14123 = vmatprep.subr.bf16.mxu0 %v16026_v13  ;;  %v13223_v17 = vld [vmem:[#allocation28] ss:$0 sm:$0xff] }
 0xd12   :  { %v6228_v3 = vmul.f32 0.7978846, %v6222_v35 }
 0xd13   :  { %v6229_v23 = vmul.f32 0.7978846, %v6223_v53 }
 0xd14   :  { %16418 = vtanh.f32 %v6228_v3  ;;  %14124 = vmatpush3.bf16.msra.mxu0 %v16027_v0 }
 0xd15   :  { %16420 = vtanh.f32 %v6229_v23  ;;  %14125 = vmatprep.subr.bf16.mxu0 %v16028_v61 }
 0xd16   :  { %v16411_v18 = vpop.eup %16410 }
 0xd17   :  { %v16413_v56 = vpop.eup %16412  ;;  %v6236_v45 = vadd.f32 1.0, %v16411_v18 }
 0xd18   :  { %v16415_v37 = vpop.eup %16414  ;;  %14126 = vmatpush3.bf16.msra.mxu0 %v16029_v28  ;;  %v6237_v26 = vadd.f32 1.0, %v16413_v56 }
 0xd19   :  { %v16417_v55 = vpop.eup %16416  ;;  %v6242_v59 = vmul.f32 0.5, %v6236_v45  ;;  %v6238_v31 = vadd.f32 1.0, %v16415_v37  ;;  %14127 = vmatprep.subr.bf16.mxu0 %v16030_v47 }
 0xd1a   :  { %v6239_v14 = vadd.f32 1.0, %v16417_v55  ;;  %v6243_v24 = vmul.f32 0.5, %v6237_v26 }
 0xd1b   :  { %v6244_v41 = vmul.f32 0.5, %v6238_v31  ;;  %v6248_v44 = vmul.f32 %v6242_v59, %v18406_v21  ;;  %v16036_v31 = vld [vmem:[%s19816_s28 + $0xc4] ss:$12 sps:$4 sm:$0xff]  }
 0xd1c   :  { %14128 = vmatpush3.bf16.msra.mxu0 %v16031_v19  ;;  %v6245_v29 = vmul.f32 0.5, %v6239_v14  ;;  %v6249_v43 = vmul.f32 %v6243_v24, %v18408_v9  ;;  %6689 = vmatprep.subr.bf16.mxu1 %v16036_v31  ;;  %v16037_v14 = vld [vmem:[%s19816_s28 + $0xd8] ss:$12 sps:$4 sm:$0xff]  }
 0xd1d   :  { %v6250_v5 = vmul.f32 %v6244_v41, %v18412_v30  ;;  %14129 = vmatprep.subr.bf16.mxu0 %v16032_v27  ;;  %v16039_v27 = vld [vmem:[%s19816_s28 + $0xdc] ss:$12 sps:$4 sm:$0xff]  }
 0xd1e   :  { %v16419_v16 = vpop.eup %16418  ;;  %v6251_v11 = vmul.f32 %v6245_v29, %v18416_v50 }
 0xd1f   :  { %v16421_v20 = vpop.eup %16420  ;;  %v6254_v2 = vpack.c.bf16 %v6250_v5, %v6248_v44  ;;  %v6240_v40 = vadd.f32 1.0, %v16419_v16 }
 0xd20   :  { %14130 = vmatpush3.bf16.msra.mxu0 %v16033_v39  ;;  %v6255_v42 = vpack.c.bf16 %v6251_v11, %v6249_v43  ;;  %v6241_v25 = vadd.f32 1.0, %v16421_v20 }
 0xd21   :  { %v6246_v54 = vmul.f32 0.5, %v6240_v40  ;;  %v16043_v40 = vld [vmem:[%s19816_s28 + $0xf4] ss:$12 sps:$4 sm:$0xff]  }
 0xd22   :  { %6425 = vmatprep.mubr.bf16.mxu0 %v6255_v42  ;;  %v6247_v22 = vmul.f32 0.5, %v6241_v25  ;;  %v16041_v42 = vld [vmem:[%s19816_s28 + $0xf0] ss:$12 sps:$4 sm:$0xff]   ;;  %v16044_v25 = vld [vmem:[%s19816_s28 + $0xe0] ss:$12 sps:$4 sm:$0xff]  }
 0xd23   :  { %6426 = vmatmul.mubr.bf16.vlgmr.msra.gmra.mrb[104].mxu0 %v6254_v2  ;;  %v6252_v30 = vmul.f32 %v6246_v54, %v18429_v38  ;;  %v16047_v54 = vld [vmem:[%s19816_s28 + $0x10c] ss:$12 sps:$4 sm:$0xff]  }
 0xd24   :  { %v6253_v21 = vmul.f32 %v6247_v22, %v18432_v7  ;;  %v16045_v22 = vld [vmem:[%s19816_s28 + $0x108] ss:$12 sps:$4 sm:$0xff]  }
 0xd25   :  { %v6256_v60 = vpack.c.bf16 %v6252_v30, %v6252_v30  ;;  %v16051_v30 = vld [vmem:[%s19816_s28 + $0x124] ss:$12 sps:$4 sm:$0xff]  }
 0xd26   :  { %v6257_v51 = vpack.c.bf16 %v6253_v21, %v6253_v21  ;;  %v16048_v21 = vld [vmem:[%s19816_s28 + $0xf8] ss:$12 sps:$4 sm:$0xff]  }
 0xd28   :  { %6433 = vmatprep.mubr.bf16.mxu0 %v6257_v51  ;;  %v16049_v51 = vld [vmem:[%s19816_s28 + $0x120] ss:$12 sps:$4 sm:$0xff]  }
 0xd2b   :  { %6434 = vmatmul.mubr.bf16.gmra.mrb[108].mxu0 %v6256_v60  ;;  %v16052_v60 = vld [vmem:[%s19816_s28 + $0x110] ss:$12 sps:$4 sm:$0xff]  }
 0xdd6   :  { %v14103_v9 = vpop.f32.mrb[96].mxu0 }
 0xdd7   :  { %v14104_v50 = vpop.f32.mrb[97].mxu0 }
 0xdd8   :  { %v14105_v57 = vadd.f32 %v14104_v50, %v14103_v9  ;;  %v14106_v33 = vpop.f32.mrb[98].mxu0  ;;  %v16055_v9 = vld [vmem:[%s19816_s28 + $0x13c] ss:$12 sps:$4 sm:$0xff]   ;;  %v16053_v50 = vld [vmem:[%s19816_s28 + $0x138] ss:$12 sps:$4 sm:$0xff]  }
 0xdd9   :  { %v14107_v34 = vpop.f32.mrb[99].mxu0  ;;  %v16059_v33 = vld [vmem:[%s19816_s28 + $0x154] ss:$12 sps:$4 sm:$0xff]  }
 0xdda   :  { %v6006_v53 = vadd.f32 %v14105_v57, %v13188_v48  ;;  %v16056_v57 = vld [vmem:[%s19816_s28 + $0x128] ss:$12 sps:$4 sm:$0xff]   ;;  %v16057_v34 = vld [vmem:[%s19816_s28 + $0x150] ss:$12 sps:$4 sm:$0xff]  }
 0xdde   :  { %v14109_v10 = vpop.f32.mrb[100].mxu0 }
 0xddf   :  { %v14110_v58 = vpop.f32.mrb[101].mxu0  ;;  %v16060_v10 = vld [vmem:[%s19816_s28 + $0x140] ss:$12 sps:$4 sm:$0xff]  }
 0xde0   :  { %v14112_v52 = vpop.f32.mrb[102].mxu0  ;;  %v16061_v58 = vld [vmem:[%s19816_s28 + $0x168] ss:$12 sps:$4 sm:$0xff]  }
 0xde1   :  { %v14113_v4 = vpop.f32.mrb[103].mxu0  ;;  %v16063_v52 = vld [vmem:[%s19816_s28 + $0x16c] ss:$12 sps:$4 sm:$0xff]  }
 0xde2   :  { %v16064_v4 = vld [vmem:[%s19816_s28 + $0x158] ss:$12 sps:$4 sm:$0xff]  }
 0xdf6   :  { %v14131_v13 = vpop.f32.mrb[104].mxu0 }
 0xdf7   :  { %v14132_v35 = vpop.f32.mrb[105].mxu0 }
 0xdf8   :  { %v14133_v7 = vadd.f32 %v14132_v35, %v14131_v13  ;;  %v14134_v0 = vpop.f32.mrb[106].mxu0  ;;  %v16065_v13 = vld [vmem:[%s19816_s28 + $0x170] ss:$12 sps:$4 sm:$0xff]  }
 0xdf9   :  { %v14135_v38 = vpop.f32.mrb[107].mxu0 }
 0xdfa   :  { %v6428_v61 = vadd.f32 %v14133_v7, %v13223_v17  ;;  %v14136_v3 = vadd.f32 %v14135_v38, %v14134_v0 }
 0xdfc   :  { %v6431_v23 = vadd.f32 %v14136_v3, %v13223_v17  ;;  %v6447_v28 = vsel %vm3447_vm15, %v6006_v53, %v6428_v61 }
 0xdfd   :  { %v18453_v47 = vadd.f32 %v6447_v28, %v18359_v46  ;;  %v16034_v46 = vld [vmem:[%s19816_s28 + $0xc0] ss:$12 sps:$4 sm:$0xff]  }
 0xdfe   :  { %v14137_v18 = vpop.f32.mrb[108].mxu0  ;;  %v18456_v56 = vadd.f32 %v6431_v23, %v18362_v36  ;;  %v16040_v36 = vld [vmem:[%s19816_s28 + $0xc8] ss:$12 sps:$4 sm:$0xff]   ;;  %6690 = vmatpush1.bf16.msra.mxu1 %v16034_v46  ;;  %v13242_v28 = vld [vmem:[%s19817_s14 + $0x1] ss:$0 sm:$0xff] }
 0xdff   :  { %v14138_v45 = vpop.f32.mrb[109].mxu0  ;;  %6457 = vadd.xlane.f32.xlu0 %v18453_v47  ;;  %14619 = vmatprep.subr.bf16.mxu0 %v16040_v36 }
 0xe00   :  { %v14139_v37 = vadd.f32 %v14138_v45, %v14137_v18  ;;  %v14140_v19 = vpop.f32.mrb[110].mxu0  ;;  %6459 = vadd.xlane.f32.xlu1 %v18456_v56  ;;  %6691 = vmatprep.subr.bf16.mxu1 %v16039_v27 }
 0xe01   :  { %v14141_v26 = vpop.f32.mrb[111].mxu0  ;;  %14620 = vmatpush3.bf16.msra.mxu0 %v16040_v36  ;;  %v13243_v19 = vld [vmem:[%s19818_s2 + $0x1] ss:$0 sm:$0xff] }
 0xe02   :  { %v6436_v55 = vadd.f32 %v14139_v37, %v13223_v17  ;;  %6692 = vmatpush1.bf16.msra.mxu1 %v16037_v14  ;;  %14621 = vmatprep.subr.bf16.mxu0 %v16044_v25 }
 0xe03   :  { %6693 = vmatprep.subr.bf16.mxu1 %v16043_v40 }
 0xe04   :  { %v18461_v59 = vadd.f32 %v6436_v55, %v18365_v49 }
 0xe05   :  { %14622 = vmatpush3.bf16.msra.mxu0 %v16044_v25 }
 0xe06   :  { %6461 = vadd.xlane.f32.xlu0 %v18461_v59  ;;  %6694 = vmatpush1.bf16.msra.mxu1 %v16041_v42 }
 0xe07   :  { %6695 = vmatprep.subr.bf16.mxu1 %v16047_v54  ;;  %14623 = vmatprep.subr.bf16.mxu0 %v16048_v21 }
 0xe09   :  { %14624 = vmatpush3.bf16.msra.mxu0 %v16048_v21 }
 0xe0a   :  { %6696 = vmatpush1.bf16.msra.mxu1 %v16045_v22  ;;  %14625 = vmatprep.subr.bf16.mxu0 %v16052_v60 }
 0xe0b   :  { %6697 = vmatprep.subr.bf16.mxu1 %v16051_v30 }
 0xe0d   :  { %14626 = vmatpush3.bf16.msra.mxu0 %v16052_v60 }
 0xe0e   :  { %6698 = vmatpush1.bf16.msra.mxu1 %v16049_v51  ;;  %14627 = vmatprep.subr.bf16.mxu0 %v16056_v57 }
 0xe0f   :  { %6699 = vmatprep.subr.bf16.mxu1 %v16055_v9 }
 0xe11   :  { %14628 = vmatpush3.bf16.msra.mxu0 %v16056_v57 }
 0xe12   :  { %6700 = vmatpush1.bf16.msra.mxu1 %v16053_v50  ;;  %14629 = vmatprep.subr.bf16.mxu0 %v16060_v10 }
 0xe13   :  { %6701 = vmatprep.subr.bf16.mxu1 %v16059_v33 }
 0xe15   :  { %14630 = vmatpush3.bf16.msra.mxu0 %v16060_v10 }
 0xe16   :  { %6702 = vmatpush1.bf16.msra.mxu1 %v16057_v34  ;;  %14631 = vmatprep.subr.bf16.mxu0 %v16064_v4 }
 0xe17   :  { %6703 = vmatprep.subr.bf16.mxu1 %v16063_v52 }
 0xe19   :  { %14632 = vmatpush3.bf16.msra.mxu0 %v16064_v4 }
 0xe1a   :  { %6704 = vmatpush1.bf16.msra.mxu1 %v16061_v58  ;;  %14633 = vmatprep.subr.bf16.mxu0 %v16065_v13 }
 0xe1d   :  { %14634 = vmatpush3.bf16.msra.mxu0 %v16065_v13 }
 0xe8c   :  { %v6458_v24 = vpop.xlane.xlu0 %6457 }
 0xe8d   :  { %v6463_v41 = vmul.f32 0.0078125, %v6458_v24  ;;  %v6460_v39 = vpop.xlane.xlu1 %6459 }
 0xe8e   :  { %v6464_v49 = vmul.f32 0.0078125, %v6460_v39 }
 0xe8f   :  { %v18470_v29 = vsub.f32 %v18453_v47, %v6463_v41 }
 0xe90   :  { %v18473_v44 = vsub.f32 %v18456_v56, %v6464_v49  ;;  %v6544_v49 = vld [vmem:[#allocation7 + $0x3] sm:$0x7] }
 0xe91   :  { %v6469_v5 = vmul.f32 %v18470_v29, %v18470_v29  ;;  %v6557_v51 = vrot.slane %v6544_v49, %v17841_v6 }
 0xe92   :  { %v6470_v16 = vmul.f32 %v18473_v44, %v18473_v44 }
 0xe93   :  { %6472 = vadd.xlane.f32.xlu1 %v6469_v5  ;;  %v6462_v43 = vpop.xlane.xlu0 %6461  ;;  %v6553_v5 = vrot.slane %v6544_v49, %v17836_v1 }
 0xe94   :  { %v6465_v11 = vmul.f32 0.0078125, %v6462_v43  ;;  %6474 = vadd.xlane.f32.xlu0 %v6470_v16 }
 0xe96   :  { %v18480_v20 = vsub.f32 %v18461_v59, %v6465_v11 }
 0xe98   :  { %v6471_v2 = vmul.f32 %v18480_v20, %v18480_v20 }
 0xe9a   :  { %6476 = vadd.xlane.f32.xlu1 %v6471_v2 }
 0xf20   :  { %v6473_v48 = vpop.xlane.xlu1 %6472 }
 0xf21   :  { %v6478_v17 = vmul.f32 0.0078125, %v6473_v48  ;;  %v6475_v35 = vpop.xlane.xlu0 %6474 }
 0xf22   :  { %v6479_v7 = vmul.f32 0.0078125, %v6475_v35 }
 0xf23   :  { %v6481_v0 = vadd.f32 1e-05, %v6478_v17 }
 0xf24   :  { %v6482_v38 = vadd.f32 1e-05, %v6479_v7 }
 0xf25   :  { %16422 = vrsqrt.f32 %v6481_v0 }
 0xf26   :  { %16424 = vrsqrt.f32 %v6482_v38 }
 0xf27   :  { %v6477_v53 = vpop.xlane.xlu1 %6476 }
 0xf28   :  { %v6480_v61 = vmul.f32 0.0078125, %v6477_v53 }
 0xf2a   :  { %v6483_v3 = vadd.f32 1e-05, %v6480_v61 }
 0xf2c   :  { %16426 = vrsqrt.f32 %v6483_v3 }
 0xf2f   :  { %v16423_v23 = vpop.eup %16422 }
 0xf30   :  { %v16425_v18 = vpop.eup %16424  ;;  %v6487_v45 = vmul.f32 %v16423_v23, %v18470_v29  ;;  %v6549_v29 = vrot.slane %v6544_v49, %v17833_v63 }
 0xf31   :  { %v6488_v37 = vmul.f32 %v16425_v18, %v18473_v44 }
 0xf32   :  { %v6496_v26 = vmul.f32 %v13242_v28, %v6487_v45 }
 0xf33   :  { %v6497_v55 = vmul.f32 %v13242_v28, %v6488_v37 }
 0xf34   :  { %v6505_v46 = vadd.f32 %v13243_v19, %v6496_v26 }
 0xf35   :  { %v6506_v31 = vadd.f32 %v13243_v19, %v6497_v55 }
 0xf36   :  { %v16427_v27 = vpop.eup %16426 }
 0xf37   :  { %v6489_v36 = vmul.f32 %v16427_v27, %v18480_v20  ;;  %v6508_v14 = vpack.c.bf16 %v6506_v31, %v6505_v46 }
 0xf39   :  { %6722 = vmatmul.mubr.bf16.vlgmr.msra.gmra.mrb[96].mxu1 %v6508_v14  ;;  %14635 = vmatprep.mubr.bf16.mxu0 %v6508_v14  ;;  %v6498_v24 = vmul.f32 %v13242_v28, %v6489_v36 }
 0xf3a   :  { %6731 = vmatprep.mubr.bf16.mxu1 %v17259_v32 }
 0xf3b   :  { %v6507_v41 = vadd.f32 %v13243_v19, %v6498_v24 }
 0xf3d   :  { %v6509_v39 = vpack.c.bf16 %v6507_v41, %v6507_v41 }
 0xf3f   :  { %14636 = vmatmul.mubr.bf16.vlgmr.msra.gmra.mrb[112].mxu0 %v6509_v39 }
 0xf41   :  { %6732 = vmatmul.mubr.bf16.gmra.mrb[100].mxu1 %v6509_v39 }
0x100c   :  { %v6723_v44 = vpop.f32.mrb[96].mxu1 }
0x100d   :  { %v6725_v16 = vpop.f32.mrb[97].mxu1  ;;  %v6724_v11 = vadd.f32 %v6723_v44, %v6549_v29 }
0x100e   :  { %v6727_v43 = vpop.f32.mrb[98].mxu1  ;;  %v6726_v40 = vadd.f32 %v6725_v16, %v6553_v5 }
0x100f   :  { %v6728_v20 = vadd.f32 %v6727_v43, %v6549_v29  ;;  %v6729_v2 = vpop.f32.mrb[99].mxu1 }
0x1010   :  { %v6730_v42 = vadd.f32 %v6729_v2, %v6553_v5 }
0x1011   :  { %v6854_v25 = vpack.c.bf16 %v6728_v20, %v6724_v11  ;;  %v15379_v54 = vpack.i.bf16 %v6728_v20, %v6724_v11 }
0x1012   :  { %v14637_v22 = vpop.f32.mrb[112].mxu0  ;;  %v15284_v21 = vpack.i.bf16 %v6730_v42, %v6726_v40  ;;  %v6936_v30 = vpack.c.bf16 %v6730_v42, %v6726_v40 }
0x1013   :  { %v6774_v60 = vpop.f32.mrb[113].mxu0  ;;  %14643 = vmatprep.mubr.msk.bf16.mxu1 %vm19837_vm6, %v6854_v25  ;;  %v18540_v3 = vadd.f32 %v14637_v22, %v6557_v51  ;;  %vm19844_vm6 = vmmov %vm19834_vm0 }
0x1014   :  { %v6733_v9 = vpop.f32.mrb[100].mxu1  ;;  %v14638_v50 = vpop.f32.mrb[114].mxu0  ;;  %15285 = vrot.lane.b32.xlu0 %v15284_v21, %s17260_s20  ;;  %14995 = vmatprep.subr.msk.bf16.mxu1 %vm19838_vm7, %v6936_v30  ;;  %v7041_v57 = vsel %vm19839_vm8, %v6936_v30, 0  ;;  %v6775_v13 = vadd.f32 %v6774_v60, %v6557_v51  ;;  %vm19845_vm7 = vmmov %vm19834_vm0 }
0x1015   :  { %v6734_v33 = vadd.f32 %v6733_v9, %v6549_v29  ;;  %v6735_v34 = vpop.f32.mrb[101].mxu1  ;;  %v6777_v10 = vpop.f32.mrb[115].mxu0  ;;  %14640 = vmatpush3.bf16.xpose.msra.mxu1 %v7041_v57  ;;  %vm19846_vm8 = vmmov %vm19834_vm0 }
0x1016   :  { %v6736_v58 = vadd.f32 %v6735_v34, %v6553_v5  ;;  %v6778_v52 = vadd.f32 %v6777_v10, %v6557_v51  ;;  %v6737_v4 = vpop.f32.mrb[102].mxu1 }
0x1017   :  { %v6738_v48 = vpop.f32.mrb[103].mxu1  ;;  %v15299_v17 = vpack.i.bf16 %v6734_v33, %v6728_v20  ;;  %v6855_v61 = vpack.c.bf16 %v6734_v33, %v6734_v33 }
0x1018   :  { %15305 = vrot.lane.b32.xlu0 %v15284_v21, %s17261_s0  ;;  %v6937_v35 = vpack.c.bf16 %v6736_v58, %v6736_v58  ;;  %v15289_v7 = vpack.i.bf16 %v6724_v11, %v6736_v58  ;;  %v18519_v0 = vpack.i.bf16 %v6778_v52, %v6775_v13  ;;  %v18523_v53 = vpack.c.bf16 %v6778_v52, %v6775_v13 }
0x101a   :  { %14996 = vmatprep.subr.msk.bf16.mxu1 %vm19840_vm10, %v6937_v35  ;;  %15290 = vrot.lane.b32.xlu1 %v15289_v7, %s17260_s20  ;;  %v7044_v38 = vsel %vm19841_vm11, %v6937_v35, 0  ;;  %vm19847_vm10 = vmmov %vm19834_vm0 }
0x101b   :  { %vm19848_vm11 = vmmov %vm19834_vm0 }
0x101c   :  { %15320 = vrot.lane.b32.xlu0 %v15289_v7, %s17261_s0 }
0x101d   :  { %14642 = vmatpush3.bf16.xpose.msra.mxu1 %v7044_v38 }
0x101e   :  { %15295 = vrot.lane.b32.xlu1 %v15284_v21, %s17262_s9 }
0x1020   :  { %15325 = vrot.lane.b32.xlu0 %v15284_v21, %s17245_s16 }
0x1022   :  { %15300 = vrot.lane.b32.xlu1 %v15299_v17, %s17260_s20 }
0x1024   :  { %15335 = vrot.lane.b32.xlu0 %v15284_v21, %s17229_s7  ;;  %14644 = vmatmul.mubr.msk.bf16.vlgmr.msra.gmra.mrb[104].mxu1 %vm19834_vm0, %v6855_v61 }
0x1026   :  { %15310 = vrot.lane.b32.xlu1 %v15289_v7, %s17262_s9 }
0x1028   :  { %15350 = vrot.lane.b32.xlu0 %v15289_v7, %s17229_s7 }
0x102a   :  { %15315 = vrot.lane.b32.xlu1 %v15299_v17, %s17262_s9 }
0x102c   :  { %15355 = vrot.lane.b32.xlu0 %v15284_v21, %s17236_s15 }
0x102e   :  { %15330 = vrot.lane.b32.xlu1 %v15299_v17, %s17261_s0 }
0x1030   :  { %15365 = vrot.lane.b32.xlu0 %v15284_v21, %s17232_s26 }
0x1032   :  { %15340 = vrot.lane.b32.xlu1 %v15289_v7, %s17245_s16 }
0x1034   :  { %6931 = vrot.lane.b32.xlu0 %v6736_v58, %s17232_s26 }
0x1036   :  { %15345 = vrot.lane.b32.xlu1 %v15299_v17, %s17245_s16 }
0x1038   :  { %15380 = vrot.lane.b32.xlu0 %v15379_v54, %s17232_s26 }
0x103a   :  { %15360 = vrot.lane.b32.xlu1 %v15299_v17, %s17229_s7 }
0x103c   :  { %6986 = vrot.lane.b32.xlu0 %v18540_v3, %s17245_s16 }
0x103e   :  { %15370 = vrot.lane.b32.xlu1 %v15289_v7, %s17236_s15 }
0x1040   :  { %15385 = vrot.lane.b32.xlu0 %v18519_v0, %s17260_s20 }
0x1042   :  { %15375 = vrot.lane.b32.xlu1 %v15299_v17, %s17236_s15 }
0x1044   :  { %15390 = vrot.lane.b32.xlu0 %v18519_v0, %s17262_s9 }
0x1046   :  { %6849 = vrot.lane.b32.xlu1 %v6734_v33, %s17232_s26 }
0x1048   :  { %15400 = vrot.lane.b32.xlu0 %v18519_v0, %s17245_s16 }
0x104a   :  { %6959 = vrot.lane.b32.xlu1 %v18540_v3, %s17260_s20 }
0x104e   :  { %6968 = vrot.lane.b32.xlu1 %v18540_v3, %s17262_s9 }
0x1052   :  { %6977 = vrot.lane.b32.xlu1 %v18540_v3, %s17261_s0 }
0x1056   :  { %6995 = vrot.lane.b32.xlu1 %v18540_v3, %s17229_s7 }
0x105a   :  { %15395 = vrot.lane.b32.xlu1 %v18519_v0, %s17261_s0 }
0x105e   :  { %15405 = vrot.lane.b32.xlu1 %v18519_v0, %s17229_s7 }
0x1086   :  { %v15286_v23 = vpop.permute.xlu0 %15285 }
0x1087   :  { %v15288_v28 = vunpack.i.h.bf16 %v15286_v23  ;;  %v15287_v18 = vunpack.i.l.bf16 %v15286_v23 }
0x1089   :  { %v6938_v45 = vpack.c.bf16 %v15288_v28, %v15287_v18 }
0x108a   :  { %v15306_v37 = vpop.permute.xlu0 %15305 }
0x108b   :  { %14997 = vmatprep.subr.msk.bf16.mxu1 %vm19842_vm3, %v6938_v45  ;;  %v7101_v19 = vsel %vm19843_vm4, %v6938_v45, 0  ;;  %v15308_v31 = vunpack.i.h.bf16 %v15306_v37  ;;  %v15307_v27 = vunpack.i.l.bf16 %v15306_v37  ;;  %vm19849_vm3 = vmmov %vm19834_vm0 }
0x108c   :  { %v15291_v26 = vpop.permute.xlu1 %15290  ;;  %14648 = vmatpush3.bf16.xpose.msra.mxu1 %v7101_v19  ;;  %vm19850_vm4 = vmmov %vm19834_vm0 }
0x108d   :  { %v15292_v55 = vunpack.i.l.bf16 %v15291_v26  ;;  %v6942_v49 = vpack.c.bf16 %v15308_v31, %v15307_v27  ;;  %v15293_v16 = vunpack.i.h.bf16 %v15291_v26 }
0x108e   :  { %v15321_v46 = vpop.permute.xlu0 %15320 }
0x108f   :  { %v6939_v36 = vpack.c.bf16 %v15292_v55, %v15292_v55  ;;  %v15322_v40 = vunpack.i.l.bf16 %v15321_v46  ;;  %v7221_v50 = vsel %vm19850_vm4, %v6942_v49, 0  ;;  %v15323_v7 = vunpack.i.h.bf16 %v15321_v46  ;;  %vm19857_vm4 = vmmov %vm19834_vm0 }
0x1090   :  { %v15296_v14 = vpop.permute.xlu1 %15295 }
0x1091   :  { %v15298_v24 = vunpack.i.h.bf16 %v15296_v14  ;;  %v15297_v41 = vunpack.i.l.bf16 %v15296_v14  ;;  %14998 = vmatprep.subr.msk.bf16.mxu1 %vm19844_vm6, %v6939_v36  ;;  %v7104_v44 = vsel %vm19845_vm7, %v6939_v36, 0  ;;  %v6943_v60 = vpack.c.bf16 %v15322_v40, %v15322_v40  ;;  %vm19851_vm6 = vmmov %vm19834_vm0 }
0x1092   :  { %v15326_v39 = vpop.permute.xlu0 %15325  ;;  %vm19852_vm7 = vmmov %vm19834_vm0 }
0x1093   :  { %v6940_v29 = vpack.c.bf16 %v15298_v24, %v15297_v41  ;;  %v15328_v54 = vunpack.i.h.bf16 %v15326_v39  ;;  %v15327_v22 = vunpack.i.l.bf16 %v15326_v39  ;;  %v7224_v28 = vsel %vm19834_vm0, %v6943_v60, 0 }
0x1094   :  { %v15301_v5 = vpop.permute.xlu1 %15300  ;;  %14650 = vmatpush3.bf16.xpose.msra.mxu1 %v7104_v44 }
0x1095   :  { %v15303_v43 = vunpack.i.h.bf16 %v15301_v5  ;;  %v15302_v11 = vunpack.i.l.bf16 %v15301_v5  ;;  %14999 = vmatprep.subr.msk.bf16.mxu0 %vm19846_vm8, %v6940_v29  ;;  %15001 = vmatprep.subr.msk.bf16.mxu1 %vm19847_vm10, %v6942_v49  ;;  %v7161_v20 = vsel %vm19848_vm11, %v6940_v29, 0  ;;  %v6944_v33 = vpack.c.bf16 %v15328_v54, %v15327_v22  ;;  %vm19853_vm8 = vmmov %vm19834_vm0 }
0x1096   :  { %v15336_v2 = vpop.permute.xlu0 %15335  ;;  %14656 = vmatpush3.bf16.xpose.msra.mxu0 %v7161_v20  ;;  %vm19854_vm10 = vmmov %vm19834_vm0 }
0x1097   :  { %v6856_v42 = vpack.c.bf16 %v15302_v11, %v15293_v16  ;;  %v6857_v21 = vpack.c.bf16 %v15303_v43, %v15303_v43  ;;  %v15338_v48 = vunpack.i.h.bf16 %v15336_v2  ;;  %v15337_v17 = vunpack.i.l.bf16 %v15336_v2  ;;  %vm19855_vm11 = vmmov %vm19834_vm0 }
0x1098   :  { %v15311_v25 = vpop.permute.xlu1 %15310 }
0x1099   :  { %v15312_v30 = vunpack.i.l.bf16 %v15311_v25  ;;  %14651 = vmatprep.mubr.msk.bf16.mxu1 %vm19834_vm0, %v6856_v42  ;;  %v15313_v34 = vunpack.i.h.bf16 %v15311_v25  ;;  %v6946_v18 = vpack.c.bf16 %v15338_v48, %v15337_v17 }
0x109a   :  { %v18574_v51 = vpop.permute.xlu0 %15350 }
0x109b   :  { %v6941_v9 = vpack.c.bf16 %v15312_v30, %v15312_v30  ;;  %14652 = vmatmul.mubr.msk.bf16.vlgmr.msra.gmra.mrb[108].mxu1 %vm19849_vm3, %v6857_v21  ;;  %vm19856_vm3 = vmmov %vm19834_vm0  ;;  %v15352_v46 = vunpack.i.l.bf16 %v18574_v51  ;;  %v15353_v43 = vunpack.i.h.bf16 %v18574_v51 }
0x109c   :  { %v15316_v57 = vpop.permute.xlu1 %15315  ;;  %14664 = vmatpush3.bf16.xpose.msra.mxu1 %v7221_v50 }
0x109d   :  { %v15317_v10 = vunpack.i.l.bf16 %v15316_v57  ;;  %15000 = vmatprep.subr.msk.bf16.mxu0 %vm19851_vm6, %v6941_v9  ;;  %15002 = vmatprep.subr.msk.bf16.mxu1 %vm19852_vm7, %v6943_v60  ;;  %v7164_v58 = vsel %vm19853_vm8, %v6941_v9, 0  ;;  %v15318_v4 = vunpack.i.h.bf16 %v15316_v57  ;;  %vm19858_vm6 = vmmov %vm19834_vm0  ;;  %v6947_v29 = vpack.c.bf16 %v15352_v46, %v15352_v46 }
0x109e   :  { %v15356_v52 = vpop.permute.xlu0 %15355  ;;  %14658 = vmatpush3.bf16.xpose.msra.mxu0 %v7164_v58  ;;  %v7281_v55 = vsel %vm19858_vm6, %v6944_v33, 0  ;;  %vm19859_vm7 = vmmov %vm19834_vm0 }
0x109f   :  { %v6858_v13 = vpack.c.bf16 %v15317_v10, %v15313_v34  ;;  %15003 = vmatprep.subr.msk.bf16.mxu0 %vm19854_vm10, %v6944_v33  ;;  %v6859_v61 = vpack.c.bf16 %v15318_v4, %v15318_v4  ;;  %v15358_v27 = vunpack.i.h.bf16 %v15356_v52  ;;  %v15357_v14 = vunpack.i.l.bf16 %v15356_v52  ;;  %vm19860_vm8 = vmmov %vm19834_vm0 }
0x10a0   :  { %v15331_v35 = vpop.permute.xlu1 %15330  ;;  %vm19861_vm10 = vmmov %vm19834_vm0 }
0x10a1   :  { %v15332_v38 = vunpack.i.l.bf16 %v15331_v35  ;;  %14659 = vmatprep.mubr.msk.bf16.mxu0 %vm19855_vm11, %v6858_v13  ;;  %v15333_v19 = vunpack.i.h.bf16 %v15331_v35  ;;  %vm19862_vm11 = vmmov %vm19834_vm0  ;;  %v6948_v11 = vpack.c.bf16 %v15358_v27, %v15357_v14 }
0x10a2   :  { %v15366_v45 = vpop.permute.xlu0 %15365  ;;  %v7341_v5 = vsel %vm19862_vm11, %v6946_v18, 0  ;;  %vm19865_vm6 = vmmov %vm19834_vm0 }
0x10a3   :  { %v6860_v23 = vpack.c.bf16 %v15332_v38, %v15323_v7  ;;  %v6861_v24 = vpack.c.bf16 %v15333_v19, %v15333_v19  ;;  %v15368_v40 = vunpack.i.h.bf16 %v15366_v45  ;;  %v15367_v42 = vunpack.i.l.bf16 %v15366_v45  ;;  %vm19869_vm11 = vmmov %vm19834_vm0 }
0x10a4   :  { %v15341_v37 = vpop.permute.xlu1 %15340  ;;  %14666 = vmatpush3.bf16.xpose.msra.mxu1 %v7224_v28 }
0x10a5   :  { %v15342_v26 = vunpack.i.l.bf16 %v15341_v37  ;;  %14660 = vmatmul.mubr.msk.bf16.vlgmr.msra.gmra.mrb[116].mxu0 %vm19856_vm3, %v6859_v61  ;;  %14667 = vmatprep.mubr.msk.bf16.mxu1 %vm19857_vm4, %v6860_v23  ;;  %v15343_v41 = vunpack.i.h.bf16 %v15341_v37  ;;  %vm19863_vm3 = vmmov %vm19834_vm0  ;;  %v6950_v51 = vpack.c.bf16 %v15368_v40, %v15367_v42 }
0x10a6   :  { %15005 = vmatprep.subr.msk.bf16.mxu1 %vm19859_vm7, %v6946_v18  ;;  %14672 = vmatpush3.bf16.xpose.msra.mxu0 %v7281_v55  ;;  %v6932_v49 = vpop.permute.xlu0 %6931  ;;  %vm19864_vm4 = vmmov %vm19834_vm0 }
0x10a7   :  { %v6945_v31 = vpack.c.bf16 %v15342_v26, %v15342_v26  ;;  %vm19866_vm7 = vmmov %vm19834_vm0  ;;  %v6951_v38 = vpack.c.bf16 %v6932_v49, %v6932_v49 }
0x10a8   :  { %v15346_v36 = vpop.permute.xlu1 %15345 }
0x10a9   :  { %v15347_v39 = vunpack.i.l.bf16 %v15346_v36  ;;  %15004 = vmatprep.subr.msk.bf16.mxu0 %vm19860_vm8, %v6945_v31  ;;  %v7284_v2 = vsel %vm19864_vm4, %v6945_v31, 0  ;;  %v15348_v25 = vunpack.i.h.bf16 %v15346_v36  ;;  %vm19867_vm8 = vmmov %vm19834_vm0  ;;  %v7464_v31 = vsel %vm19834_vm0, %v6951_v38, 0 }
0x10aa   :  { %v15381_v22 = vpop.permute.xlu0 %15380  ;;  %v7344_v9 = vsel %vm19867_vm8, %v6947_v29, 0  ;;  %vm19871_vm4 = vmmov %vm19834_vm0 }
0x10ab   :  { %v6862_v44 = vpack.c.bf16 %v15347_v39, %v15343_v41  ;;  %14668 = vmatmul.mubr.msk.bf16.vlgmr.msra.gmra.mrb[112].mxu1 %vm19861_vm10, %v6861_v24  ;;  %v6863_v60 = vpack.c.bf16 %v15348_v25, %v15348_v25  ;;  %vm19868_vm10 = vmmov %vm19834_vm0  ;;  %v15383_v52 = vunpack.i.h.bf16 %v15381_v22  ;;  %v15382_v4 = vunpack.i.l.bf16 %v15381_v22 }
0x10ac   :  { %v15361_v16 = vpop.permute.xlu1 %15360  ;;  %14680 = vmatpush3.bf16.xpose.msra.mxu1 %v7341_v5  ;;  %v7401_v57 = vsel %vm19868_vm10, %v6948_v11, 0  ;;  %vm19874_vm8 = vmmov %vm19834_vm0  ;;  %v7019_v41 = vpack.c.bf16 %v18540_v3, %v18540_v3 }
0x10ad   :  { %v15362_v20 = vunpack.i.l.bf16 %v15361_v16  ;;  %14675 = vmatprep.mubr.msk.bf16.mxu0 %vm19834_vm0, %v6862_v44  ;;  %15006 = vmatprep.subr.msk.bf16.mxu1 %vm19863_vm3, %v6947_v29  ;;  %v15363_v33 = vunpack.i.h.bf16 %v15361_v16  ;;  %vm19870_vm3 = vmmov %vm19834_vm0  ;;  %v6868_v7 = vpack.c.bf16 %v15383_v52, %v15382_v4 }
0x10ae   :  { %14674 = vmatpush3.bf16.xpose.msra.mxu0 %v7284_v2  ;;  %v18602_v13 = vpop.permute.xlu0 %6986  ;;  %vm19875_vm10 = vmmov %vm19834_vm0 }
0x10af   :  { %v6864_v54 = vpack.c.bf16 %v15362_v20, %v15353_v43  ;;  %15007 = vmatprep.subr.msk.bf16.mxu0 %vm19865_vm6, %v6948_v11  ;;  %v6865_v35 = vpack.c.bf16 %v15363_v33, %v15363_v33  ;;  %vm19872_vm6 = vmmov %vm19834_vm0 }
0x10b0   :  { %v15371_v21 = vpop.permute.xlu1 %15370 }
0x10b1   :  { %v15372_v30 = vunpack.i.l.bf16 %v15371_v21  ;;  %14683 = vmatprep.mubr.msk.bf16.mxu1 %vm19866_vm7, %v6864_v54  ;;  %v15373_v34 = vunpack.i.h.bf16 %v15371_v21  ;;  %vm19873_vm7 = vmmov %vm19834_vm0 }
0x10b2   :  { %v7461_v61 = vsel %vm19873_vm7, %v6950_v51, 0  ;;  %v15386_v23 = vpop.permute.xlu0 %15385  ;;  %vm19880_vm7 = vmmov %vm19834_vm0 }
0x10b3   :  { %v6949_v10 = vpack.c.bf16 %v15372_v30, %v15372_v30  ;;  %v15388_v45 = vunpack.i.h.bf16 %v15386_v23  ;;  %v15387_v37 = vunpack.i.l.bf16 %v15386_v23 }
0x10b4   :  { %v15376_v50 = vpop.permute.xlu1 %15375  ;;  %14682 = vmatpush3.bf16.xpose.msra.mxu1 %v7344_v9 }
0x10b5   :  { %v15377_v58 = vunpack.i.l.bf16 %v15376_v50  ;;  %14676 = vmatmul.mubr.msk.bf16.vlgmr.msra.gmra.mrb[120].mxu0 %vm19869_vm11, %v6863_v60  ;;  %15009 = vmatprep.subr.msk.bf16.mxu1 %vm19834_vm0, %v6950_v51  ;;  %vm19876_vm11 = vmmov %vm19834_vm0  ;;  %v15378_v19 = vunpack.i.h.bf16 %v15376_v50  ;;  %v7020_v27 = vpack.c.bf16 %v15388_v45, %v15387_v37 }
0x10b6   :  { %14688 = vmatpush3.bf16.xpose.msra.mxu0 %v7401_v57  ;;  %v7404_v18 = vsel %vm19876_vm11, %v6949_v10, 0  ;;  %v15391_v55 = vpop.permute.xlu0 %15390 }
0x10b7   :  { %v6866_v48 = vpack.c.bf16 %v15377_v58, %v15373_v34  ;;  %15008 = vmatprep.subr.msk.bf16.mxu0 %vm19870_vm3, %v6949_v10  ;;  %v6867_v46 = vpack.c.bf16 %v15378_v19, %v15378_v19  ;;  %v15393_v14 = vunpack.i.h.bf16 %v15391_v55  ;;  %v15392_v24 = vunpack.i.l.bf16 %v15391_v55  ;;  %vm19877_vm3 = vmmov %vm19834_vm0 }
0x10b8   :  { %v6850_v17 = vpop.permute.xlu1 %6849 }
0x10b9   :  { %14691 = vmatprep.mubr.msk.bf16.mxu0 %vm19871_vm4, %v6866_v48  ;;  %vm19878_vm4 = vcmask 1043456   ;;  %v6869_v49 = vpack.c.bf16 %v6850_v17, %v6850_v17  ;;  %v18625_v44 = vpack.c.bf16 %v15393_v14, %v15392_v24 }
0x10ba   :  { %vm19883_vm11 = vmmov %vm19878_vm4 }
0x10bb   :  { %14684 = vmatmul.mubr.msk.bf16.vlgmr.msra.gmra.mrb[116].mxu1 %vm19872_vm6, %v6865_v35  ;;  %vm19879_vm6 = vmmov %vm19878_vm4 }
0x10bc   :  { %v6960_v28 = vpop.permute.xlu1 %6959  ;;  %14696 = vmatpush3.bf16.xpose.msra.mxu1 %v7461_v61  ;;  %14699 = vmatprep.mubr.msk.bf16.mxu1 %vm19874_vm8, %v6868_v7  ;;  %v7849_v29 = vsel %vm19879_vm6, %v7019_v41, 0  ;;  %vm19881_vm8 = vmmov %vm19878_vm4 }
0x10bd   :  { %15010 = vmatprep.subr.msk.bf16.mxu1 %vm19875_vm10, %v6951_v38  ;;  %v7021_v5 = vpack.c.bf16 %v6960_v28, %v6960_v28  ;;  %vm19882_vm10 = vmmov %vm19878_vm4 }
0x10be   :  { %14690 = vmatpush3.bf16.xpose.msra.mxu0 %v7404_v18  ;;  %vm19884_vm0 = vmmov %vm19878_vm4 }
0x10bf   :  { %14703 = vmatprep.subr.bf16.mxu0 %v18523_v53  ;;  %vm19887_vm6 = vmmov %vm19884_vm0 }
0x10c0   :  { %v18612_v26 = vpop.permute.xlu1 %6968 }
0x10c4   :  { %v18615_v36 = vpop.permute.xlu1 %6977  ;;  %14698 = vmatpush3.bf16.xpose.msra.mxu1 %v7464_v31 }
0x10c5   :  { %14692 = vmatmul.mubr.msk.bf16.vlgmr.msra.gmra.mrb[124].mxu0 %vm19877_vm3, %v6867_v46  ;;  %14711 = vmatprep.subr.bf16.mxu1 %v7020_v27  ;;  %vm19885_vm3 = vmmov %vm19884_vm0 }
0x10c6   :  { %14704 = vmatpush3.bf16.msra.mxu0 %v18523_v53  ;;  %v7906_v53 = vsel %vm19882_vm10, %v7021_v5, 0  ;;  %vm19890_vm10 = vmmov %vm19884_vm0 }
0x10c7   :  { %15011 = vmatprep.subr.msk.bf16.mxu0 %vm19878_vm4, %v7019_v41  ;;  %vm19886_vm4 = vmmov %vm19884_vm0 }
0x10c8   :  { %v18622_v39 = vpop.permute.xlu1 %6995 }
0x10ca   :  { %14706 = vmatpush3.bf16.msra.mxu0 %v7849_v29 }
0x10cb   :  { %14700 = vmatmul.mubr.msk.bf16.vlgmr.msra.gmra.mrb[120].mxu1 %vm19880_vm7, %v6869_v49  ;;  %14719 = vmatprep.subr.bf16.mxu0 %v18625_v44  ;;  %vm19888_vm7 = vmmov %vm19884_vm0 }
0x10cc   :  { %v15396_v16 = vpop.permute.xlu1 %15395  ;;  %14712 = vmatpush3.bf16.msra.mxu1 %v7020_v27 }
0x10cd   :  { %v15398_v43 = vunpack.i.h.bf16 %v15396_v16  ;;  %v15397_v11 = vunpack.i.l.bf16 %v15396_v16  ;;  %15012 = vmatprep.subr.msk.bf16.mxu1 %vm19881_vm8, %v7021_v5  ;;  %vm19889_vm8 = vmmov %vm19884_vm0 }
0x10cf   :  { %v18631_v20 = vpack.c.bf16 %v15398_v43, %v15397_v11 }
0x10d0   :  { %14714 = vmatpush3.bf16.msra.mxu1 %v7906_v53 }
0x10d1   :  { %14727 = vmatprep.subr.bf16.mxu1 %v18631_v20 }
0x10f7   :  { %v14645_v2 = vpop.f32.mrb[104].mxu1 }
0x10f8   :  { %v7516_v40 = vmul.f32 0.25, %v14645_v2  ;;  %v7080_v42 = vpop.f32.mrb[105].mxu1 }
0x10f9   :  { %v7514_v25 = vmul.f32 0.25, %v7080_v42  ;;  %v14646_v54 = vpop.f32.mrb[106].mxu1 }
0x10fa   :  { %v18635_v22 = vadd.f32 %v7516_v40, %v17980_v8  ;;  %v7083_v21 = vpop.f32.mrb[107].mxu1  ;;  %v18687_v54 = vpop.permute.xlu1 %15405 }
0x10fb   :  { %v7515_v30 = vmul.f32 0.25, %v7083_v21  ;;  %v18638_v51 = vadd.f32 %v7514_v25, %v17982_v12 }
0x10fc   :  { %v7568_v60 = vsel %vm4588_vm1, %v18635_v22, -inf }
0x10fd   :  { %v18643_v9 = vadd.f32 %v7515_v30, %v17984_v15  ;;  %7569 = vmax.xlane.f32.xlu0 %v7568_v60  ;;  %v7562_v57 = vsel %vm4588_vm1, %v18638_v51, -inf }
0x10ff   :  { %v7565_v50 = vsel %vm4588_vm1, %v18643_v9, -inf }
0x1100   :  { %7566 = vmax.xlane.f32.xlu1 %v7565_v50 }
0x1101   :  { %7563 = vmax.xlane.f32.xlu0 %v7562_v57 }
0x116e   :  { %v14653_v33 = vpop.f32.mrb[108].mxu1 }
0x116f   :  { %v7519_v34 = vmul.f32 0.25, %v14653_v33  ;;  %v7140_v10 = vpop.f32.mrb[109].mxu1  ;;  %v18691_v33 = vpop.permute.xlu0 %15400 }
0x1170   :  { %v14654_v58 = vpop.f32.mrb[110].mxu1  ;;  %v7517_v35 = vmul.f32 0.25, %v7140_v10 }
0x1171   :  { %v18650_v52 = vadd.f32 %v7519_v34, %v17980_v8  ;;  %v7143_v4 = vpop.f32.mrb[111].mxu1 }
0x1172   :  { %v18658_v45 = vadd.f32 %v7517_v35, %v17982_v12  ;;  %v7518_v49 = vmul.f32 0.25, %v7143_v4 }
0x1173   :  { %v7577_v48 = vsel %vm4588_vm1, %v18650_v52, -inf }
0x1174   :  { %7578 = vmax.xlane.f32.xlu1 %v7577_v48  ;;  %v7571_v43 = vsel %vm4588_vm1, %v18658_v45, -inf  ;;  %v18681_v2 = vadd.f32 %v7518_v49, %v17984_v15 }
0x1176   :  { %v7574_v60 = vsel %vm4588_vm1, %v18681_v2, -inf }
0x1178   :  { %v14661_v17 = vpop.f32.mrb[116].mxu0 }
0x1179   :  { %v7522_v7 = vmul.f32 0.25, %v14661_v17  ;;  %v7200_v38 = vpop.f32.mrb[117].mxu0 }
0x117a   :  { %v14662_v61 = vpop.f32.mrb[118].mxu0  ;;  %v7520_v37 = vmul.f32 0.25, %v7200_v38 }
0x117b   :  { %v18655_v23 = vadd.f32 %v7522_v7, %v17980_v8  ;;  %v7203_v28 = vpop.f32.mrb[119].mxu0 }
0x117c   :  { %v7521_v18 = vmul.f32 0.25, %v7203_v28  ;;  %v18668_v29 = vadd.f32 %v7520_v37, %v17982_v12 }
0x117d   :  { %v7586_v19 = vsel %vm4588_vm1, %v18655_v23, -inf }
0x117e   :  { %v18663_v55 = vadd.f32 %v7521_v18, %v17984_v15  ;;  %7587 = vmax.xlane.f32.xlu0 %v7586_v19  ;;  %v14669_v46 = vpop.f32.mrb[112].mxu1  ;;  %v7580_v40 = vsel %vm4588_vm1, %v18668_v29, -inf }
0x117f   :  { %v7525_v31 = vmul.f32 0.25, %v14669_v46  ;;  %v7260_v27 = vpop.f32.mrb[113].mxu1 }
0x1180   :  { %v7523_v14 = vmul.f32 0.25, %v7260_v27  ;;  %v14670_v24 = vpop.f32.mrb[114].mxu1  ;;  %v7583_v41 = vsel %vm4588_vm1, %v18663_v55, -inf }
0x1181   :  { %v18671_v5 = vadd.f32 %v7525_v31, %v17980_v8  ;;  %7584 = vmax.xlane.f32.xlu1 %v7583_v41  ;;  %v7263_v16 = vpop.f32.mrb[115].mxu1 }
0x1182   :  { %7572 = vmax.xlane.f32.xlu0 %v7571_v43  ;;  %v18678_v53 = vadd.f32 %v7523_v14, %v17982_v12  ;;  %v7524_v4 = vmul.f32 0.25, %v7263_v16 }
0x1183   :  { %v7595_v11 = vsel %vm4588_vm1, %v18671_v5, -inf }
0x1184   :  { %v7589_v25 = vsel %vm4588_vm1, %v18678_v53, -inf  ;;  %v18708_v27 = vadd.f32 %v7524_v4, %v17984_v15 }
0x1185   :  { %7596 = vmax.xlane.f32.xlu1 %v7595_v11 }
0x1186   :  { %7581 = vmax.xlane.f32.xlu0 %v7580_v40  ;;  %v7592_v40 = vsel %vm4588_vm1, %v18708_v27, -inf }
0x1188   :  { %v14677_v42 = vpop.f32.mrb[120].mxu0 }
0x1189   :  { %v7528_v21 = vmul.f32 0.25, %v14677_v42  ;;  %v7320_v30 = vpop.f32.mrb[121].mxu0  ;;  %7590 = vmax.xlane.f32.xlu1 %v7589_v25 }
0x118a   :  { %v7526_v50 = vmul.f32 0.25, %v7320_v30  ;;  %v14678_v57 = vpop.f32.mrb[122].mxu0  ;;  %7575 = vmax.xlane.f32.xlu0 %v7574_v60  ;;  %v7570_v61 = vpop.xlane.xlu0 %7569 }
0x118b   :  { %v18694_v34 = vadd.f32 %v7528_v21, %v17980_v8  ;;  %v7323_v10 = vpop.f32.mrb[123].mxu0  ;;  %v7636_v16 = vsub.f32 %v18635_v22, %v7570_v61 }
0x118c   :  { %v7527_v58 = vmul.f32 0.25, %v7323_v10  ;;  %v18697_v48 = vadd.f32 %v7526_v50, %v17982_v12 }
0x118d   :  { %v7567_v17 = vpop.xlane.xlu1 %7566  ;;  %v7604_v35 = vsel %vm4588_vm1, %v18694_v34, -inf  ;;  %v7662_v42 = vmul.f32 1.442695, %v7636_v16 }
0x118e   :  { %v18702_v7 = vadd.f32 %v7527_v58, %v17984_v15  ;;  %7605 = vmax.xlane.f32.xlu0 %v7604_v35  ;;  %v14685_v38 = vpop.f32.mrb[116].mxu1  ;;  %v7635_v28 = vsub.f32 %v18643_v9, %v7567_v17  ;;  %v7598_v41 = vsel %vm4588_vm1, %v18697_v48, -inf  ;;  %v7564_v11 = vpop.xlane.xlu0 %7563 }
0x118f   :  { %v7531_v18 = vmul.f32 0.25, %v14685_v38  ;;  %v7380_v37 = vpop.f32.mrb[117].mxu1  ;;  %v7634_v25 = vsub.f32 %v18638_v51, %v7564_v11 }
0x1190   :  { %v7529_v19 = vmul.f32 0.25, %v7380_v37  ;;  %v14686_v46 = vpop.f32.mrb[118].mxu1  ;;  %v7601_v31 = vsel %vm4588_vm1, %v18702_v7, -inf  ;;  %v7660_v9 = vmul.f32 1.442695, %v7635_v28 }
0x1191   :  { %v18711_v14 = vadd.f32 %v7531_v18, %v17980_v8  ;;  %7602 = vmax.xlane.f32.xlu1 %v7601_v31  ;;  %v7383_v24 = vpop.f32.mrb[119].mxu1  ;;  %v7658_v4 = vmul.f32 1.442695, %v7634_v25 }
0x1192   :  { %7599 = vmax.xlane.f32.xlu0 %v7598_v41  ;;  %v18719_v43 = vadd.f32 %v7529_v19, %v17982_v12  ;;  %16428 = vpow2.f32 %v7660_v9  ;;  %v7530_v35 = vmul.f32 0.25, %v7383_v24 }
0x1193   :  { %v7613_v49 = vsel %vm4588_vm1, %v18711_v14, -inf  ;;  %16430 = vpow2.f32 %v7662_v42 }
0x1194   :  { %v7607_v30 = vsel %vm4588_vm1, %v18719_v43, -inf  ;;  %16432 = vpow2.f32 %v7658_v4  ;;  %v18742_v24 = vadd.f32 %v7530_v35, %v17984_v15 }
0x1195   :  { %7614 = vmax.xlane.f32.xlu1 %v7613_v49 }
0x1196   :  { %7593 = vmax.xlane.f32.xlu0 %v7592_v40  ;;  %v7610_v40 = vsel %vm4588_vm1, %v18742_v24, -inf }
0x1198   :  { %v14693_v21 = vpop.f32.mrb[124].mxu0 }
0x1199   :  { %v7534_v60 = vmul.f32 0.25, %v14693_v21  ;;  %v7440_v50 = vpop.f32.mrb[125].mxu0  ;;  %7608 = vmax.xlane.f32.xlu1 %v7607_v30 }
0x119a   :  { %v7532_v22 = vmul.f32 0.25, %v7440_v50  ;;  %v14694_v57 = vpop.f32.mrb[126].mxu0 }
0x119b   :  { %v18727_v10 = vadd.f32 %v7534_v60, %v17980_v8  ;;  %v7443_v58 = vpop.f32.mrb[127].mxu0 }
0x119c   :  { %v7533_v17 = vmul.f32 0.25, %v7443_v58  ;;  %v18730_v38 = vadd.f32 %v7532_v22, %v17982_v12  ;;  %v18739_v31 = vpop.eup %16428 }
0x119d   :  { %v7622_v51 = vsel %vm4588_vm1, %v18727_v10, -inf  ;;  %v7709_v11 = vsel %vm4588_vm1, %v18739_v31, 0.0  ;;  %v18753_v42 = vpop.eup %16430 }
0x119e   :  { %v18735_v61 = vadd.f32 %v7533_v17, %v17984_v15  ;;  %7623 = vmax.xlane.f32.xlu0 %v7622_v51  ;;  %v14701_v28 = vpop.f32.mrb[120].mxu1  ;;  %v7616_v9 = vsel %vm4588_vm1, %v18730_v38, -inf  ;;  %v7712_v60 = vsel %vm4588_vm1, %v18753_v42, 0.0  ;;  %v18762_v50 = vpop.eup %16432 }
0x119f   :  { %v7500_v18 = vpop.f32.mrb[121].mxu1  ;;  %v7537_v37 = vmul.f32 0.25, %v14701_v28  ;;  %v7706_v58 = vsel %vm4588_vm1, %v18762_v50, 0.0 }
0x11a0   :  { %v14702_v19 = vpop.f32.mrb[122].mxu1  ;;  %v7619_v46 = vsel %vm4588_vm1, %v18735_v61, -inf  ;;  %v7535_v16 = vmul.f32 0.25, %v7500_v18 }
0x11a1   :  { %7620 = vmax.xlane.f32.xlu1 %v7619_v46  ;;  %v7503_v41 = vpop.f32.mrb[123].mxu1  ;;  %v18747_v49 = vadd.f32 %v7537_v37, %v17980_v8 }
0x11a2   :  { %7617 = vmax.xlane.f32.xlu0 %v7616_v9  ;;  %v18756_v25 = vadd.f32 %v7535_v16, %v17982_v12  ;;  %v7536_v30 = vmul.f32 0.25, %v7503_v41 }
0x11a3   :  { %v7631_v21 = vsel %vm4588_vm1, %v18747_v49, -inf }
0x11a4   :  { %v7625_v22 = vsel %vm4588_vm1, %v18756_v25, -inf  ;;  %v18767_v57 = vadd.f32 %v7536_v30, %v17984_v15 }
0x11a5   :  { %7710 = vadd.xlane.f32.xlu1 %v7709_v11 }
0x11a6   :  { %7611 = vmax.xlane.f32.xlu0 %v7610_v40  ;;  %v7628_v4 = vsel %vm4588_vm1, %v18767_v57, -inf }
0x11a9   :  { %7632 = vmax.xlane.f32.xlu1 %v7631_v21 }
0x11aa   :  { %7713 = vadd.xlane.f32.xlu0 %v7712_v60 }
0x11ad   :  { %7626 = vmax.xlane.f32.xlu1 %v7625_v22 }
0x11ae   :  { %7707 = vadd.xlane.f32.xlu0 %v7706_v58 }
0x11b2   :  { %7629 = vmax.xlane.f32.xlu0 %v7628_v4 }
0x11be   :  { %15415 = vrot.lane.b32.xlu1 %v18519_v0, %s17232_s26 }
0x11c8   :  { %15410 = vrot.lane.b32.xlu0 %v18519_v0, %s17236_s15 }
0x1201   :  { %v7579_v17 = vpop.xlane.xlu1 %7578 }
0x1202   :  { %v7639_v35 = vsub.f32 %v18650_v52, %v7579_v17 }
0x1204   :  { %v7668_v51 = vmul.f32 1.442695, %v7639_v35 }
0x1206   :  { %16434 = vpow2.f32 %v7668_v51 }
0x120b   :  { %v7588_v28 = vpop.xlane.xlu0 %7587 }
0x120c   :  { %v7642_v18 = vsub.f32 %v18655_v23, %v7588_v28 }
0x120e   :  { %v7674_v37 = vmul.f32 1.442695, %v7642_v18  ;;  %v7585_v19 = vpop.xlane.xlu1 %7584 }
0x120f   :  { %v7641_v46 = vsub.f32 %v18663_v55, %v7585_v19  ;;  %v7573_v41 = vpop.xlane.xlu0 %7572 }
0x1210   :  { %v18780_v9 = vpop.eup %16434  ;;  %16436 = vpow2.f32 %v7674_v37  ;;  %v7637_v16 = vsub.f32 %v18658_v45, %v7573_v41 }
0x1211   :  { %v7721_v0 = vsel %vm4588_vm1, %v18780_v9, 0.0  ;;  %v7672_v11 = vmul.f32 1.442695, %v7641_v46 }
0x1212   :  { %v7664_v52 = vmul.f32 1.442695, %v7637_v16  ;;  %v7597_v40 = vpop.xlane.xlu1 %7596  ;;  %7722 = vadd.xlane.f32.xlu1 %v7721_v0 }
0x1213   :  { %v7645_v21 = vsub.f32 %v18671_v5, %v7597_v40  ;;  %v7582_v23 = vpop.xlane.xlu0 %7581 }
0x1214   :  { %16438 = vpow2.f32 %v7664_v52  ;;  %v7640_v30 = vsub.f32 %v18668_v29, %v7582_v23 }
0x1215   :  { %16440 = vpow2.f32 %v7672_v11  ;;  %v7680_v55 = vmul.f32 1.442695, %v7645_v21 }
0x1216   :  { %v7670_v60 = vmul.f32 1.442695, %v7640_v30  ;;  %v7591_v22 = vpop.xlane.xlu1 %7590 }
0x1217   :  { %v7643_v58 = vsub.f32 %v18678_v53, %v7591_v22  ;;  %v7576_v45 = vpop.xlane.xlu0 %7575 }
0x1218   :  { %16442 = vpow2.f32 %v7670_v60  ;;  %v7638_v4 = vsub.f32 %v18681_v2, %v7576_v45 }
0x1219   :  { %16444 = vpow2.f32 %v7680_v55  ;;  %v7676_v35 = vmul.f32 1.442695, %v7643_v58 }
0x121a   :  { %v18789_v17 = vpop.eup %16436  ;;  %v7666_v51 = vmul.f32 1.442695, %v7638_v4 }
0x121b   :  { %v7606_v5 = vpop.xlane.xlu0 %7605  ;;  %v7730_v28 = vsel %vm4588_vm1, %v18789_v17, 0.0 }
0x121c   :  { %16446 = vpow2.f32 %v7666_v51  ;;  %v7648_v29 = vsub.f32 %v18694_v34, %v7606_v5  ;;  %7731 = vadd.xlane.f32.xlu0 %v7730_v28 }
0x121d   :  { %16448 = vpow2.f32 %v7676_v35 }
0x121e   :  { %v18794_v18 = vpop.eup %16438  ;;  %v7686_v53 = vmul.f32 1.442695, %v7648_v29  ;;  %v7603_v37 = vpop.xlane.xlu1 %7602 }
0x121f   :  { %v7647_v2 = vsub.f32 %v18702_v7, %v7603_v37  ;;  %v7600_v19 = vpop.xlane.xlu0 %7599  ;;  %v7715_v46 = vsel %vm4588_vm1, %v18794_v18, 0.0  ;;  %v18799_v41 = vpop.eup %16440 }
0x1220   :  { %16450 = vpow2.f32 %v7686_v53  ;;  %v7646_v16 = vsub.f32 %v18697_v48, %v7600_v19  ;;  %7716 = vadd.xlane.f32.xlu1 %v7715_v46  ;;  %v7727_v7 = vsel %vm4588_vm1, %v18799_v41, 0.0 }
0x1221   :  { %v7684_v0 = vmul.f32 1.442695, %v7647_v2 }
0x1222   :  { %v18802_v34 = vpop.eup %16442  ;;  %v7682_v11 = vmul.f32 1.442695, %v7646_v16  ;;  %v7615_v52 = vpop.xlane.xlu1 %7614 }
0x1223   :  { %16452 = vpow2.f32 %v7684_v0  ;;  %v7651_v40 = vsub.f32 %v18711_v14, %v7615_v52  ;;  %v7594_v21 = vpop.xlane.xlu0 %7593  ;;  %v7724_v23 = vsel %vm4588_vm1, %v18802_v34, 0.0  ;;  %v18809_v30 = vpop.eup %16444 }
0x1224   :  { %16454 = vpow2.f32 %v7682_v11  ;;  %v7644_v48 = vsub.f32 %v18708_v27, %v7594_v21  ;;  %7728 = vadd.xlane.f32.xlu1 %v7727_v7  ;;  %7725 = vadd.xlane.f32.xlu0 %v7724_v23  ;;  %v7739_v45 = vsel %vm4588_vm1, %v18809_v30, 0.0 }
0x1225   :  { %v7692_v55 = vmul.f32 1.442695, %v7651_v40 }
0x1226   :  { %v18812_v60 = vpop.eup %16446  ;;  %v7678_v22 = vmul.f32 1.442695, %v7644_v48  ;;  %v7609_v58 = vpop.xlane.xlu1 %7608 }
0x1227   :  { %16456 = vpow2.f32 %v7692_v55  ;;  %v7649_v14 = vsub.f32 %v18719_v43, %v7609_v58  ;;  %v7718_v4 = vsel %vm4588_vm1, %v18812_v60, 0.0  ;;  %v18819_v35 = vpop.eup %16448 }
0x1228   :  { %16458 = vpow2.f32 %v7678_v22  ;;  %7740 = vadd.xlane.f32.xlu1 %v7739_v45  ;;  %7719 = vadd.xlane.f32.xlu0 %v7718_v4  ;;  %v7733_v28 = vsel %vm4588_vm1, %v18819_v35, 0.0 }
0x1229   :  { %v7688_v27 = vmul.f32 1.442695, %v7649_v14 }
0x122a   :  { %v18821_v51 = vpop.eup %16450 }
0x122b   :  { %16460 = vpow2.f32 %v7688_v27  ;;  %v7624_v5 = vpop.xlane.xlu0 %7623  ;;  %v7748_v43 = vsel %vm4588_vm1, %v18821_v51, 0.0 }
0x122c   :  { %v7654_v29 = vsub.f32 %v18727_v10, %v7624_v5  ;;  %7734 = vadd.xlane.f32.xlu1 %v7733_v28  ;;  %7749 = vadd.xlane.f32.xlu0 %v7748_v43 }
0x122d   :  { %v18828_v53 = vpop.eup %16452 }
0x122e   :  { %v18830_v37 = vpop.eup %16454  ;;  %v7698_v2 = vmul.f32 1.442695, %v7654_v29  ;;  %v7621_v19 = vpop.xlane.xlu1 %7620  ;;  %v7745_v46 = vsel %vm4588_vm1, %v18828_v53, 0.0 }
0x122f   :  { %v7653_v16 = vsub.f32 %v18735_v61, %v7621_v19  ;;  %v7618_v0 = vpop.xlane.xlu0 %7617  ;;  %v7742_v11 = vsel %vm4588_vm1, %v18830_v37, 0.0 }
0x1230   :  { %16462 = vpow2.f32 %v7698_v2  ;;  %v7652_v10 = vsub.f32 %v18730_v38, %v7618_v0  ;;  %7746 = vadd.xlane.f32.xlu1 %v7745_v46  ;;  %7743 = vadd.xlane.f32.xlu0 %v7742_v11 }
0x1231   :  { %v18838_v52 = vpop.eup %16456  ;;  %v7696_v21 = vmul.f32 1.442695, %v7653_v16 }
0x1232   :  { %v18840_v40 = vpop.eup %16458  ;;  %v7694_v7 = vmul.f32 1.442695, %v7652_v10  ;;  %v7711_v23 = vpop.xlane.xlu1 %7710  ;;  %v7757_v48 = vsel %vm4588_vm1, %v18838_v52, 0.0 }
0x1233   :  { %v7612_v61 = vpop.xlane.xlu0 %7611  ;;  %v7736_v55 = vsel %vm4588_vm1, %v18840_v40, 0.0 }
0x1234   :  { %16464 = vpow2.f32 %v7694_v7  ;;  %v7650_v22 = vsub.f32 %v18742_v24, %v7612_v61  ;;  %7758 = vadd.xlane.f32.xlu1 %v7757_v48  ;;  %7737 = vadd.xlane.f32.xlu0 %v7736_v55 }
0x1235   :  { %v18847_v38 = vpop.eup %16460  ;;  %16466 = vpow2.f32 %v7696_v21 }
0x1236   :  { %v7690_v58 = vmul.f32 1.442695, %v7650_v22  ;;  %v7633_v14 = vpop.xlane.xlu1 %7632  ;;  %v7751_v45 = vsel %vm4588_vm1, %v18847_v38, 0.0 }
0x1237   :  { %v7657_v4 = vsub.f32 %v18747_v49, %v7633_v14  ;;  %v7714_v27 = vpop.xlane.xlu0 %7713 }
0x1238   :  { %16468 = vpow2.f32 %v7690_v58  ;;  %7752 = vadd.xlane.f32.xlu1 %v7751_v45 }
0x1239   :  { %v7704_v5 = vmul.f32 1.442695, %v7657_v4  ;;  %16470 = vrcp.f32 %v7714_v27 }
0x123a   :  { %v18852_v28 = vpop.eup %16462  ;;  %16472 = vrcp.f32 %v7711_v23  ;;  %v7627_v24 = vpop.xlane.xlu1 %7626 }
0x123b   :  { %16474 = vpow2.f32 %v7704_v5  ;;  %v7655_v43 = vsub.f32 %v18756_v25, %v7627_v24  ;;  %v7708_v29 = vpop.xlane.xlu0 %7707  ;;  %v7766_v2 = vsel %vm4588_vm1, %v18852_v28, 0.0  ;;  %v15403_v24 = vunpack.i.h.bf16 %v18691_v33 }
0x123c   :  { %16476 = vrcp.f32 %v7708_v29  ;;  %7767 = vadd.xlane.f32.xlu0 %v7766_v2 }
0x123d   :  { %v7700_v19 = vmul.f32 1.442695, %v7655_v43  ;;  %v15402_v43 = vunpack.i.l.bf16 %v18691_v33 }
0x123e   :  { %v18857_v49 = vpop.eup %16464 }
0x123f   :  { %16478 = vpow2.f32 %v7700_v19  ;;  %v7630_v46 = vpop.xlane.xlu0 %7629  ;;  %v7760_v16 = vsel %vm4588_vm1, %v18857_v49, 0.0  ;;  %v18861_v0 = vpop.eup %16466  ;;  %v7026_v2 = vpack.c.bf16 %v15403_v24, %v15402_v43 }
0x1240   :  { %v7656_v11 = vsub.f32 %v18767_v57, %v7630_v46  ;;  %7761 = vadd.xlane.f32.xlu1 %v7760_v16  ;;  %v7763_v7 = vsel %vm4588_vm1, %v18861_v0, 0.0 }
0x1242   :  { %v18864_v25 = vpop.eup %16468  ;;  %v7702_v10 = vmul.f32 1.442695, %v7656_v11 }
0x1243   :  { %v16471_v21 = vpop.eup %16470  ;;  %v7754_v23 = vsel %vm4588_vm1, %v18864_v25, 0.0 }
0x1244   :  { %v16473_v48 = vpop.eup %16472  ;;  %16480 = vpow2.f32 %v7702_v10  ;;  %7764 = vadd.xlane.f32.xlu1 %v7763_v7  ;;  %7755 = vadd.xlane.f32.xlu0 %v7754_v23  ;;  %v7804_v22 = vmul.f32 %v16471_v21, %v18753_v42  ;;  %v7023_v42 = vpack.c.bf16 %v18612_v26, %v18612_v26  ;;  %v18898_v26 = vpop.permute.xlu1 %15415 }
0x1245   :  { %v18870_v61 = vpop.eup %16474  ;;  %v7803_v14 = vmul.f32 %v16473_v48, %v18739_v31 }
0x1246   :  { %v16477_v55 = vpop.eup %16476  ;;  %v7775_v57 = vsel %vm4588_vm1, %v18870_v61, 0.0  ;;  %v7827_v5 = vpack.c.bf16 %v7804_v22, %v7804_v22  ;;  %v7963_v29 = vsel %vm19884_vm0, %v7023_v42, 0 }
0x1247   :  { %v7802_v58 = vmul.f32 %v16477_v55, %v18762_v50 }
0x1248   :  { %7776 = vadd.xlane.f32.xlu0 %v7775_v57 }
0x1249   :  { %v18877_v45 = vpop.eup %16478  ;;  %v7826_v4 = vpack.c.bf16 %v7803_v14, %v7802_v58 }
0x124a   :  { %v7769_v27 = vsel %vm4588_vm1, %v18877_v45, 0.0 }
0x124b   :  { %14707 = vmatprep.mubr.msk.bf16.mxu0 %vm4588_vm1, %v7826_v4  ;;  %7770 = vadd.xlane.f32.xlu1 %v7769_v27 }
0x124c   :  { %14708 = vmatmul.mubr.msk.bf16.vlgmr.msra.gmra.mrb[128].mxu0 %vm4588_vm1, %v7827_v5 }
0x124d   :  { %14720 = vmatpush3.bf16.msra.mxu0 %v18625_v44  ;;  %v15411_v44 = vpop.permute.xlu0 %15410 }
0x124e   :  { %v18888_v31 = vpop.eup %16480  ;;  %15013 = vmatprep.subr.msk.bf16.mxu0 %vm19883_vm11, %v7023_v42  ;;  %vm19891_vm11 = vmmov %vm19884_vm0 }
0x124f   :  { %v7772_v50 = vsel %vm4588_vm1, %v18888_v31, 0.0 }
0x1250   :  { %7773 = vadd.xlane.f32.xlu0 %v7772_v50 }
0x1251   :  { %14722 = vmatpush3.bf16.msra.mxu0 %v7963_v29 }
0x1252   :  { %14735 = vmatprep.subr.bf16.mxu0 %v7026_v2 }
0x125c   :  { %7013 = vrot.lane.b32.xlu1 %v18540_v3, %s17232_s26 }
0x1266   :  { %7004 = vrot.lane.b32.xlu0 %v18540_v3, %s17236_s15 }
0x129f   :  { %v7723_v33 = vpop.xlane.xlu1 %7722 }
0x12a9   :  { %v7732_v19 = vpop.xlane.xlu0 %7731 }
0x12aa   :  { %16482 = vrcp.f32 %v7732_v19  ;;  %v15412_v19 = vunpack.i.l.bf16 %v15411_v44 }
0x12ad   :  { %v7717_v46 = vpop.xlane.xlu1 %7716 }
0x12b1   :  { %v7729_v16 = vpop.xlane.xlu1 %7728  ;;  %v7726_v11 = vpop.xlane.xlu0 %7725 }
0x12b2   :  { %16484 = vrcp.f32 %v7729_v16 }
0x12b3   :  { %16486 = vrcp.f32 %v7726_v11 }
0x12b4   :  { %16488 = vrcp.f32 %v7723_v33  ;;  %v16483_v48 = vpop.eup %16482  ;;  %v7027_v33 = vpack.c.bf16 %v18602_v13, %v18602_v13 }
0x12b5   :  { %16490 = vrcp.f32 %v7717_v46  ;;  %v7741_v10 = vpop.xlane.xlu1 %7740  ;;  %v7720_v21 = vpop.xlane.xlu0 %7719  ;;  %v7810_v14 = vmul.f32 %v16483_v48, %v18789_v17 }
0x12b6   :  { %16492 = vrcp.f32 %v7720_v21  ;;  %v8077_v13 = vsel %vm19886_vm4, %v7027_v33, 0  ;;  %vm19893_vm4 = vmmov %vm19884_vm0 }
0x12b7   :  { %v7831_v50 = vpack.c.bf16 %v7810_v14, %v7810_v14 }
0x12b9   :  { %v7735_v7 = vpop.xlane.xlu1 %7734  ;;  %v7750_v23 = vpop.xlane.xlu0 %7749 }
0x12ba   :  { %16494 = vrcp.f32 %v7750_v23 }
0x12bc   :  { %v16485_v3 = vpop.eup %16484 }
0x12bd   :  { %v16487_v55 = vpop.eup %16486  ;;  %v7747_v57 = vpop.xlane.xlu1 %7746  ;;  %v7809_v58 = vmul.f32 %v16485_v3, %v18799_v41 }
0x12be   :  { %v7744_v22 = vpop.xlane.xlu0 %7743  ;;  %v16489_v4 = vpop.eup %16488  ;;  %16496 = vrcp.f32 %v7747_v57  ;;  %v7808_v27 = vmul.f32 %v16487_v55, %v18802_v34  ;;  %v15413_v34 = vunpack.i.h.bf16 %v15411_v44  ;;  %v15407_v44 = vunpack.i.l.bf16 %v18687_v54 }
0x12bf   :  { %v16491_v5 = vpop.eup %16490  ;;  %16498 = vrcp.f32 %v7744_v22  ;;  %v7807_v29 = vmul.f32 %v16489_v4, %v18780_v9 }
0x12c0   :  { %16500 = vrcp.f32 %v7741_v10  ;;  %v7830_v24 = vpack.c.bf16 %v7809_v58, %v7808_v27  ;;  %v16493_v43 = vpop.eup %16492  ;;  %v7805_v17 = vmul.f32 %v16491_v5, %v18794_v18  ;;  %v7025_v18 = vpack.c.bf16 %v18615_v36, %v18615_v36 }
0x12c1   :  { %16502 = vrcp.f32 %v7735_v7  ;;  %v7806_v41 = vmul.f32 %v16493_v43, %v18812_v60  ;;  %v7759_v46 = vpop.xlane.xlu1 %7758  ;;  %v7829_v9 = vpack.c.bf16 %v7807_v29, %v7807_v29  ;;  %v15408_v60 = vunpack.i.h.bf16 %v18687_v54 }
0x12c2   :  { %v7738_v42 = vpop.xlane.xlu0 %7737  ;;  %14723 = vmatprep.mubr.msk.bf16.mxu0 %vm4588_vm1, %v7830_v24  ;;  %v7030_v10 = vpack.c.bf16 %v15413_v34, %v15412_v19  ;;  %v8020_v55 = vsel %vm19888_vm7, %v7025_v18, 0 }
0x12c3   :  { %16504 = vrcp.f32 %v7738_v42  ;;  %14724 = vmatmul.mubr.msk.bf16.vlgmr.msra.gmra.mrb[132].mxu0 %vm4588_vm1, %v7831_v50  ;;  %v7828_v16 = vpack.c.bf16 %v7806_v41, %v7805_v17  ;;  %v7028_v57 = vpack.c.bf16 %v15408_v60, %v15407_v44 }
0x12c4   :  { %14736 = vmatpush3.bf16.msra.mxu0 %v7026_v2  ;;  %v16495_v11 = vpop.eup %16494  ;;  %16506 = vrcp.f32 %v7759_v46 }
0x12c5   :  { %15015 = vmatprep.subr.msk.bf16.mxu0 %vm19885_vm3, %v7027_v33  ;;  %14715 = vmatprep.mubr.msk.bf16.mxu1 %vm4588_vm1, %v7828_v16  ;;  %v7753_v7 = vpop.xlane.xlu1 %7752  ;;  %v7816_v36 = vmul.f32 %v16495_v11, %v18821_v51  ;;  %vm19892_vm3 = vmmov %vm19884_vm0 }
0x12c6   :  { %14716 = vmatmul.mubr.msk.bf16.vlgmr.msra.gmra.mrb[124].mxu1 %vm4588_vm1, %v7829_v9 }
0x12c7   :  { %14728 = vmatpush3.bf16.msra.mxu1 %v18631_v20  ;;  %v7835_v4 = vpack.c.bf16 %v7816_v36, %v7816_v36 }
0x12c8   :  { %v16497_v2 = vpop.eup %16496  ;;  %14738 = vmatpush3.bf16.msra.mxu0 %v8077_v13  ;;  %15014 = vmatprep.subr.msk.bf16.mxu1 %vm19887_vm6, %v7025_v18  ;;  %vm19894_vm6 = vcmask 130048  }
0x12c9   :  { %v16499_v21 = vpop.eup %16498  ;;  %14751 = vmatprep.subr.bf16.mxu0 %v7030_v10  ;;  %v7815_v23 = vmul.f32 %v16497_v2, %v18828_v53  ;;  %v7768_v58 = vpop.xlane.xlu0 %7767  ;;  %vm19895_vm7 = vmmov %vm19894_vm6 }
0x12ca   :  { %v16501_v48 = vpop.eup %16500  ;;  %v7814_v3 = vmul.f32 %v16499_v21, %v18830_v37 }
0x12cb   :  { %v16503_v54 = vpop.eup %16502  ;;  %14730 = vmatpush3.bf16.msra.mxu1 %v8020_v55  ;;  %v7813_v27 = vmul.f32 %v16501_v48, %v18809_v30  ;;  %v7029_v30 = vpack.c.bf16 %v18622_v39, %v18622_v39 }
0x12cc   :  { %v7834_v22 = vpack.c.bf16 %v7815_v23, %v7814_v3  ;;  %14743 = vmatprep.subr.bf16.mxu1 %v7028_v57  ;;  %v7811_v51 = vmul.f32 %v16503_v54, %v18819_v35  ;;  %v15418_v35 = vunpack.i.h.bf16 %v18898_v26 }
0x12cd   :  { %v16505_v20 = vpop.eup %16504  ;;  %v7762_v14 = vpop.xlane.xlu1 %7761  ;;  %v7833_v43 = vpack.c.bf16 %v7813_v27, %v7813_v27  ;;  %v8134_v42 = vsel %vm19890_vm10, %v7029_v30, 0  ;;  %vm19897_vm10 = vmmov %vm19894_vm6 }
0x12ce   :  { %14739 = vmatprep.mubr.msk.bf16.mxu0 %vm4588_vm1, %v7834_v22  ;;  %v7812_v53 = vmul.f32 %v16505_v20, %v18840_v40  ;;  %16508 = vrcp.f32 %v7762_v14  ;;  %v15417_v40 = vunpack.i.l.bf16 %v18898_v26  ;;  %v16507_v33 = vpop.eup %16506 }
0x12cf   :  { %14740 = vmatmul.mubr.msk.bf16.vlgmr.msra.gmra.mrb[136].mxu0 %vm4588_vm1, %v7835_v4  ;;  %16510 = vrcp.f32 %v7753_v7  ;;  %v7819_v9 = vmul.f32 %v16507_v33, %v18838_v52 }
0x12d0   :  { %14752 = vmatpush3.bf16.msra.mxu0 %v7030_v10  ;;  %v7832_v37 = vpack.c.bf16 %v7812_v53, %v7811_v51  ;;  %v7032_v50 = vpack.c.bf16 %v15418_v35, %v15417_v40 }
0x12d1   :  { %v7765_v5 = vpop.xlane.xlu1 %7764  ;;  %v7756_v24 = vpop.xlane.xlu0 %7755  ;;  %v7837_v21 = vpack.c.bf16 %v7819_v9, %v7819_v9 }
0x12d2   :  { %16512 = vrcp.f32 %v7765_v5  ;;  %14731 = vmatprep.mubr.msk.bf16.mxu1 %vm4588_vm1, %v7832_v37 }
0x12d3   :  { %16514 = vrcp.f32 %v7756_v24  ;;  %14732 = vmatmul.mubr.msk.bf16.vlgmr.msra.gmra.mrb[128].mxu1 %vm4588_vm1, %v7833_v43  ;;  %v16066_v43 = vld [vmem:[#allocation9 + $0x40] sm:$0xff]  }
0x12d4   :  { %14744 = vmatpush3.bf16.msra.mxu1 %v7028_v57  ;;  %16516 = vrcp.f32 %v7768_v58 }
0x12d5   :  { %15016 = vmatprep.subr.msk.bf16.mxu1 %vm19889_vm8, %v7029_v30  ;;  %v7777_v29 = vpop.xlane.xlu0 %7776  ;;  %vm19896_vm8 = vmmov %vm19894_vm6 }
0x12d6   :  { %16518 = vrcp.f32 %v7777_v29 }
0x12d8   :  { %14746 = vmatpush3.bf16.msra.mxu1 %v8134_v42  ;;  %v7771_v17 = vpop.xlane.xlu1 %7770  ;;  %v16509_v39 = vpop.eup %16508 }
0x12d9   :  { %14759 = vmatprep.subr.bf16.mxu1 %v7032_v50  ;;  %v16511_v41 = vpop.eup %16510  ;;  %16520 = vrcp.f32 %v7771_v17  ;;  %v7820_v46 = vmul.f32 %v16509_v39, %v18857_v49 }
0x12da   :  { %v7817_v11 = vmul.f32 %v16511_v41, %v18847_v38 }
0x12dc   :  { %v16513_v34 = vpop.eup %16512  ;;  %v7014_v44 = vpop.permute.xlu1 %7013 }
0x12dd   :  { %v16515_v26 = vpop.eup %16514  ;;  %v7774_v19 = vpop.xlane.xlu0 %7773  ;;  %v7821_v16 = vmul.f32 %v16513_v34, %v18861_v0  ;;  %v7033_v7 = vpack.c.bf16 %v7014_v44, %v7014_v44 }
0x12de   :  { %16522 = vrcp.f32 %v7774_v19  ;;  %v7818_v13 = vmul.f32 %v16515_v26, %v18864_v25  ;;  %v16517_v18 = vpop.eup %16516  ;;  %v16068_v26 = vld [vmem:[#allocation9 + $0x50] sm:$0xff]   ;;  %v16069_v19 = vld [vmem:[#allocation9 + $0x58] sm:$0xff]  }
0x12df   :  { %v7838_v60 = vpack.c.bf16 %v7821_v16, %v7820_v46  ;;  %v7822_v0 = vmul.f32 %v16517_v18, %v18852_v28  ;;  %v8248_v36 = vsel %vm19893_vm4, %v7033_v7, 0  ;;  %v16070_v46 = vld [vmem:[#allocation9 + $0x60] sm:$0xff]   ;;  %v16071_v16 = vld [vmem:[#allocation9 + $0x68] sm:$0xff]  }
0x12e0   :  { %v7836_v10 = vpack.c.bf16 %v7818_v13, %v7817_v11  ;;  %v16519_v38 = vpop.eup %16518  ;;  %v16072_v11 = vld [vmem:[#allocation9 + $0x70] sm:$0xff]  }
0x12e1   :  { %14755 = vmatprep.mubr.msk.bf16.mxu0 %vm4588_vm1, %v7838_v60  ;;  %v7005_v2 = vpop.permute.xlu0 %7004  ;;  %v7839_v23 = vpack.c.bf16 %v7822_v0, %v7822_v0  ;;  %v7825_v28 = vmul.f32 %v16519_v38, %v18870_v61 }
0x12e2   :  { %14747 = vmatprep.mubr.msk.bf16.mxu1 %vm4588_vm1, %v7836_v10  ;;  %v7031_v49 = vpack.c.bf16 %v7005_v2, %v7005_v2  ;;  %v16073_v10 = vld [vmem:[#allocation9 + $0x78] sm:$0xff]  }
0x12e3   :  { %14748 = vmatmul.mubr.msk.bf16.vlgmr.msra.gmra.mrb[132].mxu1 %vm4588_vm1, %v7837_v21  ;;  %v16521_v25 = vpop.eup %16520  ;;  %v7841_v57 = vpack.c.bf16 %v7825_v28, %v7825_v28 }
0x12e4   :  { %14760 = vmatpush3.bf16.msra.mxu1 %v7032_v50  ;;  %15017 = vmatprep.subr.msk.bf16.mxu0 %vm19891_vm11, %v7031_v49  ;;  %v8191_v52 = vsel %vm19884_vm0, %v7031_v49, 0  ;;  %v7823_v3 = vmul.f32 %v16521_v25, %v18877_v45  ;;  %v16067_v50 = vld [vmem:[#allocation9 + $0x48] sm:$0xff]   ;;  %vm19898_vm11 = vmmov %vm19894_vm6 }
0x12e5   :  { %15018 = vmatprep.subr.msk.bf16.mxu1 %vm19892_vm3, %v7033_v7  ;;  %14754 = vmatpush3.bf16.msra.mxu0 %v8191_v52  ;;  %vm19899_vm0 = vmmov %vm19894_vm6 }
0x12e6   :  { %14767 = vmatprep.subr.bf16.mxu0 %v16066_v43  ;;  %vm19900_vm3 = vmmov %vm19899_vm0 }
0x12e7   :  { %vm19901_vm4 = vmmov %vm19899_vm0 }
0x12e8   :  { %v16523_v48 = vpop.eup %16522  ;;  %14762 = vmatpush3.bf16.msra.mxu1 %v8248_v36  ;;  %14756 = vmatmul.mubr.msk.bf16.vlgmr.msra.gmra.mrb[140].mxu0 %vm4588_vm1, %v7839_v23 }
0x12e9   :  { %v7824_v54 = vmul.f32 %v16523_v48, %v18888_v31  ;;  %14768 = vmatpush3.bf16.msra.mxu0 %v16066_v43 }
0x12ea   :  { %14769 = vmatprep.subr.bf16.mxu0 %v16067_v50 }
0x12eb   :  { %v7840_v55 = vpack.c.bf16 %v7824_v54, %v7823_v3 }
0x12ed   :  { %14763 = vmatprep.mubr.msk.bf16.mxu1 %vm4588_vm1, %v7840_v55  ;;  %14770 = vmatpush3.bf16.msra.mxu0 %v16067_v50 }
0x12ee   :  { %14764 = vmatmul.mubr.msk.bf16.vlgmr.msra.gmra.mrb[136].mxu1 %vm4588_vm1, %v7841_v57  ;;  %14771 = vmatprep.subr.bf16.mxu0 %v16068_v26 }
0x12ef   :  { %8731 = vmatprep.mubr.bf16.mxu1 %v17259_v32 }
0x12f1   :  { %14772 = vmatpush3.bf16.msra.mxu0 %v16068_v26 }
0x12f2   :  { %14773 = vmatprep.subr.bf16.mxu0 %v16069_v19 }
0x12f5   :  { %14774 = vmatpush3.bf16.msra.mxu0 %v16069_v19 }
0x12f6   :  { %14775 = vmatprep.subr.bf16.mxu0 %v16070_v46 }
0x12f9   :  { %14776 = vmatpush3.bf16.msra.mxu0 %v16070_v46 }
0x12fa   :  { %14777 = vmatprep.subr.bf16.mxu0 %v16071_v16 }
0x12fd   :  { %14778 = vmatpush3.bf16.msra.mxu0 %v16071_v16 }
0x12fe   :  { %14779 = vmatprep.subr.bf16.mxu0 %v16072_v11 }
0x1301   :  { %14780 = vmatpush3.bf16.msra.mxu0 %v16072_v11 }
0x1302   :  { %14781 = vmatprep.subr.bf16.mxu0 %v16073_v10 }
0x1305   :  { %14782 = vmatpush3.bf16.msra.mxu0 %v16073_v10 }
0x131f   :  { %v18957_v22 = vpop.f32.mrb[128].mxu0 }
0x1320   :  { %v18959_v20 = vpop.f32.mrb[129].mxu0 }
0x1321   :  { %v14710_v58 = vpop.f32.mrb[130].mxu0 }
0x1322   :  { %v18961_v14 = vpop.f32.mrb[131].mxu0 }
0x1396   :  { %v14725_v61 = vpop.f32.mrb[132].mxu0 }
0x1397   :  { %v7999_v4 = vpop.f32.mrb[133].mxu0 }
0x1398   :  { %v14726_v45 = vpop.f32.mrb[134].mxu0 }
0x1399   :  { %v8002_v27 = vpop.f32.mrb[135].mxu0  ;;  %v14717_v51 = vpop.f32.mrb[124].mxu1 }
0x139a   :  { %v15424_v31 = vpack.i.bf16 %v8002_v27, %v7999_v4  ;;  %8305 = vrot.lane.b32.xlu1 %v14717_v51, %s17232_s26  ;;  %v7942_v53 = vpop.f32.mrb[125].mxu1 }
0x139b   :  { %v14718_v37 = vpop.f32.mrb[126].mxu1 }
0x139c   :  { %v7945_v5 = vpop.f32.mrb[127].mxu1 }
0x139d   :  { %v15419_v24 = vpack.i.bf16 %v7945_v5, %v7942_v53 }
0x139e   :  { %8317 = vrot.lane.b32.xlu1 %v14725_v61, %s17236_s15 }
0x139f   :  { %15420 = vrot.lane.b32.xlu0 %v15419_v24, %s17232_s26 }
0x13a2   :  { %v14741_v30 = vpop.f32.mrb[136].mxu0 }
0x13a3   :  { %v8113_v35 = vpop.f32.mrb[137].mxu0  ;;  %15425 = vrot.lane.b32.xlu0 %v15424_v31, %s17236_s15 }
0x13a4   :  { %v14742_v40 = vpop.f32.mrb[138].mxu0 }
0x13a5   :  { %v8116_v42 = vpop.f32.mrb[139].mxu0 }
0x13a6   :  { %v15434_v29 = vpack.i.bf16 %v8116_v42, %v8113_v35  ;;  %v14733_v33 = vpop.f32.mrb[128].mxu1 }
0x13a7   :  { %8329 = vrot.lane.b32.xlu1 %v14733_v33, %s17229_s7  ;;  %v8056_v17 = vpop.f32.mrb[129].mxu1 }
0x13a8   :  { %v14734_v39 = vpop.f32.mrb[130].mxu1 }
0x13a9   :  { %v8059_v41 = vpop.f32.mrb[131].mxu1 }
0x13aa   :  { %v15429_v34 = vpack.i.bf16 %v8059_v41, %v8056_v17 }
0x13ab   :  { %8341 = vrot.lane.b32.xlu1 %v14741_v30, %s17245_s16 }
0x13ac   :  { %15430 = vrot.lane.b32.xlu0 %v15429_v34, %s17229_s7 }
0x13b0   :  { %15435 = vrot.lane.b32.xlu0 %v15434_v29, %s17245_s16 }
0x13b6   :  { %v14749_v9 = vpop.f32.mrb[132].mxu1 }
0x13b7   :  { %8353 = vrot.lane.b32.xlu1 %v14749_v9, %s17261_s0  ;;  %v8170_v13 = vpop.f32.mrb[133].mxu1 }
0x13b8   :  { %v14750_v18 = vpop.f32.mrb[134].mxu1 }
0x13b9   :  { %v8173_v60 = vpop.f32.mrb[135].mxu1 }
0x13ba   :  { %v15439_v44 = vpack.i.bf16 %v8173_v60, %v8170_v13 }
0x13bb   :  { %v14757_v2 = vpop.f32.mrb[140].mxu0 }
0x13bc   :  { %15440 = vrot.lane.b32.xlu0 %v15439_v44, %s17261_s0  ;;  %8365 = vrot.lane.b32.xlu1 %v14757_v2, %s17262_s9  ;;  %v8227_v21 = vpop.f32.mrb[141].mxu0 }
0x13bd   :  { %v14758_v49 = vpop.f32.mrb[142].mxu0 }
0x13be   :  { %v8230_v0 = vpop.f32.mrb[143].mxu0 }
0x13bf   :  { %v15444_v7 = vpack.i.bf16 %v8230_v0, %v8227_v21 }
0x13c1   :  { %v14765_v52 = vpop.f32.mrb[136].mxu1  ;;  %15445 = vrot.lane.b32.xlu0 %v15444_v7, %s17262_s9 }
0x13c2   :  { %v8284_v38 = vpop.f32.mrb[137].mxu1  ;;  %8377 = vrot.lane.b32.xlu1 %v14765_v52, %s17260_s20 }
0x13c3   :  { %v14766_v25 = vpop.f32.mrb[138].mxu1 }
0x13c4   :  { %v8287_v23 = vpop.f32.mrb[139].mxu1 }
0x13c5   :  { %v15449_v36 = vpack.i.bf16 %v8287_v23, %v8284_v38 }
0x13c7   :  { %15450 = vrot.lane.b32.xlu0 %v15449_v36, %s17260_s20  ;;  %v13340_v36 = vld [vmem:[#allocation10 + $0x1] ss:$0 sm:$0xff] }
0x140c   :  { %v8306_v48 = vpop.permute.xlu1 %8305 }
0x140d   :  { %v8384_v53 = vsel %vm19894_vm6, %v18957_v22, %v8306_v48  ;;  %vm19902_vm6 = vmmov %vm19899_vm0 }
0x1410   :  { %v8318_v3 = vpop.permute.xlu1 %8317 }
0x1411   :  { %v15421_v28 = vpop.permute.xlu0 %15420  ;;  %v8387_v5 = vsel %vm5413_vm12, %v8384_v53, %v8318_v3 }
0x1412   :  { %v15423_v27 = vunpack.i.h.bf16 %v15421_v28  ;;  %v15422_v31 = vunpack.i.l.bf16 %v15421_v28 }
0x1414   :  { %v8383_v40 = vsel %vm19895_vm7, %v18961_v14, %v15423_v27  ;;  %v8382_v42 = vsel %vm19896_vm8, %v18959_v20, %v15422_v31  ;;  %v16079_v27 = vld [vmem:[#allocation15 + $0x94] ss:$8 sps:$4 sm:$0xff]   ;;  %vm19903_vm7 = vmmov %vm19899_vm0 }
0x1415   :  { %v15426_v54 = vpop.permute.xlu0 %15425  ;;  %vm19904_vm8 = vmmov %vm19899_vm0 }
0x1416   :  { %v15427_v51 = vunpack.i.l.bf16 %v15426_v54  ;;  %v15428_v37 = vunpack.i.h.bf16 %v15426_v54 }
0x1418   :  { %v8385_v33 = vsel %vm5413_vm12, %v8382_v42, %v15427_v51  ;;  %v8386_v41 = vsel %vm5413_vm12, %v8383_v40, %v15428_v37 }
0x1419   :  { %v8330_v55 = vpop.permute.xlu1 %8329 }
0x141a   :  { %v8390_v17 = vsel %vm5417_vm13, %v8387_v5, %v8330_v55 }
0x141d   :  { %v8342_v58 = vpop.permute.xlu1 %8341 }
0x141e   :  { %v15431_v57 = vpop.permute.xlu0 %15430  ;;  %v8393_v34 = vsel %vm5421_vm2, %v8390_v17, %v8342_v58  ;;  %v16085_v17 = vld [vmem:[#allocation15 + $0xb4] ss:$8 sps:$4 sm:$0xff]  }
0x141f   :  { %v15433_v24 = vunpack.i.h.bf16 %v15431_v57  ;;  %v15432_v43 = vunpack.i.l.bf16 %v15431_v57 }
0x1421   :  { %v8388_v46 = vsel %vm5417_vm13, %v8385_v33, %v15432_v43  ;;  %v8389_v14 = vsel %vm5417_vm13, %v8386_v41, %v15433_v24  ;;  %v16083_v33 = vld [vmem:[#allocation15 + $0xb0] ss:$8 sps:$4 sm:$0xff]   ;;  %v16091_v41 = vld [vmem:[#allocation15 + $0xd4] ss:$8 sps:$4 sm:$0xff]  }
0x1422   :  { %v15436_v61 = vpop.permute.xlu0 %15435 }
0x1423   :  { %v15438_v50 = vunpack.i.h.bf16 %v15436_v61  ;;  %v15437_v29 = vunpack.i.l.bf16 %v15436_v61 }
0x1425   :  { %v8391_v9 = vsel %vm5421_vm2, %v8388_v46, %v15437_v29  ;;  %v8392_v11 = vsel %vm5421_vm2, %v8389_v14, %v15438_v50  ;;  %v16080_v50 = vld [vmem:[#allocation15 + $0xa0] ss:$8 sps:$4 sm:$0xff]   ;;  %v16082_v29 = vld [vmem:[#allocation15 + $0xa4] ss:$8 sps:$4 sm:$0xff]   ;;  %v16097_v46 = vld [vmem:[#allocation15 + $0xf4] ss:$8 sps:$4 sm:$0xff]  }
0x1426   :  { %v16095_v14 = vld [vmem:[#allocation15 + $0xf0] ss:$8 sps:$4 sm:$0xff]  }
0x1429   :  { %v8354_v4 = vpop.permute.xlu1 %8353 }
0x142a   :  { %v8396_v20 = vsel %vm5425_vm9, %v8393_v34, %v8354_v4  ;;  %v16089_v34 = vld [vmem:[#allocation15 + $0xd0] ss:$8 sps:$4 sm:$0xff]  }
0x142e   :  { %v15441_v45 = vpop.permute.xlu0 %15440  ;;  %v8366_v30 = vpop.permute.xlu1 %8365 }
0x142f   :  { %v15443_v22 = vunpack.i.h.bf16 %v15441_v45  ;;  %v15442_v39 = vunpack.i.l.bf16 %v15441_v45  ;;  %v8399_v13 = vsel %vm5429_vm14, %v8396_v20, %v8366_v30  ;;  %v16074_v45 = vld [vmem:[#allocation15 + $0x80] ss:$8 sps:$4 sm:$0xff]  }
0x1430   :  { %v16100_v20 = vld [vmem:[#allocation24 + $0x84] ss:$8 sps:$4 sm:$0xff]  }
0x1431   :  { %v8394_v60 = vsel %vm5425_vm9, %v8391_v9, %v15442_v39  ;;  %v8395_v44 = vsel %vm5425_vm9, %v8392_v11, %v15443_v22  ;;  %v16088_v22 = vld [vmem:[#allocation15 + $0xc4] ss:$8 sps:$4 sm:$0xff]   ;;  %v16086_v39 = vld [vmem:[#allocation15 + $0xc0] ss:$8 sps:$4 sm:$0xff]  }
0x1433   :  { %v15446_v35 = vpop.permute.xlu0 %15445 }
0x1434   :  { %v15448_v26 = vunpack.i.h.bf16 %v15446_v35  ;;  %v15447_v19 = vunpack.i.l.bf16 %v15446_v35  ;;  %v8378_v16 = vpop.permute.xlu1 %8377 }
0x1435   :  { %v8402_v21 = vsel %vm5433_vm5, %v8399_v13, %v8378_v16 }
0x1436   :  { %v8397_v49 = vsel %vm5429_vm14, %v8394_v60, %v15447_v19  ;;  %v8398_v0 = vsel %vm5429_vm14, %v8395_v44, %v15448_v26  ;;  %v8404_v25 = vpack.c.bf16 %v8402_v21, %v8402_v21  ;;  %v16094_v26 = vld [vmem:[#allocation15 + $0xe4] ss:$8 sps:$4 sm:$0xff]   ;;  %v16092_v19 = vld [vmem:[#allocation15 + $0xe0] ss:$8 sps:$4 sm:$0xff]  }
0x1439   :  { %v15451_v18 = vpop.permute.xlu0 %15450 }
0x143a   :  { %v15453_v10 = vunpack.i.h.bf16 %v15451_v18  ;;  %v15452_v2 = vunpack.i.l.bf16 %v15451_v18 }
0x143c   :  { %v8400_v7 = vsel %vm5433_vm5, %v8397_v49, %v15452_v2  ;;  %v8401_v52 = vsel %vm5433_vm5, %v8398_v0, %v15453_v10  ;;  %v13341_v0 = vld [vmem:[#allocation12 + $0x1] ss:$0 sm:$0xff] }
0x143d   :  { %v8403_v38 = vpack.c.bf16 %v8401_v52, %v8400_v7 }
0x143f   :  { %14783 = vmatprep.mubr.bf16.mxu0 %v8403_v38 }
0x1440   :  { %14784 = vmatmul.mubr.bf16.vlgmr.msra.gmra.mrb[144].mxu0 %v8404_v25 }
0x1513   :  { %v14785_v23 = vpop.f32.mrb[144].mxu0 }
0x1514   :  { %v8504_v48 = vpop.f32.mrb[145].mxu0  ;;  %v8520_v55 = vadd.f32 %v14785_v23, %v18461_v59  ;;  %v16077_v59 = vld [vmem:[#allocation15 + $0x90] ss:$8 sps:$4 sm:$0xff]   ;;  %v13342_v23 = vld [vmem:[#allocation13 + $0x1] ss:$0 sm:$0xff] }
0x1515   :  { %v8518_v28 = vadd.f32 %v8504_v48, %v18453_v47  ;;  %v14786_v3 = vpop.f32.mrb[146].mxu0  ;;  %v16076_v47 = vld [vmem:[#allocation15 + $0x84] ss:$8 sps:$4 sm:$0xff]  }
0x1516   :  { %v8507_v54 = vpop.f32.mrb[147].mxu0  ;;  %v19009_v4 = vadd.f32 %v13340_v36, %v8520_v55  ;;  %8699 = vmatprep.subr.bf16.mxu1 %v16076_v47  ;;  %v16101_v47 = vld [vmem:[#allocation24 + $0x90] ss:$8 sps:$4 sm:$0xff]  }
0x1517   :  { %v19003_v57 = vadd.f32 %v13340_v36, %v8518_v28  ;;  %v8519_v58 = vadd.f32 %v8507_v54, %v18456_v56  ;;  %8700 = vmatpush1.bf16.msra.mxu1 %v16074_v45  ;;  %v16098_v54 = vld [vmem:[#allocation24 + $0x80] ss:$8 sps:$4 sm:$0xff]  }
0x1518   :  { %8701 = vmatprep.subr.bf16.mxu1 %v16079_v27  ;;  %v16106_v27 = vld [vmem:[#allocation24 + $0xa4] ss:$8 sps:$4 sm:$0xff]  }
0x1519   :  { %v19006_v61 = vadd.f32 %v13340_v36, %v8519_v58  ;;  %8536 = vadd.xlane.f32.xlu0 %v19003_v57  ;;  %v16103_v58 = vld [vmem:[#allocation24 + $0x94] ss:$8 sps:$4 sm:$0xff]  }
0x151b   :  { %8538 = vadd.xlane.f32.xlu1 %v19006_v61  ;;  %8702 = vmatpush1.bf16.msra.mxu1 %v16077_v59 }
0x151c   :  { %8703 = vmatprep.subr.bf16.mxu1 %v16082_v29 }
0x151d   :  { %8540 = vadd.xlane.f32.xlu0 %v19009_v4 }
0x151f   :  { %8704 = vmatpush1.bf16.msra.mxu1 %v16080_v50  ;;  %v16121_v50 = vld [vmem:[#allocation24 + $0xf4] ss:$8 sps:$4 sm:$0xff]  }
0x1520   :  { %8705 = vmatprep.subr.bf16.mxu1 %v16085_v17  ;;  %v13377_v17 = vld [vmem:[#allocation22 + $0x1] ss:$0 sm:$0xff] }
0x1523   :  { %8706 = vmatpush1.bf16.msra.mxu1 %v16083_v33  ;;  %v16119_v33 = vld [vmem:[#allocation24 + $0xf0] ss:$8 sps:$4 sm:$0xff]  }
0x1524   :  { %8707 = vmatprep.subr.bf16.mxu1 %v16088_v22 }
0x1527   :  { %8708 = vmatpush1.bf16.msra.mxu1 %v16086_v39 }
0x1528   :  { %8709 = vmatprep.subr.bf16.mxu1 %v16091_v41 }
0x152b   :  { %8710 = vmatpush1.bf16.msra.mxu1 %v16089_v34 }
0x152c   :  { %8711 = vmatprep.subr.bf16.mxu1 %v16094_v26 }
0x152f   :  { %8712 = vmatpush1.bf16.msra.mxu1 %v16092_v19 }
0x1530   :  { %8713 = vmatprep.subr.bf16.mxu1 %v16097_v46  ;;  %v16122_v46 = vld [vmem:[#allocation18 + $0xc0] sm:$0xff]  }
0x1531   :  { %14227 = vmatprep.subr.bf16.mxu0 %v16122_v46 }
0x1533   :  { %8714 = vmatpush1.bf16.msra.mxu1 %v16095_v14  ;;  %v16123_v14 = vld [vmem:[#allocation18 + $0x80] sm:$0xff]  }
0x1534   :  { %9127 = vmatprep.subr.bf16.mxu1 %v16100_v20  ;;  %14228 = vmatpush3.bf16.msra.mxu0 %v16123_v14  ;;  %v16124_v20 = vld [vmem:[#allocation18 + $0xc8] sm:$0xff]  }
0x1535   :  { %14229 = vmatprep.subr.bf16.mxu0 %v16124_v20 }
0x15a6   :  { %v8537_v31 = vpop.xlane.xlu0 %8536 }
0x15a7   :  { %v8542_v56 = vmul.f32 0.0078125, %v8537_v31  ;;  %v16104_v31 = vld [vmem:[#allocation24 + $0xa0] ss:$8 sps:$4 sm:$0xff]  }
0x15a8   :  { %v8539_v51 = vpop.xlane.xlu1 %8538 }
0x15a9   :  { %v8545_v53 = vsub.f32 %v19003_v57, %v8542_v56  ;;  %v8543_v37 = vmul.f32 0.0078125, %v8539_v51  ;;  %v16109_v51 = vld [vmem:[#allocation24 + $0xb4] ss:$8 sps:$4 sm:$0xff]  }
0x15aa   :  { %v8541_v5 = vpop.xlane.xlu0 %8540 }
0x15ab   :  { %v8546_v24 = vsub.f32 %v19006_v61, %v8543_v37  ;;  %v8544_v43 = vmul.f32 0.0078125, %v8541_v5  ;;  %v8548_v30 = vmul.f32 %v8545_v53, %v8545_v53  ;;  %v16112_v37 = vld [vmem:[#allocation24 + $0xc4] ss:$8 sps:$4 sm:$0xff]   ;;  %v16110_v5 = vld [vmem:[#allocation24 + $0xc0] ss:$8 sps:$4 sm:$0xff]  }
0x15ad   :  { %v8547_v35 = vsub.f32 %v19009_v4, %v8544_v43  ;;  %8551 = vadd.xlane.f32.xlu0 %v8548_v30  ;;  %v8549_v42 = vmul.f32 %v8546_v24, %v8546_v24  ;;  %v16113_v43 = vld [vmem:[#allocation24 + $0xd0] ss:$8 sps:$4 sm:$0xff]   ;;  %v16118_v30 = vld [vmem:[#allocation24 + $0xe4] ss:$8 sps:$4 sm:$0xff]  }
0x15af   :  { %v8550_v40 = vmul.f32 %v8547_v35, %v8547_v35 }
0x15b1   :  { %8555 = vadd.xlane.f32.xlu1 %v8550_v40  ;;  %8553 = vadd.xlane.f32.xlu0 %v8549_v42  ;;  %v16116_v40 = vld [vmem:[#allocation24 + $0xe0] ss:$8 sps:$4 sm:$0xff]  }
0x163a   :  { %v8552_v16 = vpop.xlane.xlu0 %8551 }
0x163b   :  { %v8557_v9 = vmul.f32 0.0078125, %v8552_v16  ;;  %v16125_v16 = vld [vmem:[#allocation18 + $0x88] sm:$0xff]  }
0x163c   :  { %14230 = vmatpush3.bf16.msra.mxu0 %v16125_v16 }
0x163d   :  { %v8560_v11 = vadd.f32 1e-05, %v8557_v9  ;;  %v16126_v9 = vld [vmem:[#allocation18 + $0xd0] sm:$0xff]  }
0x163e   :  { %v8554_v13 = vpop.xlane.xlu0 %8553  ;;  %v8556_v18 = vpop.xlane.xlu1 %8555  ;;  %14231 = vmatprep.subr.bf16.mxu0 %v16126_v9 }
0x163f   :  { %16524 = vrsqrt.f32 %v8560_v11  ;;  %v8558_v60 = vmul.f32 0.0078125, %v8554_v13  ;;  %v8559_v44 = vmul.f32 0.0078125, %v8556_v18  ;;  %v16127_v11 = vld [vmem:[#allocation18 + $0x90] sm:$0xff]   ;;  %v16128_v13 = vld [vmem:[#allocation18 + $0xd8] sm:$0xff]  }
0x1640   :  { %14232 = vmatpush3.bf16.msra.mxu0 %v16127_v11  ;;  %v16129_v18 = vld [vmem:[#allocation18 + $0x98] sm:$0xff]  }
0x1641   :  { %v8561_v10 = vadd.f32 1e-05, %v8558_v60  ;;  %v8562_v2 = vadd.f32 1e-05, %v8559_v44  ;;  %14233 = vmatprep.subr.bf16.mxu0 %v16128_v13  ;;  %v16130_v60 = vld [vmem:[#allocation18 + $0xe0] sm:$0xff]  }
0x1642   :  { %v16131_v44 = vld [vmem:[#allocation18 + $0xa0] sm:$0xff]  }
0x1643   :  { %16526 = vrsqrt.f32 %v8561_v10  ;;  %v16132_v10 = vld [vmem:[#allocation18 + $0xe8] sm:$0xff]  }
0x1644   :  { %16528 = vrsqrt.f32 %v8562_v2  ;;  %14234 = vmatpush3.bf16.msra.mxu0 %v16129_v18  ;;  %v16133_v2 = vld [vmem:[#allocation18 + $0xa8] sm:$0xff]  }
0x1645   :  { %14235 = vmatprep.subr.bf16.mxu0 %v16130_v60 }
0x1648   :  { %14236 = vmatpush3.bf16.msra.mxu0 %v16131_v44 }
0x1649   :  { %v16525_v21 = vpop.eup %16524  ;;  %14237 = vmatprep.subr.bf16.mxu0 %v16132_v10 }
0x164a   :  { %v8566_v49 = vmul.f32 %v16525_v21, %v8545_v53  ;;  %v16107_v53 = vld [vmem:[#allocation24 + $0xb0] ss:$8 sps:$4 sm:$0xff]   ;;  %v16134_v21 = vld [vmem:[#allocation18 + $0xf0] sm:$0xff]  }
0x164c   :  { %v8575_v25 = vmul.f32 %v13341_v0, %v8566_v49  ;;  %14238 = vmatpush3.bf16.msra.mxu0 %v16133_v2 }
0x164d   :  { %v16527_v7 = vpop.eup %16526  ;;  %14239 = vmatprep.subr.bf16.mxu0 %v16134_v21 }
0x164e   :  { %v16529_v52 = vpop.eup %16528  ;;  %v8567_v38 = vmul.f32 %v16527_v7, %v8546_v24  ;;  %v8584_v28 = vadd.f32 %v13342_v23, %v8575_v25  ;;  %v16115_v24 = vld [vmem:[#allocation24 + $0xd4] ss:$8 sps:$4 sm:$0xff]   ;;  %v16137_v7 = vld [vmem:[#allocation18 + $0xb8] sm:$0xff]  }
0x164f   :  { %v8568_v48 = vmul.f32 %v16529_v52, %v8547_v35  ;;  %v13376_v35 = vld [vmem:[#allocation21 + $0x1] ss:$0 sm:$0xff]  ;;  %v16138_v52 = vld [vmem:[#allocation27 + $0xc0] sm:$0xff]  }
0x1650   :  { %v8576_v36 = vmul.f32 %v13341_v0, %v8567_v38  ;;  %v9004_v42 = vmul.f32 %v13376_v35, %v8567_v38  ;;  %v9003_v29 = vmul.f32 %v13376_v35, %v8566_v49  ;;  %v16135_v49 = vld [vmem:[#allocation18 + $0xb0] sm:$0xff]   ;;  %v8607_v38 = vld [vmem:[#allocation16 + $0x2] sm:$0x3] }
0x1651   :  { %v8577_v45 = vmul.f32 %v13341_v0, %v8568_v48  ;;  %v9005_v34 = vmul.f32 %v13376_v35, %v8568_v48  ;;  %v16136_v0 = vld [vmem:[#allocation18 + $0xf8] sm:$0xff]   ;;  %14240 = vmatpush3.bf16.msra.mxu0 %v16135_v49  ;;  %v8612_v25 = vrot.slane %v8607_v38, %v17833_v63 }
0x1652   :  { %v8585_v3 = vadd.f32 %v13342_v23, %v8576_v36  ;;  %v9013_v22 = vadd.f32 %v13377_v17, %v9004_v42  ;;  %v9012_v39 = vadd.f32 %v13377_v17, %v9003_v29  ;;  %14241 = vmatprep.subr.bf16.mxu0 %v16136_v0 }
0x1653   :  { %v8586_v59 = vadd.f32 %v13342_v23, %v8577_v45  ;;  %v9014_v26 = vadd.f32 %v13377_v17, %v9005_v34  ;;  %v8616_v23 = vrot.slane %v8607_v38, %v17836_v1 }
0x1654   :  { %v8587_v55 = vpack.c.bf16 %v8585_v3, %v8584_v28  ;;  %v9015_v41 = vpack.c.bf16 %v9013_v22, %v9012_v39 }
0x1655   :  { %v8588_v56 = vpack.c.bf16 %v8586_v59, %v8586_v59  ;;  %v9016_v19 = vpack.c.bf16 %v9014_v26, %v9014_v26  ;;  %14242 = vmatpush3.bf16.msra.mxu0 %v16137_v7 }
0x1656   :  { %8732 = vmatmul.mubr.bf16.vlgmr.msra.gmra.mrb[140].mxu1 %v8587_v55  ;;  %14255 = vmatprep.subr.bf16.mxu0 %v16138_v52 }
0x1657   :  { %9128 = vmatpush1.bf16.msra.mxu1 %v16098_v54  ;;  %8741 = vmatprep.mubr.bf16.mxu1 %v17259_v32 }
0x1658   :  { %9129 = vmatprep.subr.bf16.mxu1 %v16103_v58 }
0x165b   :  { %9130 = vmatpush1.bf16.msra.mxu1 %v16101_v47 }
0x165c   :  { %9131 = vmatprep.subr.bf16.mxu1 %v16106_v27 }
0x165e   :  { %8742 = vmatmul.mubr.bf16.gmra.mrb[144].mxu1 %v8588_v56 }
0x165f   :  { %9132 = vmatpush1.bf16.msra.mxu1 %v16104_v31  ;;  %9159 = vmatprep.mubr.bf16.mxu1 %v17259_v32 }
0x1660   :  { %9133 = vmatprep.subr.bf16.mxu1 %v16109_v51 }
0x1663   :  { %9134 = vmatpush1.bf16.msra.mxu1 %v16107_v53 }
0x1664   :  { %9135 = vmatprep.subr.bf16.mxu1 %v16112_v37 }
0x1667   :  { %9136 = vmatpush1.bf16.msra.mxu1 %v16110_v5 }
0x1668   :  { %9137 = vmatprep.subr.bf16.mxu1 %v16115_v24 }
0x166b   :  { %9138 = vmatpush1.bf16.msra.mxu1 %v16113_v43 }
0x166c   :  { %9139 = vmatprep.subr.bf16.mxu1 %v16118_v30 }
0x166f   :  { %9140 = vmatpush1.bf16.msra.mxu1 %v16116_v40 }
0x1670   :  { %9141 = vmatprep.subr.bf16.mxu1 %v16121_v50 }
0x1673   :  { %9142 = vmatpush1.bf16.msra.mxu1 %v16119_v33 }
0x1676   :  { %9160 = vmatmul.mubr.bf16.vlgmr.msra.gmra.mrb[148].mxu1 %v9015_v41 }
0x1677   :  { %9169 = vmatprep.mubr.bf16.mxu1 %v17259_v32 }
0x167e   :  { %9170 = vmatmul.mubr.bf16.gmra.mrb[152].mxu1 %v9016_v19 }
0x167f   :  { %9695 = vmatprep.mubr.bf16.mxu1 %v17259_v32 }
0x1729   :  { %v8733_v36 = vpop.f32.mrb[140].mxu1 }
0x172a   :  { %v19022_v48 = vadd.f32 %v8733_v36, %v8612_v25  ;;  %v8735_v28 = vpop.f32.mrb[141].mxu1 }
0x172b   :  { %v19024_v3 = vadd.f32 %v8735_v28, %v8616_v23  ;;  %v8737_v54 = vpop.f32.mrb[142].mxu1 }
0x172c   :  { %v8750_v55 = vmul.f32 %v19022_v48, %v19022_v48  ;;  %v8738_v58 = vadd.f32 %v8737_v54, %v8612_v25  ;;  %v8739_v45 = vpop.f32.mrb[143].mxu1 }
0x172d   :  { %v8751_v47 = vmul.f32 %v19024_v3, %v19024_v3  ;;  %v8740_v27 = vadd.f32 %v8739_v45, %v8616_v23 }
0x172e   :  { %v8756_v59 = vmul.f32 %v8750_v55, %v19022_v48  ;;  %v8752_v31 = vmul.f32 %v8738_v58, %v8738_v58 }
0x172f   :  { %v8757_v56 = vmul.f32 %v8751_v47, %v19024_v3  ;;  %v8753_v51 = vmul.f32 %v8740_v27, %v8740_v27 }
0x1730   :  { %v8762_v53 = vmul.f32 0.044715, %v8756_v59  ;;  %v8758_v37 = vmul.f32 %v8752_v31, %v8738_v58 }
0x1731   :  { %v8763_v5 = vmul.f32 0.044715, %v8757_v56  ;;  %v8759_v24 = vmul.f32 %v8753_v51, %v8740_v27  ;;  %v8743_v43 = vpop.f32.mrb[144].mxu1 }
0x1732   :  { %v8768_v30 = vadd.f32 %v8762_v53, %v19022_v48  ;;  %v8764_v35 = vmul.f32 0.044715, %v8758_v37  ;;  %v19033_v40 = vadd.f32 %v8743_v43, %v8612_v25  ;;  %v8745_v42 = vpop.f32.mrb[145].mxu1 }
0x1733   :  { %v8769_v50 = vadd.f32 %v8763_v5, %v19024_v3  ;;  %v8765_v29 = vmul.f32 0.044715, %v8759_v24  ;;  %v19036_v33 = vadd.f32 %v8745_v42, %v8616_v23  ;;  %v8747_v17 = vpop.f32.mrb[146].mxu1  ;;  %v9035_v23 = vld [vmem:[#allocation25 + $0x2] sm:$0x3] }
0x1734   :  { %v8774_v22 = vmul.f32 0.7978846, %v8768_v30  ;;  %v8770_v39 = vadd.f32 %v8764_v35, %v8738_v58  ;;  %v8754_v41 = vmul.f32 %v19033_v40, %v19033_v40  ;;  %v8748_v34 = vpop.f32.mrb[147].mxu1  ;;  %v9040_v55 = vrot.slane %v9035_v23, %v17833_v63 }
0x1735   :  { %v8775_v26 = vmul.f32 0.7978846, %v8769_v50  ;;  %v8771_v19 = vadd.f32 %v8765_v29, %v8740_v27  ;;  %v8755_v46 = vmul.f32 %v19036_v33, %v19036_v33  ;;  %v9044_v31 = vrot.slane %v9035_v23, %v17836_v1  ;;  %v16139_v50 = vld [vmem:[#allocation27 + $0x80] sm:$0xff]  }
0x1736   :  { %16530 = vtanh.f32 %v8774_v22  ;;  %v8776_v14 = vmul.f32 0.7978846, %v8770_v39  ;;  %v8760_v20 = vmul.f32 %v8754_v41, %v19033_v40 }
0x1737   :  { %16532 = vtanh.f32 %v8775_v26  ;;  %v8777_v16 = vmul.f32 0.7978846, %v8771_v19  ;;  %v8761_v9 = vmul.f32 %v8755_v46, %v19036_v33 }
0x1738   :  { %16534 = vtanh.f32 %v8776_v14  ;;  %v8766_v11 = vmul.f32 0.044715, %v8760_v20  ;;  %v16141_v14 = vld [vmem:[#allocation27 + $0x88] sm:$0xff]  }
0x1739   :  { %16536 = vtanh.f32 %v8777_v16  ;;  %v8767_v13 = vmul.f32 0.044715, %v8761_v9 }
0x173a   :  { %v8772_v18 = vadd.f32 %v8766_v11, %v19033_v40  ;;  %v16142_v11 = vld [vmem:[#allocation27 + $0xd0] sm:$0xff]  }
0x173b   :  { %v8773_v60 = vadd.f32 %v8767_v13, %v19036_v33 }
0x173c   :  { %v8778_v44 = vmul.f32 0.7978846, %v8772_v18 }
0x173d   :  { %v8779_v10 = vmul.f32 0.7978846, %v8773_v60 }
0x173e   :  { %16538 = vtanh.f32 %v8778_v44 }
0x173f   :  { %16540 = vtanh.f32 %v8779_v10 }
0x1740   :  { %v16531_v2 = vpop.eup %16530 }
0x1741   :  { %v16533_v21 = vpop.eup %16532  ;;  %v8786_v49 = vadd.f32 1.0, %v16531_v2 }
0x1742   :  { %v16535_v0 = vpop.eup %16534  ;;  %v8787_v7 = vadd.f32 1.0, %v16533_v21 }
0x1743   :  { %v16537_v52 = vpop.eup %16536  ;;  %v8792_v38 = vmul.f32 0.5, %v8786_v49  ;;  %v8788_v25 = vadd.f32 1.0, %v16535_v0 }
0x1744   :  { %v8789_v36 = vadd.f32 1.0, %v16537_v52  ;;  %v8793_v28 = vmul.f32 0.5, %v8787_v7  ;;  %v16143_v52 = vld [vmem:[#allocation27 + $0x90] sm:$0xff]  }
0x1745   :  { %v8794_v54 = vmul.f32 0.5, %v8788_v25  ;;  %v8798_v47 = vmul.f32 %v8792_v38, %v19022_v48 }
0x1746   :  { %v8795_v45 = vmul.f32 0.5, %v8789_v36  ;;  %v8799_v51 = vmul.f32 %v8793_v28, %v19024_v3  ;;  %v16144_v28 = vld [vmem:[#allocation27 + $0xd8] sm:$0xff]  }
0x1747   :  { %v8800_v59 = vmul.f32 %v8794_v54, %v8738_v58  ;;  %v16140_v58 = vld [vmem:[#allocation27 + $0xc8] sm:$0xff]  }
0x1748   :  { %v16539_v56 = vpop.eup %16538  ;;  %v8801_v53 = vmul.f32 %v8795_v45, %v8740_v27 }
0x1749   :  { %v16541_v37 = vpop.eup %16540  ;;  %v9161_v5 = vpop.f32.mrb[148].mxu1  ;;  %v8804_v24 = vpack.c.bf16 %v8800_v59, %v8798_v47  ;;  %v8790_v43 = vadd.f32 1.0, %v16539_v56 }
0x174a   :  { %v19050_v30 = vadd.f32 %v9161_v5, %v9040_v55  ;;  %v9163_v35 = vpop.f32.mrb[149].mxu1  ;;  %v8805_v42 = vpack.c.bf16 %v8801_v53, %v8799_v51  ;;  %v8791_v29 = vadd.f32 1.0, %v16541_v37  ;;  %v16145_v37 = vld [vmem:[#allocation27 + $0x98] sm:$0xff]  }
0x174b   :  { %v19052_v17 = vadd.f32 %v9163_v35, %v9044_v31  ;;  %v9165_v48 = vpop.f32.mrb[150].mxu1  ;;  %v8796_v22 = vmul.f32 0.5, %v8790_v43  ;;  %v16146_v43 = vld [vmem:[#allocation27 + $0xe0] sm:$0xff]  }
0x174c   :  { %v9178_v39 = vmul.f32 %v19050_v30, %v19050_v30  ;;  %v19056_v3 = vadd.f32 %v9165_v48, %v9040_v55  ;;  %v9167_v27 = vpop.f32.mrb[151].mxu1  ;;  %8977 = vmatprep.mubr.bf16.mxu0 %v8805_v42  ;;  %v8797_v41 = vmul.f32 0.5, %v8791_v29  ;;  %v16147_v29 = vld [vmem:[#allocation27 + $0xa0] sm:$0xff]  }
0x174d   :  { %v9179_v34 = vmul.f32 %v19052_v17, %v19052_v17  ;;  %v19060_v26 = vadd.f32 %v9167_v27, %v9044_v31  ;;  %8978 = vmatmul.mubr.bf16.vlgmr.msra.gmra.mrb[148].mxu0 %v8804_v24  ;;  %v8802_v13 = vmul.f32 %v8796_v22, %v19033_v40  ;;  %v16149_v27 = vld [vmem:[#allocation27 + $0xa8] sm:$0xff]  }
0x174e   :  { %v9184_v19 = vmul.f32 %v9178_v39, %v19050_v30  ;;  %v9180_v46 = vmul.f32 %v19056_v3, %v19056_v3  ;;  %14256 = vmatpush3.bf16.msra.mxu0 %v16139_v50  ;;  %v8803_v20 = vmul.f32 %v8797_v41, %v19036_v33  ;;  %v16150_v41 = vld [vmem:[#allocation27 + $0xf0] sm:$0xff]  }
0x174f   :  { %v9185_v16 = vmul.f32 %v9179_v34, %v19052_v17  ;;  %v9181_v9 = vmul.f32 %v19060_v26, %v19060_v26  ;;  %14257 = vmatprep.subr.bf16.mxu0 %v16140_v58  ;;  %v8806_v36 = vpack.c.bf16 %v8802_v13, %v8802_v13  ;;  %v16148_v58 = vld [vmem:[#allocation27 + $0xe8] sm:$0xff]  }
0x1750   :  { %v9190_v18 = vmul.f32 0.044715, %v9184_v19  ;;  %v9186_v60 = vmul.f32 %v9180_v46, %v19056_v3  ;;  %v8807_v44 = vpack.c.bf16 %v8803_v20, %v8803_v20  ;;  %v16151_v20 = vld [vmem:[#allocation27 + $0xb0] sm:$0xff]  }
0x1751   :  { %v9191_v10 = vmul.f32 0.044715, %v9185_v16  ;;  %v9187_v2 = vmul.f32 %v9181_v9, %v19060_v26  ;;  %v9171_v21 = vpop.f32.mrb[152].mxu1 }
0x1752   :  { %v9196_v49 = vadd.f32 %v9190_v18, %v19050_v30  ;;  %v9192_v33 = vmul.f32 0.044715, %v9186_v60  ;;  %v19073_v0 = vadd.f32 %v9171_v21, %v9040_v55  ;;  %v9173_v7 = vpop.f32.mrb[153].mxu1  ;;  %14258 = vmatpush3.bf16.msra.mxu0 %v16141_v14  ;;  %8985 = vmatprep.mubr.bf16.mxu0 %v8807_v44  ;;  %v16152_v18 = vld [vmem:[#allocation27 + $0xf8] sm:$0xff]  }
0x1753   :  { %v9197_v38 = vadd.f32 %v9191_v10, %v19052_v17  ;;  %v9193_v40 = vmul.f32 0.044715, %v9187_v2  ;;  %v19076_v25 = vadd.f32 %v9173_v7, %v9044_v31  ;;  %v9175_v23 = vpop.f32.mrb[154].mxu1  ;;  %14259 = vmatprep.subr.bf16.mxu0 %v16142_v11  ;;  %v16153_v2 = vld [vmem:[#allocation27 + $0xb8] sm:$0xff]  }
0x1754   :  { %v9202_v54 = vmul.f32 0.7978846, %v9196_v49  ;;  %v9198_v45 = vadd.f32 %v9192_v33, %v19056_v3  ;;  %v9182_v55 = vmul.f32 %v19073_v0, %v19073_v0  ;;  %v9176_v47 = vpop.f32.mrb[155].mxu1 }
0x1755   :  { %v9203_v59 = vmul.f32 0.7978846, %v9197_v38  ;;  %v9199_v56 = vadd.f32 %v9193_v40, %v19060_v26  ;;  %v9183_v51 = vmul.f32 %v19076_v25, %v19076_v25  ;;  %8986 = vmatmul.mubr.bf16.gmra.mrb[152].mxu0 %v8806_v36 }
0x1756   :  { %16542 = vtanh.f32 %v9202_v54  ;;  %v9204_v31 = vmul.f32 0.7978846, %v9198_v45  ;;  %v9188_v53 = vmul.f32 %v9182_v55, %v19073_v0  ;;  %14260 = vmatpush3.bf16.msra.mxu0 %v16143_v52 }
0x1757   :  { %16544 = vtanh.f32 %v9203_v59  ;;  %v9205_v5 = vmul.f32 0.7978846, %v9199_v56  ;;  %v9189_v24 = vmul.f32 %v9183_v51, %v19076_v25  ;;  %14261 = vmatprep.subr.bf16.mxu0 %v16144_v28 }
0x1758   :  { %16546 = vtanh.f32 %v9204_v31  ;;  %v9194_v35 = vmul.f32 0.044715, %v9188_v53 }
0x1759   :  { %16548 = vtanh.f32 %v9205_v5  ;;  %v9195_v42 = vmul.f32 0.044715, %v9189_v24 }
0x175a   :  { %v9200_v50 = vadd.f32 %v9194_v35, %v19073_v0  ;;  %14262 = vmatpush3.bf16.msra.mxu0 %v16145_v37  ;;  %v13359_v35 = vld [vmem:[#allocation19 + $0x1] ss:$0 sm:$0xff] }
0x175b   :  { %v9201_v48 = vadd.f32 %v9195_v42, %v19076_v25  ;;  %14263 = vmatprep.subr.bf16.mxu0 %v16146_v43  ;;  %v13394_v42 = vld [vmem:[#allocation28 + $0x1] ss:$0 sm:$0xff] }
0x175c   :  { %v9206_v22 = vmul.f32 0.7978846, %v9200_v50 }
0x175d   :  { %v9207_v39 = vmul.f32 0.7978846, %v9201_v48 }
0x175e   :  { %16550 = vtanh.f32 %v9206_v22  ;;  %14264 = vmatpush3.bf16.msra.mxu0 %v16147_v29 }
0x175f   :  { %16552 = vtanh.f32 %v9207_v39  ;;  %14265 = vmatprep.subr.bf16.mxu0 %v16148_v58 }
0x1760   :  { %v16543_v34 = vpop.eup %16542 }
0x1761   :  { %v16545_v19 = vpop.eup %16544  ;;  %v9214_v46 = vadd.f32 1.0, %v16543_v34 }
0x1762   :  { %v16547_v14 = vpop.eup %16546  ;;  %14266 = vmatpush3.bf16.msra.mxu0 %v16149_v27  ;;  %v9215_v16 = vadd.f32 1.0, %v16545_v19 }
0x1763   :  { %v16549_v9 = vpop.eup %16548  ;;  %v9220_v11 = vmul.f32 0.5, %v9214_v46  ;;  %v9216_v13 = vadd.f32 1.0, %v16547_v14  ;;  %14267 = vmatprep.subr.bf16.mxu0 %v16150_v41 }
0x1764   :  { %v9217_v60 = vadd.f32 1.0, %v16549_v9  ;;  %v9221_v44 = vmul.f32 0.5, %v9215_v16 }
0x1765   :  { %v9222_v10 = vmul.f32 0.5, %v9216_v13  ;;  %v9226_v49 = vmul.f32 %v9220_v11, %v19050_v30  ;;  %v16156_v13 = vld [vmem:[%s19816_s28 + $0x184] ss:$12 sps:$4 sm:$0xff]  }
0x1766   :  { %14268 = vmatpush3.bf16.msra.mxu0 %v16151_v20  ;;  %v9223_v21 = vmul.f32 0.5, %v9217_v60  ;;  %v9227_v52 = vmul.f32 %v9221_v44, %v19052_v17  ;;  %9663 = vmatprep.subr.bf16.mxu1 %v16156_v13  ;;  %v16157_v60 = vld [vmem:[%s19816_s28 + $0x198] ss:$12 sps:$4 sm:$0xff]  }
0x1767   :  { %v9228_v33 = vmul.f32 %v9222_v10, %v19056_v3  ;;  %14269 = vmatprep.subr.bf16.mxu0 %v16152_v18  ;;  %v16159_v18 = vld [vmem:[%s19816_s28 + $0x19c] ss:$12 sps:$4 sm:$0xff]  }
0x1768   :  { %v16551_v7 = vpop.eup %16550  ;;  %v9229_v38 = vmul.f32 %v9223_v21, %v19060_v26 }
0x1769   :  { %v16553_v40 = vpop.eup %16552  ;;  %v9232_v23 = vpack.c.bf16 %v9228_v33, %v9226_v49  ;;  %v9218_v36 = vadd.f32 1.0, %v16551_v7 }
0x176a   :  { %14270 = vmatpush3.bf16.msra.mxu0 %v16153_v2  ;;  %v9233_v28 = vpack.c.bf16 %v9229_v38, %v9227_v52  ;;  %v9219_v54 = vadd.f32 1.0, %v16553_v40 }
0x176b   :  { %v9224_v45 = vmul.f32 0.5, %v9218_v36  ;;  %v16163_v36 = vld [vmem:[%s19816_s28 + $0x1b4] ss:$12 sps:$4 sm:$0xff]  }
0x176c   :  { %9405 = vmatprep.mubr.bf16.mxu0 %v9233_v28  ;;  %v9225_v55 = vmul.f32 0.5, %v9219_v54  ;;  %v16161_v28 = vld [vmem:[%s19816_s28 + $0x1b0] ss:$12 sps:$4 sm:$0xff]   ;;  %v16164_v54 = vld [vmem:[%s19816_s28 + $0x1a0] ss:$12 sps:$4 sm:$0xff]  }
0x176d   :  { %9406 = vmatmul.mubr.bf16.vlgmr.msra.gmra.mrb[156].mxu0 %v9232_v23  ;;  %v9230_v3 = vmul.f32 %v9224_v45, %v19073_v0  ;;  %v16167_v45 = vld [vmem:[%s19816_s28 + $0x1cc] ss:$12 sps:$4 sm:$0xff]  }
0x176e   :  { %v9231_v30 = vmul.f32 %v9225_v55, %v19076_v25  ;;  %v16165_v55 = vld [vmem:[%s19816_s28 + $0x1c8] ss:$12 sps:$4 sm:$0xff]  }
0x176f   :  { %v9234_v59 = vpack.c.bf16 %v9230_v3, %v9230_v3  ;;  %v16171_v3 = vld [vmem:[%s19816_s28 + $0x1e4] ss:$12 sps:$4 sm:$0xff]  }
0x1770   :  { %v9235_v47 = vpack.c.bf16 %v9231_v30, %v9231_v30  ;;  %v16168_v30 = vld [vmem:[%s19816_s28 + $0x1b8] ss:$12 sps:$4 sm:$0xff]  }
0x1772   :  { %9413 = vmatprep.mubr.bf16.mxu0 %v9235_v47  ;;  %v16169_v47 = vld [vmem:[%s19816_s28 + $0x1e0] ss:$12 sps:$4 sm:$0xff]  }
0x1775   :  { %9414 = vmatmul.mubr.bf16.gmra.mrb[160].mxu0 %v9234_v59  ;;  %v16172_v59 = vld [vmem:[%s19816_s28 + $0x1d0] ss:$12 sps:$4 sm:$0xff]  }
0x1820   :  { %v14243_v17 = vpop.f32.mrb[148].mxu0 }
0x1821   :  { %v14244_v26 = vpop.f32.mrb[149].mxu0 }
0x1822   :  { %v14245_v56 = vadd.f32 %v14244_v26, %v14243_v17  ;;  %v14246_v51 = vpop.f32.mrb[150].mxu0  ;;  %v16175_v17 = vld [vmem:[%s19816_s28 + $0x1fc] ss:$12 sps:$4 sm:$0xff]   ;;  %v16173_v26 = vld [vmem:[%s19816_s28 + $0x1f8] ss:$12 sps:$4 sm:$0xff]  }
0x1823   :  { %v14247_v31 = vpop.f32.mrb[151].mxu0  ;;  %v16179_v51 = vld [vmem:[%s19816_s28 + $0x214] ss:$12 sps:$4 sm:$0xff]  }
0x1824   :  { %v8980_v48 = vadd.f32 %v14245_v56, %v13359_v35  ;;  %v16176_v56 = vld [vmem:[%s19816_s28 + $0x1e8] ss:$12 sps:$4 sm:$0xff]   ;;  %v16177_v31 = vld [vmem:[%s19816_s28 + $0x210] ss:$12 sps:$4 sm:$0xff]  }
0x1828   :  { %v14249_v53 = vpop.f32.mrb[152].mxu0 }
0x1829   :  { %v14250_v37 = vpop.f32.mrb[153].mxu0  ;;  %v16180_v53 = vld [vmem:[%s19816_s28 + $0x200] ss:$12 sps:$4 sm:$0xff]  }
0x182a   :  { %v14252_v5 = vpop.f32.mrb[154].mxu0  ;;  %v16181_v37 = vld [vmem:[%s19816_s28 + $0x228] ss:$12 sps:$4 sm:$0xff]  }
0x182b   :  { %v14253_v24 = vpop.f32.mrb[155].mxu0  ;;  %v16183_v5 = vld [vmem:[%s19816_s28 + $0x22c] ss:$12 sps:$4 sm:$0xff]  }
0x182c   :  { %v16184_v24 = vld [vmem:[%s19816_s28 + $0x218] ss:$12 sps:$4 sm:$0xff]  }
0x1840   :  { %v14271_v43 = vpop.f32.mrb[156].mxu0 }
0x1841   :  { %v14272_v50 = vpop.f32.mrb[157].mxu0 }
0x1842   :  { %v14273_v25 = vadd.f32 %v14272_v50, %v14271_v43  ;;  %v14274_v29 = vpop.f32.mrb[158].mxu0  ;;  %v16185_v43 = vld [vmem:[%s19816_s28 + $0x230] ss:$12 sps:$4 sm:$0xff]  }
0x1843   :  { %v14275_v0 = vpop.f32.mrb[159].mxu0 }
0x1844   :  { %v9408_v58 = vadd.f32 %v14273_v25, %v13394_v42  ;;  %v14276_v22 = vadd.f32 %v14275_v0, %v14274_v29 }
0x1846   :  { %v9411_v39 = vadd.f32 %v14276_v22, %v13394_v42  ;;  %v9421_v27 = vsel %vm3447_vm15, %v8980_v48, %v9408_v58 }
0x1847   :  { %v19097_v41 = vadd.f32 %v9421_v27, %v19003_v57  ;;  %v16154_v57 = vld [vmem:[%s19816_s28 + $0x180] ss:$12 sps:$4 sm:$0xff]  }
0x1848   :  { %v14277_v34 = vpop.f32.mrb[160].mxu0  ;;  %v19100_v19 = vadd.f32 %v9411_v39, %v19006_v61  ;;  %v16160_v61 = vld [vmem:[%s19816_s28 + $0x188] ss:$12 sps:$4 sm:$0xff]   ;;  %9664 = vmatpush1.bf16.msra.mxu1 %v16154_v57  ;;  %v13413_v27 = vld [vmem:[%s19817_s14 + $0x2] ss:$0 sm:$0xff] }
0x1849   :  { %v14278_v46 = vpop.f32.mrb[161].mxu0  ;;  %9431 = vadd.xlane.f32.xlu0 %v19097_v41  ;;  %14787 = vmatprep.subr.bf16.mxu0 %v16160_v61 }
0x184a   :  { %v14279_v14 = vadd.f32 %v14278_v46, %v14277_v34  ;;  %v14280_v20 = vpop.f32.mrb[162].mxu0  ;;  %9433 = vadd.xlane.f32.xlu1 %v19100_v19  ;;  %9665 = vmatprep.subr.bf16.mxu1 %v16159_v18 }
0x184b   :  { %v14281_v16 = vpop.f32.mrb[163].mxu0  ;;  %14788 = vmatpush3.bf16.msra.mxu0 %v16160_v61  ;;  %v13414_v20 = vld [vmem:[%s19818_s2 + $0x2] ss:$0 sm:$0xff] }
0x184c   :  { %v9416_v9 = vadd.f32 %v14279_v14, %v13394_v42  ;;  %9666 = vmatpush1.bf16.msra.mxu1 %v16157_v60  ;;  %14789 = vmatprep.subr.bf16.mxu0 %v16164_v54 }
0x184d   :  { %9667 = vmatprep.subr.bf16.mxu1 %v16163_v36 }
0x184e   :  { %v19105_v11 = vadd.f32 %v9416_v9, %v19009_v4 }
0x184f   :  { %14790 = vmatpush3.bf16.msra.mxu0 %v16164_v54 }
0x1850   :  { %9435 = vadd.xlane.f32.xlu0 %v19105_v11  ;;  %9668 = vmatpush1.bf16.msra.mxu1 %v16161_v28 }
0x1851   :  { %9669 = vmatprep.subr.bf16.mxu1 %v16167_v45  ;;  %14791 = vmatprep.subr.bf16.mxu0 %v16168_v30 }
0x1853   :  { %14792 = vmatpush3.bf16.msra.mxu0 %v16168_v30 }
0x1854   :  { %9670 = vmatpush1.bf16.msra.mxu1 %v16165_v55  ;;  %14793 = vmatprep.subr.bf16.mxu0 %v16172_v59 }
0x1855   :  { %9671 = vmatprep.subr.bf16.mxu1 %v16171_v3 }
0x1857   :  { %14794 = vmatpush3.bf16.msra.mxu0 %v16172_v59 }
0x1858   :  { %9672 = vmatpush1.bf16.msra.mxu1 %v16169_v47  ;;  %14795 = vmatprep.subr.bf16.mxu0 %v16176_v56 }
0x1859   :  { %9673 = vmatprep.subr.bf16.mxu1 %v16175_v17 }
0x185b   :  { %14796 = vmatpush3.bf16.msra.mxu0 %v16176_v56 }
0x185c   :  { %9674 = vmatpush1.bf16.msra.mxu1 %v16173_v26  ;;  %14797 = vmatprep.subr.bf16.mxu0 %v16180_v53 }
0x185d   :  { %9675 = vmatprep.subr.bf16.mxu1 %v16179_v51 }
0x185f   :  { %14798 = vmatpush3.bf16.msra.mxu0 %v16180_v53 }
0x1860   :  { %9676 = vmatpush1.bf16.msra.mxu1 %v16177_v31  ;;  %14799 = vmatprep.subr.bf16.mxu0 %v16184_v24 }
0x1861   :  { %9677 = vmatprep.subr.bf16.mxu1 %v16183_v5 }
0x1863   :  { %14800 = vmatpush3.bf16.msra.mxu0 %v16184_v24 }
0x1864   :  { %9678 = vmatpush1.bf16.msra.mxu1 %v16181_v37  ;;  %14801 = vmatprep.subr.bf16.mxu0 %v16185_v43 }
0x1867   :  { %14802 = vmatpush3.bf16.msra.mxu0 %v16185_v43 }
0x18d6   :  { %v9432_v44 = vpop.xlane.xlu0 %9431 }
0x18d7   :  { %v9437_v10 = vmul.f32 0.0078125, %v9432_v44  ;;  %v9434_v2 = vpop.xlane.xlu1 %9433 }
0x18d8   :  { %v9438_v4 = vmul.f32 0.0078125, %v9434_v2 }
0x18d9   :  { %v19114_v21 = vsub.f32 %v19097_v41, %v9437_v10 }
0x18da   :  { %v19117_v49 = vsub.f32 %v19100_v19, %v9438_v4  ;;  %v9518_v4 = vld [vmem:[#allocation7 + $0x6] sm:$0x7] }
0x18db   :  { %v9443_v33 = vmul.f32 %v19114_v21, %v19114_v21  ;;  %v9531_v47 = vrot.slane %v9518_v4, %v17841_v6 }
0x18dc   :  { %v9444_v7 = vmul.f32 %v19117_v49, %v19117_v49 }
0x18dd   :  { %9446 = vadd.xlane.f32.xlu1 %v9443_v33  ;;  %v9436_v52 = vpop.xlane.xlu0 %9435  ;;  %v9527_v33 = vrot.slane %v9518_v4, %v17836_v1 }
0x18de   :  { %v9439_v38 = vmul.f32 0.0078125, %v9436_v52  ;;  %9448 = vadd.xlane.f32.xlu0 %v9444_v7 }
0x18e0   :  { %v19124_v40 = vsub.f32 %v19105_v11, %v9439_v38 }
0x18e2   :  { %v9445_v23 = vmul.f32 %v19124_v40, %v19124_v40 }
0x18e4   :  { %9450 = vadd.xlane.f32.xlu1 %v9445_v23 }
0x196a   :  { %v9447_v35 = vpop.xlane.xlu1 %9446 }
0x196b   :  { %v9452_v42 = vmul.f32 0.0078125, %v9447_v35  ;;  %v9449_v50 = vpop.xlane.xlu0 %9448 }
0x196c   :  { %v9453_v25 = vmul.f32 0.0078125, %v9449_v50 }
0x196d   :  { %v9455_v29 = vadd.f32 1e-05, %v9452_v42 }
0x196e   :  { %v9456_v0 = vadd.f32 1e-05, %v9453_v25 }
0x196f   :  { %16554 = vrsqrt.f32 %v9455_v29 }
0x1970   :  { %16556 = vrsqrt.f32 %v9456_v0 }
0x1971   :  { %v9451_v48 = vpop.xlane.xlu1 %9450 }
0x1972   :  { %v9454_v58 = vmul.f32 0.0078125, %v9451_v48 }
0x1974   :  { %v9457_v22 = vadd.f32 1e-05, %v9454_v58 }
0x1976   :  { %16558 = vrsqrt.f32 %v9457_v22 }
0x1979   :  { %v16555_v39 = vpop.eup %16554 }
0x197a   :  { %v16557_v34 = vpop.eup %16556  ;;  %v9461_v46 = vmul.f32 %v16555_v39, %v19114_v21  ;;  %v9523_v21 = vrot.slane %v9518_v4, %v17833_v63 }
0x197b   :  { %v9462_v14 = vmul.f32 %v16557_v34, %v19117_v49 }
0x197c   :  { %v9470_v16 = vmul.f32 %v13413_v27, %v9461_v46 }
0x197d   :  { %v9471_v9 = vmul.f32 %v13413_v27, %v9462_v14 }
0x197e   :  { %v9479_v57 = vadd.f32 %v13414_v20, %v9470_v16 }
0x197f   :  { %v9480_v13 = vadd.f32 %v13414_v20, %v9471_v9 }
0x1980   :  { %v16559_v18 = vpop.eup %16558 }
0x1981   :  { %v9463_v61 = vmul.f32 %v16559_v18, %v19124_v40  ;;  %v9482_v60 = vpack.c.bf16 %v9480_v13, %v9479_v57 }
0x1983   :  { %9696 = vmatmul.mubr.bf16.vlgmr.msra.gmra.mrb[156].mxu1 %v9482_v60  ;;  %14803 = vmatprep.mubr.bf16.mxu0 %v9482_v60  ;;  %v9472_v44 = vmul.f32 %v13413_v27, %v9463_v61 }
0x1984   :  { %9705 = vmatprep.mubr.bf16.mxu1 %v17259_v32 }
0x1985   :  { %v9481_v10 = vadd.f32 %v13414_v20, %v9472_v44 }
0x1987   :  { %v9483_v2 = vpack.c.bf16 %v9481_v10, %v9481_v10 }
0x1989   :  { %14804 = vmatmul.mubr.bf16.vlgmr.msra.gmra.mrb[164].mxu0 %v9483_v2 }
0x198b   :  { %9706 = vmatmul.mubr.bf16.gmra.mrb[160].mxu1 %v9483_v2 }
0x1a56   :  { %v9697_v49 = vpop.f32.mrb[156].mxu1 }
0x1a57   :  { %v9699_v7 = vpop.f32.mrb[157].mxu1  ;;  %v9698_v38 = vadd.f32 %v9697_v49, %v9523_v21 }
0x1a58   :  { %v9701_v52 = vpop.f32.mrb[158].mxu1  ;;  %v9700_v36 = vadd.f32 %v9699_v7, %v9527_v33 }
0x1a59   :  { %v9702_v40 = vadd.f32 %v9701_v52, %v9523_v21  ;;  %v9703_v23 = vpop.f32.mrb[159].mxu1 }
0x1a5a   :  { %v9704_v28 = vadd.f32 %v9703_v23, %v9527_v33 }
0x1a5b   :  { %v9828_v54 = vpack.c.bf16 %v9702_v40, %v9698_v38  ;;  %v15549_v45 = vpack.i.bf16 %v9702_v40, %v9698_v38 }
0x1a5c   :  { %v14805_v55 = vpop.f32.mrb[164].mxu0  ;;  %v15454_v30 = vpack.i.bf16 %v9704_v28, %v9700_v36  ;;  %v9910_v3 = vpack.c.bf16 %v9704_v28, %v9700_v36 }
0x1a5d   :  { %v9748_v59 = vpop.f32.mrb[165].mxu0  ;;  %14811 = vmatprep.mubr.msk.bf16.mxu1 %vm19897_vm10, %v9828_v54  ;;  %v19184_v58 = vadd.f32 %v14805_v55, %v9531_v47  ;;  %vm19905_vm10 = vmmov %vm19899_vm0 }
0x1a5e   :  { %v9707_v17 = vpop.f32.mrb[160].mxu1  ;;  %v14806_v26 = vpop.f32.mrb[166].mxu0  ;;  %15455 = vrot.lane.b32.xlu0 %v15454_v30, %s17260_s20  ;;  %15019 = vmatprep.subr.msk.bf16.mxu1 %vm19898_vm11, %v9910_v3  ;;  %v10015_v56 = vsel %vm19899_vm0, %v9910_v3, 0  ;;  %v9749_v43 = vadd.f32 %v9748_v59, %v9531_v47  ;;  %vm19906_vm11 = vmmov %vm19899_vm0 }
0x1a5f   :  { %v9708_v51 = vadd.f32 %v9707_v17, %v9523_v21  ;;  %v9709_v31 = vpop.f32.mrb[161].mxu1  ;;  %v9751_v53 = vpop.f32.mrb[167].mxu0  ;;  %14808 = vmatpush3.bf16.xpose.msra.mxu1 %v10015_v56 }
0x1a60   :  { %v9710_v37 = vadd.f32 %v9709_v31, %v9527_v33  ;;  %v9752_v5 = vadd.f32 %v9751_v53, %v9531_v47  ;;  %v9711_v24 = vpop.f32.mrb[162].mxu1 }
0x1a61   :  { %v9712_v6 = vpop.f32.mrb[163].mxu1  ;;  %v15469_v35 = vpack.i.bf16 %v9708_v51, %v9702_v40  ;;  %v9829_v48 = vpack.c.bf16 %v9708_v51, %v9708_v51 }
0x1a62   :  { %15475 = vrot.lane.b32.xlu0 %v15454_v30, %s17261_s0  ;;  %v9911_v42 = vpack.c.bf16 %v9710_v37, %v9710_v37  ;;  %v15459_v50 = vpack.i.bf16 %v9698_v38, %v9710_v37  ;;  %v19163_v25 = vpack.i.bf16 %v9752_v5, %v9749_v43  ;;  %v19167_v0 = vpack.c.bf16 %v9752_v5, %v9749_v43 }
0x1a64   :  { %15020 = vmatprep.subr.msk.bf16.mxu1 %vm19900_vm3, %v9911_v42  ;;  %15460 = vrot.lane.b32.xlu1 %v15459_v50, %s17260_s20  ;;  %v10018_v29 = vsel %vm19901_vm4, %v9911_v42, 0  ;;  %vm19907_vm3 = vmmov %vm19899_vm0 }
0x1a65   :  { %vm19908_vm4 = vmmov %vm19899_vm0 }
0x1a66   :  { %15490 = vrot.lane.b32.xlu0 %v15459_v50, %s17261_s0 }
0x1a67   :  { %14810 = vmatpush3.bf16.xpose.msra.mxu1 %v10018_v29 }
0x1a68   :  { %15465 = vrot.lane.b32.xlu1 %v15454_v30, %s17262_s9 }
0x1a6a   :  { %15495 = vrot.lane.b32.xlu0 %v15454_v30, %s17245_s16 }
0x1a6c   :  { %15470 = vrot.lane.b32.xlu1 %v15469_v35, %s17260_s20 }
0x1a6e   :  { %15505 = vrot.lane.b32.xlu0 %v15454_v30, %s17229_s7  ;;  %14812 = vmatmul.mubr.msk.bf16.vlgmr.msra.gmra.mrb[164].mxu1 %vm19902_vm6, %v9829_v48  ;;  %vm19909_vm6 = vmmov %vm19899_vm0 }
0x1a70   :  { %15480 = vrot.lane.b32.xlu1 %v15459_v50, %s17262_s9 }
0x1a72   :  { %15520 = vrot.lane.b32.xlu0 %v15459_v50, %s17229_s7 }
0x1a74   :  { %15485 = vrot.lane.b32.xlu1 %v15469_v35, %s17262_s9 }
0x1a76   :  { %15525 = vrot.lane.b32.xlu0 %v15454_v30, %s17236_s15 }
0x1a78   :  { %15500 = vrot.lane.b32.xlu1 %v15469_v35, %s17261_s0 }
0x1a7a   :  { %15535 = vrot.lane.b32.xlu0 %v15454_v30, %s17232_s26 }
0x1a7c   :  { %15510 = vrot.lane.b32.xlu1 %v15459_v50, %s17245_s16 }
0x1a7e   :  { %9905 = vrot.lane.b32.xlu0 %v9710_v37, %s17232_s26 }
0x1a80   :  { %15515 = vrot.lane.b32.xlu1 %v15469_v35, %s17245_s16 }
0x1a82   :  { %15550 = vrot.lane.b32.xlu0 %v15549_v45, %s17232_s26 }
0x1a84   :  { %15530 = vrot.lane.b32.xlu1 %v15469_v35, %s17229_s7 }
0x1a86   :  { %9960 = vrot.lane.b32.xlu0 %v19184_v58, %s17245_s16 }
0x1a88   :  { %15540 = vrot.lane.b32.xlu1 %v15459_v50, %s17236_s15 }
0x1a8a   :  { %15555 = vrot.lane.b32.xlu0 %v19163_v25, %s17260_s20 }
0x1a8c   :  { %15545 = vrot.lane.b32.xlu1 %v15469_v35, %s17236_s15 }
0x1a8e   :  { %15560 = vrot.lane.b32.xlu0 %v19163_v25, %s17262_s9 }
0x1a90   :  { %9823 = vrot.lane.b32.xlu1 %v9708_v51, %s17232_s26 }
0x1a92   :  { %15570 = vrot.lane.b32.xlu0 %v19163_v25, %s17245_s16 }
0x1a94   :  { %9933 = vrot.lane.b32.xlu1 %v19184_v58, %s17260_s20 }
0x1a98   :  { %9942 = vrot.lane.b32.xlu1 %v19184_v58, %s17262_s9 }
0x1a9c   :  { %9951 = vrot.lane.b32.xlu1 %v19184_v58, %s17261_s0 }
0x1aa0   :  { %9969 = vrot.lane.b32.xlu1 %v19184_v58, %s17229_s7 }
0x1aa4   :  { %15565 = vrot.lane.b32.xlu1 %v19163_v25, %s17261_s0 }
0x1aa8   :  { %15575 = vrot.lane.b32.xlu1 %v19163_v25, %s17229_s7 }
0x1ad0   :  { %v15456_v22 = vpop.permute.xlu0 %15455 }
0x1ad1   :  { %v15458_v39 = vunpack.i.h.bf16 %v15456_v22  ;;  %v15457_v27 = vunpack.i.l.bf16 %v15456_v22 }
0x1ad3   :  { %v9912_v34 = vpack.c.bf16 %v15458_v39, %v15457_v27 }
0x1ad4   :  { %v15476_v46 = vpop.permute.xlu0 %15475 }
0x1ad5   :  { %15021 = vmatprep.subr.msk.bf16.mxu1 %vm19903_vm7, %v9912_v34  ;;  %v10075_v14 = vsel %vm19904_vm8, %v9912_v34, 0  ;;  %v15478_v57 = vunpack.i.h.bf16 %v15476_v46  ;;  %v15477_v13 = vunpack.i.l.bf16 %v15476_v46  ;;  %vm19910_vm7 = vmmov %vm19899_vm0 }
0x1ad6   :  { %v15461_v20 = vpop.permute.xlu1 %15460  ;;  %14816 = vmatpush3.bf16.xpose.msra.mxu1 %v10075_v14  ;;  %vm19911_vm8 = vmmov %vm19899_vm0 }
0x1ad7   :  { %v15462_v16 = vunpack.i.l.bf16 %v15461_v20  ;;  %v9916_v2 = vpack.c.bf16 %v15478_v57, %v15477_v13  ;;  %v15463_v33 = vunpack.i.h.bf16 %v15461_v20 }
0x1ad8   :  { %v15491_v9 = vpop.permute.xlu0 %15490 }
0x1ad9   :  { %v9913_v18 = vpack.c.bf16 %v15462_v16, %v15462_v16  ;;  %v15492_v23 = vunpack.i.l.bf16 %v15491_v9  ;;  %v10195_v17 = vsel %vm19911_vm8, %v9916_v2, 0  ;;  %v15493_v42 = vunpack.i.h.bf16 %v15491_v9  ;;  %vm19918_vm8 = vmmov %vm19899_vm0 }
0x1ada   :  { %v15466_v61 = vpop.permute.xlu1 %15465 }
0x1adb   :  { %v15468_v60 = vunpack.i.h.bf16 %v15466_v61  ;;  %v15467_v44 = vunpack.i.l.bf16 %v15466_v61  ;;  %15022 = vmatprep.subr.msk.bf16.mxu1 %vm19905_vm10, %v9913_v18  ;;  %v10078_v21 = vsel %vm19906_vm11, %v9913_v18, 0  ;;  %v9917_v47 = vpack.c.bf16 %v15492_v23, %v15492_v23  ;;  %vm19912_vm10 = vmmov %vm19899_vm0 }
0x1adc   :  { %v15496_v10 = vpop.permute.xlu0 %15495  ;;  %vm19913_vm11 = vmmov %vm19899_vm0 }
0x1add   :  { %v9914_v4 = vpack.c.bf16 %v15468_v60, %v15467_v44  ;;  %v15498_v54 = vunpack.i.h.bf16 %v15496_v10  ;;  %v15497_v45 = vunpack.i.l.bf16 %v15496_v10 }
0x1ade   :  { %v15471_v49 = vpop.permute.xlu1 %15470  ;;  %14818 = vmatpush3.bf16.xpose.msra.mxu1 %v10078_v21 }
0x1adf   :  { %v15473_v7 = vunpack.i.h.bf16 %v15471_v49  ;;  %v15472_v52 = vunpack.i.l.bf16 %v15471_v49  ;;  %15023 = vmatprep.subr.msk.bf16.mxu0 %vm19899_vm0, %v9914_v4  ;;  %15025 = vmatprep.subr.msk.bf16.mxu1 %vm19907_vm3, %v9916_v2  ;;  %v10135_v38 = vsel %vm19908_vm4, %v9914_v4, 0  ;;  %v9918_v56 = vpack.c.bf16 %v15498_v54, %v15497_v45  ;;  %vm19914_vm3 = vmmov %vm19899_vm0 }
0x1ae0   :  { %v15506_v40 = vpop.permute.xlu0 %15505  ;;  %14824 = vmatpush3.bf16.xpose.msra.mxu0 %v10135_v38  ;;  %vm19915_vm4 = vmmov %vm19899_vm0 }
0x1ae1   :  { %v9830_v36 = vpack.c.bf16 %v15472_v52, %v15463_v33  ;;  %v9831_v55 = vpack.c.bf16 %v15473_v7, %v15473_v7  ;;  %v15508_v43 = vunpack.i.h.bf16 %v15506_v40  ;;  %v15507_v6 = vunpack.i.l.bf16 %v15506_v40 }
0x1ae2   :  { %v15481_v28 = vpop.permute.xlu1 %15480 }
0x1ae3   :  { %v15482_v30 = vunpack.i.l.bf16 %v15481_v28  ;;  %14819 = vmatprep.mubr.msk.bf16.mxu1 %vm19909_vm6, %v9830_v36  ;;  %v15483_v51 = vunpack.i.h.bf16 %v15481_v28  ;;  %vm19916_vm6 = vmmov %vm19899_vm0  ;;  %v9920_v39 = vpack.c.bf16 %v15508_v43, %v15507_v6 }
0x1ae4   :  { %v19218_v3 = vpop.permute.xlu0 %15520  ;;  %v10198_v22 = vsel %vm19916_vm6, %v9917_v47, 0  ;;  %vm19923_vm6 = vmmov %vm19899_vm0 }
0x1ae5   :  { %v9915_v59 = vpack.c.bf16 %v15482_v30, %v15482_v30  ;;  %14820 = vmatmul.mubr.msk.bf16.vlgmr.msra.gmra.mrb[168].mxu1 %vm19910_vm7, %v9831_v55  ;;  %vm19917_vm7 = vmmov %vm19899_vm0  ;;  %v15522_v16 = vunpack.i.l.bf16 %v19218_v3  ;;  %v15523_v33 = vunpack.i.h.bf16 %v19218_v3 }
0x1ae6   :  { %v15486_v26 = vpop.permute.xlu1 %15485  ;;  %14832 = vmatpush3.bf16.xpose.msra.mxu1 %v10195_v17 }
0x1ae7   :  { %v15487_v31 = vunpack.i.l.bf16 %v15486_v26  ;;  %15024 = vmatprep.subr.msk.bf16.mxu0 %vm19912_vm10, %v9915_v59  ;;  %15026 = vmatprep.subr.msk.bf16.mxu1 %vm19913_vm11, %v9917_v47  ;;  %v10138_v53 = vsel %vm19899_vm0, %v9915_v59, 0  ;;  %v15488_v5 = vunpack.i.h.bf16 %v15486_v26  ;;  %vm19919_vm10 = vmmov %vm19899_vm0  ;;  %v9921_v2 = vpack.c.bf16 %v15522_v16, %v15522_v16 }
0x1ae8   :  { %v15526_v37 = vpop.permute.xlu0 %15525  ;;  %14826 = vmatpush3.bf16.xpose.msra.mxu0 %v10138_v53  ;;  %v10255_v20 = vsel %vm19919_vm10, %v9918_v56, 0  ;;  %vm19920_vm11 = vmmov %vm19899_vm0 }
0x1ae9   :  { %v9832_v24 = vpack.c.bf16 %v15487_v31, %v15483_v51  ;;  %15027 = vmatprep.subr.msk.bf16.mxu0 %vm19914_vm3, %v9918_v56  ;;  %v9833_v29 = vpack.c.bf16 %v15488_v5, %v15488_v5  ;;  %v15528_v57 = vunpack.i.h.bf16 %v15526_v37  ;;  %v15527_v18 = vunpack.i.l.bf16 %v15526_v37  ;;  %vm19921_vm3 = vmmov %vm19899_vm0 }
0x1aea   :  { %v15501_v35 = vpop.permute.xlu1 %15500  ;;  %vm19926_vm10 = vmmov %vm19899_vm0  ;;  %v10318_v47 = vsel %vm19899_vm0, %v9921_v2, 0 }
0x1aeb   :  { %v15502_v50 = vunpack.i.l.bf16 %v15501_v35  ;;  %14827 = vmatprep.mubr.msk.bf16.mxu0 %vm19915_vm4, %v9832_v24  ;;  %v15503_v46 = vunpack.i.h.bf16 %v15501_v35  ;;  %vm19922_vm4 = vmmov %vm19899_vm0  ;;  %v9922_v7 = vpack.c.bf16 %v15528_v57, %v15527_v18 }
0x1aec   :  { %v15536_v27 = vpop.permute.xlu0 %15535  ;;  %v10315_v21 = vsel %vm19922_vm4, %v9920_v39, 0  ;;  %vm19929_vm4 = vmmov %vm19899_vm0 }
0x1aed   :  { %v9834_v48 = vpack.c.bf16 %v15502_v50, %v15493_v42  ;;  %v9835_v61 = vpack.c.bf16 %v15503_v46, %v15503_v46  ;;  %v15538_v40 = vunpack.i.h.bf16 %v15536_v27  ;;  %v15537_v23 = vunpack.i.l.bf16 %v15536_v27 }
0x1aee   :  { %v15511_v34 = vpop.permute.xlu1 %15510  ;;  %14834 = vmatpush3.bf16.xpose.msra.mxu1 %v10198_v22 }
0x1aef   :  { %v15512_v14 = vunpack.i.l.bf16 %v15511_v34  ;;  %14828 = vmatmul.mubr.msk.bf16.vlgmr.msra.gmra.mrb[168].mxu0 %vm19917_vm7, %v9833_v29  ;;  %14835 = vmatprep.mubr.msk.bf16.mxu1 %vm19918_vm8, %v9834_v48  ;;  %v15513_v60 = vunpack.i.h.bf16 %v15511_v34  ;;  %vm19924_vm7 = vmmov %vm19899_vm0  ;;  %v9924_v30 = vpack.c.bf16 %v15538_v40, %v15537_v23 }
0x1af0   :  { %15029 = vmatprep.subr.msk.bf16.mxu1 %vm19920_vm11, %v9920_v39  ;;  %14840 = vmatpush3.bf16.xpose.msra.mxu0 %v10255_v20  ;;  %v9906_v10 = vpop.permute.xlu0 %9905  ;;  %vm19925_vm8 = vmmov %vm19899_vm0 }
0x1af1   :  { %v9919_v9 = vpack.c.bf16 %v15512_v14, %v15512_v14  ;;  %vm19927_vm11 = vmmov %vm19899_vm0  ;;  %v9925_v42 = vpack.c.bf16 %v9906_v10, %v9906_v10 }
0x1af2   :  { %v15516_v13 = vpop.permute.xlu1 %15515 }
0x1af3   :  { %v15517_v44 = vunpack.i.l.bf16 %v15516_v13  ;;  %15028 = vmatprep.subr.msk.bf16.mxu0 %vm19899_vm0, %v9919_v9  ;;  %v10258_v38 = vsel %vm19925_vm8, %v9919_v9, 0  ;;  %v15518_v36 = vunpack.i.h.bf16 %v15516_v13  ;;  %vm19932_vm8 = vmmov %vm19899_vm0 }
0x1af4   :  { %v15551_v54 = vpop.permute.xlu0 %15550 }
0x1af5   :  { %v9836_v4 = vpack.c.bf16 %v15517_v44, %v15513_v60  ;;  %14836 = vmatmul.mubr.msk.bf16.vlgmr.msra.gmra.mrb[172].mxu1 %vm19921_vm3, %v9835_v61  ;;  %v9837_v3 = vpack.c.bf16 %v15518_v36, %v15518_v36  ;;  %vm19928_vm3 = vmmov %vm19899_vm0  ;;  %v15553_v53 = vunpack.i.h.bf16 %v15551_v54  ;;  %v15552_v37 = vunpack.i.l.bf16 %v15551_v54 }
0x1af6   :  { %v15531_v49 = vpop.permute.xlu1 %15530  ;;  %14848 = vmatpush3.bf16.xpose.msra.mxu1 %v10315_v21  ;;  %v10375_v17 = vsel %vm19928_vm3, %v9922_v7, 0  ;;  %vm19935_vm3 = vmmov %vm19899_vm0  ;;  %v9993_v61 = vpack.c.bf16 %v19184_v58, %v19184_v58 }
0x1af7   :  { %v15532_v52 = vunpack.i.l.bf16 %v15531_v49  ;;  %14843 = vmatprep.mubr.msk.bf16.mxu0 %vm19923_vm6, %v9836_v4  ;;  %15030 = vmatprep.subr.msk.bf16.mxu1 %vm19924_vm7, %v9921_v2  ;;  %v15533_v26 = vunpack.i.h.bf16 %v15531_v49  ;;  %vm19930_vm6 = vmmov %vm19899_vm0  ;;  %v9842_v35 = vpack.c.bf16 %v15553_v53, %v15552_v37 }
0x1af8   :  { %14842 = vmatpush3.bf16.xpose.msra.mxu0 %v10258_v38  ;;  %v19246_v5 = vpop.permute.xlu0 %9960  ;;  %vm19931_vm7 = vmmov %vm19899_vm0 }
0x1af9   :  { %v9838_v28 = vpack.c.bf16 %v15532_v52, %v15523_v33  ;;  %15031 = vmatprep.subr.msk.bf16.mxu0 %vm19926_vm10, %v9922_v7  ;;  %v9839_v6 = vpack.c.bf16 %v15533_v26, %v15533_v26  ;;  %vm19933_vm10 = vmmov %vm19899_vm0 }
0x1afa   :  { %v15541_v45 = vpop.permute.xlu1 %15540 }
0x1afb   :  { %v15542_v55 = vunpack.i.l.bf16 %v15541_v45  ;;  %14851 = vmatprep.mubr.msk.bf16.mxu1 %vm19927_vm11, %v9838_v28  ;;  %v15543_v56 = vunpack.i.h.bf16 %v15541_v45  ;;  %vm19934_vm11 = vmmov %vm19899_vm0 }
0x1afc   :  { %v10435_v50 = vsel %vm19934_vm11, %v9924_v30, 0  ;;  %v15556_v29 = vpop.permute.xlu0 %15555  ;;  %vm19941_vm11 = vmmov %vm19899_vm0 }
0x1afd   :  { %v9923_v51 = vpack.c.bf16 %v15542_v55, %v15542_v55  ;;  %v15558_v39 = vunpack.i.h.bf16 %v15556_v29  ;;  %v15557_v27 = vunpack.i.l.bf16 %v15556_v29 }
0x1afe   :  { %v15546_v59 = vpop.permute.xlu1 %15545  ;;  %14850 = vmatpush3.bf16.xpose.msra.mxu1 %v10318_v47 }
0x1aff   :  { %v15547_v31 = vunpack.i.l.bf16 %v15546_v59  ;;  %14844 = vmatmul.mubr.msk.bf16.vlgmr.msra.gmra.mrb[172].mxu0 %vm19929_vm4, %v9837_v3  ;;  %15033 = vmatprep.subr.msk.bf16.mxu1 %vm19930_vm6, %v9924_v30  ;;  %vm19936_vm4 = vmmov %vm19899_vm0  ;;  %v15548_v34 = vunpack.i.h.bf16 %v15546_v59  ;;  %v9994_v16 = vpack.c.bf16 %v15558_v39, %v15557_v27 }
0x1b00   :  { %14856 = vmatpush3.bf16.xpose.msra.mxu0 %v10375_v17  ;;  %v10378_v22 = vsel %vm19936_vm4, %v9923_v51, 0  ;;  %v15561_v14 = vpop.permute.xlu0 %15560  ;;  %vm19937_vm6 = vmmov %vm19899_vm0 }
0x1b01   :  { %v9840_v24 = vpack.c.bf16 %v15547_v31, %v15543_v56  ;;  %15032 = vmatprep.subr.msk.bf16.mxu0 %vm19931_vm7, %v9923_v51  ;;  %v10438_v20 = vsel %vm19937_vm6, %v9925_v42, 0  ;;  %v9841_v9 = vpack.c.bf16 %v15548_v34, %v15548_v34  ;;  %v15563_v13 = vunpack.i.h.bf16 %v15561_v14  ;;  %vm19938_vm7 = vmmov %vm19899_vm0 }
0x1b02   :  { %v9824_v43 = vpop.permute.xlu1 %9823  ;;  %v15562_v18 = vunpack.i.l.bf16 %v15561_v14 }
0x1b03   :  { %14859 = vmatprep.mubr.msk.bf16.mxu0 %vm19932_vm8, %v9840_v24  ;;  %vm19939_vm8 = vcmask 1043456   ;;  %v9843_v10 = vpack.c.bf16 %v9824_v43, %v9824_v43 }
0x1b04   :  { %v19268_v44 = vpack.c.bf16 %v15563_v13, %v15562_v18 }
0x1b05   :  { %14852 = vmatmul.mubr.msk.bf16.vlgmr.msra.gmra.mrb[176].mxu1 %vm19933_vm10, %v9839_v6  ;;  %vm19940_vm10 = vmmov %vm19939_vm8 }
0x1b06   :  { %v9934_v48 = vpop.permute.xlu1 %9933  ;;  %14864 = vmatpush3.bf16.xpose.msra.mxu1 %v10435_v50  ;;  %14867 = vmatprep.mubr.msk.bf16.mxu1 %vm19899_vm0, %v9842_v35  ;;  %v10823_v2 = vsel %vm19940_vm10, %v9993_v61, 0  ;;  %vm19942_vm0 = vmmov %vm19939_vm8 }
0x1b07   :  { %15034 = vmatprep.subr.msk.bf16.mxu1 %vm19935_vm3, %v9925_v42  ;;  %v9995_v4 = vpack.c.bf16 %v9934_v48, %v9934_v48  ;;  %vm19943_vm3 = vmmov %vm19942_vm0 }
0x1b08   :  { %14858 = vmatpush3.bf16.xpose.msra.mxu0 %v10378_v22  ;;  %vm19944_vm4 = vmmov %vm19942_vm0 }
0x1b09   :  { %14871 = vmatprep.subr.bf16.mxu0 %v19167_v0  ;;  %vm19945_vm6 = vmmov %vm19942_vm0 }
0x1b0a   :  { %v19256_v46 = vpop.permute.xlu1 %9942  ;;  %vm19948_vm10 = vmmov %vm19942_vm0 }
0x1b0e   :  { %v19259_v57 = vpop.permute.xlu1 %9951  ;;  %14866 = vmatpush3.bf16.xpose.msra.mxu1 %v10438_v20 }
0x1b0f   :  { %14860 = vmatmul.mubr.msk.bf16.vlgmr.msra.gmra.mrb[176].mxu0 %vm19938_vm7, %v9841_v9  ;;  %14879 = vmatprep.subr.bf16.mxu1 %v9994_v16  ;;  %vm19946_vm7 = vmmov %vm19942_vm0 }
0x1b10   :  { %14872 = vmatpush3.bf16.msra.mxu0 %v19167_v0  ;;  %v10880_v0 = vsel %vm19943_vm3, %v9995_v4, 0  ;;  %vm19950_vm3 = vmmov %vm19942_vm0 }
0x1b11   :  { %15035 = vmatprep.subr.msk.bf16.mxu0 %vm19939_vm8, %v9993_v61  ;;  %vm19947_vm8 = vmmov %vm19942_vm0 }
0x1b12   :  { %v19266_v60 = vpop.permute.xlu1 %9969 }
0x1b14   :  { %14874 = vmatpush3.bf16.msra.mxu0 %v10823_v2 }
0x1b15   :  { %14868 = vmatmul.mubr.msk.bf16.vlgmr.msra.gmra.mrb[180].mxu1 %vm19941_vm11, %v9843_v10  ;;  %14887 = vmatprep.subr.bf16.mxu0 %v19268_v44  ;;  %vm19949_vm11 = vmmov %vm19942_vm0 }
0x1b16   :  { %v15566_v21 = vpop.permute.xlu1 %15565  ;;  %14880 = vmatpush3.bf16.msra.mxu1 %v9994_v16 }
0x1b17   :  { %v15568_v49 = vunpack.i.h.bf16 %v15566_v21  ;;  %v15567_v33 = vunpack.i.l.bf16 %v15566_v21  ;;  %15036 = vmatprep.subr.msk.bf16.mxu1 %vm19942_vm0, %v9995_v4 }
0x1b19   :  { %v19275_v7 = vpack.c.bf16 %v15568_v49, %v15567_v33 }
0x1b1a   :  { %14882 = vmatpush3.bf16.msra.mxu1 %v10880_v0 }
0x1b1b   :  { %14895 = vmatprep.subr.bf16.mxu1 %v19275_v7 }
0x1b41   :  { %v14813_v52 = vpop.f32.mrb[164].mxu1 }
0x1b42   :  { %v10490_v38 = vmul.f32 0.25, %v14813_v52  ;;  %v10054_v40 = vpop.f32.mrb[165].mxu1 }
0x1b43   :  { %v10488_v23 = vmul.f32 0.25, %v10054_v40  ;;  %v14814_v36 = vpop.f32.mrb[166].mxu1 }
0x1b44   :  { %v19279_v28 = vadd.f32 %v10490_v38, %v17980_v8  ;;  %v10057_v54 = vpop.f32.mrb[167].mxu1 }
0x1b45   :  { %v10489_v45 = vmul.f32 0.25, %v10057_v54  ;;  %v19282_v55 = vadd.f32 %v10488_v23, %v17982_v12  ;;  %v19331_v23 = vpop.permute.xlu1 %15575 }
0x1b46   :  { %v10542_v30 = vsel %vm4588_vm1, %v19279_v28, -inf }
0x1b47   :  { %v19287_v3 = vadd.f32 %v10489_v45, %v17984_v15  ;;  %10543 = vmax.xlane.f32.xlu0 %v10542_v30  ;;  %v10536_v59 = vsel %vm4588_vm1, %v19282_v55, -inf }
0x1b49   :  { %v10539_v47 = vsel %vm4588_vm1, %v19287_v3, -inf }
0x1b4a   :  { %10540 = vmax.xlane.f32.xlu1 %v10539_v47 }
0x1b4b   :  { %10537 = vmax.xlane.f32.xlu0 %v10536_v59  ;;  %v19335_v59 = vpop.permute.xlu0 %15570 }
0x1bb8   :  { %v14821_v17 = vpop.f32.mrb[168].mxu1 }
0x1bb9   :  { %v10493_v26 = vmul.f32 0.25, %v14821_v17  ;;  %v10114_v56 = vpop.f32.mrb[169].mxu1 }
0x1bba   :  { %v14822_v51 = vpop.f32.mrb[170].mxu1  ;;  %v10491_v43 = vmul.f32 0.25, %v10114_v56 }
0x1bbb   :  { %v19294_v31 = vadd.f32 %v10493_v26, %v17980_v8  ;;  %v10117_v53 = vpop.f32.mrb[171].mxu1 }
0x1bbc   :  { %v19302_v22 = vadd.f32 %v10491_v43, %v17982_v12  ;;  %v10492_v61 = vmul.f32 0.25, %v10117_v53 }
0x1bbd   :  { %v10551_v37 = vsel %vm4588_vm1, %v19294_v31, -inf }
0x1bbe   :  { %10552 = vmax.xlane.f32.xlu1 %v10551_v37  ;;  %v10545_v21 = vsel %vm4588_vm1, %v19302_v22, -inf  ;;  %v19325_v0 = vadd.f32 %v10492_v61, %v17984_v15 }
0x1bc0   :  { %v10548_v45 = vsel %vm4588_vm1, %v19325_v0, -inf }
0x1bc2   :  { %v14829_v24 = vpop.f32.mrb[168].mxu0 }
0x1bc3   :  { %v10496_v6 = vmul.f32 0.25, %v14829_v24  ;;  %v10174_v35 = vpop.f32.mrb[169].mxu0 }
0x1bc4   :  { %v14830_v42 = vpop.f32.mrb[170].mxu0  ;;  %v10494_v39 = vmul.f32 0.25, %v10174_v35 }
0x1bc5   :  { %v19299_v50 = vadd.f32 %v10496_v6, %v17980_v8  ;;  %v10177_v29 = vpop.f32.mrb[171].mxu0 }
0x1bc6   :  { %v10495_v48 = vmul.f32 0.25, %v10177_v29  ;;  %v19312_v10 = vadd.f32 %v10494_v39, %v17982_v12 }
0x1bc7   :  { %v10560_v27 = vsel %vm4588_vm1, %v19299_v50, -inf }
0x1bc8   :  { %v19307_v34 = vadd.f32 %v10495_v48, %v17984_v15  ;;  %10561 = vmax.xlane.f32.xlu0 %v10560_v27  ;;  %v14837_v14 = vpop.f32.mrb[172].mxu1  ;;  %v10554_v52 = vsel %vm4588_vm1, %v19312_v10, -inf }
0x1bc9   :  { %v10499_v20 = vmul.f32 0.25, %v14837_v14  ;;  %v10234_v16 = vpop.f32.mrb[173].mxu1 }
0x1bca   :  { %v10497_v9 = vmul.f32 0.25, %v10234_v16  ;;  %v14838_v13 = vpop.f32.mrb[174].mxu1  ;;  %v10557_v18 = vsel %vm4588_vm1, %v19307_v34, -inf }
0x1bcb   :  { %v19315_v2 = vadd.f32 %v10499_v20, %v17980_v8  ;;  %10558 = vmax.xlane.f32.xlu1 %v10557_v18  ;;  %v10237_v4 = vpop.f32.mrb[175].mxu1 }
0x1bcc   :  { %10546 = vmax.xlane.f32.xlu0 %v10545_v21  ;;  %v19322_v33 = vadd.f32 %v10497_v9, %v17982_v12  ;;  %v10498_v51 = vmul.f32 0.25, %v10237_v4 }
0x1bcd   :  { %v10569_v49 = vsel %vm4588_vm1, %v19315_v2, -inf }
0x1bce   :  { %v10563_v40 = vsel %vm4588_vm1, %v19322_v33, -inf  ;;  %v19352_v20 = vadd.f32 %v10498_v51, %v17984_v15 }
0x1bcf   :  { %10570 = vmax.xlane.f32.xlu1 %v10569_v49 }
0x1bd0   :  { %10555 = vmax.xlane.f32.xlu0 %v10554_v52  ;;  %v10566_v49 = vsel %vm4588_vm1, %v19352_v20, -inf }
0x1bd2   :  { %v14845_v38 = vpop.f32.mrb[172].mxu0 }
0x1bd3   :  { %v10502_v36 = vmul.f32 0.25, %v14845_v38  ;;  %v10294_v54 = vpop.f32.mrb[173].mxu0  ;;  %10564 = vmax.xlane.f32.xlu1 %v10563_v40 }
0x1bd4   :  { %v10500_v30 = vmul.f32 0.25, %v10294_v54  ;;  %v14846_v47 = vpop.f32.mrb[174].mxu0  ;;  %10549 = vmax.xlane.f32.xlu0 %v10548_v45  ;;  %v10544_v35 = vpop.xlane.xlu0 %10543 }
0x1bd5   :  { %v19338_v17 = vadd.f32 %v10502_v36, %v17980_v8  ;;  %v10297_v26 = vpop.f32.mrb[175].mxu0  ;;  %v10610_v61 = vsub.f32 %v19279_v28, %v10544_v35 }
0x1bd6   :  { %v10501_v56 = vmul.f32 0.25, %v10297_v26  ;;  %v19341_v53 = vadd.f32 %v10500_v30, %v17982_v12 }
0x1bd7   :  { %v10541_v37 = vpop.xlane.xlu1 %10540  ;;  %v10578_v24 = vsel %vm4588_vm1, %v19338_v17, -inf  ;;  %v10636_v52 = vmul.f32 1.442695, %v10610_v61 }
0x1bd8   :  { %v19346_v43 = vadd.f32 %v10501_v56, %v17984_v15  ;;  %10579 = vmax.xlane.f32.xlu0 %v10578_v24  ;;  %v14853_v6 = vpop.f32.mrb[176].mxu1  ;;  %v10609_v42 = vsub.f32 %v19287_v3, %v10541_v37  ;;  %v10572_v13 = vsel %vm4588_vm1, %v19341_v53, -inf  ;;  %v10538_v21 = vpop.xlane.xlu0 %10537 }
0x1bd9   :  { %v10505_v29 = vmul.f32 0.25, %v14853_v6  ;;  %v10354_v48 = vpop.f32.mrb[177].mxu1  ;;  %v10608_v38 = vsub.f32 %v19282_v55, %v10538_v21 }
0x1bda   :  { %v10503_v39 = vmul.f32 0.25, %v10354_v48  ;;  %v14854_v27 = vpop.f32.mrb[178].mxu1  ;;  %v10575_v14 = vsel %vm4588_vm1, %v19346_v43, -inf  ;;  %v10634_v3 = vmul.f32 1.442695, %v10609_v42 }
0x1bdb   :  { %v19355_v16 = vadd.f32 %v10505_v29, %v17980_v8  ;;  %10576 = vmax.xlane.f32.xlu1 %v10575_v14  ;;  %v10357_v9 = vpop.f32.mrb[179].mxu1  ;;  %v10632_v56 = vmul.f32 1.442695, %v10608_v38 }
0x1bdc   :  { %10573 = vmax.xlane.f32.xlu0 %v10572_v13  ;;  %v19363_v4 = vadd.f32 %v10503_v39, %v17982_v12  ;;  %16560 = vpow2.f32 %v10634_v3  ;;  %v10504_v37 = vmul.f32 0.25, %v10357_v9 }
0x1bdd   :  { %v10587_v18 = vsel %vm4588_vm1, %v19355_v16, -inf  ;;  %16562 = vpow2.f32 %v10636_v52 }
0x1bde   :  { %v10581_v36 = vsel %vm4588_vm1, %v19363_v4, -inf  ;;  %16564 = vpow2.f32 %v10632_v56  ;;  %v19386_v14 = vadd.f32 %v10504_v37, %v17984_v15 }
0x1bdf   :  { %10588 = vmax.xlane.f32.xlu1 %v10587_v18 }
0x1be0   :  { %10567 = vmax.xlane.f32.xlu0 %v10566_v49  ;;  %v10584_v21 = vsel %vm4588_vm1, %v19386_v14, -inf }
0x1be2   :  { %v14861_v40 = vpop.f32.mrb[176].mxu0 }
0x1be3   :  { %v10508_v54 = vmul.f32 0.25, %v14861_v40  ;;  %v10414_v45 = vpop.f32.mrb[177].mxu0  ;;  %10582 = vmax.xlane.f32.xlu1 %v10581_v36 }
0x1be4   :  { %v10506_v28 = vmul.f32 0.25, %v10414_v45  ;;  %v14862_v30 = vpop.f32.mrb[178].mxu0 }
0x1be5   :  { %v19371_v47 = vadd.f32 %v10508_v54, %v17980_v8  ;;  %v10417_v26 = vpop.f32.mrb[179].mxu0 }
0x1be6   :  { %v10507_v51 = vmul.f32 0.25, %v10417_v26  ;;  %v19374_v24 = vadd.f32 %v10506_v28, %v17982_v12  ;;  %v19383_v27 = vpop.eup %16560 }
0x1be7   :  { %v10596_v55 = vsel %vm4588_vm1, %v19371_v47, -inf  ;;  %v10683_v61 = vsel %vm4588_vm1, %v19383_v27, 0.0  ;;  %v19397_v49 = vpop.eup %16562 }
0x1be8   :  { %v19379_v6 = vadd.f32 %v10507_v51, %v17984_v15  ;;  %10597 = vmax.xlane.f32.xlu0 %v10596_v55  ;;  %v14869_v35 = vpop.f32.mrb[180].mxu1  ;;  %v10590_v13 = vsel %vm4588_vm1, %v19374_v24, -inf  ;;  %v19406_v36 = vpop.eup %16564 }
0x1be9   :  { %v10474_v42 = vpop.f32.mrb[181].mxu1  ;;  %v10511_v29 = vmul.f32 0.25, %v14869_v35 }
0x1bea   :  { %v14870_v48 = vpop.f32.mrb[182].mxu1  ;;  %v10593_v39 = vsel %vm4588_vm1, %v19379_v6, -inf  ;;  %v10509_v18 = vmul.f32 0.25, %v10474_v42 }
0x1beb   :  { %10594 = vmax.xlane.f32.xlu1 %v10593_v39  ;;  %v10477_v9 = vpop.f32.mrb[183].mxu1  ;;  %v19391_v3 = vadd.f32 %v10511_v29, %v17980_v8  ;;  %v10686_v8 = vsel %vm4588_vm1, %v19397_v49, 0.0 }
0x1bec   :  { %10591 = vmax.xlane.f32.xlu0 %v10590_v13  ;;  %v19400_v52 = vadd.f32 %v10509_v18, %v17982_v12  ;;  %v10510_v40 = vmul.f32 0.25, %v10477_v9  ;;  %v10680_v12 = vsel %vm4588_vm1, %v19406_v36, 0.0 }
0x1bed   :  { %v10605_v38 = vsel %vm4588_vm1, %v19391_v3, -inf }
0x1bee   :  { %v10599_v54 = vsel %vm4588_vm1, %v19400_v52, -inf  ;;  %v19411_v45 = vadd.f32 %v10510_v40, %v17984_v15 }
0x1bef   :  { %10684 = vadd.xlane.f32.xlu1 %v10683_v61 }
0x1bf0   :  { %10585 = vmax.xlane.f32.xlu0 %v10584_v21  ;;  %v10602_v28 = vsel %vm4588_vm1, %v19411_v45, -inf }
0x1bf3   :  { %10606 = vmax.xlane.f32.xlu1 %v10605_v38 }
0x1bf4   :  { %10687 = vadd.xlane.f32.xlu0 %v10686_v8 }
0x1bf7   :  { %10600 = vmax.xlane.f32.xlu1 %v10599_v54 }
0x1bf8   :  { %10681 = vadd.xlane.f32.xlu0 %v10680_v12 }
0x1bfc   :  { %10603 = vmax.xlane.f32.xlu0 %v10602_v28 }
0x1c08   :  { %15585 = vrot.lane.b32.xlu1 %v19163_v25, %s17232_s26 }
0x1c12   :  { %15580 = vrot.lane.b32.xlu0 %v19163_v25, %s17236_s15 }
0x1c4b   :  { %v10553_v30 = vpop.xlane.xlu1 %10552 }
0x1c4c   :  { %v10613_v26 = vsub.f32 %v19294_v31, %v10553_v30 }
0x1c4e   :  { %v10642_v15 = vmul.f32 1.442695, %v10613_v26 }
0x1c50   :  { %16566 = vpow2.f32 %v10642_v15 }
0x1c55   :  { %v10562_v56 = vpop.xlane.xlu0 %10561 }
0x1c56   :  { %v10616_v51 = vsub.f32 %v19299_v50, %v10562_v56 }
0x1c58   :  { %v10648_v37 = vmul.f32 1.442695, %v10616_v51  ;;  %v10559_v55 = vpop.xlane.xlu1 %10558 }
0x1c59   :  { %v10615_v35 = vsub.f32 %v19307_v34, %v10559_v55  ;;  %v10547_v42 = vpop.xlane.xlu0 %10546 }
0x1c5a   :  { %v19424_v29 = vpop.eup %16566  ;;  %16568 = vpow2.f32 %v10648_v37  ;;  %v10611_v48 = vsub.f32 %v19302_v22, %v10547_v42 }
0x1c5b   :  { %v10695_v25 = vsel %vm4588_vm1, %v19424_v29, 0.0  ;;  %v10646_v39 = vmul.f32 1.442695, %v10615_v35 }
0x1c5c   :  { %v10638_v31 = vmul.f32 1.442695, %v10611_v48  ;;  %v10571_v9 = vpop.xlane.xlu1 %10570  ;;  %10696 = vadd.xlane.f32.xlu1 %v10695_v25 }
0x1c5d   :  { %v10619_v13 = vsub.f32 %v19315_v2, %v10571_v9  ;;  %v10556_v50 = vpop.xlane.xlu0 %10555 }
0x1c5e   :  { %16570 = vpow2.f32 %v10638_v31  ;;  %v10614_v18 = vsub.f32 %v19312_v10, %v10556_v50 }
0x1c5f   :  { %16572 = vpow2.f32 %v10646_v39  ;;  %v10654_v34 = vmul.f32 1.442695, %v10619_v13 }
0x1c60   :  { %v10644_v61 = vmul.f32 1.442695, %v10614_v18  ;;  %v10565_v21 = vpop.xlane.xlu1 %10564 }
0x1c61   :  { %v10617_v38 = vsub.f32 %v19322_v33, %v10565_v21  ;;  %v10550_v22 = vpop.xlane.xlu0 %10549 }
0x1c62   :  { %16574 = vpow2.f32 %v10644_v61  ;;  %v10612_v40 = vsub.f32 %v19325_v0, %v10550_v22 }
0x1c63   :  { %16576 = vpow2.f32 %v10654_v34  ;;  %v10650_v54 = vmul.f32 1.442695, %v10617_v38 }
0x1c64   :  { %v19433_v8 = vpop.eup %16568  ;;  %v10640_v12 = vmul.f32 1.442695, %v10612_v40 }
0x1c65   :  { %v10580_v2 = vpop.xlane.xlu0 %10579  ;;  %v10704_v28 = vsel %vm4588_vm1, %v19433_v8, 0.0 }
0x1c66   :  { %16578 = vpow2.f32 %v10640_v12  ;;  %v10622_v10 = vsub.f32 %v19338_v17, %v10580_v2  ;;  %10705 = vadd.xlane.f32.xlu0 %v10704_v28 }
0x1c67   :  { %16580 = vpow2.f32 %v10650_v54 }
0x1c68   :  { %v19438_v30 = vpop.eup %16570  ;;  %v10660_v33 = vmul.f32 1.442695, %v10622_v10  ;;  %v10577_v26 = vpop.xlane.xlu1 %10576 }
0x1c69   :  { %v10621_v0 = vsub.f32 %v19346_v43, %v10577_v26  ;;  %v10574_v15 = vpop.xlane.xlu0 %10573  ;;  %v10689_v56 = vsel %vm4588_vm1, %v19438_v30, 0.0  ;;  %v19443_v51 = vpop.eup %16572 }
0x1c6a   :  { %16582 = vpow2.f32 %v10660_v33  ;;  %v10620_v37 = vsub.f32 %v19341_v53, %v10574_v15  ;;  %10690 = vadd.xlane.f32.xlu1 %v10689_v56  ;;  %v10701_v43 = vsel %vm4588_vm1, %v19443_v51, 0.0 }
0x1c6b   :  { %v10658_v55 = vmul.f32 1.442695, %v10621_v0 }
0x1c6c   :  { %v19446_v17 = vpop.eup %16574  ;;  %v10656_v35 = vmul.f32 1.442695, %v10620_v37  ;;  %v10589_v42 = vpop.xlane.xlu1 %10588 }
0x1c6d   :  { %16584 = vpow2.f32 %v10658_v55  ;;  %v10625_v48 = vsub.f32 %v19355_v16, %v10589_v42  ;;  %v10568_v25 = vpop.xlane.xlu0 %10567  ;;  %v10698_v39 = vsel %vm4588_vm1, %v19446_v17, 0.0  ;;  %v19453_v31 = vpop.eup %16576 }
0x1c6e   :  { %16586 = vpow2.f32 %v10656_v35  ;;  %v10618_v53 = vsub.f32 %v19352_v20, %v10568_v25  ;;  %10702 = vadd.xlane.f32.xlu1 %v10701_v43  ;;  %10699 = vadd.xlane.f32.xlu0 %v10698_v39  ;;  %v10713_v34 = vsel %vm4588_vm1, %v19453_v31, 0.0 }
0x1c6f   :  { %v10666_v9 = vmul.f32 1.442695, %v10625_v48 }
0x1c70   :  { %v19456_v13 = vpop.eup %16578  ;;  %v10652_v50 = vmul.f32 1.442695, %v10618_v53  ;;  %v10583_v18 = vpop.xlane.xlu1 %10582 }
0x1c71   :  { %16588 = vpow2.f32 %v10666_v9  ;;  %v10623_v16 = vsub.f32 %v19363_v4, %v10583_v18  ;;  %v10692_v61 = vsel %vm4588_vm1, %v19456_v13, 0.0  ;;  %v19463_v21 = vpop.eup %16580 }
0x1c72   :  { %16590 = vpow2.f32 %v10652_v50  ;;  %10714 = vadd.xlane.f32.xlu1 %v10713_v34  ;;  %10693 = vadd.xlane.f32.xlu0 %v10692_v61  ;;  %v10707_v40 = vsel %vm4588_vm1, %v19463_v21, 0.0 }
0x1c73   :  { %v10662_v20 = vmul.f32 1.442695, %v10623_v16 }
0x1c74   :  { %v19465_v38 = vpop.eup %16582 }
0x1c75   :  { %16592 = vpow2.f32 %v10662_v20  ;;  %v10598_v22 = vpop.xlane.xlu0 %10597  ;;  %v10722_v4 = vsel %vm4588_vm1, %v19465_v38, 0.0 }
0x1c76   :  { %v10628_v54 = vsub.f32 %v19371_v47, %v10598_v22  ;;  %10708 = vadd.xlane.f32.xlu1 %v10707_v40  ;;  %10723 = vadd.xlane.f32.xlu0 %v10722_v4 }
0x1c77   :  { %v19472_v12 = vpop.eup %16584 }
0x1c78   :  { %v19474_v2 = vpop.eup %16586  ;;  %v10672_v28 = vmul.f32 1.442695, %v10628_v54  ;;  %v10595_v10 = vpop.xlane.xlu1 %10594  ;;  %v10719_v33 = vsel %vm4588_vm1, %v19472_v12, 0.0 }
0x1c79   :  { %v10627_v26 = vsub.f32 %v19379_v6, %v10595_v10  ;;  %v10592_v0 = vpop.xlane.xlu0 %10591  ;;  %v10716_v15 = vsel %vm4588_vm1, %v19474_v2, 0.0 }
0x1c7a   :  { %16594 = vpow2.f32 %v10672_v28  ;;  %v10626_v47 = vsub.f32 %v19374_v24, %v10592_v0  ;;  %10720 = vadd.xlane.f32.xlu1 %v10719_v33  ;;  %10717 = vadd.xlane.f32.xlu0 %v10716_v15 }
0x1c7b   :  { %v19482_v56 = vpop.eup %16588  ;;  %v10670_v55 = vmul.f32 1.442695, %v10627_v26 }
0x1c7c   :  { %v19484_v37 = vpop.eup %16590  ;;  %v10668_v35 = vmul.f32 1.442695, %v10626_v47  ;;  %v10685_v42 = vpop.xlane.xlu1 %10684  ;;  %v10731_v48 = vsel %vm4588_vm1, %v19482_v56, 0.0 }
0x1c7d   :  { %v10586_v6 = vpop.xlane.xlu0 %10585  ;;  %v10710_v25 = vsel %vm4588_vm1, %v19484_v37, 0.0 }
0x1c7e   :  { %16596 = vpow2.f32 %v10668_v35  ;;  %v10624_v43 = vsub.f32 %v19386_v14, %v10586_v6  ;;  %10732 = vadd.xlane.f32.xlu1 %v10731_v48  ;;  %10711 = vadd.xlane.f32.xlu0 %v10710_v25 }
0x1c7f   :  { %v19491_v24 = vpop.eup %16592  ;;  %16598 = vpow2.f32 %v10670_v55 }
0x1c80   :  { %v10664_v39 = vmul.f32 1.442695, %v10624_v43  ;;  %v10607_v53 = vpop.xlane.xlu1 %10606  ;;  %v10725_v9 = vsel %vm4588_vm1, %v19491_v24, 0.0 }
0x1c81   :  { %v10631_v50 = vsub.f32 %v19391_v3, %v10607_v53  ;;  %v10688_v18 = vpop.xlane.xlu0 %10687 }
0x1c82   :  { %16600 = vpow2.f32 %v10664_v39  ;;  %10726 = vadd.xlane.f32.xlu1 %v10725_v9  ;;  %v15572_v9 = vunpack.i.l.bf16 %v19335_v59 }
0x1c83   :  { %v10678_v16 = vmul.f32 1.442695, %v10631_v50  ;;  %16602 = vrcp.f32 %v10688_v18 }
0x1c84   :  { %v19496_v34 = vpop.eup %16594  ;;  %16604 = vrcp.f32 %v10685_v42  ;;  %v10601_v14 = vpop.xlane.xlu1 %10600 }
0x1c85   :  { %16606 = vpow2.f32 %v10678_v16  ;;  %v10629_v61 = vsub.f32 %v19400_v52, %v10601_v14  ;;  %v10682_v20 = vpop.xlane.xlu0 %10681  ;;  %v10740_v22 = vsel %vm4588_vm1, %v19496_v34, 0.0 }
0x1c86   :  { %16608 = vrcp.f32 %v10682_v20  ;;  %10741 = vadd.xlane.f32.xlu0 %v10740_v22 }
0x1c87   :  { %v10674_v40 = vmul.f32 1.442695, %v10629_v61 }
0x1c88   :  { %v19501_v3 = vpop.eup %16596 }
0x1c89   :  { %16610 = vpow2.f32 %v10674_v40  ;;  %v10604_v4 = vpop.xlane.xlu0 %10603  ;;  %v10734_v54 = vsel %vm4588_vm1, %v19501_v3, 0.0  ;;  %v19505_v28 = vpop.eup %16598 }
0x1c8a   :  { %v10630_v10 = vsub.f32 %v19411_v45, %v10604_v4  ;;  %10735 = vadd.xlane.f32.xlu1 %v10734_v54  ;;  %v10737_v0 = vsel %vm4588_vm1, %v19505_v28, 0.0 }
0x1c8c   :  { %v19508_v52 = vpop.eup %16600  ;;  %v10676_v33 = vmul.f32 1.442695, %v10630_v10 }
0x1c8d   :  { %v16603_v26 = vpop.eup %16602  ;;  %v10728_v15 = vsel %vm4588_vm1, %v19508_v52, 0.0 }
0x1c8e   :  { %v16605_v47 = vpop.eup %16604  ;;  %16612 = vpow2.f32 %v10676_v33  ;;  %10738 = vadd.xlane.f32.xlu1 %v10737_v0  ;;  %10729 = vadd.xlane.f32.xlu0 %v10728_v15  ;;  %v10778_v45 = vmul.f32 %v16603_v26, %v19397_v49  ;;  %v15573_v49 = vunpack.i.h.bf16 %v19335_v59 }
0x1c8f   :  { %v19514_v55 = vpop.eup %16606  ;;  %v10777_v6 = vmul.f32 %v16605_v47, %v19383_v27 }
0x1c90   :  { %v16609_v35 = vpop.eup %16608  ;;  %v10749_v42 = vsel %vm4588_vm1, %v19514_v55, 0.0  ;;  %v10801_v53 = vpack.c.bf16 %v10778_v45, %v10778_v45  ;;  %v10000_v18 = vpack.c.bf16 %v15573_v49, %v15572_v9 }
0x1c91   :  { %v10776_v48 = vmul.f32 %v16609_v35, %v19406_v36  ;;  %v9997_v36 = vpack.c.bf16 %v19256_v46, %v19256_v46  ;;  %v19542_v46 = vpop.permute.xlu1 %15585 }
0x1c92   :  { %10750 = vadd.xlane.f32.xlu0 %v10749_v42 }
0x1c93   :  { %v19521_v25 = vpop.eup %16610  ;;  %v10800_v43 = vpack.c.bf16 %v10777_v6, %v10776_v48  ;;  %v10937_v16 = vsel %vm19945_vm6, %v9997_v36, 0  ;;  %vm19952_vm6 = vmmov %vm19942_vm0 }
0x1c94   :  { %v10743_v39 = vsel %vm4588_vm1, %v19521_v25, 0.0 }
0x1c95   :  { %14875 = vmatprep.mubr.msk.bf16.mxu0 %vm4588_vm1, %v10800_v43  ;;  %10744 = vadd.xlane.f32.xlu1 %v10743_v39 }
0x1c96   :  { %14876 = vmatmul.mubr.msk.bf16.vlgmr.msra.gmra.mrb[180].mxu0 %vm4588_vm1, %v10801_v53 }
0x1c97   :  { %14888 = vmatpush3.bf16.msra.mxu0 %v19268_v44  ;;  %v15581_v44 = vpop.permute.xlu0 %15580 }
0x1c98   :  { %v19532_v27 = vpop.eup %16612  ;;  %15037 = vmatprep.subr.msk.bf16.mxu0 %vm19944_vm4, %v9997_v36  ;;  %v15582_v36 = vunpack.i.l.bf16 %v15581_v44  ;;  %vm19951_vm4 = vmmov %vm19942_vm0 }
0x1c99   :  { %v10746_v50 = vsel %vm4588_vm1, %v19532_v27, 0.0 }
0x1c9a   :  { %10747 = vadd.xlane.f32.xlu0 %v10746_v50 }
0x1c9b   :  { %14890 = vmatpush3.bf16.msra.mxu0 %v10937_v16 }
0x1c9c   :  { %14903 = vmatprep.subr.bf16.mxu0 %v10000_v18 }
0x1ca6   :  { %9987 = vrot.lane.b32.xlu1 %v19184_v58, %s17232_s26 }
0x1cb0   :  { %9978 = vrot.lane.b32.xlu0 %v19184_v58, %s17236_s15 }
0x1ce9   :  { %v10697_v59 = vpop.xlane.xlu1 %10696 }
0x1cf3   :  { %v10706_v14 = vpop.xlane.xlu0 %10705 }
0x1cf4   :  { %16614 = vrcp.f32 %v10706_v14 }
0x1cf7   :  { %v10691_v61 = vpop.xlane.xlu1 %10690 }
0x1cfb   :  { %v10703_v20 = vpop.xlane.xlu1 %10702  ;;  %v10700_v22 = vpop.xlane.xlu0 %10699 }
0x1cfc   :  { %16616 = vrcp.f32 %v10703_v20 }
0x1cfd   :  { %16618 = vrcp.f32 %v10700_v22 }
0x1cfe   :  { %16620 = vrcp.f32 %v10697_v59  ;;  %v16615_v33 = vpop.eup %16614 }
0x1cff   :  { %16622 = vrcp.f32 %v10691_v61  ;;  %v10715_v40 = vpop.xlane.xlu1 %10714  ;;  %v10694_v4 = vpop.xlane.xlu0 %10693  ;;  %v10784_v0 = vmul.f32 %v16615_v33, %v19433_v8  ;;  %v10001_v8 = vpack.c.bf16 %v19246_v5, %v19246_v5 }
0x1d00   :  { %16624 = vrcp.f32 %v10694_v4 }
0x1d01   :  { %v10805_v49 = vpack.c.bf16 %v10784_v0, %v10784_v0  ;;  %v11051_v5 = vsel %vm19947_vm8, %v10001_v8, 0  ;;  %vm19954_vm8 = vmmov %vm19942_vm0 }
0x1d03   :  { %v10709_v54 = vpop.xlane.xlu1 %10708  ;;  %v10724_v10 = vpop.xlane.xlu0 %10723 }
0x1d04   :  { %16626 = vrcp.f32 %v10724_v10 }
0x1d06   :  { %v16617_v58 = vpop.eup %16616 }
0x1d07   :  { %v16619_v26 = vpop.eup %16618  ;;  %v10721_v15 = vpop.xlane.xlu1 %10720  ;;  %v10783_v35 = vmul.f32 %v16617_v58, %v19443_v51 }
0x1d08   :  { %v10718_v47 = vpop.xlane.xlu0 %10717  ;;  %v16621_v45 = vpop.eup %16620  ;;  %16628 = vrcp.f32 %v10721_v15  ;;  %v10782_v42 = vmul.f32 %v16619_v26, %v19446_v17  ;;  %v15583_v17 = vunpack.i.h.bf16 %v15581_v44  ;;  %v15577_v44 = vunpack.i.l.bf16 %v19331_v23 }
0x1d09   :  { %v16623_v48 = vpop.eup %16622  ;;  %16630 = vrcp.f32 %v10718_v47  ;;  %v10781_v39 = vmul.f32 %v16621_v45, %v19424_v29  ;;  %v10003_v45 = vpack.c.bf16 %v19266_v60, %v19266_v60 }
0x1d0a   :  { %16632 = vrcp.f32 %v10715_v40  ;;  %v10804_v6 = vpack.c.bf16 %v10783_v35, %v10782_v42  ;;  %v16625_v43 = vpop.eup %16624  ;;  %v10779_v51 = vmul.f32 %v16623_v48, %v19438_v30  ;;  %v9999_v30 = vpack.c.bf16 %v19259_v57, %v19259_v57 }
0x1d0b   :  { %16634 = vrcp.f32 %v10709_v54  ;;  %v10780_v9 = vmul.f32 %v16625_v43, %v19456_v13  ;;  %v10733_v50 = vpop.xlane.xlu1 %10732  ;;  %v10803_v16 = vpack.c.bf16 %v10781_v39, %v10781_v39  ;;  %v15578_v13 = vunpack.i.h.bf16 %v19331_v23 }
0x1d0c   :  { %v10712_v53 = vpop.xlane.xlu0 %10711  ;;  %14891 = vmatprep.mubr.msk.bf16.mxu0 %vm4588_vm1, %v10804_v6  ;;  %v10004_v14 = vpack.c.bf16 %v15583_v17, %v15582_v36  ;;  %v10994_v54 = vsel %vm19949_vm11, %v9999_v30, 0  ;;  %v11108_v42 = vsel %vm19950_vm3, %v10003_v45, 0 }
0x1d0d   :  { %16636 = vrcp.f32 %v10712_v53  ;;  %14892 = vmatmul.mubr.msk.bf16.vlgmr.msra.gmra.mrb[184].mxu0 %vm4588_vm1, %v10805_v49  ;;  %v10802_v29 = vpack.c.bf16 %v10780_v9, %v10779_v51  ;;  %v10002_v10 = vpack.c.bf16 %v15578_v13, %v15577_v44 }
0x1d0e   :  { %14904 = vmatpush3.bf16.msra.mxu0 %v10000_v18  ;;  %v16627_v59 = vpop.eup %16626  ;;  %16638 = vrcp.f32 %v10733_v50 }
0x1d0f   :  { %15039 = vmatprep.subr.msk.bf16.mxu0 %vm19946_vm7, %v10001_v8  ;;  %14883 = vmatprep.mubr.msk.bf16.mxu1 %vm4588_vm1, %v10802_v29  ;;  %v10790_v20 = vmul.f32 %v16627_v59, %v19465_v38  ;;  %v10727_v22 = vpop.xlane.xlu1 %10726  ;;  %vm19953_vm7 = vmmov %vm19942_vm0 }
0x1d10   :  { %14884 = vmatmul.mubr.msk.bf16.vlgmr.msra.gmra.mrb[184].mxu1 %vm4588_vm1, %v10803_v16 }
0x1d11   :  { %14896 = vmatpush3.bf16.msra.mxu1 %v19275_v7  ;;  %v10809_v0 = vpack.c.bf16 %v10790_v20, %v10790_v20 }
0x1d12   :  { %v16629_v18 = vpop.eup %16628  ;;  %14906 = vmatpush3.bf16.msra.mxu0 %v11051_v5  ;;  %15038 = vmatprep.subr.msk.bf16.mxu1 %vm19948_vm10, %v9999_v30  ;;  %vm19955_vm10 = vcmask 130048  }
0x1d13   :  { %v16631_v61 = vpop.eup %16630  ;;  %14919 = vmatprep.subr.bf16.mxu0 %v10004_v14  ;;  %v10789_v57 = vmul.f32 %v16629_v18, %v19472_v12  ;;  %v10742_v26 = vpop.xlane.xlu0 %10741  ;;  %vm19956_vm11 = vmmov %vm19955_vm10 }
0x1d14   :  { %v16633_v40 = vpop.eup %16632  ;;  %v10788_v4 = vmul.f32 %v16631_v61, %v19474_v2 }
0x1d15   :  { %v16635_v23 = vpop.eup %16634  ;;  %14898 = vmatpush3.bf16.msra.mxu1 %v10994_v54  ;;  %v10787_v58 = vmul.f32 %v16633_v40, %v19453_v31 }
0x1d16   :  { %v10808_v33 = vpack.c.bf16 %v10789_v57, %v10788_v4  ;;  %14911 = vmatprep.subr.bf16.mxu1 %v10002_v10  ;;  %v10785_v12 = vmul.f32 %v16635_v23, %v19463_v21  ;;  %v15588_v21 = vunpack.i.h.bf16 %v19542_v46 }
0x1d17   :  { %v16637_v7 = vpop.eup %16636  ;;  %v10736_v38 = vpop.xlane.xlu1 %10735  ;;  %v10807_v31 = vpack.c.bf16 %v10787_v58, %v10787_v58 }
0x1d18   :  { %14907 = vmatprep.mubr.msk.bf16.mxu0 %vm4588_vm1, %v10808_v33  ;;  %v10786_v15 = vmul.f32 %v16637_v7, %v19484_v37  ;;  %16640 = vrcp.f32 %v10736_v38  ;;  %v15587_v37 = vunpack.i.l.bf16 %v19542_v46  ;;  %v16639_v43 = vpop.eup %16638 }
0x1d19   :  { %14908 = vmatmul.mubr.msk.bf16.vlgmr.msra.gmra.mrb[188].mxu0 %vm4588_vm1, %v10809_v0  ;;  %16642 = vrcp.f32 %v10727_v22  ;;  %v10793_v8 = vmul.f32 %v16639_v43, %v19482_v56 }
0x1d1a   :  { %14920 = vmatpush3.bf16.msra.mxu0 %v10004_v14  ;;  %v10806_v2 = vpack.c.bf16 %v10786_v15, %v10785_v12  ;;  %v10006_v48 = vpack.c.bf16 %v15588_v21, %v15587_v37  ;;  %v16186_v15 = vld [vmem:[#allocation9 + $0x80] sm:$0xff]  }
0x1d1b   :  { %v10739_v47 = vpop.xlane.xlu1 %10738  ;;  %v10730_v35 = vpop.xlane.xlu0 %10729  ;;  %v10811_v13 = vpack.c.bf16 %v10793_v8, %v10793_v8  ;;  %v16192_v8 = vld [vmem:[#allocation9 + $0xb0] sm:$0xff]  }
0x1d1c   :  { %16644 = vrcp.f32 %v10739_v47  ;;  %14899 = vmatprep.mubr.msk.bf16.mxu1 %vm4588_vm1, %v10806_v2 }
0x1d1d   :  { %16646 = vrcp.f32 %v10730_v35  ;;  %14900 = vmatmul.mubr.msk.bf16.vlgmr.msra.gmra.mrb[188].mxu1 %vm4588_vm1, %v10807_v31 }
0x1d1e   :  { %14912 = vmatpush3.bf16.msra.mxu1 %v10002_v10  ;;  %16648 = vrcp.f32 %v10742_v26 }
0x1d1f   :  { %15040 = vmatprep.subr.msk.bf16.mxu1 %vm19942_vm0, %v10003_v45  ;;  %v10751_v6 = vpop.xlane.xlu0 %10750  ;;  %v16187_v45 = vld [vmem:[#allocation9 + $0x88] sm:$0xff]   ;;  %vm19957_vm0 = vmmov %vm19955_vm10 }
0x1d20   :  { %16650 = vrcp.f32 %v10751_v6 }
0x1d22   :  { %14914 = vmatpush3.bf16.msra.mxu1 %v11108_v42  ;;  %v10745_v39 = vpop.xlane.xlu1 %10744  ;;  %v16641_v60 = vpop.eup %16640 }
0x1d23   :  { %14927 = vmatprep.subr.bf16.mxu1 %v10006_v48  ;;  %v16643_v53 = vpop.eup %16642  ;;  %16652 = vrcp.f32 %v10745_v39  ;;  %v10794_v9 = vmul.f32 %v16641_v60, %v19501_v3  ;;  %v16188_v39 = vld [vmem:[#allocation9 + $0x90] sm:$0xff]   ;;  %v16189_v60 = vld [vmem:[#allocation9 + $0x98] sm:$0xff]  }
0x1d24   :  { %v10791_v36 = vmul.f32 %v16643_v53, %v19491_v24  ;;  %v16190_v53 = vld [vmem:[#allocation9 + $0xa0] sm:$0xff]  }
0x1d26   :  { %v16645_v49 = vpop.eup %16644  ;;  %v9988_v59 = vpop.permute.xlu1 %9987 }
0x1d27   :  { %v16647_v46 = vpop.eup %16646  ;;  %v10748_v51 = vpop.xlane.xlu0 %10747  ;;  %v10795_v17 = vmul.f32 %v16645_v49, %v19505_v28  ;;  %v10007_v44 = vpack.c.bf16 %v9988_v59, %v9988_v59 }
0x1d28   :  { %16654 = vrcp.f32 %v10748_v51  ;;  %v10792_v50 = vmul.f32 %v16647_v46, %v19508_v52  ;;  %v16649_v29 = vpop.eup %16648  ;;  %v16191_v46 = vld [vmem:[#allocation9 + $0xa8] sm:$0xff]  }
0x1d29   :  { %v10812_v16 = vpack.c.bf16 %v10795_v17, %v10794_v9  ;;  %v10796_v56 = vmul.f32 %v16649_v29, %v19496_v34  ;;  %v11222_v18 = vsel %vm19954_vm8, %v10007_v44, 0 }
0x1d2a   :  { %v10810_v5 = vpack.c.bf16 %v10792_v50, %v10791_v36  ;;  %v16651_v28 = vpop.eup %16650  ;;  %v16193_v50 = vld [vmem:[#allocation9 + $0xb8] sm:$0xff]  }
0x1d2b   :  { %14923 = vmatprep.mubr.msk.bf16.mxu0 %vm4588_vm1, %v10812_v16  ;;  %v9979_v30 = vpop.permute.xlu0 %9978  ;;  %v10813_v14 = vpack.c.bf16 %v10796_v56, %v10796_v56  ;;  %v10799_v61 = vmul.f32 %v16651_v28, %v19514_v55 }
0x1d2c   :  { %14915 = vmatprep.mubr.msk.bf16.mxu1 %vm4588_vm1, %v10810_v5  ;;  %v10005_v3 = vpack.c.bf16 %v9979_v30, %v9979_v30 }
0x1d2d   :  { %14916 = vmatmul.mubr.msk.bf16.vlgmr.msra.gmra.mrb[192].mxu1 %vm4588_vm1, %v10811_v13  ;;  %v16653_v52 = vpop.eup %16652  ;;  %v10815_v40 = vpack.c.bf16 %v10799_v61, %v10799_v61 }
0x1d2e   :  { %v11165_v24 = vsel %vm19951_vm4, %v10005_v3, 0  ;;  %14928 = vmatpush3.bf16.msra.mxu1 %v10006_v48  ;;  %15041 = vmatprep.subr.msk.bf16.mxu0 %vm19952_vm6, %v10005_v3  ;;  %v10797_v20 = vmul.f32 %v16653_v52, %v19521_v25 }
0x1d2f   :  { %15042 = vmatprep.subr.msk.bf16.mxu1 %vm19953_vm7, %v10007_v44  ;;  %14922 = vmatpush3.bf16.msra.mxu0 %v11165_v24 }
0x1d30   :  { %14935 = vmatprep.subr.bf16.mxu0 %v16186_v15 }
0x1d32   :  { %v16655_v34 = vpop.eup %16654  ;;  %14930 = vmatpush3.bf16.msra.mxu1 %v11222_v18  ;;  %14924 = vmatmul.mubr.msk.bf16.vlgmr.msra.gmra.mrb[192].mxu0 %vm4588_vm1, %v10813_v14 }
0x1d33   :  { %v10798_v22 = vmul.f32 %v16655_v34, %v19532_v27  ;;  %14936 = vmatpush3.bf16.msra.mxu0 %v16186_v15 }
0x1d34   :  { %14937 = vmatprep.subr.bf16.mxu0 %v16187_v45 }
0x1d35   :  { %v10814_v57 = vpack.c.bf16 %v10798_v22, %v10797_v20 }
0x1d37   :  { %14931 = vmatprep.mubr.msk.bf16.mxu1 %vm4588_vm1, %v10814_v57  ;;  %14938 = vmatpush3.bf16.msra.mxu0 %v16187_v45 }
0x1d38   :  { %14932 = vmatmul.mubr.msk.bf16.vlgmr.msra.gmra.mrb[196].mxu1 %vm4588_vm1, %v10815_v40  ;;  %14939 = vmatprep.subr.bf16.mxu0 %v16188_v39 }
0x1d39   :  { %11705 = vmatprep.mubr.bf16.mxu1 %v17259_v32 }
0x1d3b   :  { %14940 = vmatpush3.bf16.msra.mxu0 %v16188_v39 }
0x1d3c   :  { %14941 = vmatprep.subr.bf16.mxu0 %v16189_v60 }
0x1d3f   :  { %14942 = vmatpush3.bf16.msra.mxu0 %v16189_v60 }
0x1d40   :  { %14943 = vmatprep.subr.bf16.mxu0 %v16190_v53 }
0x1d43   :  { %14944 = vmatpush3.bf16.msra.mxu0 %v16190_v53 }
0x1d44   :  { %14945 = vmatprep.subr.bf16.mxu0 %v16191_v46 }
0x1d47   :  { %14946 = vmatpush3.bf16.msra.mxu0 %v16191_v46 }
0x1d48   :  { %14947 = vmatprep.subr.bf16.mxu0 %v16192_v8 }
0x1d4b   :  { %14948 = vmatpush3.bf16.msra.mxu0 %v16192_v8 }
0x1d4c   :  { %14949 = vmatprep.subr.bf16.mxu0 %v16193_v50 }
0x1d4f   :  { %14950 = vmatpush3.bf16.msra.mxu0 %v16193_v50 }
0x1d69   :  { %v19601_v4 = vpop.f32.mrb[180].mxu0 }
0x1d6a   :  { %v19603_v23 = vpop.f32.mrb[181].mxu0 }
0x1d6b   :  { %v14878_v55 = vpop.f32.mrb[182].mxu0 }
0x1d6c   :  { %v19605_v54 = vpop.f32.mrb[183].mxu0 }
0x1de0   :  { %v14893_v10 = vpop.f32.mrb[184].mxu0 }
0x1de1   :  { %v10973_v33 = vpop.f32.mrb[185].mxu0 }
0x1de2   :  { %v14894_v25 = vpop.f32.mrb[186].mxu0 }
0x1de3   :  { %v10976_v7 = vpop.f32.mrb[187].mxu0  ;;  %v14885_v58 = vpop.f32.mrb[184].mxu1 }
0x1de4   :  { %v15594_v27 = vpack.i.bf16 %v10976_v7, %v10973_v33  ;;  %11279 = vrot.lane.b32.xlu1 %v14885_v58, %s17232_s26  ;;  %v10916_v26 = vpop.f32.mrb[185].mxu1 }
0x1de5   :  { %v14886_v38 = vpop.f32.mrb[186].mxu1 }
0x1de6   :  { %v10919_v0 = vpop.f32.mrb[187].mxu1 }
0x1de7   :  { %v15589_v12 = vpack.i.bf16 %v10919_v0, %v10916_v26 }
0x1de8   :  { %11291 = vrot.lane.b32.xlu1 %v14893_v10, %s17236_s15 }
0x1de9   :  { %15590 = vrot.lane.b32.xlu0 %v15589_v12, %s17232_s26 }
0x1dec   :  { %v14909_v2 = vpop.f32.mrb[188].mxu0 }
0x1ded   :  { %v11087_v47 = vpop.f32.mrb[189].mxu0  ;;  %15595 = vrot.lane.b32.xlu0 %v15594_v27, %s17236_s15 }
0x1dee   :  { %v14910_v35 = vpop.f32.mrb[190].mxu0 }
0x1def   :  { %v11090_v31 = vpop.f32.mrb[191].mxu0 }
0x1df0   :  { %v15604_v21 = vpack.i.bf16 %v11090_v31, %v11087_v47  ;;  %v14901_v37 = vpop.f32.mrb[188].mxu1 }
0x1df1   :  { %11303 = vrot.lane.b32.xlu1 %v14901_v37, %s17229_s7  ;;  %v11030_v42 = vpop.f32.mrb[189].mxu1 }
0x1df2   :  { %v14902_v48 = vpop.f32.mrb[190].mxu1 }
0x1df3   :  { %v11033_v6 = vpop.f32.mrb[191].mxu1 }
0x1df4   :  { %v15599_v43 = vpack.i.bf16 %v11033_v6, %v11030_v42 }
0x1df5   :  { %11315 = vrot.lane.b32.xlu1 %v14909_v2, %s17245_s16 }
0x1df6   :  { %15600 = vrot.lane.b32.xlu0 %v15599_v43, %s17229_s7 }
0x1dfa   :  { %15605 = vrot.lane.b32.xlu0 %v15604_v21, %s17245_s16 }
0x1e00   :  { %v14917_v49 = vpop.f32.mrb[192].mxu1 }
0x1e01   :  { %11327 = vrot.lane.b32.xlu1 %v14917_v49, %s17261_s0  ;;  %v11144_v51 = vpop.f32.mrb[193].mxu1 }
0x1e02   :  { %v14918_v9 = vpop.f32.mrb[194].mxu1 }
0x1e03   :  { %v11147_v17 = vpop.f32.mrb[195].mxu1 }
0x1e04   :  { %v15609_v36 = vpack.i.bf16 %v11147_v17, %v11144_v51 }
0x1e05   :  { %v14925_v29 = vpop.f32.mrb[192].mxu0 }
0x1e06   :  { %15610 = vrot.lane.b32.xlu0 %v15609_v36, %s17261_s0  ;;  %11339 = vrot.lane.b32.xlu1 %v14925_v29, %s17262_s9  ;;  %v11201_v16 = vpop.f32.mrb[193].mxu0 }
0x1e07   :  { %v14926_v59 = vpop.f32.mrb[194].mxu0 }
0x1e08   :  { %v11204_v5 = vpop.f32.mrb[195].mxu0 }
0x1e09   :  { %v15614_v30 = vpack.i.bf16 %v11204_v5, %v11201_v16 }
0x1e0b   :  { %v14933_v13 = vpop.f32.mrb[196].mxu1  ;;  %15615 = vrot.lane.b32.xlu0 %v15614_v30, %s17262_s9 }
0x1e0c   :  { %v11258_v56 = vpop.f32.mrb[197].mxu1  ;;  %11351 = vrot.lane.b32.xlu1 %v14933_v13, %s17260_s20  ;;  %v13511_v13 = vld [vmem:[#allocation10 + $0x2] ss:$0 sm:$0xff] }
0x1e0d   :  { %v14934_v3 = vpop.f32.mrb[198].mxu1 }
0x1e0e   :  { %v11261_v44 = vpop.f32.mrb[199].mxu1 }
0x1e0f   :  { %v15619_v24 = vpack.i.bf16 %v11261_v44, %v11258_v56 }
0x1e11   :  { %15620 = vrot.lane.b32.xlu0 %v15619_v24, %s17260_s20 }
0x1e56   :  { %v11280_v28 = vpop.permute.xlu1 %11279 }
0x1e57   :  { %v11358_v25 = vsel %vm19955_vm10, %v19601_v4, %v11280_v28 }
0x1e5a   :  { %v11292_v14 = vpop.permute.xlu1 %11291 }
0x1e5b   :  { %v15591_v52 = vpop.permute.xlu0 %15590  ;;  %v11361_v27 = vsel %vm5413_vm12, %v11358_v25, %v11292_v14 }
0x1e5c   :  { %v15593_v55 = vunpack.i.h.bf16 %v15591_v52  ;;  %v15592_v10 = vunpack.i.l.bf16 %v15591_v52 }
0x1e5e   :  { %v11357_v12 = vsel %vm19956_vm11, %v19605_v54, %v15593_v55  ;;  %v11356_v15 = vsel %vm19957_vm0, %v19603_v23, %v15592_v10 }
0x1e5f   :  { %v15596_v18 = vpop.permute.xlu0 %15595 }
0x1e60   :  { %v15597_v33 = vunpack.i.l.bf16 %v15596_v18  ;;  %v15598_v7 = vunpack.i.h.bf16 %v15596_v18 }
0x1e62   :  { %v11359_v35 = vsel %vm5413_vm12, %v11356_v15, %v15597_v33  ;;  %v11360_v21 = vsel %vm5413_vm12, %v11357_v12, %v15598_v7  ;;  %v16205_v12 = vld [vmem:[#allocation15 + $0x134] ss:$8 sps:$4 sm:$0xff]   ;;  %v16203_v15 = vld [vmem:[#allocation15 + $0x130] ss:$8 sps:$4 sm:$0xff]   ;;  %vm17265_vm12 = vmmov 0  }
0x1e63   :  { %v11304_v34 = vpop.permute.xlu1 %11303 }
0x1e64   :  { %v11364_v31 = vsel %vm5417_vm13, %v11361_v27, %v11304_v34 }
0x1e67   :  { %v11316_v20 = vpop.permute.xlu1 %11315 }
0x1e68   :  { %v15601_v61 = vpop.permute.xlu0 %15600  ;;  %v11367_v37 = vsel %vm5421_vm2, %v11364_v31, %v11316_v20  ;;  %v16199_v20 = vld [vmem:[#allocation15 + $0x114] ss:$8 sps:$4 sm:$0xff]   ;;  %v16209_v31 = vld [vmem:[#allocation15 + $0x150] ss:$8 sps:$4 sm:$0xff]  }
0x1e69   :  { %v15603_v58 = vunpack.i.h.bf16 %v15601_v61  ;;  %v15602_v26 = vunpack.i.l.bf16 %v15601_v61  ;;  %v16194_v61 = vld [vmem:[#allocation15 + $0x100] ss:$8 sps:$4 sm:$0xff]  }
0x1e6b   :  { %v11362_v6 = vsel %vm5417_vm13, %v11359_v35, %v15602_v26  ;;  %v11363_v54 = vsel %vm5417_vm13, %v11360_v21, %v15603_v58  ;;  %v16211_v35 = vld [vmem:[#allocation15 + $0x154] ss:$8 sps:$4 sm:$0xff]   ;;  %vm19958_vm13 = vmmov %vm19950_vm3 }
0x1e6c   :  { %v15606_v22 = vpop.permute.xlu0 %15605  ;;  %v16217_v21 = vld [vmem:[#allocation15 + $0x174] ss:$8 sps:$4 sm:$0xff]  }
0x1e6d   :  { %v15608_v2 = vunpack.i.h.bf16 %v15606_v22  ;;  %v15607_v47 = vunpack.i.l.bf16 %v15606_v22 }
0x1e6f   :  { %v11365_v39 = vsel %vm5421_vm2, %v11362_v6, %v15607_v47  ;;  %v11366_v60 = vsel %vm5421_vm2, %v11363_v54, %v15608_v2  ;;  %v16208_v2 = vld [vmem:[#allocation15 + $0x144] ss:$8 sps:$4 sm:$0xff]   ;;  %v16206_v47 = vld [vmem:[#allocation15 + $0x140] ss:$8 sps:$4 sm:$0xff]  }
0x1e73   :  { %v11328_v57 = vpop.permute.xlu1 %11327 }
0x1e74   :  { %v11370_v23 = vsel %vm5425_vm9, %v11367_v37, %v11328_v57  ;;  %v16215_v37 = vld [vmem:[#allocation15 + $0x170] ss:$8 sps:$4 sm:$0xff]  }
0x1e78   :  { %v15611_v40 = vpop.permute.xlu0 %15610  ;;  %v11340_v38 = vpop.permute.xlu1 %11339 }
0x1e79   :  { %v15613_v4 = vunpack.i.h.bf16 %v15611_v40  ;;  %v15612_v45 = vunpack.i.l.bf16 %v15611_v40  ;;  %v11373_v53 = vsel %vm5429_vm14, %v11370_v23, %v11340_v38  ;;  %v16202_v38 = vld [vmem:[#allocation15 + $0x124] ss:$8 sps:$4 sm:$0xff]  }
0x1e7b   :  { %v11368_v46 = vsel %vm5425_vm9, %v11365_v39, %v15612_v45  ;;  %v11369_v8 = vsel %vm5425_vm9, %v11366_v60, %v15613_v4  ;;  %v16212_v4 = vld [vmem:[#allocation15 + $0x160] ss:$8 sps:$4 sm:$0xff]   ;;  %v16214_v45 = vld [vmem:[#allocation15 + $0x164] ss:$8 sps:$4 sm:$0xff]  }
0x1e7d   :  { %v15616_v0 = vpop.permute.xlu0 %15615 }
0x1e7e   :  { %v15618_v42 = vunpack.i.h.bf16 %v15616_v0  ;;  %v15617_v48 = vunpack.i.l.bf16 %v15616_v0  ;;  %v11352_v43 = vpop.permute.xlu1 %11351  ;;  %v16200_v0 = vld [vmem:[#allocation15 + $0x120] ss:$8 sps:$4 sm:$0xff]  }
0x1e7f   :  { %v11376_v50 = vsel %vm5433_vm5, %v11373_v53, %v11352_v43 }
0x1e80   :  { %v11372_v17 = vsel %vm5429_vm14, %v11369_v8, %v15618_v42  ;;  %v11371_v36 = vsel %vm5429_vm14, %v11368_v46, %v15617_v48  ;;  %v11378_v5 = vpack.c.bf16 %v11376_v50, %v11376_v50  ;;  %v16220_v42 = vld [vmem:[#allocation24 + $0x104] ss:$8 sps:$4 sm:$0xff]  }
0x1e83   :  { %v15621_v49 = vpop.permute.xlu0 %15620 }
0x1e84   :  { %v15623_v51 = vunpack.i.h.bf16 %v15621_v49  ;;  %v15622_v9 = vunpack.i.l.bf16 %v15621_v49 }
0x1e86   :  { %v11374_v29 = vsel %vm5433_vm5, %v11371_v36, %v15622_v9  ;;  %v11375_v16 = vsel %vm5433_vm5, %v11372_v17, %v15623_v51  ;;  %v13512_v51 = vld [vmem:[#allocation12 + $0x2] ss:$0 sm:$0xff] }
0x1e87   :  { %v11377_v59 = vpack.c.bf16 %v11375_v16, %v11374_v29  ;;  %v13513_v29 = vld [vmem:[#allocation13 + $0x2] ss:$0 sm:$0xff] }
0x1e89   :  { %14951 = vmatprep.mubr.bf16.mxu0 %v11377_v59 }
0x1e8a   :  { %14952 = vmatmul.mubr.bf16.vlgmr.msra.gmra.mrb[196].mxu0 %v11378_v5 }
0x1f5d   :  { %v14953_v30 = vpop.f32.mrb[196].mxu0 }
0x1f5e   :  { %v11478_v56 = vpop.f32.mrb[197].mxu0  ;;  %v11494_v28 = vadd.f32 %v14953_v30, %v19105_v11  ;;  %v16197_v11 = vld [vmem:[#allocation15 + $0x110] ss:$8 sps:$4 sm:$0xff]  }
0x1f5f   :  { %v11492_v3 = vadd.f32 %v11478_v56, %v19097_v41  ;;  %v14954_v44 = vpop.f32.mrb[198].mxu0  ;;  %v16196_v41 = vld [vmem:[#allocation15 + $0x104] ss:$8 sps:$4 sm:$0xff]  }
0x1f60   :  { %v11481_v24 = vpop.f32.mrb[199].mxu0  ;;  %v19653_v34 = vadd.f32 %v13511_v13, %v11494_v28  ;;  %11673 = vmatprep.subr.bf16.mxu1 %v16196_v41  ;;  %v16226_v28 = vld [vmem:[#allocation24 + $0x124] ss:$8 sps:$4 sm:$0xff]  }
0x1f61   :  { %v19647_v52 = vadd.f32 %v13511_v13, %v11492_v3  ;;  %v11493_v14 = vadd.f32 %v11481_v24, %v19100_v19  ;;  %11674 = vmatpush1.bf16.msra.mxu1 %v16194_v61  ;;  %v16223_v3 = vld [vmem:[#allocation24 + $0x114] ss:$8 sps:$4 sm:$0xff]   ;;  %v16221_v24 = vld [vmem:[#allocation24 + $0x110] ss:$8 sps:$4 sm:$0xff]   ;;  %v16224_v61 = vld [vmem:[#allocation24 + $0x120] ss:$8 sps:$4 sm:$0xff]  }
0x1f62   :  { %11675 = vmatprep.subr.bf16.mxu1 %v16199_v20  ;;  %v16229_v20 = vld [vmem:[#allocation24 + $0x134] ss:$8 sps:$4 sm:$0xff]  }
0x1f63   :  { %v19650_v18 = vadd.f32 %v13511_v13, %v11493_v14  ;;  %11510 = vadd.xlane.f32.xlu0 %v19647_v52  ;;  %v16218_v13 = vld [vmem:[#allocation24 + $0x100] ss:$8 sps:$4 sm:$0xff]  }
0x1f65   :  { %11512 = vadd.xlane.f32.xlu1 %v19650_v18  ;;  %11676 = vmatpush1.bf16.msra.mxu1 %v16197_v11  ;;  %v16227_v11 = vld [vmem:[#allocation24 + $0x130] ss:$8 sps:$4 sm:$0xff]  }
0x1f66   :  { %11677 = vmatprep.subr.bf16.mxu1 %v16202_v38 }
0x1f67   :  { %11514 = vadd.xlane.f32.xlu0 %v19653_v34 }
0x1f69   :  { %11678 = vmatpush1.bf16.msra.mxu1 %v16200_v0 }
0x1f6a   :  { %11679 = vmatprep.subr.bf16.mxu1 %v16205_v12 }
0x1f6d   :  { %11680 = vmatpush1.bf16.msra.mxu1 %v16203_v15 }
0x1f6e   :  { %11681 = vmatprep.subr.bf16.mxu1 %v16208_v2 }
0x1f71   :  { %11682 = vmatpush1.bf16.msra.mxu1 %v16206_v47 }
0x1f72   :  { %11683 = vmatprep.subr.bf16.mxu1 %v16211_v35  ;;  %v16242_v35 = vld [vmem:[#allocation18 + $0x140] sm:$0xff]  }
0x1f73   :  { %14367 = vmatprep.subr.bf16.mxu0 %v16242_v35 }
0x1f75   :  { %11684 = vmatpush1.bf16.msra.mxu1 %v16209_v31  ;;  %v16243_v31 = vld [vmem:[#allocation18 + $0x100] sm:$0xff]  }
0x1f76   :  { %11685 = vmatprep.subr.bf16.mxu1 %v16214_v45  ;;  %14368 = vmatpush3.bf16.msra.mxu0 %v16243_v31  ;;  %v16245_v45 = vld [vmem:[#allocation18 + $0x108] sm:$0xff]  }
0x1f79   :  { %11686 = vmatpush1.bf16.msra.mxu1 %v16212_v4  ;;  %v16244_v4 = vld [vmem:[#allocation18 + $0x148] sm:$0xff]  }
0x1f7a   :  { %11687 = vmatprep.subr.bf16.mxu1 %v16217_v21  ;;  %14369 = vmatprep.subr.bf16.mxu0 %v16244_v4  ;;  %v16246_v21 = vld [vmem:[#allocation18 + $0x150] sm:$0xff]  }
0x1f7b   :  { %14370 = vmatpush3.bf16.msra.mxu0 %v16245_v45 }
0x1f7c   :  { %14371 = vmatprep.subr.bf16.mxu0 %v16246_v21 }
0x1f7d   :  { %11688 = vmatpush1.bf16.msra.mxu1 %v16215_v37  ;;  %v16247_v37 = vld [vmem:[#allocation18 + $0x110] sm:$0xff]  }
0x1f7e   :  { %12101 = vmatprep.subr.bf16.mxu1 %v16220_v42  ;;  %v16248_v42 = vld [vmem:[#allocation18 + $0x158] sm:$0xff]  }
0x1f7f   :  { %14372 = vmatpush3.bf16.msra.mxu0 %v16247_v37 }
0x1f80   :  { %14373 = vmatprep.subr.bf16.mxu0 %v16248_v42 }
0x1ff0   :  { %v11511_v22 = vpop.xlane.xlu0 %11510 }
0x1ff1   :  { %v11516_v19 = vmul.f32 0.0078125, %v11511_v22  ;;  %v16232_v22 = vld [vmem:[#allocation24 + $0x144] ss:$8 sps:$4 sm:$0xff]  }
0x1ff2   :  { %v11513_v57 = vpop.xlane.xlu1 %11512 }
0x1ff3   :  { %v11519_v40 = vsub.f32 %v19647_v52, %v11516_v19  ;;  %v11517_v55 = vmul.f32 0.0078125, %v11513_v57  ;;  %v16230_v19 = vld [vmem:[#allocation24 + $0x140] ss:$8 sps:$4 sm:$0xff]   ;;  %v16235_v57 = vld [vmem:[#allocation24 + $0x154] ss:$8 sps:$4 sm:$0xff]  }
0x1ff4   :  { %v11515_v10 = vpop.xlane.xlu0 %11514 }
0x1ff5   :  { %v11520_v33 = vsub.f32 %v19650_v18, %v11517_v55  ;;  %v11518_v25 = vmul.f32 0.0078125, %v11515_v10  ;;  %v11522_v7 = vmul.f32 %v11519_v40, %v11519_v40  ;;  %v16238_v55 = vld [vmem:[#allocation24 + $0x164] ss:$8 sps:$4 sm:$0xff]   ;;  %v13547_v10 = vld [vmem:[#allocation21 + $0x2] ss:$0 sm:$0xff] }
0x1ff7   :  { %v11521_v27 = vsub.f32 %v19653_v34, %v11518_v25  ;;  %11525 = vadd.xlane.f32.xlu0 %v11522_v7  ;;  %v11523_v26 = vmul.f32 %v11520_v33, %v11520_v33  ;;  %v16241_v7 = vld [vmem:[#allocation24 + $0x174] ss:$8 sps:$4 sm:$0xff]  }
0x1ff9   :  { %v11524_v58 = vmul.f32 %v11521_v27, %v11521_v27 }
0x1ffb   :  { %11529 = vadd.xlane.f32.xlu1 %v11524_v58  ;;  %11527 = vadd.xlane.f32.xlu0 %v11523_v26  ;;  %v16239_v58 = vld [vmem:[#allocation24 + $0x170] ss:$8 sps:$4 sm:$0xff]   ;;  %v13548_v26 = vld [vmem:[#allocation22 + $0x2] ss:$0 sm:$0xff] }
0x2084   :  { %v11526_v48 = vpop.xlane.xlu0 %11525 }
0x2085   :  { %v11531_v6 = vmul.f32 0.0078125, %v11526_v48  ;;  %v16249_v48 = vld [vmem:[#allocation18 + $0x118] sm:$0xff]  }
0x2086   :  { %14374 = vmatpush3.bf16.msra.mxu0 %v16249_v48 }
0x2087   :  { %v11534_v54 = vadd.f32 1e-05, %v11531_v6  ;;  %v16251_v6 = vld [vmem:[#allocation18 + $0x120] sm:$0xff]  }
0x2088   :  { %v11528_v23 = vpop.xlane.xlu0 %11527  ;;  %v11530_v43 = vpop.xlane.xlu1 %11529 }
0x2089   :  { %16656 = vrsqrt.f32 %v11534_v54  ;;  %v11532_v39 = vmul.f32 0.0078125, %v11528_v23  ;;  %v11533_v60 = vmul.f32 0.0078125, %v11530_v43  ;;  %v16252_v54 = vld [vmem:[#allocation18 + $0x168] sm:$0xff]   ;;  %v16254_v43 = vld [vmem:[#allocation18 + $0x170] sm:$0xff]  }
0x208a   :  { %v16253_v23 = vld [vmem:[#allocation18 + $0x128] sm:$0xff]  }
0x208b   :  { %v11535_v53 = vadd.f32 1e-05, %v11532_v39  ;;  %v11536_v49 = vadd.f32 1e-05, %v11533_v60  ;;  %v16255_v39 = vld [vmem:[#allocation18 + $0x130] sm:$0xff]   ;;  %v16256_v60 = vld [vmem:[#allocation18 + $0x178] sm:$0xff]  }
0x208d   :  { %16658 = vrsqrt.f32 %v11535_v53  ;;  %v16257_v53 = vld [vmem:[#allocation18 + $0x138] sm:$0xff]  }
0x208e   :  { %16660 = vrsqrt.f32 %v11536_v49  ;;  %v16258_v49 = vld [vmem:[#allocation27 + $0x140] sm:$0xff]  }
0x2093   :  { %v16657_v46 = vpop.eup %16656 }
0x2094   :  { %v11540_v8 = vmul.f32 %v16657_v46, %v11519_v40  ;;  %v16233_v40 = vld [vmem:[#allocation24 + $0x150] ss:$8 sps:$4 sm:$0xff]  }
0x2095   :  { %v11581_v46 = vld [vmem:[#allocation16 + $0x4] sm:$0x3] }
0x2096   :  { %v11549_v50 = vmul.f32 %v13512_v51, %v11540_v8 }
0x2097   :  { %v16659_v9 = vpop.eup %16658 }
0x2098   :  { %v16661_v17 = vpop.eup %16660  ;;  %v11541_v36 = vmul.f32 %v16659_v9, %v11520_v33  ;;  %v11558_v5 = vadd.f32 %v13513_v29, %v11549_v50  ;;  %v16236_v33 = vld [vmem:[#allocation24 + $0x160] ss:$8 sps:$4 sm:$0xff]  }
0x2099   :  { %v11542_v59 = vmul.f32 %v16661_v17, %v11521_v27  ;;  %v11977_v27 = vmul.f32 %v13547_v10, %v11540_v8  ;;  %v11586_v8 = vrot.slane %v11581_v46, %v17833_v63 }
0x209a   :  { %v11550_v16 = vmul.f32 %v13512_v51, %v11541_v36  ;;  %v11978_v25 = vmul.f32 %v13547_v10, %v11541_v36 }
0x209b   :  { %v11551_v44 = vmul.f32 %v13512_v51, %v11542_v59  ;;  %v11986_v0 = vadd.f32 %v13548_v26, %v11977_v27  ;;  %v11979_v15 = vmul.f32 %v13547_v10, %v11542_v59  ;;  %v11590_v51 = vrot.slane %v11581_v46, %v17836_v1 }
0x209c   :  { %v11559_v30 = vadd.f32 %v13513_v29, %v11550_v16  ;;  %v11987_v38 = vadd.f32 %v13548_v26, %v11978_v25 }
0x209d   :  { %v11560_v14 = vadd.f32 %v13513_v29, %v11551_v44  ;;  %v11988_v2 = vadd.f32 %v13548_v26, %v11979_v15 }
0x209e   :  { %v11561_v56 = vpack.c.bf16 %v11559_v30, %v11558_v5  ;;  %v11989_v12 = vpack.c.bf16 %v11987_v38, %v11986_v0 }
0x209f   :  { %v11562_v41 = vpack.c.bf16 %v11560_v14, %v11560_v14  ;;  %v11990_v47 = vpack.c.bf16 %v11988_v2, %v11988_v2 }
0x20a0   :  { %11706 = vmatmul.mubr.bf16.vlgmr.msra.gmra.mrb[200].mxu1 %v11561_v56 }
0x20a1   :  { %12102 = vmatpush1.bf16.msra.mxu1 %v16218_v13  ;;  %11715 = vmatprep.mubr.bf16.mxu1 %v17259_v32 }
0x20a2   :  { %12103 = vmatprep.subr.bf16.mxu1 %v16223_v3 }
0x20a5   :  { %12104 = vmatpush1.bf16.msra.mxu1 %v16221_v24 }
0x20a6   :  { %12105 = vmatprep.subr.bf16.mxu1 %v16226_v28 }
0x20a8   :  { %11716 = vmatmul.mubr.bf16.gmra.mrb[204].mxu1 %v11562_v41 }
0x20a9   :  { %12106 = vmatpush1.bf16.msra.mxu1 %v16224_v61  ;;  %12133 = vmatprep.mubr.bf16.mxu1 %v17259_v32 }
0x20aa   :  { %12107 = vmatprep.subr.bf16.mxu1 %v16229_v20 }
0x20ad   :  { %12108 = vmatpush1.bf16.msra.mxu1 %v16227_v11 }
0x20ae   :  { %12109 = vmatprep.subr.bf16.mxu1 %v16232_v22 }
0x20b1   :  { %12110 = vmatpush1.bf16.msra.mxu1 %v16230_v19 }
0x20b2   :  { %12111 = vmatprep.subr.bf16.mxu1 %v16235_v57 }
0x20b5   :  { %12112 = vmatpush1.bf16.msra.mxu1 %v16233_v40 }
0x20b6   :  { %12113 = vmatprep.subr.bf16.mxu1 %v16238_v55 }
0x20b9   :  { %12114 = vmatpush1.bf16.msra.mxu1 %v16236_v33 }
0x20ba   :  { %12115 = vmatprep.subr.bf16.mxu1 %v16241_v7 }
0x20bd   :  { %12116 = vmatpush1.bf16.msra.mxu1 %v16239_v58 }
0x20c0   :  { %12134 = vmatmul.mubr.bf16.vlgmr.msra.gmra.mrb[208].mxu1 %v11989_v12 }
0x20c1   :  { %12143 = vmatprep.mubr.bf16.mxu1 %v17259_v32  ;;  %v16250_v32 = vld [vmem:[#allocation18 + $0x160] sm:$0xff]  }
0x20c2   :  { %14375 = vmatprep.subr.bf16.mxu0 %v16250_v32 }
0x20c3   :  { %14376 = vmatpush3.bf16.msra.mxu0 %v16251_v6 }
0x20c4   :  { %14377 = vmatprep.subr.bf16.mxu0 %v16252_v54 }
0x20c7   :  { %14378 = vmatpush3.bf16.msra.mxu0 %v16253_v23 }
0x20c8   :  { %12144 = vmatmul.mubr.bf16.gmra.mrb[212].mxu1 %v11990_v47  ;;  %14379 = vmatprep.subr.bf16.mxu0 %v16254_v43 }
0x20cb   :  { %14380 = vmatpush3.bf16.msra.mxu0 %v16255_v39 }
0x20cc   :  { %14381 = vmatprep.subr.bf16.mxu0 %v16256_v60  ;;  %v12009_v60 = vld [vmem:[#allocation25 + $0x4] sm:$0x3] }
0x20cf   :  { %14382 = vmatpush3.bf16.msra.mxu0 %v16257_v53 }
0x20d0   :  { %14395 = vmatprep.subr.bf16.mxu0 %v16258_v49 }
0x2173   :  { %v11707_v9 = vpop.f32.mrb[200].mxu1 }
0x2174   :  { %v19665_v17 = vadd.f32 %v11707_v9, %v11586_v8  ;;  %v11709_v36 = vpop.f32.mrb[201].mxu1 }
0x2175   :  { %v19667_v50 = vadd.f32 %v11709_v36, %v11590_v51  ;;  %v11711_v29 = vpop.f32.mrb[202].mxu1 }
0x2176   :  { %v11724_v16 = vmul.f32 %v19665_v17, %v19665_v17  ;;  %v11712_v59 = vadd.f32 %v11711_v29, %v11586_v8  ;;  %v11713_v5 = vpop.f32.mrb[203].mxu1  ;;  %v12018_v29 = vrot.slane %v12009_v60, %v17836_v1 }
0x2177   :  { %v11725_v30 = vmul.f32 %v19667_v50, %v19667_v50  ;;  %v11714_v13 = vadd.f32 %v11713_v5, %v11590_v51 }
0x2178   :  { %v11730_v56 = vmul.f32 %v11724_v16, %v19665_v17  ;;  %v11726_v3 = vmul.f32 %v11712_v59, %v11712_v59 }
0x2179   :  { %v11731_v44 = vmul.f32 %v11725_v30, %v19667_v50  ;;  %v11727_v24 = vmul.f32 %v11714_v13, %v11714_v13 }
0x217a   :  { %v11736_v28 = vmul.f32 0.044715, %v11730_v56  ;;  %v11732_v14 = vmul.f32 %v11726_v3, %v11712_v59 }
0x217b   :  { %v11737_v61 = vmul.f32 0.044715, %v11731_v44  ;;  %v11733_v41 = vmul.f32 %v11727_v24, %v11714_v13  ;;  %v11717_v20 = vpop.f32.mrb[204].mxu1 }
0x217c   :  { %v11742_v11 = vadd.f32 %v11736_v28, %v19665_v17  ;;  %v11738_v22 = vmul.f32 0.044715, %v11732_v14  ;;  %v19676_v19 = vadd.f32 %v11717_v20, %v11586_v8  ;;  %v11719_v57 = vpop.f32.mrb[205].mxu1  ;;  %v12014_v8 = vrot.slane %v12009_v60, %v17833_v63 }
0x217d   :  { %v11743_v40 = vadd.f32 %v11737_v61, %v19667_v50  ;;  %v11739_v55 = vmul.f32 0.044715, %v11733_v41  ;;  %v19679_v10 = vadd.f32 %v11719_v57, %v11590_v51  ;;  %v11721_v33 = vpop.f32.mrb[206].mxu1  ;;  %v16259_v41 = vld [vmem:[#allocation27 + $0x100] sm:$0xff]  }
0x217e   :  { %v11748_v25 = vmul.f32 0.7978846, %v11742_v11  ;;  %v11744_v7 = vadd.f32 %v11738_v22, %v11712_v59  ;;  %v11728_v27 = vmul.f32 %v19676_v19, %v19676_v19  ;;  %v11722_v58 = vpop.f32.mrb[207].mxu1 }
0x217f   :  { %v11749_v26 = vmul.f32 0.7978846, %v11743_v40  ;;  %v11745_v38 = vadd.f32 %v11739_v55, %v11714_v13  ;;  %v11729_v0 = vmul.f32 %v19679_v10, %v19679_v10 }
0x2180   :  { %16662 = vtanh.f32 %v11748_v25  ;;  %v11750_v12 = vmul.f32 0.7978846, %v11744_v7  ;;  %v11734_v15 = vmul.f32 %v11728_v27, %v19676_v19  ;;  %v16261_v27 = vld [vmem:[#allocation27 + $0x108] sm:$0xff]  }
0x2181   :  { %16664 = vtanh.f32 %v11749_v26  ;;  %v11751_v2 = vmul.f32 0.7978846, %v11745_v38  ;;  %v11735_v47 = vmul.f32 %v11729_v0, %v19679_v10  ;;  %v16262_v0 = vld [vmem:[#allocation27 + $0x150] sm:$0xff]  }
0x2182   :  { %16666 = vtanh.f32 %v11750_v12  ;;  %v11740_v35 = vmul.f32 0.044715, %v11734_v15 }
0x2183   :  { %16668 = vtanh.f32 %v11751_v2  ;;  %v11741_v31 = vmul.f32 0.044715, %v11735_v47 }
0x2184   :  { %v11746_v4 = vadd.f32 %v11740_v35, %v19676_v19 }
0x2185   :  { %v11747_v45 = vadd.f32 %v11741_v31, %v19679_v10 }
0x2186   :  { %v11752_v21 = vmul.f32 0.7978846, %v11746_v4 }
0x2187   :  { %v11753_v37 = vmul.f32 0.7978846, %v11747_v45 }
0x2188   :  { %16670 = vtanh.f32 %v11752_v21 }
0x2189   :  { %16672 = vtanh.f32 %v11753_v37 }
0x218a   :  { %v16663_v42 = vpop.eup %16662 }
0x218b   :  { %v16665_v48 = vpop.eup %16664  ;;  %v11760_v32 = vadd.f32 1.0, %v16663_v42  ;;  %v16263_v42 = vld [vmem:[#allocation27 + $0x110] sm:$0xff]  }
0x218c   :  { %v16667_v6 = vpop.eup %16666  ;;  %v11761_v54 = vadd.f32 1.0, %v16665_v48 }
0x218d   :  { %v16669_v23 = vpop.eup %16668  ;;  %v11766_v43 = vmul.f32 0.5, %v11760_v32  ;;  %v11762_v39 = vadd.f32 1.0, %v16667_v6 }
0x218e   :  { %v11763_v53 = vadd.f32 1.0, %v16669_v23  ;;  %v11767_v49 = vmul.f32 0.5, %v11761_v54  ;;  %v16264_v23 = vld [vmem:[#allocation27 + $0x158] sm:$0xff]  }
0x218f   :  { %v11768_v46 = vmul.f32 0.5, %v11762_v39  ;;  %v11772_v9 = vmul.f32 %v11766_v43, %v19665_v17 }
0x2190   :  { %v11769_v51 = vmul.f32 0.5, %v11763_v53  ;;  %v11773_v5 = vmul.f32 %v11767_v49, %v19667_v50 }
0x2191   :  { %v11774_v36 = vmul.f32 %v11768_v46, %v11712_v59  ;;  %v16260_v59 = vld [vmem:[#allocation27 + $0x148] sm:$0xff]  }
0x2192   :  { %v16671_v16 = vpop.eup %16670  ;;  %v11775_v30 = vmul.f32 %v11769_v51, %v11714_v13 }
0x2193   :  { %v16673_v56 = vpop.eup %16672  ;;  %v12135_v3 = vpop.f32.mrb[208].mxu1  ;;  %v11778_v44 = vpack.c.bf16 %v11774_v36, %v11772_v9  ;;  %v11764_v24 = vadd.f32 1.0, %v16671_v16  ;;  %v16265_v36 = vld [vmem:[#allocation27 + $0x118] sm:$0xff]  }
0x2194   :  { %v19693_v28 = vadd.f32 %v12135_v3, %v12014_v8  ;;  %v12137_v14 = vpop.f32.mrb[209].mxu1  ;;  %v11779_v61 = vpack.c.bf16 %v11775_v30, %v11773_v5  ;;  %v11765_v20 = vadd.f32 1.0, %v16673_v56  ;;  %v16266_v5 = vld [vmem:[#allocation27 + $0x160] sm:$0xff]  }
0x2195   :  { %v19695_v11 = vadd.f32 %v12137_v14, %v12018_v29  ;;  %v12139_v17 = vpop.f32.mrb[210].mxu1  ;;  %v11770_v22 = vmul.f32 0.5, %v11764_v24  ;;  %v16268_v14 = vld [vmem:[#allocation27 + $0x168] sm:$0xff]  }
0x2196   :  { %v12152_v57 = vmul.f32 %v19693_v28, %v19693_v28  ;;  %v19699_v50 = vadd.f32 %v12139_v17, %v12014_v8  ;;  %v12141_v13 = vpop.f32.mrb[211].mxu1  ;;  %11951 = vmatprep.mubr.bf16.mxu0 %v11779_v61  ;;  %v11771_v40 = vmul.f32 0.5, %v11765_v20  ;;  %v16269_v20 = vld [vmem:[#allocation27 + $0x128] sm:$0xff]   ;;  %v16270_v17 = vld [vmem:[#allocation27 + $0x170] sm:$0xff]  }
0x2197   :  { %v12153_v55 = vmul.f32 %v19695_v11, %v19695_v11  ;;  %v19703_v33 = vadd.f32 %v12141_v13, %v12018_v29  ;;  %11952 = vmatmul.mubr.bf16.vlgmr.msra.gmra.mrb[200].mxu0 %v11778_v44  ;;  %v11776_v12 = vmul.f32 %v11770_v22, %v19676_v19  ;;  %v16267_v44 = vld [vmem:[#allocation27 + $0x120] sm:$0xff]  }
0x2198   :  { %v12158_v25 = vmul.f32 %v12152_v57, %v19693_v28  ;;  %v12154_v7 = vmul.f32 %v19699_v50, %v19699_v50  ;;  %14396 = vmatpush3.bf16.msra.mxu0 %v16259_v41  ;;  %v11777_v58 = vmul.f32 %v11771_v40, %v19679_v10  ;;  %v16271_v40 = vld [vmem:[#allocation27 + $0x130] sm:$0xff]  }
0x2199   :  { %v12159_v26 = vmul.f32 %v12153_v55, %v19695_v11  ;;  %v12155_v38 = vmul.f32 %v19703_v33, %v19703_v33  ;;  %14397 = vmatprep.subr.bf16.mxu0 %v16260_v59  ;;  %v11780_v54 = vpack.c.bf16 %v11776_v12, %v11776_v12  ;;  %v16273_v12 = vld [vmem:[#allocation27 + $0x138] sm:$0xff]  }
0x219a   :  { %v12164_v15 = vmul.f32 0.044715, %v12158_v25  ;;  %v12160_v2 = vmul.f32 %v12154_v7, %v19699_v50  ;;  %v11781_v47 = vpack.c.bf16 %v11777_v58, %v11777_v58  ;;  %v16272_v58 = vld [vmem:[#allocation27 + $0x178] sm:$0xff]  }
0x219b   :  { %v12165_v35 = vmul.f32 0.044715, %v12159_v26  ;;  %v12161_v31 = vmul.f32 %v12155_v38, %v19703_v33  ;;  %v12145_v4 = vpop.f32.mrb[212].mxu1 }
0x219c   :  { %v12170_v45 = vadd.f32 %v12164_v15, %v19693_v28  ;;  %v12166_v10 = vmul.f32 0.044715, %v12160_v2  ;;  %v19716_v21 = vadd.f32 %v12145_v4, %v12014_v8  ;;  %v12147_v37 = vpop.f32.mrb[213].mxu1  ;;  %14398 = vmatpush3.bf16.msra.mxu0 %v16261_v27  ;;  %11959 = vmatprep.mubr.bf16.mxu0 %v11781_v47 }
0x219d   :  { %v12171_v48 = vadd.f32 %v12165_v35, %v19695_v11  ;;  %v12167_v19 = vmul.f32 0.044715, %v12161_v31  ;;  %v19719_v32 = vadd.f32 %v12147_v37, %v12018_v29  ;;  %v12149_v6 = vpop.f32.mrb[214].mxu1  ;;  %14399 = vmatprep.subr.bf16.mxu0 %v16262_v0 }
0x219e   :  { %v12176_v43 = vmul.f32 0.7978846, %v12170_v45  ;;  %v12172_v39 = vadd.f32 %v12166_v10, %v19699_v50  ;;  %v12156_v60 = vmul.f32 %v19716_v21, %v19716_v21  ;;  %v12150_v53 = vpop.f32.mrb[215].mxu1 }
0x219f   :  { %v12177_v49 = vmul.f32 0.7978846, %v12171_v48  ;;  %v12173_v46 = vadd.f32 %v12167_v19, %v19703_v33  ;;  %v12157_v8 = vmul.f32 %v19719_v32, %v19719_v32  ;;  %11960 = vmatmul.mubr.bf16.gmra.mrb[204].mxu0 %v11780_v54 }
0x21a0   :  { %16674 = vtanh.f32 %v12176_v43  ;;  %v12178_v51 = vmul.f32 0.7978846, %v12172_v39  ;;  %v12162_v9 = vmul.f32 %v12156_v60, %v19716_v21  ;;  %14400 = vmatpush3.bf16.msra.mxu0 %v16263_v42  ;;  %v13584_v43 = vld [vmem:[#allocation3] ss:$0 sm:$0xff] }
0x21a1   :  { %16676 = vtanh.f32 %v12177_v49  ;;  %v12179_v29 = vmul.f32 0.7978846, %v12173_v46  ;;  %v12163_v16 = vmul.f32 %v12157_v8, %v19719_v32  ;;  %14401 = vmatprep.subr.bf16.mxu0 %v16264_v23  ;;  %12468 = vperm.xlu1 %15625, %v13584_v43  }
0x21a2   :  { %16678 = vtanh.f32 %v12178_v51  ;;  %v12168_v30 = vmul.f32 0.044715, %v12162_v9 }
0x21a3   :  { %16680 = vtanh.f32 %v12179_v29  ;;  %v12169_v56 = vmul.f32 0.044715, %v12163_v16  ;;  %v13565_v29 = vld [vmem:[#allocation28 + $0x2] ss:$0 sm:$0xff] }
0x21a4   :  { %v12174_v3 = vadd.f32 %v12168_v30, %v19716_v21  ;;  %14402 = vmatpush3.bf16.msra.mxu0 %v16265_v36  ;;  %v13530_v36 = vld [vmem:[#allocation19 + $0x2] ss:$0 sm:$0xff] }
0x21a5   :  { %v12175_v24 = vadd.f32 %v12169_v56, %v19719_v32  ;;  %14403 = vmatprep.subr.bf16.mxu0 %v16266_v5 }
0x21a6   :  { %v12180_v61 = vmul.f32 0.7978846, %v12174_v3 }
0x21a7   :  { %v12181_v41 = vmul.f32 0.7978846, %v12175_v24 }
0x21a8   :  { %16682 = vtanh.f32 %v12180_v61  ;;  %14404 = vmatpush3.bf16.msra.mxu0 %v16267_v44 }
0x21a9   :  { %16684 = vtanh.f32 %v12181_v41  ;;  %14405 = vmatprep.subr.bf16.mxu0 %v16268_v14 }
0x21aa   :  { %v16675_v59 = vpop.eup %16674 }
0x21ab   :  { %v16677_v22 = vpop.eup %16676  ;;  %v12188_v57 = vadd.f32 1.0, %v16675_v59 }
0x21ac   :  { %v16679_v13 = vpop.eup %16678  ;;  %14406 = vmatpush3.bf16.msra.mxu0 %v16269_v20  ;;  %v12189_v55 = vadd.f32 1.0, %v16677_v22 }
0x21ad   :  { %v16681_v25 = vpop.eup %16680  ;;  %v12194_v7 = vmul.f32 0.5, %v12188_v57  ;;  %v12190_v27 = vadd.f32 1.0, %v16679_v13  ;;  %14407 = vmatprep.subr.bf16.mxu0 %v16270_v17 }
0x21ae   :  { %v12191_v26 = vadd.f32 1.0, %v16681_v25  ;;  %v12195_v38 = vmul.f32 0.5, %v12189_v55 }
0x21af   :  { %v12196_v0 = vmul.f32 0.5, %v12190_v27  ;;  %v12200_v2 = vmul.f32 %v12194_v7, %v19693_v28  ;;  %v12403_v27 = vld [vmem:[#allocation30] sm:$0x1] }
0x21b0   :  { %14408 = vmatpush3.bf16.msra.mxu0 %v16271_v40  ;;  %v12197_v15 = vmul.f32 0.5, %v12191_v26  ;;  %v12201_v31 = vmul.f32 %v12195_v38, %v19695_v11  ;;  %v17264_v11 = vmov 0.0  }
0x21b1   :  { %v12202_v47 = vmul.f32 %v12196_v0, %v19699_v50  ;;  %14409 = vmatprep.subr.bf16.mxu0 %v16272_v58  ;;  %14955 = vmatprep.subr.bf16.mxu1 %v17264_v11 }
0x21b2   :  { %v16683_v35 = vpop.eup %16682  ;;  %v12203_v4 = vmul.f32 %v12197_v15, %v19703_v33  ;;  %14959 = vmatprep.mubr.msk.bf16.mxu1 %vm17265_vm12, %v17264_v11  ;;  %v13582_v33 = vld [vmem:[#allocation2] ss:$0 sm:$0xff] }
0x21b3   :  { %v16685_v45 = vpop.eup %16684  ;;  %v12206_v10 = vpack.c.bf16 %v12202_v47, %v12200_v2  ;;  %v12192_v37 = vadd.f32 1.0, %v16683_v35  ;;  %12411 = vperm.xlu0 %15624, %v13582_v33  }
0x21b4   :  { %14410 = vmatpush3.bf16.msra.mxu0 %v16273_v12  ;;  %v12207_v42 = vpack.c.bf16 %v12203_v4, %v12201_v31  ;;  %v12193_v48 = vadd.f32 1.0, %v16685_v45 }
0x21b5   :  { %v12198_v19 = vmul.f32 0.5, %v12192_v37  ;;  %v16274_v37 = vld [vmem:[%s17418_s3 + $0x40] sm:$0xff]  }
0x21b6   :  { %12379 = vmatprep.mubr.bf16.mxu0 %v12207_v42  ;;  %v12199_v6 = vmul.f32 0.5, %v12193_v48  ;;  %v16275_v42 = vld [vmem:[%s17418_s3] sm:$0xff]   ;;  %v16276_v48 = vld [vmem:[%s17418_s3 + $0x48] sm:$0xff]  }
0x21b7   :  { %12380 = vmatmul.mubr.bf16.vlgmr.msra.gmra.mrb[208].mxu0 %v12206_v10  ;;  %v12204_v50 = vmul.f32 %v12198_v19, %v19716_v21  ;;  %v16277_v19 = vld [vmem:[%s17418_s3 + $0x8] sm:$0xff]  }
0x21b8   :  { %v12205_v28 = vmul.f32 %v12199_v6, %v19719_v32 }
0x21b9   :  { %v12208_v23 = vpack.c.bf16 %v12204_v50, %v12204_v50 }
0x21ba   :  { %v12209_v54 = vpack.c.bf16 %v12205_v28, %v12205_v28 }
0x21bc   :  { %12387 = vmatprep.mubr.bf16.mxu0 %v12209_v54 }
0x21bf   :  { %12388 = vmatmul.mubr.bf16.gmra.mrb[212].mxu0 %v12208_v23 }
0x2220   :  { %v12469_v0 = vpop.permute.xlu1 %12468 }
0x2232   :  { %v12412_v38 = vpop.permute.xlu0 %12411 }
0x226a   :  { %v14383_v39 = vpop.f32.mrb[200].mxu0 }
0x226b   :  { %v14384_v60 = vpop.f32.mrb[201].mxu0 }
0x226c   :  { %v14385_v53 = vadd.f32 %v14384_v60, %v14383_v39  ;;  %v14386_v49 = vpop.f32.mrb[202].mxu0  ;;  %v16278_v60 = vld [vmem:[%s17418_s3 + $0x50] sm:$0xff]  }
0x226d   :  { %v14387_v32 = vpop.f32.mrb[203].mxu0  ;;  %v16280_v49 = vld [vmem:[%s17418_s3 + $0x58] sm:$0xff]  }
0x226e   :  { %v11954_v3 = vadd.f32 %v14385_v53, %v13530_v36  ;;  %v16279_v53 = vld [vmem:[%s17418_s3 + $0x10] sm:$0xff]   ;;  %v16281_v32 = vld [vmem:[%s17418_s3 + $0x18] sm:$0xff]  }
0x226f   :  { %v16287_v36 = vld [vmem:[%s17418_s3 + $0x30] sm:$0xff]  }
0x2272   :  { %v14389_v46 = vpop.f32.mrb[204].mxu0 }
0x2273   :  { %v14390_v21 = vpop.f32.mrb[205].mxu0  ;;  %v16282_v46 = vld [vmem:[%s17418_s3 + $0x60] sm:$0xff]  }
0x2274   :  { %v14392_v8 = vpop.f32.mrb[206].mxu0  ;;  %v16283_v21 = vld [vmem:[%s17418_s3 + $0x20] sm:$0xff]  }
0x2275   :  { %v14393_v51 = vpop.f32.mrb[207].mxu0  ;;  %v16284_v8 = vld [vmem:[%s17418_s3 + $0x68] sm:$0xff]  }
0x2276   :  { %v16285_v51 = vld [vmem:[%s17418_s3 + $0x28] sm:$0xff]  }
0x228a   :  { %v14411_v9 = vpop.f32.mrb[208].mxu0 }
0x228b   :  { %v14412_v16 = vpop.f32.mrb[209].mxu0 }
0x228c   :  { %v14413_v5 = vadd.f32 %v14412_v16, %v14411_v9  ;;  %v14414_v30 = vpop.f32.mrb[210].mxu0  ;;  %v16286_v9 = vld [vmem:[%s17418_s3 + $0x70] sm:$0xff]   ;;  %v16289_v16 = vld [vmem:[%s17418_s3 + $0x38] sm:$0xff]  }
0x228d   :  { %v14415_v56 = vpop.f32.mrb[211].mxu0 }
0x228e   :  { %v12382_v44 = vadd.f32 %v14413_v5, %v13565_v29  ;;  %v14416_v24 = vadd.f32 %v14415_v56, %v14414_v30 }
0x2290   :  { %v12395_v14 = vsel %vm3447_vm15, %v11954_v3, %v12382_v44  ;;  %v12385_v61 = vadd.f32 %v14416_v24, %v13565_v29  ;;  %vm12516_vm15 = vcmask 1041408   ;;  %v12514_v3 = vld [vmem:[#allocation33] sm:$0x3]  ;;  %v12515_v44 = vld [vmem:[#allocation34] sm:$0x3] }
0x2291   :  { %v12398_v41 = vadd.f32 %v12395_v14, %v19647_v52  ;;  %v12460_v52 = vld [vmem:[#allocation31] sm:$0x1]  ;;  %v12542_v24 = vrot.slane %v12514_v3, %v17833_v63  ;;  %v12546_v14 = vrot.slane %v12514_v3, %v17836_v1 }
0x2292   :  { %v12399_v20 = vadd.f32 %v12385_v61, %v19650_v18  ;;  %v14417_v17 = vpop.f32.mrb[212].mxu0 }
0x2293   :  { %v14418_v59 = vpop.f32.mrb[213].mxu0 }
0x2294   :  { %v12401_v22 = vpack.c.bf16 %v12399_v20, %v12398_v41  ;;  %v14419_v57 = vadd.f32 %v14418_v59, %v14417_v17  ;;  %v14420_v13 = vpop.f32.mrb[214].mxu0  ;;  %v12555_v17 = vrot.slane %v12515_v44, %v17833_v63  ;;  %v12559_v59 = vrot.slane %v12515_v44, %v17836_v1 }
0x2295   :  { %v14421_v40 = vpop.f32.mrb[215].mxu0 }
0x2296   :  { %v12390_v55 = vadd.f32 %v14419_v57, %v13565_v29  ;;  %14956 = vmatpush3.bf16.msra.mxu1 %v12401_v22  ;;  %v16288_v29 = vld [vmem:[%s17418_s3 + $0x78] sm:$0xff]   ;;  %s17266_s3 = smov [#allocation37]  }
0x2297   :  { %14957 = vmatprep.subr.bf16.mxu1 %v17264_v11  ;;  %s12748_s7 = sshll.u32 %s17266_s3, 4  ;;  %s12749_s7 = int_to_ptr.vmem [resolvable:$true] %s12748_s7 }
0x2298   :  { %v12400_v25 = vadd.f32 %v12390_v55, %v19653_v34  ;;  %s17150_s26 = scalar_lea.vmem %s12749_s7, 32  ;;  %p17155_p1 = scmp.lt.s32.totalorder %s12749_s7, %s12749_s7 }
0x2299   :  { %p17151_p0 = scmp.ne.s32.totalorder %s12749_s7, %s17150_s26  ;;  %p17156_p2 = scmp.lt.s32.totalorder %s17150_s26, %s17150_s26 }
0x229a   :  { %v12402_v7 = vpack.c.bf16 %v12400_v25, %v12400_v25 }
0x229b   :  { %p17157_p3 = por %p17156_p2, %p17155_p1 }
0x229c   :  { %v12418_v62 = vsel %vm19958_vm13, %v12402_v7, 0 }
0x229d   :  { %14958 = vmatpush3.bf16.msra.mxu1 %v12418_v62  ;;  %p17158_p4 = pnand %p17157_p3, %p17151_p0 }
0x229e   :  { %14963 = vmatprep.subr.bf16.mxu1 %v17264_v11 }
0x22a0   :  { %14960 = vmatmul.mubr.msk.bf16.vlgmr.msra.gmra.mrb[216].mxu1 %vm4588_vm1, %v12403_v27 }
0x22a1   :  { %14964 = vmatpush3.bf16.msra.mxu1 %v12401_v22  ;;  %14967 = vmatprep.mubr.msk.bf16.mxu1 %vm17265_vm12, %v17264_v11 }
0x22a2   :  { %14965 = vmatprep.subr.bf16.mxu1 %v17264_v11 }
0x22a5   :  { %14966 = vmatpush3.bf16.msra.mxu1 %v12418_v62  ;;  %v13586_v62 = vld [vmem:[#allocation36] ss:$0 sm:$0xff] }
0x22a6   :  { %14429 = vmatprep.subr.bf16.mxu1 %v16274_v37 }
0x22a8   :  { %14968 = vmatmul.mubr.msk.bf16.vlgmr.msra.gmra.mrb[220].mxu1 %vm4588_vm1, %v12460_v52 }
0x22a9   :  { %14430 = vmatpush3.bf16.msra.mxu1 %v16275_v42 }
0x22aa   :  { %14431 = vmatprep.subr.bf16.mxu1 %v16276_v48 }
0x22ad   :  { %14432 = vmatpush3.bf16.msra.mxu1 %v16277_v19 }
0x22ae   :  { %14433 = vmatprep.subr.bf16.mxu1 %v16278_v60 }
0x22b1   :  { %14434 = vmatpush3.bf16.msra.mxu1 %v16279_v53 }
0x22b2   :  { %14435 = vmatprep.subr.bf16.mxu1 %v16280_v49 }
0x22b5   :  { %14436 = vmatpush3.bf16.msra.mxu1 %v16281_v32 }
0x22b6   :  { %14437 = vmatprep.subr.bf16.mxu1 %v16282_v46 }
0x22b9   :  { %14438 = vmatpush3.bf16.msra.mxu1 %v16283_v21 }
0x22ba   :  { %14439 = vmatprep.subr.bf16.mxu1 %v16284_v8 }
0x22bd   :  { %14440 = vmatpush3.bf16.msra.mxu1 %v16285_v51 }
0x22be   :  { %14441 = vmatprep.subr.bf16.mxu1 %v16286_v9 }
0x22c1   :  { %14442 = vmatpush3.bf16.msra.mxu1 %v16287_v36 }
0x22c2   :  { %14443 = vmatprep.subr.bf16.mxu1 %v16288_v29 }
0x22c5   :  { %14444 = vmatpush3.bf16.msra.mxu1 %v16289_v16 }
0x2373   :  { %v12454_v18 = vpop.f32.mrb[216].mxu1 }
0x2374   :  { %v14961_v58 = vpop.f32.mrb[217].mxu1  ;;  %v12455_v12 = vadd.f32 %v12454_v18, %v12412_v38 }
0x2375   :  { %v12457_v34 = vpop.f32.mrb[218].mxu1 }
0x2376   :  { %v14962_v26 = vpop.f32.mrb[219].mxu1  ;;  %v12517_v31 = vsel %vm12516_vm15, %v12455_v12, 0.0 }
0x237b   :  { %v12508_v15 = vpop.f32.mrb[220].mxu1 }
0x237c   :  { %v12509_v2 = vadd.f32 %v12508_v15, %v12469_v0  ;;  %v14969_v47 = vpop.f32.mrb[221].mxu1 }
0x237d   :  { %v12511_v35 = vpop.f32.mrb[222].mxu1 }
0x237e   :  { %v12518_v4 = vsel %vm12516_vm15, %v12509_v2, 0.0  ;;  %v14970_v45 = vpop.f32.mrb[223].mxu1 }
0x237f   :  { %v12519_v10 = vadd.f32 %v12518_v4, %v12517_v31 }
0x2381   :  { %12520 = vadd.xlane.f32.xlu1 %v12519_v10 }
0x240e   :  { %v12521_v6 = vpop.xlane.xlu1 %12520 }
0x240f   :  { %v12523_v28 = vmul.f32 0.00390625, %v12521_v6 }
0x2411   :  { %v12524_v50 = vsub.f32 %v12455_v12, %v12523_v28  ;;  %v12525_v54 = vsub.f32 %v12509_v2, %v12523_v28 }
0x2413   :  { %v12526_v23 = vmul.f32 %v12524_v50, %v12524_v50  ;;  %v12527_v11 = vmul.f32 %v12525_v54, %v12525_v54 }
0x2415   :  { %v12528_v33 = vsel %vm12516_vm15, %v12526_v23, 0.0  ;;  %v12529_v43 = vsel %vm12516_vm15, %v12527_v11, 0.0 }
0x2416   :  { %v12530_v39 = vadd.f32 %v12529_v43, %v12528_v33 }
0x2418   :  { %12531 = vadd.xlane.f32.xlu0 %v12530_v39 }
0x24a5   :  { %v12532_v5 = vpop.xlane.xlu0 %12531 }
0x24a6   :  { %v12533_v30 = vmul.f32 0.00390625, %v12532_v5 }
0x24a8   :  { %v12534_v56 = vadd.f32 1e-05, %v12533_v30 }
0x24aa   :  { %16686 = vrsqrt.f32 %v12534_v56 }
0x24b4   :  { %v16687_v61 = vpop.eup %16686 }
0x24b5   :  { %v12536_v41 = vmul.f32 %v16687_v61, %v12524_v50  ;;  %v12537_v20 = vmul.f32 %v16687_v61, %v12525_v54 }
0x24b7   :  { %v12550_v22 = vmul.f32 %v12546_v14, %v12537_v20  ;;  %v12549_v57 = vmul.f32 %v12542_v24, %v12536_v41 }
0x24b9   :  { %v12563_v13 = vadd.f32 %v12559_v59, %v12550_v22  ;;  %v12562_v40 = vadd.f32 %v12555_v17, %v12549_v57 }
0x24bb   :  { %v12565_v55 = vpack.c.bf16 %v12563_v13, %v12563_v13  ;;  %v12564_v25 = vpack.c.bf16 %v12562_v40, %v12562_v40 }
0x24bd   :  { %12733 = vmatprep.mubr.bf16.mxu1 %v12565_v55 }
0x24be   :  { %12734 = vmatmul.mubr.bf16.vlgmr.msra.gmra.mrb[224].mxu1 %v12564_v25 }
0x2591   :  { %v14445_v7 = vpop.f32.mrb[224].mxu1 }
0x2592   :  { %v14446_v27 = vpop.f32.mrb[225].mxu1 }
0x2593   :  { %v14447_v52 = vadd.f32 %v14446_v27, %v14445_v7  ;;  %v14448_v18 = vpop.f32.mrb[226].mxu1 }
0x2594   :  { %v14449_v58 = vpop.f32.mrb[227].mxu1 }
0x2595   :  { %v12736_v34 = vadd.f32 %v14447_v52, %v13586_v62 }
0x2597   :  { %12741 = vst [vmem:[#allocation37] sm:$0x3] %v12736_v34 }
0x2598   :  { %17161 = shalt.err (!%p17158_p4)
}
0x2599   :  { %s17162_s15 = scalar_lea.hbm %s17428_s8, 32 }
0x259a   :  { %p17163_p5 = scmp.ne.s32.totalorder %s17428_s8, %s17162_s15  ;;  %p17166_p6 = scmp.lt.u32.totalorder %s17162_s15, %s17428_s8 }
0x259c   :  { %p17168_p7 = pnand %p17166_p6, %p17163_p5 }
0x259e   :  { %17171 = shalt.err (!%p17168_p7)
}
0x259f   :  { %12751 = dma.vmem_to_hbm [thread:$0]  %s12749_s7, 32, %s17428_s8, [#allocation6]  }
0x25a0   :  { %17194 = dma.done.wait [#allocation6], 32  }
0x25a1   :  { %17195 = vsyncadd [#allocation6], 4294967264 }
0x25a2   :  { %12755 = vsyncpa [#allocation5], 1 }
0x25a3   :  { %12756 = vsyncpa [#allocation8], 1 }
0x25a4   :  { %12757 = vsyncpa [#allocation11], 1 }
0x25a5   :  { %12758 = vsyncpa [#allocation14], 1 }
0x25a6   :  { %12759 = vsyncpa [#allocation17], 1 }
0x25a7   :  { %12760 = vsyncpa [#allocation20], 1 }
0x25a8   :  { %12761 = vsyncpa [#allocation23], 1 }
0x25a9   :  { %12762 = vsyncpa [#allocation26], 1 }
0x25aa   :  { %12763 = vsyncpa [#allocation29], 1 }
0x25ab   :  { %12764 = vsyncpa [#allocation32], 1 }
0x25ac   :  { %12765 = vsyncpa [#allocation35], 1 }
0x25ad   :  { %12766 = vsyncpa [#allocation6], 1 }

</bundles_post_ra>
